<compile_context>
chip_gen: v6e
topology: v6e:2x2x1
jax: 0.10.0
libtpu: 0.0.40
codegen_flags: <defaults>
</compile_context>

<pallas_src>
import jax
import jax.numpy as jnp
from jax import lax
from jax.experimental import pallas as pl
from jax.experimental.pallas import tpu as pltpu

EPS = 1e-5


# ---------------------------------------------------------------------------
# Fused kernel: NB images per grid step.
#   x_ref  : (NB, H, W, Cin)    bf16  input block (NHWC)
#   s1, b1 : (1, Cin)           f32   folded BN1 scale / bias
#   w1     : (Cin, C4)          bf16  1x1 conv weights (BN2 scale folded in)
#   b2     : (1, C4)            f32   folded BN2 bias
#   w2     : (9, C4, G)         bf16  3x3 conv weights, tap-major
#   o_ref  : (NB, H, W, G)      bf16  NEW feature channels only
#   hpad   : (NB, H+2, W+2, C4) f32   zero-halo padded intermediate (VMEM)
# ---------------------------------------------------------------------------
def _bottleneck_kernel(x_ref, s1_ref, b1_ref, w1_ref, b2_ref, w2_ref,
                       o_ref, hpad_ref):
    NB, H, W, Cin = x_ref.shape
    C4 = w1_ref.shape[1]
    G = o_ref.shape[-1]
    Wp = W + 2
    M = NB * H * W

    # ---- BN1 + ReLU: f32 elementwise on the VPU (input arrives bf16) ------
    x = x_ref[...].astype(jnp.float32).reshape(M, Cin)
    y = jnp.maximum(x * s1_ref[...] + b1_ref[...], 0.0)

    # ---- 1x1 conv (BN2 scale pre-folded): bf16 MXU, f32 accumulation ------
    h = jnp.dot(y.astype(jnp.bfloat16), w1_ref[...],
                preferred_element_type=jnp.float32)           # (M, C4)
    h = jnp.maximum(h + b2_ref[...], 0.0)                     # BN2 bias + ReLU

    # ---- zero-halo padded intermediate: zero ONLY the halo ring, write ----
    # ---- the interior exactly once.                                     ----
    zrow = jnp.zeros((NB, 1, Wp, C4), jnp.float32)
    zcol = jnp.zeros((NB, H, 1, C4), jnp.float32)
    hpad_ref[:, 0:1, :, :] = zrow
    hpad_ref[:, H + 1:H + 2, :, :] = zrow
    hpad_ref[:, 1:H + 1, 0:1, :] = zcol
    hpad_ref[:, 1:H + 1, W + 1:W + 2, :] = zcol
    hpad_ref[:, 1:H + 1, 1:W + 1, :] = h.reshape(NB, H, W, C4)

    # ---- 3x3 "same" conv: 9 accumulating MXU matmuls over shifted windows -
    # Each dy row-slab is read once and reused for the 3 dx taps; the f32
    # accumulator stays in registers (no im2col buffer, no VMEM round-trip).
    acc = jnp.zeros((M, G), jnp.float32)
    for dy in range(3):
        slab = hpad_ref[:, dy:dy + H, :, :]                    # (NB, H, Wp, C4)
        for dx in range(3):
            tap = slab[:, :, dx:dx + W, :].reshape(M, C4).astype(jnp.bfloat16)
            acc = acc + jnp.dot(tap, w2_ref[dy * 3 + dx],
                                preferred_element_type=jnp.float32)

    # ---- store only the G new channels (bf16 HBM output) ------------------
    o_ref[...] = acc.reshape(NB, H, W, G).astype(o_ref.dtype)


# ---------------------------------------------------------------------------
# Channels-last (NHWC) entry point: returns ONLY the new features (N,H,W,G).
# A real dense block should alias these into a preallocated channel slab
# (input_output_aliases) instead of concatenating every layer.
# ---------------------------------------------------------------------------
def stochastic_bottleneck_new_features_nhwc(x_nhwc, params, *,
                                            survival_prob=1.0,
                                            nb=None,
                                            vmem_limit_bytes=None):
    N, H, W, Cin = x_nhwc.shape
    g1, b1, m1, v1 = params["bn1"]          # (Cin,)
    w1 = params["conv1_w"]                  # (C4, Cin, 1, 1)  OIHW
    g2, b2, m2, v2 = params["bn2"]          # (C4,)
    w2 = params["conv2_w"]                  # (G, C4, 3, 3)    OIHW
    C4 = w1.shape[0]
    G = w2.shape[0]

    # --- fold BN into per-channel scale/bias (tiny wrapper-side work) ------
    s1 = g1 * lax.rsqrt(v1 + EPS)
    bb1 = b1 - m1 * s1
    s2 = g2 * lax.rsqrt(v2 + EPS)
    bb2 = b2 - m2 * s2

    # 1x1 weights with BN2 scale folded in; bf16 for the MXU.
    w1_mat = (jnp.transpose(w1[:, :, 0, 0], (1, 0)) * s2[None, :]).astype(jnp.bfloat16)
    # 3x3 weights tap-major (9, C4, G); eval-mode stochastic-depth scaling
    # (if used by the block) folds into these weights.
    w2_taps = (jnp.transpose(w2, (2, 3, 1, 0)).reshape(9, C4, G)
               * jnp.float32(survival_prob)).astype(jnp.bfloat16)

    if nb is None:
        # Per-step working set ~ nb*((H+2)*(W+2)*C4*4B + I/O blocks); keep it
        # small enough for v7x (64 MiB physical / 32 MiB scoped VMEM).  On
        # v5e/v6e (128 MiB, lower HBM BW) raise nb and vmem_limit_bytes.
        nb = 1
        for cand in (8, 4, 2):
            if N % cand == 0:
                nb = cand
                break
    assert N % nb == 0, (N, nb)

    return pl.pallas_call(
        _bottleneck_kernel,
        out_shape=jax.ShapeDtypeStruct((N, H, W, G), jnp.bfloat16),
        grid=(N // nb,),
        in_specs=[
            pl.BlockSpec((nb, H, W, Cin), lambda n: (n, 0, 0, 0)),
            pl.BlockSpec((1, Cin), lambda n: (0, 0)),
            pl.BlockSpec((1, Cin), lambda n: (0, 0)),
            pl.BlockSpec((Cin, C4), lambda n: (0, 0)),
            pl.BlockSpec((1, C4), lambda n: (0, 0)),
            pl.BlockSpec((9, C4, G), lambda n: (0, 0, 0)),
        ],
        out_specs=pl.BlockSpec((nb, H, W, G), lambda n: (n, 0, 0, 0)),
        scratch_shapes=[
            pltpu.VMEM((nb, H + 2, W + 2, C4), jnp.float32),   # zero-halo h
        ],
        compiler_params=pltpu.CompilerParams(
            dimension_semantics=("parallel",),                 # megacore sharding
            vmem_limit_bytes=vmem_limit_bytes,                 # per-generation knob
        ),
    )(x_nhwc.astype(jnp.bfloat16),
      s1.reshape(1, Cin).astype(jnp.float32),
      bb1.reshape(1, Cin).astype(jnp.float32),
      w1_mat,
      bb2.reshape(1, C4).astype(jnp.float32),
      w2_taps)


def stochastic_bottleneck_forward_nhwc(x_nhwc, params, survival_prob=1.0):
    new = stochastic_bottleneck_new_features_nhwc(
        x_nhwc, params, survival_prob=survival_prob)
    # TODO(synk): in a multi-layer dense block, write `new` into a
    # preallocated (N,H,W,C_total) slab via input_output_aliases instead of
    # concatenating per layer (avoids O(L^2) HBM traffic).
    return jnp.concatenate([new.astype(x_nhwc.dtype), x_nhwc], axis=-1)


# ---------------------------------------------------------------------------
# PyTorch-layout (NCHW) adapter used for the reference comparison.  Real
# channels-last composition should call the NHWC entry points directly.
# ---------------------------------------------------------------------------
def stochastic_bottleneck_forward(x_nchw, params, survival_prob=1.0):
    x_nhwc = jnp.transpose(x_nchw, (0, 2, 3, 1))
    out_nhwc = stochastic_bottleneck_forward_nhwc(x_nhwc, params, survival_prob)
    return jnp.transpose(out_nhwc, (0, 3, 1, 2))


# ---------------------------------------------------------------------------
# Pure-JAX reference (mirrors PyTorch eval-mode forward) for verification
# ---------------------------------------------------------------------------
def _reference_forward(x_nchw, params):
    g1, b1, m1, v1 = params["bn1"]
    w1 = params["conv1_w"]
    g2, b2, m2, v2 = params["bn2"]
    w2 = params["conv2_w"]

    def bn(x, g, b, m, v):
        return (x - m[None, :, None, None]) / jnp.sqrt(v[None, :, None, None] + EPS) \
               * g[None, :, None, None] + b[None, :, None, None]

    dn = ("NCHW", "OIHW", "NCHW")
    y = jax.nn.relu(bn(x_nchw, g1, b1, m1, v1))
    y = lax.conv_general_dilated(y, w1, (1, 1), "VALID", dimension_numbers=dn)
    y = jax.nn.relu(bn(y, g2, b2, m2, v2))
    y = lax.conv_general_dilated(y, w2, (1, 1), ((1, 1), (1, 1)), dimension_numbers=dn)
    return jnp.concatenate([y, x_nchw], axis=1)


# ---------------------------------------------------------------------------
def _init_params(key, in_planes, growth_rate):
    C4 = 4 * growth_rate
    ks = jax.random.split(key, 6)
    return {
        "bn1": (jnp.ones((in_planes,), jnp.float32),
                jnp.zeros((in_planes,), jnp.float32),
                0.1 * jax.random.normal(ks[0], (in_planes,), jnp.float32),
                1.0 + 0.1 * jax.random.uniform(ks[1], (in_planes,), jnp.float32)),
        "conv1_w": 0.1 * jax.random.normal(ks[2], (C4, in_planes, 1, 1), jnp.float32),
        "bn2": (jnp.ones((C4,), jnp.float32),
                jnp.zeros((C4,), jnp.float32),
                0.1 * jax.random.normal(ks[3], (C4,), jnp.float32),
                1.0 + 0.1 * jax.random.uniform(ks[4], (C4,), jnp.float32)),
        "conv2_w": 0.1 * jax.random.normal(ks[5], (growth_rate, C4, 3, 3), jnp.float32),
    }


if __name__ == "__main__":
    key = jax.random.PRNGKey(0)
    kx, kp = jax.random.split(key)

    N, in_planes, H, W = 2, 8, 16, 16
    growth_rate = 8

    x = jax.random.normal(kx, (N, in_planes, H, W), jnp.float32)   # NCHW input
    params = _init_params(kp, in_planes, growth_rate)

    fwd = jax.jit(stochastic_bottleneck_forward)
    out = jax.block_until_ready(fwd(x, params))
    ref = jax.block_until_ready(_reference_forward(x, params))

    assert out.shape == (N, growth_rate + in_planes, H, W), out.shape
    # bf16 HBM I/O + bf16 MXU operands (f32 accumulation) -> loose tolerance.
    max_err = float(jnp.max(jnp.abs(out - ref)))
    assert max_err < 5e-2, f"max abs err {max_err}"

    print("KERNEL_OK")
</pallas_src>

<mosaic_0001>
module attributes {stable_mosaic.version = 11 : i64} {
  func.func @_bottleneck_kernel(%arg0: i32, %arg1: memref<2x16x16x8xbf16, #tpu.memory_space<vmem>>, %arg2: memref<1x8xf32, #tpu.memory_space<vmem>>, %arg3: memref<1x8xf32, #tpu.memory_space<vmem>>, %arg4: memref<8x32xbf16, #tpu.memory_space<vmem>>, %arg5: memref<1x32xf32, #tpu.memory_space<vmem>>, %arg6: memref<9x32x8xbf16, #tpu.memory_space<vmem>>, %arg7: memref<2x16x16x8xbf16, #tpu.memory_space<vmem>>, %arg8: memref<2x18x18x32xf32, #tpu.memory_space<vmem>>) attributes {dimension_semantics = [#tpu.dimension_semantics<parallel>], iteration_bounds = array<i64: 1>, scalar_prefetch = 0 : i64, scratch_operands = 1 : i64, tpu.core_type = #tpu.core_type<tc>, window_params = [{transform_indices = @transform_0, window_bounds = array<i64: 2, 16, 16, 8>}, {pipeline_mode = #tpu.pipeline_mode<synchronous>, transform_indices = @transform_1, window_bounds = array<i64: 1, 8>}, {pipeline_mode = #tpu.pipeline_mode<synchronous>, transform_indices = @transform_2, window_bounds = array<i64: 1, 8>}, {pipeline_mode = #tpu.pipeline_mode<synchronous>, transform_indices = @transform_3, window_bounds = array<i64: 8, 32>}, {pipeline_mode = #tpu.pipeline_mode<synchronous>, transform_indices = @transform_4, window_bounds = array<i64: 1, 32>}, {pipeline_mode = #tpu.pipeline_mode<synchronous>, transform_indices = @transform_5, window_bounds = array<i64: 9, 32, 8>}, {transform_indices = @transform_6, window_bounds = array<i64: 2, 16, 16, 8>}]} {
    %c0 = arith.constant 0 : index
    %c0_0 = arith.constant 0 : index
    %c0_1 = arith.constant 0 : index
    %c0_2 = arith.constant 0 : index
    %0 = vector.load %arg1[%c0, %c0_0, %c0_1, %c0_2] : memref<2x16x16x8xbf16, #tpu.memory_space<vmem>>, vector<2x16x16x8xbf16>
    %1 = arith.extf %0 : vector<2x16x16x8xbf16> to vector<2x16x16x8xf32>
    %2 = vector.shape_cast %1 : vector<2x16x16x8xf32> to vector<512x8xf32>
    %c0_3 = arith.constant 0 : index
    %c0_4 = arith.constant 0 : index
    %3 = vector.load %arg2[%c0_3, %c0_4] : memref<1x8xf32, #tpu.memory_space<vmem>>, vector<1x8xf32>
    %4 = vector.broadcast %3 : vector<1x8xf32> to vector<512x8xf32>
    %5 = arith.mulf %2, %4 : vector<512x8xf32>
    %c0_5 = arith.constant 0 : index
    %c0_6 = arith.constant 0 : index
    %6 = vector.load %arg3[%c0_5, %c0_6] : memref<1x8xf32, #tpu.memory_space<vmem>>, vector<1x8xf32>
    %7 = vector.broadcast %6 : vector<1x8xf32> to vector<512x8xf32>
    %8 = arith.addf %5, %7 : vector<512x8xf32>
    %cst = arith.constant 0.000000e+00 : f32
    %9 = vector.broadcast %cst : f32 to vector<512x8xf32>
    %10 = arith.maximumf %8, %9 : vector<512x8xf32>
    %11 = arith.truncf %10 : vector<512x8xf32> to vector<512x8xbf16>
    %c0_7 = arith.constant 0 : index
    %c0_8 = arith.constant 0 : index
    %12 = vector.load %arg4[%c0_7, %c0_8] : memref<8x32xbf16, #tpu.memory_space<vmem>>, vector<8x32xbf16>
    %cst_9 = arith.constant dense<0.000000e+00> : vector<512x32xf32>
    %13 = tpu.matmul %11, %12, %cst_9 {dimension_numbers = #tpu.dot_dimension_numbers<[1], [0], [0], [1], [0, 0, 1, 1], [], []>} : vector<512x8xbf16>, vector<8x32xbf16>, vector<512x32xf32> -> vector<512x32xf32>
    %c0_10 = arith.constant 0 : index
    %c0_11 = arith.constant 0 : index
    %14 = vector.load %arg5[%c0_10, %c0_11] : memref<1x32xf32, #tpu.memory_space<vmem>>, vector<1x32xf32>
    %15 = vector.broadcast %14 : vector<1x32xf32> to vector<512x32xf32>
    %16 = arith.addf %13, %15 : vector<512x32xf32>
    %cst_12 = arith.constant 0.000000e+00 : f32
    %17 = vector.broadcast %cst_12 : f32 to vector<512x32xf32>
    %18 = arith.maximumf %16, %17 : vector<512x32xf32>
    %cst_13 = arith.constant 0.000000e+00 : f32
    %19 = vector.broadcast %cst_13 : f32 to vector<2x1x18x32xf32>
    %cst_14 = arith.constant 0.000000e+00 : f32
    %20 = vector.broadcast %cst_14 : f32 to vector<2x16x1x32xf32>
    %c0_15 = arith.constant 0 : index
    %c0_16 = arith.constant 0 : index
    %c0_17 = arith.constant 0 : index
    %c0_18 = arith.constant 0 : index
    %21 = vector.load %arg8[%c0_15, %c0_16, %c0_17, %c0_18] : memref<2x18x18x32xf32, #tpu.memory_space<vmem>>, vector<2x1x18x32xf32>
    tpu.vector_store %arg8[%c0_15, %c0_16, %c0_17, %c0_18], %19 {strides = array<i32>} : memref<2x18x18x32xf32, #tpu.memory_space<vmem>>, vector<2x1x18x32xf32>,
    %c0_19 = arith.constant 0 : index
    %c17 = arith.constant 17 : index
    %c0_20 = arith.constant 0 : index
    %c0_21 = arith.constant 0 : index
    %22 = vector.load %arg8[%c0_19, %c17, %c0_20, %c0_21] : memref<2x18x18x32xf32, #tpu.memory_space<vmem>>, vector<2x1x18x32xf32>
    tpu.vector_store %arg8[%c0_19, %c17, %c0_20, %c0_21], %19 {strides = array<i32>} : memref<2x18x18x32xf32, #tpu.memory_space<vmem>>, vector<2x1x18x32xf32>,
    %c0_22 = arith.constant 0 : index
    %c1 = arith.constant 1 : index
    %c0_23 = arith.constant 0 : index
    %c0_24 = arith.constant 0 : index
    %23 = vector.load %arg8[%c0_22, %c1, %c0_23, %c0_24] : memref<2x18x18x32xf32, #tpu.memory_space<vmem>>, vector<2x16x1x32xf32>
    tpu.vector_store %arg8[%c0_22, %c1, %c0_23, %c0_24], %20 {strides = array<i32>} : memref<2x18x18x32xf32, #tpu.memory_space<vmem>>, vector<2x16x1x32xf32>,
    %c0_25 = arith.constant 0 : index
    %c1_26 = arith.constant 1 : index
    %c17_27 = arith.constant 17 : index
    %c0_28 = arith.constant 0 : index
    %24 = vector.load %arg8[%c0_25, %c1_26, %c17_27, %c0_28] : memref<2x18x18x32xf32, #tpu.memory_space<vmem>>, vector<2x16x1x32xf32>
    tpu.vector_store %arg8[%c0_25, %c1_26, %c17_27, %c0_28], %20 {strides = array<i32>} : memref<2x18x18x32xf32, #tpu.memory_space<vmem>>, vector<2x16x1x32xf32>,
    %25 = vector.shape_cast %18 : vector<512x32xf32> to vector<2x16x16x32xf32>
    %c0_29 = arith.constant 0 : index
    %c1_30 = arith.constant 1 : index
    %c1_31 = arith.constant 1 : index
    %c0_32 = arith.constant 0 : index
    %26 = vector.load %arg8[%c0_29, %c1_30, %c1_31, %c0_32] : memref<2x18x18x32xf32, #tpu.memory_space<vmem>>, vector<2x16x16x32xf32>
    tpu.vector_store %arg8[%c0_29, %c1_30, %c1_31, %c0_32], %25 {strides = array<i32>} : memref<2x18x18x32xf32, #tpu.memory_space<vmem>>, vector<2x16x16x32xf32>,
    %cst_33 = arith.constant 0.000000e+00 : f32
    %27 = vector.broadcast %cst_33 : f32 to vector<512x8xf32>
    %c0_34 = arith.constant 0 : index
    %c0_35 = arith.constant 0 : index
    %c0_36 = arith.constant 0 : index
    %c0_37 = arith.constant 0 : index
    %28 = vector.load %arg8[%c0_34, %c0_35, %c0_36, %c0_37] : memref<2x18x18x32xf32, #tpu.memory_space<vmem>>, vector<2x16x18x32xf32>
    %29 = vector.extract_strided_slice %28 {offsets = [0, 0, 0, 0], sizes = [2, 16, 16, 32], strides = [1, 1, 1, 1]} : vector<2x16x18x32xf32> to vector<2x16x16x32xf32>
    %30 = vector.shape_cast %29 : vector<2x16x16x32xf32> to vector<512x32xf32>
    %31 = arith.truncf %30 : vector<512x32xf32> to vector<512x32xbf16>
    %c0_38 = arith.constant 0 : index
    %c0_39 = arith.constant 0 : index
    %c0_40 = arith.constant 0 : index
    %32 = vector.load %arg6[%c0_38, %c0_39, %c0_40] : memref<9x32x8xbf16, #tpu.memory_space<vmem>>, vector<1x32x8xbf16>
    %33 = vector.shape_cast %32 : vector<1x32x8xbf16> to vector<32x8xbf16>
    %cst_41 = arith.constant dense<0.000000e+00> : vector<512x8xf32>
    %34 = tpu.matmul %31, %33, %cst_41 {dimension_numbers = #tpu.dot_dimension_numbers<[1], [0], [0], [1], [0, 0, 1, 1], [], []>} : vector<512x32xbf16>, vector<32x8xbf16>, vector<512x8xf32> -> vector<512x8xf32>
    %35 = arith.addf %27, %34 : vector<512x8xf32>
    %36 = vector.extract_strided_slice %28 {offsets = [0, 0, 1, 0], sizes = [2, 16, 16, 32], strides = [1, 1, 1, 1]} : vector<2x16x18x32xf32> to vector<2x16x16x32xf32>
    %37 = vector.shape_cast %36 : vector<2x16x16x32xf32> to vector<512x32xf32>
    %38 = arith.truncf %37 : vector<512x32xf32> to vector<512x32xbf16>
    %c1_42 = arith.constant 1 : index
    %c0_43 = arith.constant 0 : index
    %c0_44 = arith.constant 0 : index
    %39 = vector.load %arg6[%c1_42, %c0_43, %c0_44] : memref<9x32x8xbf16, #tpu.memory_space<vmem>>, vector<1x32x8xbf16>
    %40 = vector.shape_cast %39 : vector<1x32x8xbf16> to vector<32x8xbf16>
    %cst_45 = arith.constant dense<0.000000e+00> : vector<512x8xf32>
    %41 = tpu.matmul %38, %40, %cst_45 {dimension_numbers = #tpu.dot_dimension_numbers<[1], [0], [0], [1], [0, 0, 1, 1], [], []>} : vector<512x32xbf16>, vector<32x8xbf16>, vector<512x8xf32> -> vector<512x8xf32>
    %42 = arith.addf %35, %41 : vector<512x8xf32>
    %43 = vector.extract_strided_slice %28 {offsets = [0, 0, 2, 0], sizes = [2, 16, 16, 32], strides = [1, 1, 1, 1]} : vector<2x16x18x32xf32> to vector<2x16x16x32xf32>
    %44 = vector.shape_cast %43 : vector<2x16x16x32xf32> to vector<512x32xf32>
    %45 = arith.truncf %44 : vector<512x32xf32> to vector<512x32xbf16>
    %c2 = arith.constant 2 : index
    %c0_46 = arith.constant 0 : index
    %c0_47 = arith.constant 0 : index
    %46 = vector.load %arg6[%c2, %c0_46, %c0_47] : memref<9x32x8xbf16, #tpu.memory_space<vmem>>, vector<1x32x8xbf16>
    %47 = vector.shape_cast %46 : vector<1x32x8xbf16> to vector<32x8xbf16>
    %cst_48 = arith.constant dense<0.000000e+00> : vector<512x8xf32>
    %48 = tpu.matmul %45, %47, %cst_48 {dimension_numbers = #tpu.dot_dimension_numbers<[1], [0], [0], [1], [0, 0, 1, 1], [], []>} : vector<512x32xbf16>, vector<32x8xbf16>, vector<512x8xf32> -> vector<512x8xf32>
    %49 = arith.addf %42, %48 : vector<512x8xf32>
    %c0_49 = arith.constant 0 : index
    %c1_50 = arith.constant 1 : index
    %c0_51 = arith.constant 0 : index
    %c0_52 = arith.constant 0 : index
    %50 = vector.load %arg8[%c0_49, %c1_50, %c0_51, %c0_52] : memref<2x18x18x32xf32, #tpu.memory_space<vmem>>, vector<2x16x18x32xf32>
    %51 = vector.extract_strided_slice %50 {offsets = [0, 0, 0, 0], sizes = [2, 16, 16, 32], strides = [1, 1, 1, 1]} : vector<2x16x18x32xf32> to vector<2x16x16x32xf32>
    %52 = vector.shape_cast %51 : vector<2x16x16x32xf32> to vector<512x32xf32>
    %53 = arith.truncf %52 : vector<512x32xf32> to vector<512x32xbf16>
    %c3 = arith.constant 3 : index
    %c0_53 = arith.constant 0 : index
    %c0_54 = arith.constant 0 : index
    %54 = vector.load %arg6[%c3, %c0_53, %c0_54] : memref<9x32x8xbf16, #tpu.memory_space<vmem>>, vector<1x32x8xbf16>
    %55 = vector.shape_cast %54 : vector<1x32x8xbf16> to vector<32x8xbf16>
    %cst_55 = arith.constant dense<0.000000e+00> : vector<512x8xf32>
    %56 = tpu.matmul %53, %55, %cst_55 {dimension_numbers = #tpu.dot_dimension_numbers<[1], [0], [0], [1], [0, 0, 1, 1], [], []>} : vector<512x32xbf16>, vector<32x8xbf16>, vector<512x8xf32> -> vector<512x8xf32>
    %57 = arith.addf %49, %56 : vector<512x8xf32>
    %58 = vector.extract_strided_slice %50 {offsets = [0, 0, 1, 0], sizes = [2, 16, 16, 32], strides = [1, 1, 1, 1]} : vector<2x16x18x32xf32> to vector<2x16x16x32xf32>
    %59 = vector.shape_cast %58 : vector<2x16x16x32xf32> to vector<512x32xf32>
    %60 = arith.truncf %59 : vector<512x32xf32> to vector<512x32xbf16>
    %c4 = arith.constant 4 : index
    %c0_56 = arith.constant 0 : index
    %c0_57 = arith.constant 0 : index
    %61 = vector.load %arg6[%c4, %c0_56, %c0_57] : memref<9x32x8xbf16, #tpu.memory_space<vmem>>, vector<1x32x8xbf16>
    %62 = vector.shape_cast %61 : vector<1x32x8xbf16> to vector<32x8xbf16>
    %cst_58 = arith.constant dense<0.000000e+00> : vector<512x8xf32>
    %63 = tpu.matmul %60, %62, %cst_58 {dimension_numbers = #tpu.dot_dimension_numbers<[1], [0], [0], [1], [0, 0, 1, 1], [], []>} : vector<512x32xbf16>, vector<32x8xbf16>, vector<512x8xf32> -> vector<512x8xf32>
    %64 = arith.addf %57, %63 : vector<512x8xf32>
    %65 = vector.extract_strided_slice %50 {offsets = [0, 0, 2, 0], sizes = [2, 16, 16, 32], strides = [1, 1, 1, 1]} : vector<2x16x18x32xf32> to vector<2x16x16x32xf32>
    %66 = vector.shape_cast %65 : vector<2x16x16x32xf32> to vector<512x32xf32>
    %67 = arith.truncf %66 : vector<512x32xf32> to vector<512x32xbf16>
    %c5 = arith.constant 5 : index
    %c0_59 = arith.constant 0 : index
    %c0_60 = arith.constant 0 : index
    %68 = vector.load %arg6[%c5, %c0_59, %c0_60] : memref<9x32x8xbf16, #tpu.memory_space<vmem>>, vector<1x32x8xbf16>
    %69 = vector.shape_cast %68 : vector<1x32x8xbf16> to vector<32x8xbf16>
    %cst_61 = arith.constant dense<0.000000e+00> : vector<512x8xf32>
    %70 = tpu.matmul %67, %69, %cst_61 {dimension_numbers = #tpu.dot_dimension_numbers<[1], [0], [0], [1], [0, 0, 1, 1], [], []>} : vector<512x32xbf16>, vector<32x8xbf16>, vector<512x8xf32> -> vector<512x8xf32>
    %71 = arith.addf %64, %70 : vector<512x8xf32>
    %c0_62 = arith.constant 0 : index
    %c2_63 = arith.constant 2 : index
    %c0_64 = arith.constant 0 : index
    %c0_65 = arith.constant 0 : index
    %72 = vector.load %arg8[%c0_62, %c2_63, %c0_64, %c0_65] : memref<2x18x18x32xf32, #tpu.memory_space<vmem>>, vector<2x16x18x32xf32>
    %73 = vector.extract_strided_slice %72 {offsets = [0, 0, 0, 0], sizes = [2, 16, 16, 32], strides = [1, 1, 1, 1]} : vector<2x16x18x32xf32> to vector<2x16x16x32xf32>
    %74 = vector.shape_cast %73 : vector<2x16x16x32xf32> to vector<512x32xf32>
    %75 = arith.truncf %74 : vector<512x32xf32> to vector<512x32xbf16>
    %c6 = arith.constant 6 : index
    %c0_66 = arith.constant 0 : index
    %c0_67 = arith.constant 0 : index
    %76 = vector.load %arg6[%c6, %c0_66, %c0_67] : memref<9x32x8xbf16, #tpu.memory_space<vmem>>, vector<1x32x8xbf16>
    %77 = vector.shape_cast %76 : vector<1x32x8xbf16> to vector<32x8xbf16>
    %cst_68 = arith.constant dense<0.000000e+00> : vector<512x8xf32>
    %78 = tpu.matmul %75, %77, %cst_68 {dimension_numbers = #tpu.dot_dimension_numbers<[1], [0], [0], [1], [0, 0, 1, 1], [], []>} : vector<512x32xbf16>, vector<32x8xbf16>, vector<512x8xf32> -> vector<512x8xf32>
    %79 = arith.addf %71, %78 : vector<512x8xf32>
    %80 = vector.extract_strided_slice %72 {offsets = [0, 0, 1, 0], sizes = [2, 16, 16, 32], strides = [1, 1, 1, 1]} : vector<2x16x18x32xf32> to vector<2x16x16x32xf32>
    %81 = vector.shape_cast %80 : vector<2x16x16x32xf32> to vector<512x32xf32>
    %82 = arith.truncf %81 : vector<512x32xf32> to vector<512x32xbf16>
    %c7 = arith.constant 7 : index
    %c0_69 = arith.constant 0 : index
    %c0_70 = arith.constant 0 : index
    %83 = vector.load %arg6[%c7, %c0_69, %c0_70] : memref<9x32x8xbf16, #tpu.memory_space<vmem>>, vector<1x32x8xbf16>
    %84 = vector.shape_cast %83 : vector<1x32x8xbf16> to vector<32x8xbf16>
    %cst_71 = arith.constant dense<0.000000e+00> : vector<512x8xf32>
    %85 = tpu.matmul %82, %84, %cst_71 {dimension_numbers = #tpu.dot_dimension_numbers<[1], [0], [0], [1], [0, 0, 1, 1], [], []>} : vector<512x32xbf16>, vector<32x8xbf16>, vector<512x8xf32> -> vector<512x8xf32>
    %86 = arith.addf %79, %85 : vector<512x8xf32>
    %87 = vector.extract_strided_slice %72 {offsets = [0, 0, 2, 0], sizes = [2, 16, 16, 32], strides = [1, 1, 1, 1]} : vector<2x16x18x32xf32> to vector<2x16x16x32xf32>
    %88 = vector.shape_cast %87 : vector<2x16x16x32xf32> to vector<512x32xf32>
    %89 = arith.truncf %88 : vector<512x32xf32> to vector<512x32xbf16>
    %c8 = arith.constant 8 : index
    %c0_72 = arith.constant 0 : index
    %c0_73 = arith.constant 0 : index
    %90 = vector.load %arg6[%c8, %c0_72, %c0_73] : memref<9x32x8xbf16, #tpu.memory_space<vmem>>, vector<1x32x8xbf16>
    %91 = vector.shape_cast %90 : vector<1x32x8xbf16> to vector<32x8xbf16>
    %cst_74 = arith.constant dense<0.000000e+00> : vector<512x8xf32>
    %92 = tpu.matmul %89, %91, %cst_74 {dimension_numbers = #tpu.dot_dimension_numbers<[1], [0], [0], [1], [0, 0, 1, 1], [], []>} : vector<512x32xbf16>, vector<32x8xbf16>, vector<512x8xf32> -> vector<512x8xf32>
    %93 = arith.addf %86, %92 : vector<512x8xf32>
    %94 = vector.shape_cast %93 : vector<512x8xf32> to vector<2x16x16x8xf32>
    %95 = arith.truncf %94 : vector<2x16x16x8xf32> to vector<2x16x16x8xbf16>
    %c0_75 = arith.constant 0 : index
    %c0_76 = arith.constant 0 : index
    %c0_77 = arith.constant 0 : index
    %c0_78 = arith.constant 0 : index
    %96 = vector.load %arg7[%c0_75, %c0_76, %c0_77, %c0_78] : memref<2x16x16x8xbf16, #tpu.memory_space<vmem>>, vector<2x16x16x8xbf16>
    tpu.vector_store %arg7[%c0_75, %c0_76, %c0_77, %c0_78], %95 {strides = array<i32>} : memref<2x16x16x8xbf16, #tpu.memory_space<vmem>>, vector<2x16x16x8xbf16>,
    return
  }
  func.func @transform_0(%arg0: i32) -> (i32, i32, i32, i32) {
    %c0_i32 = arith.constant 0 : i32
    %c0_i32_0 = arith.constant 0 : i32
    %c0_i32_1 = arith.constant 0 : i32
    %c0_i32_2 = arith.constant 0 : i32
    return %arg0, %c0_i32, %c0_i32_0, %c0_i32_1 : i32, i32, i32, i32
  }
  func.func @transform_1(%arg0: i32) -> (i32, i32) {
    %c0_i32 = arith.constant 0 : i32
    %c0_i32_0 = arith.constant 0 : i32
    %c0_i32_1 = arith.constant 0 : i32
    return %c0_i32, %c0_i32_0 : i32, i32
  }
  func.func @transform_2(%arg0: i32) -> (i32, i32) {
    %c0_i32 = arith.constant 0 : i32
    %c0_i32_0 = arith.constant 0 : i32
    %c0_i32_1 = arith.constant 0 : i32
    return %c0_i32, %c0_i32_0 : i32, i32
  }
  func.func @transform_3(%arg0: i32) -> (i32, i32) {
    %c0_i32 = arith.constant 0 : i32
    %c0_i32_0 = arith.constant 0 : i32
    %c0_i32_1 = arith.constant 0 : i32
    return %c0_i32, %c0_i32_0 : i32, i32
  }
  func.func @transform_4(%arg0: i32) -> (i32, i32) {
    %c0_i32 = arith.constant 0 : i32
    %c0_i32_0 = arith.constant 0 : i32
    %c0_i32_1 = arith.constant 0 : i32
    return %c0_i32, %c0_i32_0 : i32, i32
  }
  func.func @transform_5(%arg0: i32) -> (i32, i32, i32) {
    %c0_i32 = arith.constant 0 : i32
    %c0_i32_0 = arith.constant 0 : i32
    %c0_i32_1 = arith.constant 0 : i32
    %c0_i32_2 = arith.constant 0 : i32
    return %c0_i32, %c0_i32_0, %c0_i32_1 : i32, i32, i32
  }
  func.func @transform_6(%arg0: i32) -> (i32, i32, i32, i32) {
    %c0_i32 = arith.constant 0 : i32
    %c0_i32_0 = arith.constant 0 : i32
    %c0_i32_1 = arith.constant 0 : i32
    %c0_i32_2 = arith.constant 0 : i32
    return %arg0, %c0_i32, %c0_i32_0, %c0_i32_1 : i32, i32, i32, i32
  }
}

</mosaic_0001>

<bundles_post_ra>
// kernel: stochastic_bottleneck_forward.1
= control target key start
LH: loop header
LB: loop body
LE: loop exit
PB: predicated region body
PF: predicated region fallthrough
CT: control target
= control target key end

     0   :  { %vm495_vm0 = vcmask 1043456   ;;  %vm398_vm1 = vcmask 64512   ;;  %vm852_vm2 = vcmask 261120   ;;  %vm868_vm3 = vcmask 253952   ;;  %s14386_s3 = inlined_call_operand.vmem [shape: bf16[8,32], index: 3, kind: input, shape index: {}]   ;;  %s14387_s0 = inlined_call_operand.vmem [shape: bf16[2,16,16,8], index: 0, kind: input, shape index: {}]   ;;  %s14388_s1 = inlined_call_operand.vmem [shape: f32[1,8], index: 1, kind: input, shape index: {}]   ;;  %s14389_s2 = inlined_call_operand.vmem [shape: f32[1,8], index: 2, kind: input, shape index: {}]   ;;  %s14390_s5 = inlined_call_operand.vmem [shape: bf16[9,32,8], index: 5, kind: input, shape index: {}]   ;;  %s14391_s4 = inlined_call_operand.vmem [shape: f32[1,32], index: 4, kind: input, shape index: {}]   ;;  %s14392_s6 = inlined_call_operand.vmem [shape: bf16[2,16,16,8], index: 6, kind: output, shape index: {}]  }
   0x1   :  { %v390_v0 = vld [vmem:[%s14386_s3] sm:$0xf]  ;;  %v8227_v6 = vld [vmem:[%s14387_s0 + $0x8] sm:$0xff]   ;;  %v8228_v7 = vld [vmem:[%s14387_s0 + $0x10] sm:$0xff]   ;;  %vm855_vm4 = vcmask 254976   ;;  %vm1225_vm5 = vcmask 1046528  }
   0x2   :  { %v8100_v1 = vld [vmem:[%s14387_s0] sm:$0xff]   ;;  %9275 = vmatprep.subr.msk.bf16.mxu0 %vm495_vm0, %v390_v0  ;;  %v497_v3 = vsel %vm495_vm0, %v390_v0, 0  ;;  %v8105_v9 = vunpack.c.l.bf16 %v8227_v6  ;;  %v8106_v10 = vunpack.c.h.bf16 %v8227_v6  ;;  %v8109_v11 = vunpack.c.l.bf16 %v8228_v7  ;;  %v8229_v13 = vld [vmem:[%s14387_s0 + $0x18] sm:$0xff]   ;;  %v8231_v35 = vld [vmem:[%s14387_s0 + $0x28] sm:$0xff]  }
   0x3   :  { %v9446_v2 = vld [vmem:[%s14388_s1] ss:$0 sm:$0xff]  ;;  %v8101_v4 = vunpack.c.l.bf16 %v8100_v1  ;;  %v8102_v5 = vunpack.c.h.bf16 %v8100_v1  ;;  %8598 = vmatpush3.bf16.msra.mxu0 %v497_v3  ;;  %v8110_v12 = vunpack.c.h.bf16 %v8228_v7  ;;  %v8113_v16 = vunpack.c.l.bf16 %v8229_v13  ;;  %v8232_v40 = vld [vmem:[%s14387_s0 + $0x30] sm:$0xff]   ;;  %v8233_v55 = vld [vmem:[%s14387_s0 + $0x38] sm:$0xff]  }
   0x4   :  { %v9457_v8 = vld [vmem:[%s14389_s2] ss:$0 sm:$0xff]  ;;  %v8114_v17 = vunpack.c.h.bf16 %v8229_v13  ;;  %v161_v18 = vmul.f32 %v8105_v9, %v9446_v2  ;;  %v162_v19 = vmul.f32 %v8106_v10, %v9446_v2  ;;  %v163_v20 = vmul.f32 %v8109_v11, %v9446_v2 }
   0x5   :  { %v159_v14 = vmul.f32 %v8101_v4, %v9446_v2  ;;  %v160_v15 = vmul.f32 %v8102_v5, %v9446_v2  ;;  %v164_v21 = vmul.f32 %v8110_v12, %v9446_v2  ;;  %v165_v24 = vmul.f32 %v8113_v16, %v9446_v2  ;;  %v8230_v30 = vld [vmem:[%s14387_s0 + $0x20] sm:$0xff]   ;;  %v8235_v16 = vld [vmem:[%s14387_s0 + $0x48] sm:$0xff]  }
   0x6   :  { %v166_v25 = vmul.f32 %v8114_v17, %v9446_v2  ;;  %v232_v26 = vadd.f32 %v9457_v8, %v161_v18  ;;  %v233_v27 = vadd.f32 %v9457_v8, %v162_v19  ;;  %v234_v28 = vadd.f32 %v9457_v8, %v163_v20  ;;  %v8234_v61 = vld [vmem:[%s14387_s0 + $0x40] sm:$0xff]  }
   0x7   :  { %v230_v22 = vadd.f32 %v9457_v8, %v159_v14  ;;  %v231_v23 = vadd.f32 %v9457_v8, %v160_v15  ;;  %v235_v29 = vadd.f32 %v9457_v8, %v164_v21  ;;  %v236_v33 = vadd.f32 %v9457_v8, %v165_v24  ;;  %v8236_v21 = vld [vmem:[%s14387_s0 + $0x50] sm:$0xff]  }
   0x8   :  { %v237_v34 = vadd.f32 %v9457_v8, %v166_v25  ;;  %v296_v36 = vmax.f32 %v232_v26, 0.0  ;;  %v297_v37 = vmax.f32 %v233_v27, 0.0  ;;  %v298_v38 = vmax.f32 %v234_v28, 0.0 }
   0x9   :  { %v294_v31 = vmax.f32 %v230_v22, 0.0  ;;  %v295_v32 = vmax.f32 %v231_v23, 0.0  ;;  %v299_v39 = vmax.f32 %v235_v29, 0.0  ;;  %v8117_v42 = vunpack.c.l.bf16 %v8230_v30 }
   0xa   :  { %v359_v43 = vpack.c.bf16 %v297_v37, %v296_v36  ;;  %v8118_v45 = vunpack.c.h.bf16 %v8230_v30  ;;  %v8121_v46 = vunpack.c.l.bf16 %v8231_v35  ;;  %v300_v47 = vmax.f32 %v236_v33, 0.0 }
   0xb   :  { %v358_v41 = vpack.c.bf16 %v295_v32, %v294_v31  ;;  %v360_v44 = vpack.c.bf16 %v299_v39, %v298_v38  ;;  %v167_v48 = vmul.f32 %v8117_v42, %v9446_v2  ;;  %v8122_v49 = vunpack.c.h.bf16 %v8231_v35  ;;  %v8237_v38 = vld [vmem:[%s14387_s0 + $0x58] sm:$0xff]  }
   0xc   :  { %v8125_v50 = vunpack.c.l.bf16 %v8232_v40  ;;  %v301_v51 = vmax.f32 %v237_v34, 0.0  ;;  %v168_v52 = vmul.f32 %v8118_v45, %v9446_v2  ;;  %v169_v53 = vmul.f32 %v8121_v46, %v9446_v2 }
   0xd   :  { %8599 = vmatprep.mubr.msk.bf16.mxu0 %vm398_vm1, %v358_v41  ;;  %v8126_v54 = vunpack.c.h.bf16 %v8232_v40  ;;  %v238_v56 = vadd.f32 %v9457_v8, %v167_v48  ;;  %v170_v57 = vmul.f32 %v8122_v49, %v9446_v2  ;;  %v8129_v63 = vunpack.c.l.bf16 %v8233_v55  ;;  %v8238_v41 = vld [vmem:[%s14387_s0 + $0x60] sm:$0xff]  }
   0xe   :  { %8600 = vmatmul.mubr.msk.bf16.vlgmr.msra.gmra.mxu0 %vm398_vm1, %v359_v43  ;;  %v171_v58 = vmul.f32 %v8125_v50, %v9446_v2  ;;  %v239_v59 = vadd.f32 %v9457_v8, %v168_v52  ;;  %v8130_v0 = vunpack.c.h.bf16 %v8233_v55  ;;  %v361_v1 = vpack.c.bf16 %v301_v51, %v300_v47 }
   0xf   :  { %8603 = vmatprep.mubr.msk.bf16.mxu0 %vm398_vm1, %v360_v44  ;;  %v172_v60 = vmul.f32 %v8126_v54, %v9446_v2  ;;  %v302_v62 = vmax.f32 %v238_v56, 0.0  ;;  %v240_v4 = vadd.f32 %v9457_v8, %v169_v53  ;;  %v241_v5 = vadd.f32 %v9457_v8, %v170_v57 }
  0x10   :  { %v303_v3 = vmax.f32 %v239_v59, 0.0  ;;  %v242_v6 = vadd.f32 %v9457_v8, %v171_v58  ;;  %v8133_v9 = vunpack.c.l.bf16 %v8234_v61  ;;  %v8134_v11 = vunpack.c.h.bf16 %v8234_v61  ;;  %v8239_v58 = vld [vmem:[%s14387_s0 + $0x68] sm:$0xff]   ;;  %v8240_v61 = vld [vmem:[%s14387_s0 + $0x70] sm:$0xff]  }
  0x11   :  { %v243_v7 = vadd.f32 %v9457_v8, %v172_v60  ;;  %v173_v12 = vmul.f32 %v8129_v63, %v9446_v2  ;;  %v174_v13 = vmul.f32 %v8130_v0, %v9446_v2  ;;  %v304_v14 = vmax.f32 %v240_v4, 0.0 }
  0x12   :  { %v362_v10 = vpack.c.bf16 %v303_v3, %v302_v62  ;;  %v305_v15 = vmax.f32 %v241_v5, 0.0  ;;  %v306_v17 = vmax.f32 %v242_v6, 0.0  ;;  %v175_v19 = vmul.f32 %v8133_v9, %v9446_v2 }
  0x13   :  { %v307_v18 = vmax.f32 %v243_v7, 0.0  ;;  %v176_v20 = vmul.f32 %v8134_v11, %v9446_v2  ;;  %v244_v22 = vadd.f32 %v9457_v8, %v173_v12  ;;  %v245_v23 = vadd.f32 %v9457_v8, %v174_v13 }
  0x14   :  { %v8137_v24 = vunpack.c.l.bf16 %v8235_v16  ;;  %v363_v25 = vpack.c.bf16 %v305_v15, %v304_v14  ;;  %v8138_v26 = vunpack.c.h.bf16 %v8235_v16  ;;  %v8141_v27 = vunpack.c.l.bf16 %v8236_v21  ;;  %v8241_v14 = vld [vmem:[%s14387_s0 + $0x78] sm:$0xff]  }
  0x15   :  { %v8142_v28 = vunpack.c.h.bf16 %v8236_v21  ;;  %v364_v29 = vpack.c.bf16 %v307_v18, %v306_v17  ;;  %v246_v30 = vadd.f32 %v9457_v8, %v175_v19  ;;  %v247_v31 = vadd.f32 %v9457_v8, %v176_v20  ;;  %v8242_v19 = vld [vmem:[%s14387_s0 + $0x80] sm:$0xff]  }
  0x16   :  { %8604 = vmatmul.mubr.msk.bf16.gmra.mxu0 %vm398_vm1, %v361_v1  ;;  %v308_v32 = vmax.f32 %v244_v22, 0.0  ;;  %v309_v33 = vmax.f32 %v245_v23, 0.0  ;;  %v177_v34 = vmul.f32 %v8137_v24, %v9446_v2  ;;  %v178_v35 = vmul.f32 %v8138_v26, %v9446_v2 }
  0x17   :  { %8607 = vmatprep.mubr.msk.bf16.mxu0 %vm398_vm1, %v362_v10  ;;  %v179_v36 = vmul.f32 %v8141_v27, %v9446_v2  ;;  %v180_v37 = vmul.f32 %v8142_v28, %v9446_v2  ;;  %v310_v39 = vmax.f32 %v246_v30, 0.0  ;;  %v311_v40 = vmax.f32 %v247_v31, 0.0 }
  0x18   :  { %v365_v42 = vpack.c.bf16 %v309_v33, %v308_v32  ;;  %v248_v43 = vadd.f32 %v9457_v8, %v177_v34  ;;  %v8145_v44 = vunpack.c.l.bf16 %v8237_v38  ;;  %v249_v45 = vadd.f32 %v9457_v8, %v178_v35 }
  0x19   :  { %v250_v46 = vadd.f32 %v9457_v8, %v179_v36  ;;  %v251_v47 = vadd.f32 %v9457_v8, %v180_v37  ;;  %v8146_v48 = vunpack.c.h.bf16 %v8237_v38  ;;  %v366_v49 = vpack.c.bf16 %v311_v40, %v310_v39  ;;  %v8243_v38 = vld [vmem:[%s14387_s0 + $0x88] sm:$0xff]   ;;  %v8244_v39 = vld [vmem:[%s14387_s0 + $0x90] sm:$0xff]  }
  0x1a   :  { %v8149_v50 = vunpack.c.l.bf16 %v8238_v41  ;;  %v8150_v51 = vunpack.c.h.bf16 %v8238_v41  ;;  %v312_v52 = vmax.f32 %v248_v43, 0.0  ;;  %v181_v53 = vmul.f32 %v8145_v44, %v9446_v2 }
  0x1b   :  { %v313_v54 = vmax.f32 %v249_v45, 0.0  ;;  %v314_v55 = vmax.f32 %v250_v46, 0.0  ;;  %v315_v56 = vmax.f32 %v251_v47, 0.0  ;;  %v182_v57 = vmul.f32 %v8146_v48, %v9446_v2 }
  0x1c   :  { %v183_v59 = vmul.f32 %v8149_v50, %v9446_v2  ;;  %v184_v60 = vmul.f32 %v8150_v51, %v9446_v2  ;;  %v8153_v62 = vunpack.c.l.bf16 %v8239_v58  ;;  %v8154_v63 = vunpack.c.h.bf16 %v8239_v58  ;;  %v8245_v51 = vld [vmem:[%s14387_s0 + $0x98] sm:$0xff]  }
  0x1d   :  { %v367_v0 = vpack.c.bf16 %v313_v54, %v312_v52  ;;  %v368_v1 = vpack.c.bf16 %v315_v56, %v314_v55  ;;  %v252_v3 = vadd.f32 %v9457_v8, %v181_v53  ;;  %v253_v4 = vadd.f32 %v9457_v8, %v182_v57 }
  0x1e   :  { %8608 = vmatmul.mubr.msk.bf16.gmra.mxu0 %vm398_vm1, %v363_v25  ;;  %v254_v5 = vadd.f32 %v9457_v8, %v183_v59  ;;  %v255_v6 = vadd.f32 %v9457_v8, %v184_v60  ;;  %v8157_v7 = vunpack.c.l.bf16 %v8240_v61  ;;  %v8158_v9 = vunpack.c.h.bf16 %v8240_v61  ;;  %v8246_v61 = vld [vmem:[%s14387_s0 + $0xa0] sm:$0xff]  }
  0x1f   :  { %8611 = vmatprep.mubr.msk.bf16.mxu0 %vm398_vm1, %v364_v29  ;;  %v185_v10 = vmul.f32 %v8153_v62, %v9446_v2  ;;  %v186_v11 = vmul.f32 %v8154_v63, %v9446_v2  ;;  %v316_v12 = vmax.f32 %v252_v3, 0.0  ;;  %v317_v13 = vmax.f32 %v253_v4, 0.0 }
  0x20   :  { %v318_v15 = vmax.f32 %v254_v5, 0.0  ;;  %v319_v16 = vmax.f32 %v255_v6, 0.0  ;;  %v187_v17 = vmul.f32 %v8157_v7, %v9446_v2  ;;  %v188_v18 = vmul.f32 %v8158_v9, %v9446_v2 }
  0x21   :  { %v256_v20 = vadd.f32 %v9457_v8, %v185_v10  ;;  %v257_v21 = vadd.f32 %v9457_v8, %v186_v11  ;;  %v8161_v22 = vunpack.c.l.bf16 %v8241_v14  ;;  %v369_v23 = vpack.c.bf16 %v317_v13, %v316_v12  ;;  %v8247_v10 = vld [vmem:[%s14387_s0 + $0xa8] sm:$0xff]   ;;  %v8248_v13 = vld [vmem:[%s14387_s0 + $0xb0] sm:$0xff]  }
  0x22   :  { %v8162_v24 = vunpack.c.h.bf16 %v8241_v14  ;;  %v8165_v25 = vunpack.c.l.bf16 %v8242_v19  ;;  %v370_v26 = vpack.c.bf16 %v319_v16, %v318_v15  ;;  %v258_v27 = vadd.f32 %v9457_v8, %v187_v17 }
  0x23   :  { %v259_v28 = vadd.f32 %v9457_v8, %v188_v18  ;;  %v8166_v29 = vunpack.c.h.bf16 %v8242_v19  ;;  %v320_v30 = vmax.f32 %v256_v20, 0.0  ;;  %v321_v31 = vmax.f32 %v257_v21, 0.0  ;;  %v8249_v21 = vld [vmem:[%s14387_s0 + $0xb8] sm:$0xff]  }
  0x24   :  { %v189_v32 = vmul.f32 %v8161_v22, %v9446_v2  ;;  %v190_v33 = vmul.f32 %v8162_v24, %v9446_v2  ;;  %v322_v34 = vmax.f32 %v258_v27, 0.0  ;;  %v191_v36 = vmul.f32 %v8165_v25, %v9446_v2 }
  0x25   :  { %v323_v35 = vmax.f32 %v259_v28, 0.0  ;;  %v192_v37 = vmul.f32 %v8166_v29, %v9446_v2  ;;  %v371_v40 = vpack.c.bf16 %v321_v31, %v320_v30  ;;  %v8169_v43 = vunpack.c.l.bf16 %v8243_v38 }
  0x26   :  { %8612 = vmatmul.mubr.msk.bf16.gmra.mxu0 %vm398_vm1, %v365_v42  ;;  %v260_v41 = vadd.f32 %v9457_v8, %v189_v32  ;;  %v261_v42 = vadd.f32 %v9457_v8, %v190_v33  ;;  %v8170_v44 = vunpack.c.h.bf16 %v8243_v38  ;;  %v8173_v45 = vunpack.c.l.bf16 %v8244_v39 }
  0x27   :  { %8615 = vmatprep.mubr.msk.bf16.mxu0 %vm398_vm1, %v366_v49  ;;  %v372_v46 = vpack.c.bf16 %v323_v35, %v322_v34  ;;  %v262_v47 = vadd.f32 %v9457_v8, %v191_v36  ;;  %v263_v48 = vadd.f32 %v9457_v8, %v192_v37  ;;  %v8174_v49 = vunpack.c.h.bf16 %v8244_v39  ;;  %v9637_v39 = vld [vmem:[%s14387_s0 + $0xc8] sm:$0xff]  }
  0x28   :  { %v324_v50 = vmax.f32 %v260_v41, 0.0  ;;  %v325_v52 = vmax.f32 %v261_v42, 0.0  ;;  %v193_v53 = vmul.f32 %v8169_v43, %v9446_v2  ;;  %v194_v54 = vmul.f32 %v8170_v44, %v9446_v2 }
  0x29   :  { %v195_v55 = vmul.f32 %v8173_v45, %v9446_v2  ;;  %v326_v56 = vmax.f32 %v262_v47, 0.0  ;;  %v327_v57 = vmax.f32 %v263_v48, 0.0  ;;  %v196_v58 = vmul.f32 %v8174_v49, %v9446_v2  ;;  %v9653_v47 = vld [vmem:[%s14387_s0 + $0xd0] sm:$0xff]  }
  0x2a   :  { %v8177_v59 = vunpack.c.l.bf16 %v8245_v51  ;;  %v8178_v60 = vunpack.c.h.bf16 %v8245_v51  ;;  %v373_v62 = vpack.c.bf16 %v325_v52, %v324_v50  ;;  %v264_v63 = vadd.f32 %v9457_v8, %v193_v53 }
  0x2b   :  { %v374_v3 = vpack.c.bf16 %v327_v57, %v326_v56  ;;  %v267_v4 = vadd.f32 %v9457_v8, %v196_v58  ;;  %v8181_v5 = vunpack.c.l.bf16 %v8246_v61  ;;  %v8182_v6 = vunpack.c.h.bf16 %v8246_v61 }
  0x2c   :  { %v197_v7 = vmul.f32 %v8177_v59, %v9446_v2  ;;  %v198_v9 = vmul.f32 %v8178_v60, %v9446_v2  ;;  %v328_v11 = vmax.f32 %v264_v63, 0.0  ;;  %v8185_v20 = vunpack.c.l.bf16 %v8247_v10 }
  0x2d   :  { %v331_v15 = vmax.f32 %v267_v4, 0.0  ;;  %v199_v16 = vmul.f32 %v8181_v5, %v9446_v2  ;;  %v200_v17 = vmul.f32 %v8182_v6, %v9446_v2  ;;  %v8186_v22 = vunpack.c.h.bf16 %v8247_v10 }
  0x2e   :  { %8616 = vmatmul.mubr.msk.bf16.gmra.mxu0 %vm398_vm1, %v367_v0  ;;  %v265_v0 = vadd.f32 %v9457_v8, %v194_v54  ;;  %v268_v18 = vadd.f32 %v9457_v8, %v197_v7  ;;  %v269_v19 = vadd.f32 %v9457_v8, %v198_v9  ;;  %v8190_v25 = vunpack.c.h.bf16 %v8248_v13 }
  0x2f   :  { %8619 = vmatprep.mubr.msk.bf16.mxu0 %vm398_vm1, %v368_v1  ;;  %v266_v1 = vadd.f32 %v9457_v8, %v195_v55  ;;  %v270_v28 = vadd.f32 %v9457_v8, %v199_v16  ;;  %v271_v29 = vadd.f32 %v9457_v8, %v200_v17  ;;  %v8193_v30 = vunpack.c.l.bf16 %v8249_v21 }
  0x30   :  { %v329_v12 = vmax.f32 %v265_v0, 0.0  ;;  %v332_v31 = vmax.f32 %v268_v18, 0.0  ;;  %v333_v32 = vmax.f32 %v269_v19, 0.0  ;;  %v201_v33 = vmul.f32 %v8185_v20, %v9446_v2  ;;  %v8253_v18 = vld [vmem:[%s14387_s0 + $0xd8] sm:$0xff]  }
  0x31   :  { %v330_v14 = vmax.f32 %v266_v1, 0.0  ;;  %v8194_v34 = vunpack.c.h.bf16 %v8249_v21  ;;  %v202_v35 = vmul.f32 %v8186_v22, %v9446_v2  ;;  %v204_v38 = vmul.f32 %v8190_v25, %v9446_v2  ;;  %v9278_v21 = vld [vmem:[%s14390_s5 + $0x18] sm:$0xff]  }
  0x32   :  { %v375_v24 = vpack.c.bf16 %v329_v12, %v328_v11  ;;  %v335_v41 = vmax.f32 %v271_v29, 0.0  ;;  %v205_v42 = vmul.f32 %v8193_v30, %v9446_v2  ;;  %v9641_v43 = vpack.c.bf16 %v333_v32, %v332_v31  ;;  %8663 = vmatprep.subr.bf16.mxu1 %v9278_v21  ;;  %v9280_v31 = vld [vmem:[%s14390_s5 + $0x10] sm:$0xff]  }
  0x33   :  { %v376_v27 = vpack.c.bf16 %v331_v15, %v330_v14  ;;  %v9644_v44 = vadd.f32 %v9457_v8, %v201_v33  ;;  %v9647_v45 = vmul.f32 %v8194_v34, %v9446_v2  ;;  %v9656_v48 = vadd.f32 %v9457_v8, %v202_v35  ;;  %8664 = vmatpush3.bf16.msra.mxu1 %v9278_v21 }
  0x34   :  { %v8201_v51 = vunpack.c.l.bf16 %v9637_v39  ;;  %v9666_v52 = vadd.f32 %v9457_v8, %v204_v38  ;;  %v9671_v54 = vadd.f32 %v9457_v8, %v205_v42  ;;  %v8202_v55 = vunpack.c.h.bf16 %v9637_v39  ;;  %8665 = vmatprep.subr.bf16.mxu1 %v9280_v31 }
  0x35   :  { %v8205_v56 = vunpack.c.l.bf16 %v9653_v47  ;;  %v9401_v57 = vmov 0.0   ;;  %v277_v58 = vadd.f32 %v9457_v8, %v9647_v45  ;;  %v8206_v60 = vunpack.c.h.bf16 %v9653_v47 }
  0x36   :  { %8620 = vmatmul.mubr.msk.bf16.gmra.mxu0 %vm398_vm1, %v369_v23  ;;  %v8189_v23 = vunpack.c.l.bf16 %v8248_v13  ;;  %853 = vst.msk [vmem:[#allocation2] sm:$0xff] %vm852_vm2, %v9401_v57  ;;  %854 = vst.msk [vmem:[#allocation2 + $0x8] sm:$0xff] %vm852_vm2, %v9401_v57  ;;  %v336_v63 = vmax.f32 %v9644_v44, 0.0  ;;  %v337_v0 = vmax.f32 %v9656_v48, 0.0  ;;  %v340_v4 = vmax.f32 %v9671_v54, 0.0  ;;  %v9277_v13 = vld [vmem:[%s14390_s5 + $0x8] sm:$0xff]  }
  0x37   :  { %8623 = vmatprep.mubr.msk.bf16.mxu0 %vm398_vm1, %v370_v26  ;;  %v9624_v26 = vld [vmem:[%s14387_s0 + $0xc0] sm:$0xff]   ;;  %857 = vst.msk [vmem:[#allocation2 + $0x1b0] sm:$0xff] %vm852_vm2, %v9401_v57  ;;  %858 = vst.msk [vmem:[#allocation2 + $0x1b8] sm:$0xff] %vm852_vm2, %v9401_v57  ;;  %v210_v5 = vmul.f32 %v8202_v55, %v9446_v2  ;;  %v211_v6 = vmul.f32 %v8205_v56, %v9446_v2  ;;  %v341_v7 = vmax.f32 %v277_v58, 0.0  ;;  %8731 = vmatprep.subr.bf16.mxu0 %v9277_v13  ;;  %vm2281_vm6 = vcmask 1045504  }
  0x38   :  { %v203_v36 = vmul.f32 %v8189_v23, %v9446_v2  ;;  %v8197_v37 = vunpack.c.l.bf16 %v9624_v26  ;;  %861 = vst.msk [vmem:[#allocation2 + $0x198] sm:$0xff] %vm852_vm2, %v9401_v57  ;;  %862 = vst.msk [vmem:[#allocation2 + $0x1a0] sm:$0xff] %vm852_vm2, %v9401_v57  ;;  %v212_v10 = vmul.f32 %v8206_v60, %v9446_v2  ;;  %v379_v14 = vpack.c.bf16 %v337_v0, %v336_v63  ;;  %v9279_v23 = vld [vmem:[%s14390_s5] sm:$0xff]  }
  0x39   :  { %864 = vst.msk [vmem:[#allocation2 + $0x348] sm:$0xff] %vm852_vm2, %v9401_v57  ;;  %865 = vst.msk [vmem:[#allocation2 + $0x350] sm:$0xff] %vm852_vm2, %v9401_v57  ;;  %v281_v16 = vadd.f32 %v9457_v8, %v210_v5  ;;  %v282_v17 = vadd.f32 %v9457_v8, %v211_v6  ;;  %8732 = vmatpush3.bf16.msra.mxu0 %v9277_v13  ;;  %v8209_v30 = vunpack.c.l.bf16 %v8253_v18  ;;  %v8210_v38 = vunpack.c.h.bf16 %v8253_v18  ;;  %v8257_v6 = vld [vmem:[%s14387_s0 + $0xf8] sm:$0xff]  }
  0x3a   :  { %v9659_v49 = vadd.f32 %v9457_v8, %v203_v36  ;;  %v9662_v50 = vmul.f32 %v8197_v37, %v9446_v2  ;;  %869 = vst.msk [vmem:[#allocation2 + $0x18] sm:$0x1] %vm868_vm3, %v9401_v57  ;;  %870 = vst.msk [vmem:[#allocation2 + $0x30] sm:$0x1] %vm868_vm3, %v9401_v57  ;;  %v283_v20 = vadd.f32 %v9457_v8, %v212_v10  ;;  %8733 = vmatprep.subr.bf16.mxu0 %v9279_v23  ;;  %vm7529_vm7 = vcmask 60416  }
  0x3b   :  { %871 = vst.msk [vmem:[#allocation2 + $0x48] sm:$0x1] %vm868_vm3, %v9401_v57  ;;  %872 = vst.msk [vmem:[#allocation2 + $0x60] sm:$0x1] %vm868_vm3, %v9401_v57  ;;  %v345_v25 = vmax.f32 %v281_v16, 0.0  ;;  %v381_v36 = vpack.c.bf16 %v341_v7, %v340_v4  ;;  %8666 = vmatpush3.bf16.msra.mxu1 %v9280_v31  ;;  %v213_v45 = vmul.f32 %v8209_v30, %v9446_v2 }
  0x3c   :  { %873 = vst.msk [vmem:[#allocation2 + $0x78] sm:$0x1] %vm868_vm3, %v9401_v57  ;;  %874 = vst.msk [vmem:[#allocation2 + $0x90] sm:$0x1] %vm868_vm3, %v9401_v57  ;;  %v278_v61 = vadd.f32 %v9457_v8, %v9662_v50  ;;  %v338_v1 = vmax.f32 %v9659_v49, 0.0  ;;  %v347_v29 = vmax.f32 %v283_v20, 0.0 }
  0x3d   :  { %875 = vst.msk [vmem:[#allocation2 + $0xa8] sm:$0x1] %vm868_vm3, %v9401_v57  ;;  %876 = vst.msk [vmem:[#allocation2 + $0xc0] sm:$0x1] %vm868_vm3, %v9401_v57  ;;  %8734 = vmatpush3.bf16.msra.mxu0 %v9279_v23  ;;  %v8256_v49 = vld [vmem:[%s14387_s0 + $0xf0] sm:$0xff]   ;;  %v284_v50 = vadd.f32 %v9457_v8, %v213_v45 }
  0x3e   :  { %8624 = vmatmul.mubr.msk.bf16.gmra.mxu0 %vm398_vm1, %v371_v40  ;;  %v334_v40 = vmax.f32 %v270_v28, 0.0  ;;  %877 = vst.msk [vmem:[#allocation2 + $0xd8] sm:$0x1] %vm868_vm3, %v9401_v57  ;;  %878 = vst.msk [vmem:[#allocation2 + $0xf0] sm:$0x1] %vm868_vm3, %v9401_v57  ;;  %v342_v11 = vmax.f32 %v278_v61, 0.0  ;;  %v8222_v60 = vunpack.c.h.bf16 %v8256_v49 }
  0x3f   :  { %8627 = vmatprep.mubr.msk.bf16.mxu0 %vm398_vm1, %v372_v46  ;;  %v8198_v46 = vunpack.c.h.bf16 %v9624_v26  ;;  %879 = vst.msk [vmem:[#allocation2 + $0x108] sm:$0x1] %vm868_vm3, %v9401_v57  ;;  %880 = vst.msk [vmem:[#allocation2 + $0x120] sm:$0x1] %vm868_vm3, %v9401_v57  ;;  %v346_v26 = vmax.f32 %v282_v17, 0.0  ;;  %v9874_v28 = vld [vmem:[#allocation2 + $0x8] sm:$0xff] }
  0x40   :  { %v9668_v53 = vpack.c.bf16 %v335_v41, %v334_v40  ;;  %881 = vst.msk [vmem:[#allocation2 + $0x138] sm:$0x1] %vm868_vm3, %v9401_v57  ;;  %882 = vst.msk [vmem:[#allocation2 + $0x150] sm:$0x1] %vm868_vm3, %v9401_v57  ;;  %v1227_v34 = vrot.slane %v9874_v28, 1  ;;  %v220_v5 = vmul.f32 %v8222_v60, %v9446_v2  ;;  %v9947_v45 = vld [vmem:[#allocation2 + $0x1b8] sm:$0xff] }
  0x41   :  { %883 = vst.msk [vmem:[#allocation2 + $0x168] sm:$0x1] %vm868_vm3, %v9401_v57  ;;  %884 = vst.msk [vmem:[#allocation2 + $0x180] sm:$0x1] %vm868_vm3, %v9401_v57  ;;  %v208_v59 = vmul.f32 %v8198_v46, %v9446_v2  ;;  %v214_v46 = vmul.f32 %v8210_v38, %v9446_v2  ;;  %v384_v54 = vpack.c.bf16 %v347_v29, %v346_v26  ;;  %v9937_v31 = vld [vmem:[%s14391_s4] ss:$0 sm:$0xff] }
  0x42   :  { %885 = vst.msk [vmem:[#allocation2 + $0x1c8] sm:$0x1] %vm868_vm3, %v9401_v57  ;;  %886 = vst.msk [vmem:[#allocation2 + $0x1e0] sm:$0x1] %vm868_vm3, %v9401_v57 }
  0x43   :  { %887 = vst.msk [vmem:[#allocation2 + $0x1f8] sm:$0x1] %vm868_vm3, %v9401_v57  ;;  %888 = vst.msk [vmem:[#allocation2 + $0x210] sm:$0x1] %vm868_vm3, %v9401_v57  ;;  %v279_v9 = vadd.f32 %v9457_v8, %v208_v59  ;;  %v285_v55 = vadd.f32 %v9457_v8, %v214_v46  ;;  %v8221_v59 = vunpack.c.l.bf16 %v8256_v49 }
  0x44   :  { %889 = vst.msk [vmem:[#allocation2 + $0x228] sm:$0x1] %vm868_vm3, %v9401_v57  ;;  %890 = vst.msk [vmem:[#allocation2 + $0x240] sm:$0x1] %vm868_vm3, %v9401_v57 }
  0x45   :  { %891 = vst.msk [vmem:[#allocation2 + $0x258] sm:$0x1] %vm868_vm3, %v9401_v57  ;;  %892 = vst.msk [vmem:[#allocation2 + $0x270] sm:$0x1] %vm868_vm3, %v9401_v57  ;;  %v343_v19 = vmax.f32 %v279_v9, 0.0  ;;  %v349_v63 = vmax.f32 %v285_v55, 0.0  ;;  %v219_v4 = vmul.f32 %v8221_v59, %v9446_v2 }
  0x46   :  { %8628 = vmatmul.mubr.msk.bf16.gmra.mxu0 %vm398_vm1, %v373_v62  ;;  %893 = vst.msk [vmem:[#allocation2 + $0x288] sm:$0x1] %vm868_vm3, %v9401_v57  ;;  %894 = vst.msk [vmem:[#allocation2 + $0x2a0] sm:$0x1] %vm868_vm3, %v9401_v57  ;;  %v209_v62 = vmul.f32 %v8201_v51, %v9446_v2  ;;  %v9283_v59 = vld [vmem:[%s14390_s5 + $0x38] sm:$0xff]  }
  0x47   :  { %8631 = vmatprep.mubr.msk.bf16.mxu0 %vm398_vm1, %v374_v3  ;;  %895 = vst.msk [vmem:[#allocation2 + $0x2b8] sm:$0x1] %vm868_vm3, %v9401_v57  ;;  %896 = vst.msk [vmem:[#allocation2 + $0x2d0] sm:$0x1] %vm868_vm3, %v9401_v57  ;;  %v339_v3 = vmax.f32 %v9666_v52, 0.0  ;;  %v382_v37 = vpack.c.bf16 %v343_v19, %v342_v11  ;;  %v9903_v52 = vld [vmem:[%s14390_s5 + $0x28] sm:$0xff]   ;;  %v8225_v11 = vunpack.c.l.bf16 %v8257_v6  ;;  %8867 = vmatprep.subr.bf16.mxu0 %v9283_v59 }
  0x48   :  { %897 = vst.msk [vmem:[#allocation2 + $0x2e8] sm:$0x1] %vm868_vm3, %v9401_v57  ;;  %898 = vst.msk [vmem:[#allocation2 + $0x300] sm:$0x1] %vm868_vm3, %v9401_v57  ;;  %v280_v12 = vadd.f32 %v9457_v8, %v209_v62  ;;  %8799 = vmatprep.subr.bf16.mxu1 %v9903_v52  ;;  %v348_v62 = vmax.f32 %v284_v50, 0.0 }
  0x49   :  { %899 = vst.msk [vmem:[#allocation2 + $0x318] sm:$0x1] %vm868_vm3, %v9401_v57  ;;  %900 = vst.msk [vmem:[#allocation2 + $0x330] sm:$0x1] %vm868_vm3, %v9401_v57  ;;  %v380_v15 = vpack.c.bf16 %v339_v3, %v338_v1  ;;  %v221_v18 = vmul.f32 %v8225_v11, %v9446_v2 }
  0x4a   :  { %901 = vst.msk [vmem:[#allocation2 + $0x29] sm:$0x1] %vm868_vm3, %v9401_v57  ;;  %902 = vst.msk [vmem:[#allocation2 + $0x41] sm:$0x1] %vm868_vm3, %v9401_v57  ;;  %v344_v22 = vmax.f32 %v280_v12, 0.0  ;;  %v385_v9 = vpack.c.bf16 %v349_v63, %v348_v62  ;;  %v8226_v12 = vunpack.c.h.bf16 %v8257_v6 }
  0x4b   :  { %903 = vst.msk [vmem:[#allocation2 + $0x59] sm:$0x1] %vm868_vm3, %v9401_v57  ;;  %904 = vst.msk [vmem:[#allocation2 + $0x71] sm:$0x1] %vm868_vm3, %v9401_v57  ;;  %v292_v23 = vadd.f32 %v9457_v8, %v221_v18 }
  0x4c   :  { %905 = vst.msk [vmem:[#allocation2 + $0x89] sm:$0x1] %vm868_vm3, %v9401_v57  ;;  %906 = vst.msk [vmem:[#allocation2 + $0xa1] sm:$0x1] %vm868_vm3, %v9401_v57  ;;  %v222_v19 = vmul.f32 %v8226_v12, %v9446_v2 }
  0x4d   :  { %907 = vst.msk [vmem:[#allocation2 + $0xb9] sm:$0x1] %vm868_vm3, %v9401_v57  ;;  %908 = vst.msk [vmem:[#allocation2 + $0xd1] sm:$0x1] %vm868_vm3, %v9401_v57  ;;  %v356_v26 = vmax.f32 %v292_v23, 0.0 }
  0x4e   :  { %8632 = vmatmul.mubr.msk.bf16.gmra.mxu0 %vm398_vm1, %v375_v24  ;;  %909 = vst.msk [vmem:[#allocation2 + $0xe9] sm:$0x1] %vm868_vm3, %v9401_v57  ;;  %910 = vst.msk [vmem:[#allocation2 + $0x101] sm:$0x1] %vm868_vm3, %v9401_v57  ;;  %v8254_v24 = vld [vmem:[%s14387_s0 + $0xe0] sm:$0xff]  }
  0x4f   :  { %8635 = vmatprep.mubr.msk.bf16.mxu0 %vm398_vm1, %v376_v27  ;;  %911 = vst.msk [vmem:[#allocation2 + $0x119] sm:$0x1] %vm868_vm3, %v9401_v57  ;;  %912 = vst.msk [vmem:[#allocation2 + $0x131] sm:$0x1] %vm868_vm3, %v9401_v57  ;;  %v9872_v27 = vld [vmem:[#allocation2] sm:$0xff]  ;;  %v8213_v39 = vunpack.c.l.bf16 %v8254_v24  ;;  %v8214_v40 = vunpack.c.h.bf16 %v8254_v24  ;;  %v293_v24 = vadd.f32 %v9457_v8, %v222_v19 }
  0x50   :  { %913 = vst.msk [vmem:[#allocation2 + $0x149] sm:$0x1] %vm868_vm3, %v9401_v57  ;;  %914 = vst.msk [vmem:[#allocation2 + $0x161] sm:$0x1] %vm868_vm3, %v9401_v57  ;;  %v1226_v33 = vrot.slane %v9872_v27, 1 }
  0x51   :  { %915 = vst.msk [vmem:[#allocation2 + $0x179] sm:$0x1] %vm868_vm3, %v9401_v57  ;;  %916 = vst.msk [vmem:[#allocation2 + $0x191] sm:$0x1] %vm868_vm3, %v9401_v57  ;;  %v215_v47 = vmul.f32 %v8213_v39, %v9446_v2  ;;  %v216_v48 = vmul.f32 %v8214_v40, %v9446_v2  ;;  %v357_v29 = vmax.f32 %v293_v24, 0.0 }
  0x52   :  { %917 = vst.msk [vmem:[#allocation2 + $0x1d9] sm:$0x1] %vm868_vm3, %v9401_v57  ;;  %918 = vst.msk [vmem:[#allocation2 + $0x1f1] sm:$0x1] %vm868_vm3, %v9401_v57  ;;  %v1228_v41 = vsel %vm1225_vm5, %v1226_v33, %v1227_v34 }
  0x53   :  { %919 = vst.msk [vmem:[#allocation2 + $0x209] sm:$0x1] %vm868_vm3, %v9401_v57  ;;  %920 = vst.msk [vmem:[#allocation2 + $0x221] sm:$0x1] %vm868_vm3, %v9401_v57  ;;  %v287_v58 = vadd.f32 %v9457_v8, %v216_v48  ;;  %v389_v30 = vpack.c.bf16 %v357_v29, %v356_v26 }
  0x54   :  { %921 = vst.msk [vmem:[#allocation2 + $0x239] sm:$0x1] %vm868_vm3, %v9401_v57  ;;  %922 = vst.msk [vmem:[#allocation2 + $0x251] sm:$0x1] %vm868_vm3, %v9401_v57 }
  0x55   :  { %923 = vst.msk [vmem:[#allocation2 + $0x269] sm:$0x1] %vm868_vm3, %v9401_v57  ;;  %924 = vst.msk [vmem:[#allocation2 + $0x281] sm:$0x1] %vm868_vm3, %v9401_v57  ;;  %v351_v3 = vmax.f32 %v287_v58, 0.0 }
  0x56   :  { %925 = vst.msk [vmem:[#allocation2 + $0x299] sm:$0x1] %vm868_vm3, %v9401_v57  ;;  %926 = vst.msk [vmem:[#allocation2 + $0x2b1] sm:$0x1] %vm868_vm3, %v9401_v57  ;;  %8636 = vmatmul.mubr.msk.bf16.gmra.mxu0 %vm398_vm1, %v9641_v43  ;;  %v8255_v43 = vld [vmem:[%s14387_s0 + $0xe8] sm:$0xff]  }
  0x57   :  { %927 = vst.msk [vmem:[#allocation2 + $0x2c9] sm:$0x1] %vm868_vm3, %v9401_v57  ;;  %928 = vst.msk [vmem:[#allocation2 + $0x2e1] sm:$0x1] %vm868_vm3, %v9401_v57  ;;  %8639 = vmatprep.mubr.msk.bf16.mxu0 %vm398_vm1, %v9668_v53  ;;  %v8217_v51 = vunpack.c.l.bf16 %v8255_v43  ;;  %v383_v53 = vpack.c.bf16 %v345_v25, %v344_v22  ;;  %v8218_v56 = vunpack.c.h.bf16 %v8255_v43  ;;  %v9945_v43 = vld [vmem:[#allocation2 + $0x1b0] sm:$0xff] }
  0x58   :  { %929 = vst.msk [vmem:[#allocation2 + $0x2f9] sm:$0x1] %vm868_vm3, %v9401_v57  ;;  %930 = vst.msk [vmem:[#allocation2 + $0x311] sm:$0x1] %vm868_vm3, %v9401_v57  ;;  %v1306_v50 = vrot.slane %v9945_v43, 1 }
  0x59   :  { %931 = vst.msk [vmem:[#allocation2 + $0x329] sm:$0x1] %vm868_vm3, %v9401_v57  ;;  %932 = vst.msk [vmem:[#allocation2 + $0x341] sm:$0x1] %vm868_vm3, %v9401_v57  ;;  %v217_v61 = vmul.f32 %v8217_v51, %v9446_v2  ;;  %v218_v0 = vmul.f32 %v8218_v56, %v9446_v2  ;;  %v1093_v2 = vpack.c.bf16 %v9874_v28, %v9872_v27 }
  0x5a   :  { %856 = vst.msk [vmem:[#allocation2 + $0x10] sm:$0x3] %vm855_vm4, %v9401_v57  ;;  %863 = vst.msk [vmem:[#allocation2 + $0x1a8] sm:$0x3] %vm855_vm4, %v9401_v57 }
  0x5b   :  { %866 = vst.msk [vmem:[#allocation2 + $0x358] sm:$0x3] %vm855_vm4, %v9401_v57  ;;  %859 = vst.msk [vmem:[#allocation2 + $0x1c0] sm:$0x3] %vm855_vm4, %v9401_v57  ;;  %v286_v57 = vadd.f32 %v9457_v8, %v215_v47  ;;  %v288_v7 = vadd.f32 %v9457_v8, %v217_v61  ;;  %v289_v10 = vadd.f32 %v9457_v8, %v218_v0  ;;  %v2282_v61 = vrot.slane %v9872_v27, 2  ;;  %v9285_v27 = vld [vmem:[%s14390_s5 + $0x48] sm:$0xff]  }
  0x5d   :  { %v350_v1 = vmax.f32 %v286_v57, 0.0  ;;  %v352_v16 = vmax.f32 %v288_v7, 0.0  ;;  %v353_v17 = vmax.f32 %v289_v10, 0.0 }
  0x5e   :  { %8640 = vmatmul.mubr.msk.bf16.gmra.mxu0 %vm398_vm1, %v379_v14  ;;  %v290_v14 = vadd.f32 %v9457_v8, %v219_v4  ;;  %v2283_v4 = vrot.slane %v9874_v28, 2 }
  0x5f   :  { %8643 = vmatprep.mubr.msk.bf16.mxu0 %vm398_vm1, %v380_v15  ;;  %v386_v13 = vpack.c.bf16 %v351_v3, %v350_v1  ;;  %v291_v15 = vadd.f32 %v9457_v8, %v220_v5  ;;  %v387_v22 = vpack.c.bf16 %v353_v17, %v352_v16 }
  0x60   :  { %v354_v20 = vmax.f32 %v290_v14, 0.0 }
  0x61   :  { %v9879_v32 = vld [vmem:[#allocation2 + $0x10] sm:$0x3]  ;;  %v355_v21 = vmax.f32 %v291_v15, 0.0 }
  0x62   :  { %v1229_v35 = vrot.slane %v9879_v32, 1  ;;  %v1047_v46 = vld [vmem:[#allocation2 + $0x1c0] sm:$0x3]  ;;  %v2285_v7 = vrot.slane %v9879_v32, 2 }
  0x63   :  { %v388_v25 = vpack.c.bf16 %v355_v21, %v354_v20  ;;  %v1309_v55 = vrot.slane %v1047_v46, 1 }
  0x64   :  { %v1230_v42 = vsel %vm1225_vm5, %v1227_v34, %v1229_v35 }
  0x65   :  { %v1450_v44 = vpack.c.bf16 %v1230_v42, %v1228_v41 }
  0x66   :  { %8644 = vmatmul.mubr.msk.bf16.gmra.mxu0 %vm398_vm1, %v381_v36 }
  0x67   :  { %8667 = vmatprep.mubr.msk.bf16.mxu1 %vm852_vm2, %v1450_v44  ;;  %8647 = vmatprep.mubr.msk.bf16.mxu0 %vm398_vm1, %v382_v37 }
  0x6e   :  { %8648 = vmatmul.mubr.msk.bf16.gmra.mxu0 %vm398_vm1, %v383_v53 }
  0x6f   :  { %8651 = vmatprep.mubr.msk.bf16.mxu0 %vm398_vm1, %v384_v54  ;;  %v1307_v54 = vrot.slane %v9947_v45, 1 }
  0x71   :  { %v9964_v0 = vsel %vm1225_vm5, %v1306_v50, %v1307_v54  ;;  %v9967_v1 = vsel %vm1225_vm5, %v1307_v54, %v1309_v55 }
  0x76   :  { %8652 = vmatmul.mubr.msk.bf16.gmra.mxu0 %vm398_vm1, %v385_v9 }
  0x77   :  { %8655 = vmatprep.mubr.msk.bf16.mxu0 %vm398_vm1, %v386_v13 }
  0x7e   :  { %8656 = vmatmul.mubr.msk.bf16.gmra.mxu0 %vm398_vm1, %v387_v22 }
  0x7f   :  { %8659 = vmatprep.mubr.msk.bf16.mxu0 %vm398_vm1, %v388_v25  ;;  %v9284_v25 = vld [vmem:[%s14390_s5 + $0x30] sm:$0xff]  }
  0x86   :  { %8660 = vmatmul.mubr.msk.bf16.gmra.mxu0 %vm398_vm1, %v389_v30 }
  0x87   :  { %8735 = vmatprep.mubr.msk.bf16.mxu0 %vm852_vm2, %v1093_v2 }
  0xce   :  { %v8601_v8 = vpop.f32.mrf.mxu0 }
  0xcf   :  { %v542_v33 = vadd.f32 %v8601_v8, %v9937_v31 }
  0xd0   :  { %v533_v34 = vpop.f32.mrf.mxu0 }
  0xd1   :  { %v790_v35 = vmax.f32 %v542_v33, 0.0  ;;  %v534_v36 = vadd.f32 %v9937_v31, %v533_v34 }
  0xd2   :  { %v8602_v37 = vpop.f32.mrf.mxu0 }
  0xd3   :  { %935 = vst.msk [vmem:[#allocation2 + $0x31] sm:$0xff] %vm852_vm2, %v790_v35  ;;  %v788_v38 = vmax.f32 %v534_v36, 0.0  ;;  %v545_v39 = vadd.f32 %v8602_v37, %v9937_v31 }
  0xd4   :  { %v536_v40 = vpop.f32.mrf.mxu0 }
  0xd5   :  { %933 = vst.msk [vmem:[#allocation2 + $0x19] sm:$0xff] %vm852_vm2, %v788_v38  ;;  %v791_v41 = vmax.f32 %v545_v39, 0.0  ;;  %v537_v42 = vadd.f32 %v9937_v31, %v536_v40 }
  0xd6   :  { %v8605_v44 = vpop.f32.mrf.mxu0 }
  0xd7   :  { %936 = vst.msk [vmem:[#allocation2 + $0x39] sm:$0xff] %vm852_vm2, %v791_v41  ;;  %v789_v47 = vmax.f32 %v537_v42, 0.0  ;;  %v558_v48 = vadd.f32 %v8605_v44, %v9937_v31 }
  0xd8   :  { %v549_v49 = vpop.f32.mrf.mxu0 }
  0xd9   :  { %934 = vst.msk [vmem:[#allocation2 + $0x21] sm:$0xff] %vm852_vm2, %v789_v47  ;;  %v794_v51 = vmax.f32 %v558_v48, 0.0  ;;  %v550_v53 = vadd.f32 %v9937_v31, %v549_v49 }
  0xda   :  { %v8606_v56 = vpop.f32.mrf.mxu0  ;;  %v9970_v5 = vld [vmem:[#allocation2 + $0x30] sm:$0xff] }
  0xdb   :  { %939 = vst.msk [vmem:[#allocation2 + $0x61] sm:$0xff] %vm852_vm2, %v794_v51  ;;  %v792_v57 = vmax.f32 %v550_v53, 0.0  ;;  %v561_v58 = vadd.f32 %v8606_v56, %v9937_v31  ;;  %v1236_v24 = vrot.slane %v9970_v5, 1  ;;  %v10005_v33 = vld [vmem:[#allocation2 + $0x30] sm:$0xff]  ;;  %v2292_v40 = vrot.slane %v9970_v5, 2  ;;  %v9282_v51 = vld [vmem:[%s14390_s5 + $0x20] sm:$0xff]  }
  0xdc   :  { %v552_v60 = vpop.f32.mrf.mxu0  ;;  %v9979_v12 = vld [vmem:[#allocation2 + $0x18] sm:$0xff]  ;;  %14685 = vst [vmem:[#allocation3_spill] sm:$0xff] %v10005_v33 }
  0xdd   :  { %937 = vst.msk [vmem:[#allocation2 + $0x49] sm:$0xff] %vm852_vm2, %v792_v57  ;;  %v795_v62 = vmax.f32 %v561_v58, 0.0  ;;  %v553_v63 = vadd.f32 %v9937_v31, %v552_v60  ;;  %v1231_v30 = vrot.slane %v9979_v12, 1  ;;  %v10012_v38 = vld [vmem:[#allocation2 + $0x18] sm:$0xff]  ;;  %v2287_v54 = vrot.slane %v9979_v12, 2 }
  0xde   :  { %v8609_v3 = vpop.f32.mrf.mxu0  ;;  %v9972_v6 = vld [vmem:[#allocation2 + $0x38] sm:$0xff]  ;;  %v9975_v9 = vld [vmem:[#allocation2 + $0x40] sm:$0x3] }
  0xdf   :  { %940 = vst.msk [vmem:[#allocation2 + $0x69] sm:$0xff] %vm852_vm2, %v795_v62  ;;  %v793_v10 = vmax.f32 %v553_v63, 0.0  ;;  %v574_v11 = vadd.f32 %v8609_v3, %v9937_v31  ;;  %v1237_v13 = vrot.slane %v9972_v6, 1  ;;  %v1239_v17 = vrot.slane %v9975_v9, 1 }
  0xe0   :  { %v565_v14 = vpop.f32.mrf.mxu0  ;;  %v9982_v15 = vld [vmem:[#allocation2 + $0x20] sm:$0xff]  ;;  %v9984_v16 = vld [vmem:[#allocation2 + $0x28] sm:$0x3]  ;;  %v1095_v29 = vpack.c.bf16 %v9972_v6, %v9970_v5 }
  0xe1   :  { %938 = vst.msk [vmem:[#allocation2 + $0x51] sm:$0xff] %vm852_vm2, %v793_v10  ;;  %v798_v21 = vmax.f32 %v574_v11, 0.0  ;;  %v566_v22 = vadd.f32 %v9937_v31, %v565_v14  ;;  %v1094_v23 = vpack.c.bf16 %v9982_v15, %v9979_v12  ;;  %v1232_v2 = vrot.slane %v9982_v15, 1 }
  0xe2   :  { %v8610_v26 = vpop.f32.mrf.mxu0  ;;  %v1234_v8 = vrot.slane %v9984_v16, 1  ;;  %v1238_v36 = vsel %vm1225_vm5, %v1236_v24, %v1237_v13  ;;  %v1240_v37 = vsel %vm1225_vm5, %v1237_v13, %v1239_v17  ;;  %v10023_v50 = vld [vmem:[#allocation2 + $0x60] sm:$0xff] }
  0xe3   :  { %943 = vst.msk [vmem:[#allocation2 + $0x91] sm:$0xff] %vm852_vm2, %v798_v21  ;;  %v796_v34 = vmax.f32 %v566_v22, 0.0  ;;  %v577_v35 = vadd.f32 %v8610_v26, %v9937_v31  ;;  %8736 = vmatmul.mubr.msk.bf16.vlgmr.msra.gmra.mxu0 %vm852_vm2, %v1094_v23  ;;  %v1233_v41 = vsel %vm1225_vm5, %v1231_v30, %v1232_v2  ;;  %v1452_v56 = vpack.c.bf16 %v1240_v37, %v1238_v36  ;;  %v10062_v30 = vld [vmem:[#allocation2 + $0x38] sm:$0xff] }
  0xe4   :  { %v568_v39 = vpop.f32.mrf.mxu0  ;;  %8739 = vmatprep.mubr.msk.bf16.mxu0 %vm852_vm2, %v1095_v29  ;;  %v1235_v42 = vsel %vm1225_vm5, %v1232_v2, %v1234_v8  ;;  %8868 = vmatpush3.bf16.msra.mxu0 %v9283_v59  ;;  %v10021_v49 = vld [vmem:[#allocation2 + $0x48] sm:$0xff]  ;;  %v1246_v17 = vrot.slane %v10023_v50, 1  ;;  %v10055_v23 = vsel %vm2281_vm6, %v2282_v61, %v2283_v4  ;;  %14686 = vst [vmem:[#allocation4_spill] sm:$0xff] %v10062_v30  ;;  %v2293_v61 = vrot.slane %v9972_v6, 2 }
  0xe5   :  { %941 = vst.msk [vmem:[#allocation2 + $0x79] sm:$0xff] %vm852_vm2, %v796_v34  ;;  %v799_v46 = vmax.f32 %v577_v35, 0.0  ;;  %v569_v47 = vadd.f32 %v9937_v31, %v568_v39  ;;  %v1451_v48 = vpack.c.bf16 %v1235_v42, %v1233_v41  ;;  %8869 = vmatprep.subr.bf16.mxu0 %v9284_v25  ;;  %v1241_v14 = vrot.slane %v10021_v49, 1  ;;  %v10077_v41 = vld [vmem:[#allocation2 + $0x20] sm:$0xff] }
  0xe6   :  { %v8613_v55 = vpop.f32.mrf.mxu0  ;;  %v10030_v57 = vld [vmem:[#allocation2 + $0x68] sm:$0xff]  ;;  %v10032_v58 = vld [vmem:[#allocation2 + $0x70] sm:$0x3]  ;;  %v2288_v42 = vrot.slane %v9982_v15, 2 }
  0xe7   :  { %944 = vst.msk [vmem:[#allocation2 + $0x99] sm:$0xff] %vm852_vm2, %v799_v46  ;;  %v797_v62 = vmax.f32 %v569_v47, 0.0  ;;  %v590_v63 = vadd.f32 %v8613_v55, %v9937_v31  ;;  %8668 = vmatmul.mubr.msk.bf16.vlgmr.msra.gmra.mxu1 %vm852_vm2, %v1451_v48  ;;  %v1247_v3 = vrot.slane %v10030_v57, 1  ;;  %v1249_v22 = vrot.slane %v10032_v58, 1 }
  0xe8   :  { %8800 = vmatpush3.bf16.msra.mxu1 %v9903_v52  ;;  %8671 = vmatprep.mubr.msk.bf16.mxu1 %vm852_vm2, %v1452_v56  ;;  %v581_v11 = vpop.f32.mrf.mxu0  ;;  %v10043_v13 = vld [vmem:[#allocation2 + $0x50] sm:$0xff]  ;;  %v10047_v21 = vld [vmem:[#allocation2 + $0x58] sm:$0x3]  ;;  %v1097_v8 = vpack.c.bf16 %v10030_v57, %v10023_v50  ;;  %v2290_v46 = vrot.slane %v9984_v16, 2 }
  0xe9   :  { %942 = vst.msk [vmem:[#allocation2 + $0x81] sm:$0xff] %vm852_vm2, %v797_v62  ;;  %v802_v52 = vmax.f32 %v590_v63, 0.0  ;;  %v582_v24 = vadd.f32 %v9937_v31, %v581_v11  ;;  %v1096_v26 = vpack.c.bf16 %v10043_v13, %v10021_v49  ;;  %v1242_v29 = vrot.slane %v10043_v13, 1  ;;  %8801 = vmatprep.subr.bf16.mxu1 %v9282_v51  ;;  %8870 = vmatpush3.bf16.msra.mxu0 %v9284_v25 }
  0xea   :  { %v8614_v2 = vpop.f32.mrf.mxu0  ;;  %v1244_v34 = vrot.slane %v10047_v21, 1  ;;  %v1248_v35 = vsel %vm1225_vm5, %v1246_v17, %v1247_v3  ;;  %v1250_v39 = vsel %vm1225_vm5, %v1247_v3, %v1249_v22  ;;  %v2297_v17 = vrot.slane %v10021_v49, 2 }
  0xeb   :  { %947 = vst.msk [vmem:[#allocation2 + $0xc1] sm:$0xff] %vm852_vm2, %v802_v52  ;;  %v800_v36 = vmax.f32 %v582_v24, 0.0  ;;  %v593_v25 = vadd.f32 %v8614_v2, %v9937_v31  ;;  %8740 = vmatmul.mubr.msk.bf16.gmra.mxu0 %vm852_vm2, %v1096_v26  ;;  %v1243_v37 = vsel %vm1225_vm5, %v1241_v14, %v1242_v29  ;;  %v10090_v14 = vld [vmem:[#allocation2 + $0x90] sm:$0xff]  ;;  %v14394_v60 = vrot.slane %v10043_v13, 2 }
  0xec   :  { %v584_v47 = vpop.f32.mrf.mxu0  ;;  %8743 = vmatprep.mubr.msk.bf16.mxu0 %vm852_vm2, %v1097_v8  ;;  %v1245_v48 = vsel %vm1225_vm5, %v1242_v29, %v1244_v34  ;;  %8802 = vmatpush3.bf16.msra.mxu1 %v9282_v51  ;;  %v10088_v11 = vld [vmem:[#allocation2 + $0x78] sm:$0xff]  ;;  %v1454_v51 = vpack.c.bf16 %v1250_v39, %v1248_v35 }
  0xed   :  { %945 = vst.msk [vmem:[#allocation2 + $0xa9] sm:$0xff] %vm852_vm2, %v800_v36  ;;  %v803_v56 = vmax.f32 %v593_v25, 0.0  ;;  %v585_v62 = vadd.f32 %v9937_v31, %v584_v47  ;;  %v1453_v3 = vpack.c.bf16 %v1245_v48, %v1243_v37  ;;  %8935 = vmatprep.subr.bf16.mxu1 %v9285_v27  ;;  %v1251_v25 = vrot.slane %v10088_v11, 1 }
  0xee   :  { %v8617_v22 = vpop.f32.mrf.mxu0  ;;  %v10093_v52 = vld [vmem:[#allocation2 + $0x98] sm:$0xff]  ;;  %v10095_v24 = vld [vmem:[#allocation2 + $0xa0] sm:$0x3]  ;;  %v1256_v37 = vrot.slane %v10090_v14, 1  ;;  %v10118_v48 = vsel %vm2281_vm6, %v2283_v4, %v2285_v7 }
  0xef   :  { %948 = vst.msk [vmem:[#allocation2 + $0xc9] sm:$0xff] %vm852_vm2, %v803_v56  ;;  %v801_v2 = vmax.f32 %v585_v62, 0.0  ;;  %v606_v8 = vadd.f32 %v8617_v22, %v9937_v31  ;;  %8672 = vmatmul.mubr.msk.bf16.gmra.mxu1 %vm852_vm2, %v1453_v3  ;;  %v1257_v27 = vrot.slane %v10093_v52, 1  ;;  %v1259_v47 = vrot.slane %v10095_v24, 1 }
  0xf0   :  { %8675 = vmatprep.mubr.msk.bf16.mxu1 %vm852_vm2, %v1454_v51  ;;  %v597_v35 = vpop.f32.mrf.mxu0  ;;  %v10106_v36 = vld [vmem:[#allocation2 + $0x80] sm:$0xff]  ;;  %v10110_v39 = vld [vmem:[#allocation2 + $0x88] sm:$0x3]  ;;  %v1099_v32 = vpack.c.bf16 %v10093_v52, %v10090_v14 }
  0xf1   :  { %946 = vst.msk [vmem:[#allocation2 + $0xb1] sm:$0xff] %vm852_vm2, %v801_v2  ;;  %v806_v56 = vmax.f32 %v606_v8, 0.0  ;;  %v598_v62 = vadd.f32 %v9937_v31, %v597_v35  ;;  %v1098_v3 = vpack.c.bf16 %v10106_v36, %v10088_v11  ;;  %v1252_v22 = vrot.slane %v10106_v36, 1  ;;  %v10377_v33 = vld [vmem:[#allocation2 + $0x80] sm:$0xff] }
  0xf2   :  { %v8618_v53 = vpop.f32.mrf.mxu0  ;;  %v1254_v28 = vrot.slane %v10110_v39, 1  ;;  %v1258_v4 = vsel %vm1225_vm5, %v1256_v37, %v1257_v27  ;;  %v1260_v35 = vsel %vm1225_vm5, %v1257_v27, %v1259_v47  ;;  %v10139_v10 = vld [vmem:[#allocation2 + $0xc0] sm:$0xff]  ;;  %14702 = vst [vmem:[#allocation17_spill] sm:$0xff] %v10377_v33 }
  0xf3   :  { %951 = vst.msk [vmem:[#allocation2 + $0xf1] sm:$0xff] %vm852_vm2, %v806_v56  ;;  %v804_v7 = vmax.f32 %v598_v62, 0.0  ;;  %v609_v2 = vadd.f32 %v8618_v53, %v9937_v31  ;;  %8744 = vmatmul.mubr.msk.bf16.gmra.mxu0 %vm852_vm2, %v1098_v3  ;;  %v1253_v8 = vsel %vm1225_vm5, %v1251_v25, %v1252_v22 }
  0xf4   :  { %v600_v59 = vpop.f32.mrf.mxu0  ;;  %8747 = vmatprep.mubr.msk.bf16.mxu0 %vm852_vm2, %v1099_v32  ;;  %v1255_v37 = vsel %vm1225_vm5, %v1252_v22, %v1254_v28  ;;  %v10144_v27 = vld [vmem:[#allocation2 + $0xa8] sm:$0xff]  ;;  %v1456_v32 = vpack.c.bf16 %v1260_v35, %v1258_v4  ;;  %v10165_v28 = vsel %vm2281_vm6, %v2288_v42, %v2290_v46  ;;  %v10186_v35 = vsel %vm2281_vm6, %v2292_v40, %v2293_v61 }
  0xf5   :  { %949 = vst.msk [vmem:[#allocation2 + $0xd9] sm:$0xff] %vm852_vm2, %v804_v7  ;;  %v807_v53 = vmax.f32 %v609_v2, 0.0  ;;  %v601_v25 = vadd.f32 %v9937_v31, %v600_v59  ;;  %v1455_v62 = vpack.c.bf16 %v1255_v37, %v1253_v8  ;;  %v10158_v59 = vsel %vm2281_vm6, %v2287_v54, %v2288_v42  ;;  %14688 = vst [vmem:[#allocation6_spill] sm:$0xff] %v10165_v28 }
  0xf6   :  { %v8621_v3 = vpop.f32.mrf.mxu0  ;;  %v10147_v34 = vld [vmem:[#allocation2 + $0xc8] sm:$0xff]  ;;  %v10149_v19 = vld [vmem:[#allocation2 + $0xd0] sm:$0x3]  ;;  %14687 = vst [vmem:[#allocation5_spill] sm:$0xff] %v10158_v59  ;;  %v1266_v2 = vrot.slane %v10139_v10, 1  ;;  %v1261_v15 = vrot.slane %v10144_v27, 1 }
  0xf7   :  { %952 = vst.msk [vmem:[#allocation2 + $0xf9] sm:$0xff] %vm852_vm2, %v807_v53  ;;  %v805_v4 = vmax.f32 %v601_v25, 0.0  ;;  %v622_v7 = vadd.f32 %v8621_v3, %v9937_v31  ;;  %8676 = vmatmul.mubr.msk.bf16.gmra.mxu1 %vm852_vm2, %v1455_v62  ;;  %v1267_v12 = vrot.slane %v10147_v34, 1  ;;  %v1269_v46 = vrot.slane %v10149_v19, 1  ;;  %14689 = vst [vmem:[#allocation7_spill] sm:$0xff] %v10186_v35  ;;  %v10193_v3 = vld [vmem:[#allocation2 + $0x48] sm:$0xff] }
  0xf8   :  { %8679 = vmatprep.mubr.msk.bf16.mxu1 %vm852_vm2, %v1456_v32  ;;  %v613_v54 = vpop.f32.mrf.mxu0  ;;  %v10173_v16 = vld [vmem:[#allocation2 + $0xb0] sm:$0xff]  ;;  %v10176_v42 = vld [vmem:[#allocation2 + $0xb8] sm:$0x3]  ;;  %14690 = vst [vmem:[#allocation8_spill] sm:$0xff] %v10193_v3  ;;  %v1101_v40 = vpack.c.bf16 %v10147_v34, %v10139_v10 }
  0xf9   :  { %950 = vst.msk [vmem:[#allocation2 + $0xe1] sm:$0xff] %vm852_vm2, %v805_v4  ;;  %v810_v37 = vmax.f32 %v622_v7, 0.0  ;;  %v614_v53 = vadd.f32 %v9937_v31, %v613_v54  ;;  %v1100_v25 = vpack.c.bf16 %v10173_v16, %v10144_v27  ;;  %v1262_v62 = vrot.slane %v10173_v16, 1  ;;  %v10195_v32 = vld [vmem:[#allocation2 + $0x50] sm:$0xff] }
  0xfa   :  { %14691 = vst [vmem:[#allocation9_spill] sm:$0xff] %v10195_v32  ;;  %v8622_v5 = vpop.f32.mrf.mxu0  ;;  %v1264_v4 = vrot.slane %v10176_v42, 1  ;;  %v1268_v7 = vsel %vm1225_vm5, %v1266_v2, %v1267_v12  ;;  %v1270_v44 = vsel %vm1225_vm5, %v1267_v12, %v1269_v46  ;;  %v10217_v12 = vld [vmem:[#allocation2 + $0xf0] sm:$0xff] }
  0xfb   :  { %955 = vst.msk [vmem:[#allocation2 + $0x121] sm:$0xff] %vm852_vm2, %v810_v37  ;;  %v808_v54 = vmax.f32 %v614_v53, 0.0  ;;  %v625_v47 = vadd.f32 %v8622_v5, %v9937_v31  ;;  %8748 = vmatmul.mubr.msk.bf16.gmra.mxu0 %vm852_vm2, %v1100_v25  ;;  %v1263_v8 = vsel %vm1225_vm5, %v1261_v15, %v1262_v62  ;;  %v2295_v37 = vrot.slane %v9975_v9, 2  ;;  %v10258_v9 = vld [vmem:[#allocation2 + $0x68] sm:$0xff] }
  0xfc   :  { %v616_v55 = vpop.f32.mrf.mxu0  ;;  %8751 = vmatprep.mubr.msk.bf16.mxu0 %vm852_vm2, %v1101_v40  ;;  %v1265_v22 = vsel %vm1225_vm5, %v1262_v62, %v1264_v4  ;;  %v10215_v5 = vld [vmem:[#allocation2 + $0xd8] sm:$0xff]  ;;  %v1458_v4 = vpack.c.bf16 %v1270_v44, %v1268_v7  ;;  %14693 = vst [vmem:[#allocation11_spill] sm:$0xff] %v10258_v9 }
  0xfd   :  { %953 = vst.msk [vmem:[#allocation2 + $0x109] sm:$0xff] %vm852_vm2, %v808_v54  ;;  %v811_v53 = vmax.f32 %v625_v47, 0.0  ;;  %v617_v25 = vadd.f32 %v9937_v31, %v616_v55  ;;  %v1457_v15 = vpack.c.bf16 %v1265_v22, %v1263_v8  ;;  %v10227_v55 = vsel %vm2281_vm6, %v2293_v61, %v2295_v37 }
  0xfe   :  { %v8625_v40 = vpop.f32.mrf.mxu0  ;;  %v10221_v26 = vld [vmem:[#allocation2 + $0xf8] sm:$0xff]  ;;  %v1029_v2 = vld [vmem:[#allocation2 + $0x100] sm:$0x3]  ;;  %14692 = vst [vmem:[#allocation10_spill] sm:$0xff] %v10227_v55  ;;  %v1271_v6 = vrot.slane %v10215_v5, 1  ;;  %v1276_v61 = vrot.slane %v10217_v12, 1 }
  0xff   :  { %956 = vst.msk [vmem:[#allocation2 + $0x129] sm:$0xff] %vm852_vm2, %v811_v53  ;;  %v809_v22 = vmax.f32 %v617_v25, 0.0  ;;  %v638_v8 = vadd.f32 %v8625_v40, %v9937_v31  ;;  %8680 = vmatmul.mubr.msk.bf16.gmra.mxu1 %vm852_vm2, %v1457_v15  ;;  %v1277_v44 = vrot.slane %v10221_v26, 1  ;;  %v1279_v46 = vrot.slane %v1029_v2, 1 }
 0x100   :  { %8683 = vmatprep.mubr.msk.bf16.mxu1 %vm852_vm2, %v1458_v4  ;;  %v629_v7 = vpop.f32.mrf.mxu0  ;;  %v10235_v54 = vld [vmem:[#allocation2 + $0xe0] sm:$0xff]  ;;  %v10239_v37 = vld [vmem:[#allocation2 + $0xe8] sm:$0x3]  ;;  %v1103_v29 = vpack.c.bf16 %v10221_v26, %v10217_v12 }
 0x101   :  { %954 = vst.msk [vmem:[#allocation2 + $0x111] sm:$0xff] %vm852_vm2, %v809_v22  ;;  %v814_v25 = vmax.f32 %v638_v8, 0.0  ;;  %v630_v15 = vadd.f32 %v9937_v31, %v629_v7  ;;  %v1102_v40 = vpack.c.bf16 %v10235_v54, %v10215_v5  ;;  %v1272_v4 = vrot.slane %v10235_v54, 1 }
 0x102   :  { %v8626_v20 = vpop.f32.mrf.mxu0  ;;  %v1274_v2 = vrot.slane %v10239_v37, 1  ;;  %v1278_v53 = vsel %vm1225_vm5, %v1276_v61, %v1277_v44  ;;  %v1280_v62 = vsel %vm1225_vm5, %v1277_v44, %v1279_v46  ;;  %v10272_v56 = vld [vmem:[#allocation2 + $0x120] sm:$0xff] }
 0x103   :  { %959 = vst.msk [vmem:[#allocation2 + $0x151] sm:$0xff] %vm852_vm2, %v814_v25  ;;  %v812_v22 = vmax.f32 %v630_v15, 0.0  ;;  %v641_v8 = vadd.f32 %v8626_v20, %v9937_v31  ;;  %8752 = vmatmul.mubr.msk.bf16.gmra.mxu0 %vm852_vm2, %v1102_v40  ;;  %v1273_v7 = vsel %vm1225_vm5, %v1271_v6, %v1272_v4  ;;  %v10265_v20 = vld [vmem:[#allocation2 + $0x60] sm:$0xff]  ;;  %v1460_v25 = vpack.c.bf16 %v1280_v62, %v1278_v53 }
 0x104   :  { %v632_v47 = vpop.f32.mrf.mxu0  ;;  %8755 = vmatprep.mubr.msk.bf16.mxu0 %vm852_vm2, %v1103_v29  ;;  %v1275_v61 = vsel %vm1225_vm5, %v1272_v4, %v1274_v2  ;;  %14694 = vst [vmem:[#allocation12_spill] sm:$0xff] %v10265_v20  ;;  %v10270_v40 = vld [vmem:[#allocation2 + $0x108] sm:$0xff]  ;;  %v10365_v20 = vld [vmem:[#allocation2 + $0x78] sm:$0xff] }
 0x105   :  { %957 = vst.msk [vmem:[#allocation2 + $0x139] sm:$0xff] %vm852_vm2, %v812_v22  ;;  %v815_v46 = vmax.f32 %v641_v8, 0.0  ;;  %v633_v44 = vadd.f32 %v9937_v31, %v632_v47  ;;  %v1459_v6 = vpack.c.bf16 %v1275_v61, %v1273_v7  ;;  %v1281_v4 = vrot.slane %v10270_v40, 1  ;;  %14701 = vst [vmem:[#allocation16_spill] sm:$0xff] %v10365_v20 }
 0x106   :  { %v8629_v2 = vpop.f32.mrf.mxu0  ;;  %v10276_v18 = vld [vmem:[#allocation2 + $0x128] sm:$0xff]  ;;  %v10278_v63 = vld [vmem:[#allocation2 + $0x130] sm:$0x3]  ;;  %v1286_v22 = vrot.slane %v10272_v56, 1 }
 0x107   :  { %960 = vst.msk [vmem:[#allocation2 + $0x159] sm:$0xff] %vm852_vm2, %v815_v46  ;;  %v813_v47 = vmax.f32 %v633_v44, 0.0  ;;  %v654_v8 = vadd.f32 %v8629_v2, %v9937_v31  ;;  %8684 = vmatmul.mubr.msk.bf16.gmra.mxu1 %vm852_vm2, %v1459_v6  ;;  %v1287_v7 = vrot.slane %v10276_v18, 1  ;;  %v1289_v46 = vrot.slane %v10278_v63, 1 }
 0x108   :  { %8687 = vmatprep.mubr.msk.bf16.mxu1 %vm852_vm2, %v1460_v25  ;;  %v645_v62 = vpop.f32.mrf.mxu0  ;;  %v10288_v53 = vld [vmem:[#allocation2 + $0x110] sm:$0xff]  ;;  %v10292_v29 = vld [vmem:[#allocation2 + $0x118] sm:$0x3]  ;;  %v10300_v44 = vsel %vm2281_vm6, %v2297_v17, %v14394_v60  ;;  %v1105_v35 = vpack.c.bf16 %v10276_v18, %v10272_v56 }
 0x109   :  { %14695 = vst [vmem:[#allocation13_spill] sm:$0xff] %v10300_v44  ;;  %958 = vst.msk [vmem:[#allocation2 + $0x141] sm:$0xff] %vm852_vm2, %v813_v47  ;;  %v818_v25 = vmax.f32 %v654_v8, 0.0  ;;  %v646_v6 = vadd.f32 %v9937_v31, %v645_v62  ;;  %v1104_v2 = vpack.c.bf16 %v10288_v53, %v10270_v40  ;;  %v1282_v61 = vrot.slane %v10288_v53, 1 }
 0x10a   :  { %v8630_v51 = vpop.f32.mrf.mxu0  ;;  %v1284_v49 = vrot.slane %v10292_v29, 1  ;;  %v1288_v17 = vsel %vm1225_vm5, %v1286_v22, %v1287_v7  ;;  %v1290_v60 = vsel %vm1225_vm5, %v1287_v7, %v1289_v46  ;;  %v10321_v28 = vld [vmem:[#allocation2 + $0x150] sm:$0xff] }
 0x10b   :  { %963 = vst.msk [vmem:[#allocation2 + $0x181] sm:$0xff] %vm852_vm2, %v818_v25  ;;  %v816_v47 = vmax.f32 %v646_v6, 0.0  ;;  %v657_v8 = vadd.f32 %v8630_v51, %v9937_v31  ;;  %8756 = vmatmul.mubr.msk.bf16.gmra.mxu0 %vm852_vm2, %v1104_v2  ;;  %v1283_v62 = vsel %vm1225_vm5, %v1281_v4, %v1282_v61  ;;  %v1462_v59 = vpack.c.bf16 %v1290_v60, %v1288_v17 }
 0x10c   :  { %v648_v55 = vpop.f32.mrf.mxu0  ;;  %8759 = vmatprep.mubr.msk.bf16.mxu0 %vm852_vm2, %v1105_v35  ;;  %v1285_v22 = vsel %vm1225_vm5, %v1282_v61, %v1284_v49  ;;  %v10326_v7 = vld [vmem:[#allocation2 + $0x138] sm:$0xff]  ;;  %v2300_v49 = vrot.slane %v10047_v21, 2  ;;  %v1296_v60 = vrot.slane %v10321_v28, 1 }
 0x10d   :  { %961 = vst.msk [vmem:[#allocation2 + $0x169] sm:$0xff] %vm852_vm2, %v816_v47  ;;  %v819_v51 = vmax.f32 %v657_v8, 0.0  ;;  %v649_v4 = vadd.f32 %v9937_v31, %v648_v55  ;;  %v1461_v6 = vpack.c.bf16 %v1285_v22, %v1283_v62  ;;  %v14696_v47 = vrot.slane %v10030_v57, 2 }
 0x10e   :  { %v8633_v2 = vpop.f32.mrf.mxu0  ;;  %v10330_v15 = vld [vmem:[#allocation2 + $0x158] sm:$0xff]  ;;  %v10332_v61 = vld [vmem:[#allocation2 + $0x160] sm:$0x3]  ;;  %v14697_v8 = vrot.slane %v10023_v50, 2  ;;  %v1291_v50 = vrot.slane %v10326_v7, 1 }
 0x10f   :  { %964 = vst.msk [vmem:[#allocation2 + $0x189] sm:$0xff] %vm852_vm2, %v819_v51  ;;  %v817_v62 = vmax.f32 %v649_v4, 0.0  ;;  %v670_v22 = vadd.f32 %v8633_v2, %v9937_v31  ;;  %8688 = vmatmul.mubr.msk.bf16.gmra.mxu1 %vm852_vm2, %v1461_v6  ;;  %v1297_v17 = vrot.slane %v10330_v15, 1  ;;  %v1299_v51 = vrot.slane %v10332_v61, 1 }
 0x110   :  { %v10340_v55 = vsel %vm2281_vm6, %v14697_v8, %v14696_v47  ;;  %8691 = vmatprep.mubr.msk.bf16.mxu1 %vm852_vm2, %v1462_v59  ;;  %v661_v21 = vpop.f32.mrf.mxu0  ;;  %v10348_v25 = vld [vmem:[#allocation2 + $0x140] sm:$0xff]  ;;  %v10351_v47 = vld [vmem:[#allocation2 + $0x148] sm:$0x3]  ;;  %v14699_v4 = vrot.slane %v10043_v13, 2  ;;  %v2305_v6 = vrot.slane %v10032_v58, 2  ;;  %v1107_v13 = vpack.c.bf16 %v10330_v15, %v10321_v28 }
 0x111   :  { %14698 = vst [vmem:[#allocation14_spill] sm:$0xff] %v10340_v55  ;;  %962 = vst.msk [vmem:[#allocation2 + $0x171] sm:$0xff] %vm852_vm2, %v817_v62  ;;  %v822_v8 = vmax.f32 %v670_v22, 0.0  ;;  %v662_v59 = vadd.f32 %v9937_v31, %v661_v21  ;;  %v1106_v46 = vpack.c.bf16 %v10348_v25, %v10326_v7  ;;  %v1292_v35 = vrot.slane %v10348_v25, 1 }
 0x112   :  { %v10357_v2 = vsel %vm2281_vm6, %v14699_v4, %v2300_v49  ;;  %v8634_v3 = vpop.f32.mrf.mxu0  ;;  %v1294_v49 = vrot.slane %v10351_v47, 1  ;;  %v1298_v58 = vsel %vm1225_vm5, %v1296_v60, %v1297_v17  ;;  %v1300_v32 = vsel %vm1225_vm5, %v1297_v17, %v1299_v51 }
 0x113   :  { %14700 = vst [vmem:[#allocation15_spill] sm:$0xff] %v10357_v2  ;;  %967 = vst.msk [vmem:[#allocation2 + $0x1e1] sm:$0xff] %vm852_vm2, %v822_v8  ;;  %v820_v22 = vmax.f32 %v662_v59, 0.0  ;;  %v673_v21 = vadd.f32 %v8634_v3, %v9937_v31  ;;  %8760 = vmatmul.mubr.msk.bf16.gmra.mxu0 %vm852_vm2, %v1106_v46  ;;  %v1293_v4 = vsel %vm1225_vm5, %v1291_v50, %v1292_v35  ;;  %v14703_v3 = vrot.slane %v10030_v57, 2  ;;  %v10500_v2 = vld [vmem:[#allocation2 + $0xb0] sm:$0xff] }
 0x114   :  { %v664_v30 = vpop.f32.mrf.mxu0  ;;  %8763 = vmatprep.mubr.msk.bf16.mxu0 %vm852_vm2, %v1107_v13  ;;  %v1295_v60 = vsel %vm1225_vm5, %v1292_v35, %v1294_v49  ;;  %v10392_v13 = vld [vmem:[#allocation2 + $0x168] sm:$0xff]  ;;  %v1464_v62 = vpack.c.bf16 %v1300_v32, %v1298_v58  ;;  %14722 = vst [vmem:[#allocation28_spill] sm:$0xff] %v10500_v2 }
 0x115   :  { %v10387_v46 = vsel %vm2281_vm6, %v14703_v3, %v2305_v6  ;;  %965 = vst.msk [vmem:[#allocation2 + $0x1c9] sm:$0xff] %vm852_vm2, %v820_v22  ;;  %v823_v17 = vmax.f32 %v673_v21, 0.0  ;;  %v665_v51 = vadd.f32 %v9937_v31, %v664_v30  ;;  %v1463_v59 = vpack.c.bf16 %v1295_v60, %v1293_v4  ;;  %v10403_v4 = vld [vmem:[#allocation2 + $0x98] sm:$0xff] }
 0x116   :  { %14704 = vst [vmem:[#allocation18_spill] sm:$0xff] %v10387_v46  ;;  %v8637_v49 = vpop.f32.mrf.mxu0  ;;  %14705 = vst [vmem:[#allocation19_spill] sm:$0xff] %v10403_v4  ;;  %v1301_v3 = vrot.slane %v10392_v13, 1  ;;  %v10583_v4 = vld [vmem:[#allocation2 + $0xc0] sm:$0xff] }
 0x117   :  { %968 = vst.msk [vmem:[#allocation2 + $0x1e9] sm:$0xff] %vm852_vm2, %v823_v17  ;;  %v821_v6 = vmax.f32 %v665_v51, 0.0  ;;  %v686_v21 = vadd.f32 %v8637_v49, %v9937_v31  ;;  %8692 = vmatmul.mubr.msk.bf16.gmra.mxu1 %vm852_vm2, %v1463_v59  ;;  %v10423_v51 = vld [vmem:[#allocation2 + $0x90] sm:$0xff]  ;;  %v14707_v59 = vrot.slane %v10106_v36, 2  ;;  %14735 = vst [vmem:[#allocation39_spill] sm:$0xff] %v10583_v4 }
 0x118   :  { %8695 = vmatprep.mubr.msk.bf16.mxu1 %vm852_vm2, %v1464_v62  ;;  %v677_v58 = vpop.f32.mrf.mxu0  ;;  %v10407_v60 = vld [vmem:[#allocation2 + $0x170] sm:$0xff]  ;;  %v10410_v17 = vld [vmem:[#allocation2 + $0x178] sm:$0x3]  ;;  %14706 = vst [vmem:[#allocation20_spill] sm:$0xff] %v10423_v51 }
 0x119   :  { %966 = vst.msk [vmem:[#allocation2 + $0x1d1] sm:$0xff] %vm852_vm2, %v821_v6  ;;  %v826_v49 = vmax.f32 %v686_v21, 0.0  ;;  %v678_v8 = vadd.f32 %v9937_v31, %v677_v58  ;;  %v1108_v62 = vpack.c.bf16 %v10407_v60, %v10392_v13  ;;  %v1302_v30 = vrot.slane %v10407_v60, 1 }
 0x11a   :  { %v8638_v32 = vpop.f32.mrf.mxu0  ;;  %v1304_v50 = vrot.slane %v10410_v17, 1  ;;  %v14708_v6 = vrot.slane %v10088_v11, 2 }
 0x11b   :  { %971 = vst.msk [vmem:[#allocation2 + $0x211] sm:$0xff] %vm852_vm2, %v826_v49  ;;  %v824_v58 = vmax.f32 %v678_v8, 0.0  ;;  %v689_v35 = vadd.f32 %v8638_v32, %v9937_v31  ;;  %8764 = vmatmul.mubr.msk.bf16.gmra.mxu0 %vm852_vm2, %v1108_v62  ;;  %v1303_v22 = vsel %vm1225_vm5, %v1301_v3, %v1302_v30  ;;  %v10444_v8 = vld [vmem:[#allocation2 + $0x1e0] sm:$0xff]  ;;  %v2310_v32 = vrot.slane %v10110_v39, 2 }
 0x11c   :  { %v10430_v21 = vsel %vm2281_vm6, %v14708_v6, %v14707_v59  ;;  %v680_v46 = vpop.f32.mrf.mxu0  ;;  %v1305_v11 = vsel %vm1225_vm5, %v1302_v30, %v1304_v50  ;;  %v14710_v59 = vpack.c.bf16 %v9947_v45, %v9945_v43  ;;  %14711 = vst [vmem:[#allocation22_spill] sm:$0xff] %v10444_v8  ;;  %v14712_v49 = vrot.slane %v10093_v52, 2  ;;  %v10456_v57 = vld [vmem:[#allocation2 + $0x1c8] sm:$0xff] }
 0x11d   :  { %14709 = vst [vmem:[#allocation21_spill] sm:$0xff] %v10430_v21  ;;  %v14713_v3 = vrot.slane %v10090_v14, 2  ;;  %969 = vst.msk [vmem:[#allocation2 + $0x1f9] sm:$0xff] %vm852_vm2, %v824_v58  ;;  %v827_v6 = vmax.f32 %v689_v35, 0.0  ;;  %v681_v50 = vadd.f32 %v9937_v31, %v680_v46  ;;  %v1465_v30 = vpack.c.bf16 %v1305_v11, %v1303_v22 }
 0x11e   :  { %8767 = vmatprep.mubr.msk.bf16.mxu0 %vm852_vm2, %v14710_v59  ;;  %v8641_v55 = vpop.f32.mrf.mxu0  ;;  %v10459_v44 = vld [vmem:[#allocation2 + $0x1e8] sm:$0xff]  ;;  %v10461_v39 = vld [vmem:[#allocation2 + $0x1f0] sm:$0x3]  ;;  %v2315_v46 = vrot.slane %v10095_v24, 2  ;;  %v1316_v11 = vrot.slane %v10444_v8, 1 }
 0x11f   :  { %v10452_v62 = vsel %vm2281_vm6, %v14713_v3, %v14712_v49  ;;  %14715 = vst [vmem:[#allocation24_spill] sm:$0xff] %v10461_v39  ;;  %v14716_v3 = vrot.slane %v10106_v36, 2  ;;  %972 = vst.msk [vmem:[#allocation2 + $0x219] sm:$0xff] %vm852_vm2, %v827_v6  ;;  %v825_v22 = vmax.f32 %v681_v50, 0.0  ;;  %v702_v58 = vadd.f32 %v8641_v55, %v9937_v31  ;;  %8696 = vmatmul.mubr.msk.bf16.gmra.mxu1 %vm852_vm2, %v1465_v30 }
 0x120   :  { %14714 = vst [vmem:[#allocation23_spill] sm:$0xff] %v10452_v62  ;;  %v1317_v59 = vrot.slane %v10459_v44, 1  ;;  %v693_v14 = vpop.f32.mrf.mxu0  ;;  %v10476_v49 = vld [vmem:[#allocation2 + $0x1d0] sm:$0xff]  ;;  %v1311_v36 = vrot.slane %v10456_v57, 1  ;;  %v10483_v24 = vld [vmem:[#allocation2 + $0x1d8] sm:$0x3] }
 0x121   :  { %v10468_v35 = vsel %vm2281_vm6, %v14716_v3, %v2310_v32  ;;  %v14718_v32 = vpack.c.bf16 %v9967_v1, %v9964_v0  ;;  %v1319_v55 = vrot.slane %v10461_v39, 1  ;;  %v14719_v50 = vrot.slane %v10093_v52, 2  ;;  %970 = vst.msk [vmem:[#allocation2 + $0x201] sm:$0xff] %vm852_vm2, %v825_v22 }
 0x122   :  { %14717 = vst [vmem:[#allocation25_spill] sm:$0xff] %v10468_v35  ;;  %v830_v3 = vmax.f32 %v702_v58, 0.0  ;;  %v694_v51 = vadd.f32 %v9937_v31, %v693_v14  ;;  %v1110_v0 = vpack.c.bf16 %v10476_v49, %v10456_v57  ;;  %v1312_v1 = vrot.slane %v10476_v49, 1  ;;  %v8642_v6 = vpop.f32.mrf.mxu0 }
 0x123   :  { %8699 = vmatprep.mubr.msk.bf16.mxu1 %vm852_vm2, %v14718_v32  ;;  %v10491_v30 = vsel %vm2281_vm6, %v14719_v50, %v2315_v46  ;;  %v10498_v32 = vld [vmem:[#allocation2 + $0xa8] sm:$0xff]  ;;  %v1111_v52 = vpack.c.bf16 %v10459_v44, %v10444_v8  ;;  %v1314_v46 = vrot.slane %v10483_v24, 1  ;;  %v1318_v22 = vsel %vm1225_vm5, %v1316_v11, %v1317_v59 }
 0x124   :  { %14720 = vst [vmem:[#allocation26_spill] sm:$0xff] %v10491_v30  ;;  %14721 = vst [vmem:[#allocation27_spill] sm:$0xff] %v10498_v32  ;;  %v828_v14 = vmax.f32 %v694_v51, 0.0  ;;  %v705_v50 = vadd.f32 %v8642_v6, %v9937_v31  ;;  %8768 = vmatmul.mubr.msk.bf16.gmra.mxu0 %vm852_vm2, %v1110_v0  ;;  %v1313_v21 = vsel %vm1225_vm5, %v1311_v36, %v1312_v1  ;;  %v696_v20 = vpop.f32.mrf.mxu0  ;;  %v14728_v51 = vrot.slane %v10173_v16, 2  ;;  %v10567_v30 = vld [vmem:[#allocation2 + $0xc8] sm:$0xff] }
 0x125   :  { %975 = vst.msk [vmem:[#allocation2 + $0x241] sm:$0xff] %vm852_vm2, %v830_v3  ;;  %v1320_v35 = vsel %vm1225_vm5, %v1317_v59, %v1319_v55  ;;  %8771 = vmatprep.mubr.msk.bf16.mxu0 %vm852_vm2, %v1111_v52  ;;  %v1315_v33 = vsel %vm1225_vm5, %v1312_v1, %v1314_v46  ;;  %v697_v36 = vadd.f32 %v9937_v31, %v696_v20  ;;  %v10521_v59 = vld [vmem:[#allocation2 + $0x1f8] sm:$0xff]  ;;  %v10523_v55 = vld [vmem:[#allocation2 + $0x210] sm:$0xff]  ;;  %v10538_v20 = vld [vmem:[%s14391_s4] ss:$0 sm:$0xff] }
 0x126   :  { %973 = vst.msk [vmem:[#allocation2 + $0x229] sm:$0xff] %vm852_vm2, %v828_v14  ;;  %v831_v6 = vmax.f32 %v705_v50, 0.0  ;;  %v1467_v3 = vpack.c.bf16 %v1315_v33, %v1313_v21  ;;  %14723 = vst [vmem:[#allocation29_spill] sm:$0xff] %v10521_v59  ;;  %v8645_v52 = vpop.f32.mrf.mxu0  ;;  %v1468_v46 = vpack.c.bf16 %v1320_v35, %v1318_v22  ;;  %v10527_v58 = vld [vmem:[#allocation2 + $0x218] sm:$0xff]  ;;  %v10529_v11 = vld [vmem:[#allocation2 + $0x220] sm:$0x3] }
 0x127   :  { %14724 = vst [vmem:[#allocation30_spill] sm:$0xff] %v10523_v55  ;;  %14725 = vst [vmem:[#allocation31_spill] sm:$0xff] %v10527_v58  ;;  %v829_v31 = vmax.f32 %v697_v36, 0.0  ;;  %v718_v21 = vadd.f32 %v10538_v20, %v8645_v52  ;;  %v1327_v35 = vrot.slane %v10527_v58, 1  ;;  %v1326_v36 = vrot.slane %v10523_v55, 1 }
 0x128   :  { %14726 = vst [vmem:[#allocation32_spill] sm:$0xff] %v10529_v11  ;;  %976 = vst.msk [vmem:[#allocation2 + $0x249] sm:$0xff] %vm852_vm2, %v831_v6  ;;  %8700 = vmatmul.mubr.msk.bf16.gmra.mxu1 %vm852_vm2, %v1467_v3  ;;  %v709_v22 = vpop.f32.mrf.mxu0  ;;  %v10544_v0 = vld [vmem:[#allocation2 + $0x200] sm:$0xff]  ;;  %v1321_v6 = vrot.slane %v10521_v59, 1  ;;  %v10548_v14 = vld [vmem:[#allocation2 + $0x208] sm:$0x3] }
 0x129   :  { %8703 = vmatprep.mubr.msk.bf16.mxu1 %vm852_vm2, %v1468_v46  ;;  %14727 = vst [vmem:[#allocation33_spill] sm:$0xff] %v10548_v14  ;;  %v1329_v50 = vrot.slane %v10529_v11, 1  ;;  %v14729_v52 = vrot.slane %v10144_v27, 2  ;;  %974 = vst.msk [vmem:[#allocation2 + $0x231] sm:$0xff] %vm852_vm2, %v829_v31  ;;  %v834_v46 = vmax.f32 %v718_v21, 0.0  ;;  %v710_v33 = vadd.f32 %v10538_v20, %v709_v22 }
 0x12a   :  { %v10562_v1 = vpack.c.bf16 %v10544_v0, %v10521_v59  ;;  %v10565_v62 = vrot.slane %v10544_v0, 1  ;;  %14733 = vst [vmem:[#allocation37_spill] sm:$0xff] %v10567_v30  ;;  %v8646_v27 = vpop.f32.mrf.mxu0  ;;  %v1324_v31 = vrot.slane %v10548_v14, 1  ;;  %v1328_v21 = vsel %vm1225_vm5, %v1326_v36, %v1327_v35 }
 0x12b   :  { %v10556_v3 = vsel %vm2281_vm6, %v14729_v52, %v14728_v51  ;;  %v1113_v51 = vpack.c.bf16 %v10527_v58, %v10523_v55  ;;  %979 = vst.msk [vmem:[#allocation2 + $0x271] sm:$0xff] %vm852_vm2, %v834_v46  ;;  %v832_v22 = vmax.f32 %v710_v33, 0.0  ;;  %v721_v52 = vadd.f32 %v10538_v20, %v8646_v27  ;;  %v10620_v55 = vld [vmem:[#allocation2 + $0xd8] sm:$0xff] }
 0x12c   :  { %14730 = vst [vmem:[#allocation34_spill] sm:$0xff] %v10556_v3  ;;  %14731 = vst [vmem:[#allocation35_spill] sm:$0xff] %v10562_v1  ;;  %8772 = vmatmul.mubr.msk.bf16.gmra.mxu0 %vm852_vm2, %v10562_v1  ;;  %v10580_v2 = vsel %vm1225_vm5, %v1321_v6, %v10565_v62  ;;  %v1330_v32 = vsel %vm1225_vm5, %v1327_v35, %v1329_v50  ;;  %v712_v11 = vpop.f32.mrf.mxu0  ;;  %v1325_v33 = vsel %vm1225_vm5, %v10565_v62, %v1324_v31  ;;  %v10598_v36 = vld [vmem:[#allocation2 + $0x240] sm:$0xff] }
 0x12d   :  { %14732 = vst [vmem:[#allocation36_spill] sm:$0xff] %v10565_v62  ;;  %14734 = vst [vmem:[#allocation38_spill] sm:$0xff] %v10580_v2  ;;  %8775 = vmatprep.mubr.msk.bf16.mxu0 %vm852_vm2, %v1113_v51  ;;  %v835_v6 = vmax.f32 %v721_v52, 0.0  ;;  %v713_v50 = vadd.f32 %v10538_v20, %v712_v11  ;;  %v1469_v27 = vpack.c.bf16 %v1325_v33, %v10580_v2  ;;  %v10596_v9 = vld [vmem:[#allocation2 + $0x228] sm:$0xff]  ;;  %v10600_v51 = vld [vmem:[#allocation2 + $0xe0] sm:$0xff]  ;;  %v14739_v52 = vrot.slane %v10147_v34, 2 }
 0x12e   :  { %977 = vst.msk [vmem:[#allocation2 + $0x259] sm:$0xff] %vm852_vm2, %v832_v22  ;;  %14736 = vst [vmem:[#allocation40_spill] sm:$0xff] %v10598_v36  ;;  %v8649_v62 = vpop.f32.mrf.mxu0  ;;  %v1470_v1 = vpack.c.bf16 %v1330_v32, %v1328_v21  ;;  %v14740_v33 = vrot.slane %v10139_v10, 2  ;;  %v10656_v58 = vrot.slane %v10544_v0, 2 }
 0x12f   :  { %14737 = vst [vmem:[#allocation41_spill] sm:$0xff] %v10600_v51  ;;  %v10603_v46 = vld [vmem:[#allocation2 + $0x248] sm:$0xff]  ;;  %v10605_v22 = vld [vmem:[#allocation2 + $0x250] sm:$0x3]  ;;  %980 = vst.msk [vmem:[#allocation2 + $0x279] sm:$0xff] %vm852_vm2, %v835_v6  ;;  %v833_v2 = vmax.f32 %v713_v50, 0.0  ;;  %v734_v31 = vadd.f32 %v10538_v20, %v8649_v62 }
 0x130   :  { %14738 = vst [vmem:[#allocation42_spill] sm:$0xff] %v10605_v22  ;;  %v10613_v35 = vsel %vm2281_vm6, %v14740_v33, %v14739_v52  ;;  %8704 = vmatmul.mubr.msk.bf16.gmra.mxu1 %vm852_vm2, %v1469_v27  ;;  %v1337_v32 = vrot.slane %v10603_v46, 1  ;;  %14742 = vst [vmem:[#allocation44_spill] sm:$0xff] %v10620_v55  ;;  %v725_v11 = vpop.f32.mrf.mxu0  ;;  %v10623_v10 = vld [vmem:[#allocation2 + $0x230] sm:$0xff]  ;;  %v1331_v52 = vrot.slane %v10596_v9, 1  ;;  %v1336_v6 = vrot.slane %v10598_v36, 1 }
 0x131   :  { %14741 = vst [vmem:[#allocation43_spill] sm:$0xff] %v10613_v35  ;;  %8707 = vmatprep.mubr.msk.bf16.mxu1 %vm852_vm2, %v1470_v1  ;;  %v10627_v50 = vld [vmem:[#allocation2 + $0x238] sm:$0x3]  ;;  %v1339_v62 = vrot.slane %v10605_v22, 1  ;;  %978 = vst.msk [vmem:[#allocation2 + $0x261] sm:$0xff] %vm852_vm2, %v833_v2  ;;  %v838_v33 = vmax.f32 %v734_v31, 0.0  ;;  %v726_v21 = vadd.f32 %v10538_v20, %v725_v11  ;;  %v10636_v1 = vpack.c.bf16 %v10623_v10, %v10596_v9 }
 0x132   :  { %14743 = vst [vmem:[#allocation45_spill] sm:$0xff] %v10627_v50  ;;  %v10639_v14 = vrot.slane %v10623_v10, 1  ;;  %v8650_v39 = vpop.f32.mrf.mxu0  ;;  %v1115_v22 = vpack.c.bf16 %v10603_v46, %v10598_v36  ;;  %v1334_v27 = vrot.slane %v10627_v50, 1  ;;  %v1338_v2 = vsel %vm1225_vm5, %v1336_v6, %v1337_v32  ;;  %14747 = vst [vmem:[#allocation49_spill] sm:$0xff] %v10656_v58  ;;  %v10797_v55 = vld [vmem:[#allocation2 + $0xf8] sm:$0xff] }
 0x133   :  { %14744 = vst [vmem:[#allocation46_spill] sm:$0xff] %v10636_v1  ;;  %983 = vst.msk [vmem:[#allocation2 + $0x2a1] sm:$0xff] %vm852_vm2, %v838_v33  ;;  %v836_v31 = vmax.f32 %v726_v21, 0.0  ;;  %v737_v11 = vadd.f32 %v10538_v20, %v8650_v39  ;;  %v1340_v59 = vsel %vm1225_vm5, %v1337_v32, %v1339_v62  ;;  %v10662_v21 = vld [vmem:[#allocation2 + $0x270] sm:$0xff]  ;;  %v2320_v33 = vrot.slane %v10176_v42, 2 }
 0x134   :  { %14745 = vst [vmem:[#allocation47_spill] sm:$0xff] %v10639_v14  ;;  %8776 = vmatmul.mubr.msk.bf16.gmra.mxu0 %vm852_vm2, %v10636_v1  ;;  %v10652_v8 = vsel %vm1225_vm5, %v1331_v52, %v10639_v14  ;;  %v728_v50 = vpop.f32.mrf.mxu0  ;;  %v1335_v39 = vsel %vm1225_vm5, %v10639_v14, %v1334_v27  ;;  %14748 = vst [vmem:[#allocation50_spill] sm:$0xff] %v10662_v21  ;;  %v1472_v36 = vpack.c.bf16 %v1340_v59, %v1338_v2 }
 0x135   :  { %14746 = vst [vmem:[#allocation48_spill] sm:$0xff] %v10652_v8  ;;  %8779 = vmatprep.mubr.msk.bf16.mxu0 %vm852_vm2, %v1115_v22  ;;  %981 = vst.msk [vmem:[#allocation2 + $0x289] sm:$0xff] %vm852_vm2, %v836_v31  ;;  %v839_v52 = vmax.f32 %v737_v11, 0.0  ;;  %v729_v32 = vadd.f32 %v10538_v20, %v728_v50  ;;  %v1471_v0 = vpack.c.bf16 %v1335_v39, %v10652_v8  ;;  %v10668_v62 = vld [vmem:[#allocation2 + $0x258] sm:$0xff]  ;;  %v2325_v31 = vrot.slane %v10149_v19, 2 }
 0x136   :  { %v8653_v1 = vpop.f32.mrf.mxu0  ;;  %v1070_v27 = vld [vmem:[#allocation2 + $0x278] sm:$0xff]  ;;  %v10672_v14 = vld [vmem:[#allocation2 + $0x280] sm:$0x3]  ;;  %v1346_v39 = vrot.slane %v10662_v21, 1  ;;  %v1341_v42 = vrot.slane %v10668_v62, 1  ;;  %14773 = vst [vmem:[#allocation71_spill] sm:$0xff] %v10797_v55 }
 0x137   :  { %14749 = vst [vmem:[#allocation51_spill] sm:$0xff] %v10672_v14  ;;  %984 = vst.msk [vmem:[#allocation2 + $0x2a9] sm:$0xff] %vm852_vm2, %v839_v52  ;;  %v837_v50 = vmax.f32 %v729_v32, 0.0  ;;  %v750_v11 = vadd.f32 %v10538_v20, %v8653_v1  ;;  %v10680_v22 = vrot.slane %v1070_v27, 1  ;;  %v1349_v19 = vrot.slane %v10672_v14, 1  ;;  %v10930_v55 = vld [vmem:[#allocation2 + $0x128] sm:$0xff] }
 0x138   :  { %8708 = vmatmul.mubr.msk.bf16.gmra.mxu1 %vm852_vm2, %v1471_v0  ;;  %v741_v59 = vpop.f32.mrf.mxu0  ;;  %v10683_v2 = vld [vmem:[#allocation2 + $0x260] sm:$0xff]  ;;  %v10686_v6 = vld [vmem:[#allocation2 + $0x268] sm:$0x3]  ;;  %v14751_v52 = vrot.slane %v10173_v16, 2  ;;  %v14753_v32 = vrot.slane %v10147_v34, 2 }
 0x139   :  { %14750 = vst [vmem:[#allocation52_spill] sm:$0xff] %v10680_v22  ;;  %8711 = vmatprep.mubr.msk.bf16.mxu1 %vm852_vm2, %v1472_v36  ;;  %982 = vst.msk [vmem:[#allocation2 + $0x291] sm:$0xff] %vm852_vm2, %v837_v50  ;;  %v842_v36 = vmax.f32 %v750_v11, 0.0  ;;  %v742_v8 = vadd.f32 %v10538_v20, %v741_v59  ;;  %v10703_v4 = vpack.c.bf16 %v10683_v2, %v10668_v62  ;;  %v10706_v30 = vrot.slane %v10683_v2, 1 }
 0x13a   :  { %v10692_v1 = vsel %vm2281_vm6, %v14751_v52, %v2320_v33  ;;  %v10697_v0 = vsel %vm2281_vm6, %v14753_v32, %v2325_v31  ;;  %v8654_v16 = vpop.f32.mrf.mxu0  ;;  %v10709_v33 = vpack.c.bf16 %v1070_v27, %v10662_v21  ;;  %v1344_v34 = vrot.slane %v10686_v6, 1 }
 0x13b   :  { %14752 = vst [vmem:[#allocation53_spill] sm:$0xff] %v10692_v1  ;;  %14754 = vst [vmem:[#allocation54_spill] sm:$0xff] %v10697_v0  ;;  %v10714_v31 = vsel %vm1225_vm5, %v1346_v39, %v10680_v22  ;;  %v840_v11 = vmax.f32 %v742_v8, 0.0  ;;  %v753_v59 = vadd.f32 %v10538_v20, %v8654_v16  ;;  %v10723_v52 = vsel %vm1225_vm5, %v1341_v42, %v10706_v30  ;;  %v10795_v1 = vld [vmem:[#allocation2 + $0xf0] sm:$0xff] }
 0x13c   :  { %14755 = vst [vmem:[#allocation55_spill] sm:$0xff] %v10703_v4  ;;  %14756 = vst [vmem:[#allocation56_spill] sm:$0xff] %v10706_v30  ;;  %8780 = vmatmul.mubr.msk.bf16.gmra.mxu0 %vm852_vm2, %v10703_v4  ;;  %v1350_v32 = vsel %vm1225_vm5, %v10680_v22, %v1349_v19  ;;  %v744_v14 = vpop.f32.mrf.mxu0  ;;  %v1345_v8 = vsel %vm1225_vm5, %v10706_v30, %v1344_v34  ;;  %v10740_v22 = vrot.slane %v10623_v10, 2  ;;  %v10744_v30 = vld [vmem:[#allocation2 + $0x2a0] sm:$0xff]  ;;  %v10753_v10 = vld [vmem:[#allocation2 + $0x288] sm:$0xff]  ;;  %v10800_v51 = vrot.slane %v10683_v2, 2 }
 0x13d   :  { %14757 = vst [vmem:[#allocation57_spill] sm:$0xff] %v10709_v33  ;;  %14758 = vst [vmem:[#allocation58_spill] sm:$0xff] %v10714_v31  ;;  %8783 = vmatprep.mubr.msk.bf16.mxu0 %vm852_vm2, %v10709_v33  ;;  %v843_v42 = vmax.f32 %v753_v59, 0.0  ;;  %v745_v50 = vadd.f32 %v10538_v20, %v744_v14  ;;  %v1473_v19 = vpack.c.bf16 %v1345_v8, %v10723_v52  ;;  %v10759_v33 = vrot.slane %v1070_v27, 2 }
 0x13e   :  { %987 = vst.msk [vmem:[#allocation2 + $0x2d1] sm:$0xff] %vm852_vm2, %v842_v36  ;;  %14759 = vst [vmem:[#allocation59_spill] sm:$0xff] %v10723_v52  ;;  %v8657_v34 = vpop.f32.mrf.mxu0  ;;  %v1474_v36 = vpack.c.bf16 %v1350_v32, %v10714_v31  ;;  %v1076_v16 = vld [vmem:[#allocation2 + $0x2a8] sm:$0xff]  ;;  %v10746_v4 = vld [vmem:[#allocation2 + $0x2b0] sm:$0x3]  ;;  %v1356_v39 = vrot.slane %v10744_v30, 1 }
 0x13f   :  { %985 = vst.msk [vmem:[#allocation2 + $0x2b9] sm:$0xff] %vm852_vm2, %v840_v11  ;;  %14760 = vst [vmem:[#allocation60_spill] sm:$0xff] %v10740_v22  ;;  %v841_v11 = vmax.f32 %v745_v50, 0.0  ;;  %v766_v59 = vadd.f32 %v10538_v20, %v8657_v34  ;;  %v10755_v8 = vrot.slane %v1076_v16, 1  ;;  %v1359_v50 = vrot.slane %v10746_v4, 1 }
 0x140   :  { %14761 = vst [vmem:[#allocation61_spill] sm:$0xff] %v10744_v30  ;;  %14762 = vst [vmem:[#allocation62_spill] sm:$0xff] %v10746_v4  ;;  %8712 = vmatmul.mubr.msk.bf16.gmra.mxu1 %vm852_vm2, %v1473_v19  ;;  %v757_v14 = vpop.f32.mrf.mxu0  ;;  %v1073_v31 = vld [vmem:[#allocation2 + $0x290] sm:$0xff]  ;;  %v14766_v19 = vrot.slane %v10235_v54, 2  ;;  %v14767_v34 = vrot.slane %v10215_v5, 2  ;;  %v10779_v0 = vpack.c.bf16 %v1076_v16, %v10744_v30  ;;  %v1351_v3 = vrot.slane %v10753_v10, 1 }
 0x141   :  { %988 = vst.msk [vmem:[#allocation2 + $0x2d9] sm:$0xff] %vm852_vm2, %v843_v42  ;;  %14763 = vst [vmem:[#allocation63_spill] sm:$0xff] %v10753_v10  ;;  %8715 = vmatprep.mubr.msk.bf16.mxu1 %vm852_vm2, %v1474_v36  ;;  %v10762_v42 = vld [vmem:[#allocation2 + $0x298] sm:$0x3]  ;;  %v846_v32 = vmax.f32 %v766_v59, 0.0  ;;  %v758_v27 = vadd.f32 %v10538_v20, %v757_v14  ;;  %v10775_v36 = vpack.c.bf16 %v1073_v31, %v10753_v10  ;;  %v10782_v5 = vrot.slane %v1073_v31, 1 }
 0x142   :  { %14764 = vst [vmem:[#allocation64_spill] sm:$0xff] %v10755_v8  ;;  %14765 = vst [vmem:[#allocation65_spill] sm:$0xff] %v10762_v42  ;;  %v10770_v52 = vsel %vm2281_vm6, %v14767_v34, %v14766_v19  ;;  %v8658_v35 = vpop.f32.mrf.mxu0  ;;  %v1354_v19 = vrot.slane %v10762_v42, 1  ;;  %v10791_v59 = vsel %vm1225_vm5, %v1356_v39, %v10755_v8  ;;  %v1360_v34 = vsel %vm1225_vm5, %v10755_v8, %v1359_v50  ;;  %v10876_v10 = vld [vmem:[#allocation2 + $0x110] sm:$0xff] }
 0x143   :  { %986 = vst.msk [vmem:[#allocation2 + $0x2c1] sm:$0xff] %vm852_vm2, %v841_v11  ;;  %14768 = vst [vmem:[#allocation66_spill] sm:$0xff] %v10775_v36  ;;  %v844_v11 = vmax.f32 %v758_v27, 0.0  ;;  %v769_v14 = vadd.f32 %v10538_v20, %v8658_v35  ;;  %v10807_v39 = vsel %vm1225_vm5, %v1351_v3, %v10782_v5 }
 0x144   :  { %14769 = vst [vmem:[#allocation67_spill] sm:$0xff] %v10779_v0  ;;  %14770 = vst [vmem:[#allocation68_spill] sm:$0xff] %v10782_v5  ;;  %8784 = vmatmul.mubr.msk.bf16.gmra.mxu0 %vm852_vm2, %v10775_v36  ;;  %v1355_v50 = vsel %vm1225_vm5, %v10782_v5, %v1354_v19  ;;  %v10838_v19 = vrot.slane %v1073_v31, 2 }
 0x145   :  { %991 = vst.msk [vmem:[#allocation2 + $0x301] sm:$0xff] %vm852_vm2, %v846_v32  ;;  %14771 = vst [vmem:[#allocation69_spill] sm:$0xff] %v10791_v59  ;;  %v760_v32 = vpop.f32.mrf.mxu0  ;;  %8787 = vmatprep.mubr.msk.bf16.mxu0 %vm852_vm2, %v10779_v0  ;;  %v847_v27 = vmax.f32 %v769_v14, 0.0  ;;  %v1475_v36 = vpack.c.bf16 %v1355_v50, %v10807_v39  ;;  %v1476_v0 = vpack.c.bf16 %v1360_v34, %v10791_v59  ;;  %v10816_v35 = vld [vmem:[#allocation2 + $0x2d0] sm:$0xff]  ;;  %v14778_v14 = vrot.slane %v10217_v12, 2 }
 0x146   :  { %14772 = vst [vmem:[#allocation70_spill] sm:$0xff] %v10795_v1  ;;  %14774 = vst [vmem:[#allocation72_spill] sm:$0xff] %v10807_v39  ;;  %v761_v2 = vadd.f32 %v10538_v20, %v760_v32  ;;  %v10830_v34 = vrot.slane %v1076_v16, 2  ;;  %v10834_v59 = vld [vmem:[#allocation2 + $0x2b8] sm:$0xff] }
 0x147   :  { %989 = vst.msk [vmem:[#allocation2 + $0x2e9] sm:$0xff] %vm852_vm2, %v844_v11  ;;  %v8661_v4 = vpop.f32.mrf.mxu0  ;;  %14775 = vst [vmem:[#allocation73_spill] sm:$0xff] %v10816_v35  ;;  %v14777_v11 = vrot.slane %v10221_v26, 2 }
 0x148   :  { %v1082_v30 = vld [vmem:[#allocation2 + $0x2d8] sm:$0xff]  ;;  %v10818_v3 = vld [vmem:[#allocation2 + $0x2e0] sm:$0x3]  ;;  %992 = vst.msk [vmem:[#allocation2 + $0x309] sm:$0xff] %vm852_vm2, %v847_v27  ;;  %v845_v50 = vmax.f32 %v761_v2, 0.0  ;;  %14780 = vst [vmem:[#allocation76_spill] sm:$0xff] %v10830_v34  ;;  %v782_v8 = vadd.f32 %v10538_v20, %v8661_v4  ;;  %8716 = vmatmul.mubr.msk.bf16.gmra.mxu1 %vm852_vm2, %v1475_v36 }
 0x149   :  { %14776 = vst [vmem:[#allocation74_spill] sm:$0xff] %v10818_v3  ;;  %v10827_v32 = vsel %vm2281_vm6, %v14778_v14, %v14777_v11  ;;  %v10836_v21 = vrot.slane %v1082_v30, 1  ;;  %14782 = vst [vmem:[#allocation78_spill] sm:$0xff] %v10838_v19  ;;  %8719 = vmatprep.mubr.msk.bf16.mxu1 %vm852_vm2, %v1476_v0  ;;  %v773_v12 = vpop.f32.mrf.mxu0  ;;  %v1369_v16 = vrot.slane %v10818_v3, 1  ;;  %v1366_v2 = vrot.slane %v10816_v35, 1  ;;  %v10874_v34 = vld [vmem:[#allocation2 + $0x108] sm:$0xff] }
 0x14a   :  { %14779 = vst [vmem:[#allocation75_spill] sm:$0xff] %v10827_v32  ;;  %v10841_v11 = vld [vmem:[#allocation2 + $0x2c0] sm:$0xff]  ;;  %v10843_v14 = vld [vmem:[#allocation2 + $0x2c8] sm:$0x3]  ;;  %990 = vst.msk [vmem:[#allocation2 + $0x2f1] sm:$0xff] %vm852_vm2, %v845_v50  ;;  %v850_v27 = vmax.f32 %v782_v8, 0.0  ;;  %v774_v31 = vadd.f32 %v10538_v20, %v773_v12  ;;  %v10857_v5 = vpack.c.bf16 %v1082_v30, %v10816_v35 }
 0x14b   :  { %14781 = vst [vmem:[#allocation77_spill] sm:$0xff] %v10836_v21  ;;  %v10853_v0 = vpack.c.bf16 %v10841_v11, %v10834_v59  ;;  %v8662_v39 = vpop.f32.mrf.mxu0  ;;  %v1361_v3 = vrot.slane %v10834_v59, 1  ;;  %v10861_v4 = vrot.slane %v10841_v11, 1  ;;  %v1364_v50 = vrot.slane %v10843_v14, 1  ;;  %v9296_v19 = vld [vmem:[#allocation2 + $0x100] sm:$0x3] }
 0x14c   :  { %14784 = vst [vmem:[#allocation80_spill] sm:$0xff] %v10857_v5  ;;  %995 = vst.msk [vmem:[#allocation2 + $0x331] sm:$0xff] %vm852_vm2, %v850_v27  ;;  %v848_v8 = vmax.f32 %v774_v31, 0.0  ;;  %v785_v12 = vadd.f32 %v10538_v20, %v8662_v39  ;;  %v10870_v36 = vsel %vm1225_vm5, %v1366_v2, %v10836_v21  ;;  %v1370_v1 = vsel %vm1225_vm5, %v10836_v21, %v1369_v16  ;;  %v10888_v16 = vld [vmem:[#allocation2 + $0x300] sm:$0xff] }
 0x14d   :  { %14783 = vst [vmem:[#allocation79_spill] sm:$0xff] %v10853_v0  ;;  %14785 = vst [vmem:[#allocation81_spill] sm:$0xff] %v10861_v4  ;;  %8788 = vmatmul.mubr.msk.bf16.gmra.mxu0 %vm852_vm2, %v10853_v0  ;;  %v776_v27 = vpop.f32.mrf.mxu0  ;;  %v10884_v31 = vsel %vm1225_vm5, %v1361_v3, %v10861_v4  ;;  %v1365_v2 = vsel %vm1225_vm5, %v10861_v4, %v1364_v50  ;;  %v1478_v39 = vpack.c.bf16 %v1370_v1, %v10870_v36 }
 0x14e   :  { %14786 = vst [vmem:[#allocation82_spill] sm:$0xff] %v10870_v36  ;;  %8791 = vmatprep.mubr.msk.bf16.mxu0 %vm852_vm2, %v10857_v5  ;;  %14787 = vst [vmem:[#allocation83_spill] sm:$0xff] %v10884_v31  ;;  %v851_v21 = vmax.f32 %v785_v12, 0.0  ;;  %v777_v0 = vadd.f32 %v10538_v20, %v776_v27  ;;  %v1477_v5 = vpack.c.bf16 %v1365_v2, %v10884_v31  ;;  %v10895_v35 = vld [vmem:[#allocation2 + $0x2e8] sm:$0xff]  ;;  %v10904_v20 = vrot.slane %v1082_v30, 2 }
 0x14f   :  { %993 = vst.msk [vmem:[#allocation2 + $0x319] sm:$0xff] %vm852_vm2, %v848_v8  ;;  %v1088_v3 = vld [vmem:[#allocation2 + $0x308] sm:$0xff]  ;;  %v10897_v42 = vld [vmem:[#allocation2 + $0x310] sm:$0x3]  ;;  %v1376_v1 = vrot.slane %v10888_v16, 1  ;;  %v2330_v8 = vrot.slane %v10239_v37, 2 }
 0x150   :  { %14788 = vst [vmem:[#allocation84_spill] sm:$0xff] %v10897_v42  ;;  %996 = vst.msk [vmem:[#allocation2 + $0x339] sm:$0xff] %vm852_vm2, %v851_v21  ;;  %v849_v12 = vmax.f32 %v777_v0, 0.0  ;;  %8720 = vmatmul.mubr.msk.bf16.gmra.mxu1 %vm852_vm2, %v1477_v5  ;;  %v10908_v27 = vrot.slane %v1088_v3, 1  ;;  %v1379_v4 = vrot.slane %v10897_v42, 1  ;;  %v2335_v21 = vrot.slane %v9296_v19, 2 }
 0x151   :  { %14789 = vst [vmem:[#allocation85_spill] sm:$0xff] %v10904_v20  ;;  %8723 = vmatprep.mubr.msk.bf16.mxu1 %vm852_vm2, %v1478_v39  ;;  %v1085_v2 = vld [vmem:[#allocation2 + $0x2f0] sm:$0xff]  ;;  %v10911_v50 = vld [vmem:[#allocation2 + $0x2f8] sm:$0x3]  ;;  %v14791_v30 = vrot.slane %v10288_v53, 2  ;;  %v14792_v0 = vrot.slane %v10270_v40, 2  ;;  %v10933_v19 = vpack.c.bf16 %v1088_v3, %v10888_v16 }
 0x152   :  { %14790 = vst [vmem:[#allocation86_spill] sm:$0xff] %v10908_v27  ;;  %994 = vst.msk [vmem:[#allocation2 + $0x321] sm:$0xff] %vm852_vm2, %v849_v12  ;;  %v10924_v39 = vpack.c.bf16 %v1085_v2, %v10895_v35  ;;  %v1371_v36 = vrot.slane %v10895_v35, 1  ;;  %v10927_v31 = vrot.slane %v1085_v2, 1  ;;  %v1374_v37 = vrot.slane %v10911_v50, 1 }
 0x153   :  { %v10920_v5 = vsel %vm2281_vm6, %v14792_v0, %v14791_v30  ;;  %14795 = vst [vmem:[#allocation89_spill] sm:$0xff] %v10933_v19  ;;  %v10937_v40 = vsel %vm1225_vm5, %v1376_v1, %v10908_v27  ;;  %v14797_v30 = vrot.slane %v10235_v54, 2  ;;  %v1380_v1 = vsel %vm1225_vm5, %v10908_v27, %v1379_v4  ;;  %v10957_v54 = vld [vmem:[#allocation2 + $0x120] sm:$0xff] }
 0x154   :  { %14793 = vst [vmem:[#allocation87_spill] sm:$0xff] %v10924_v39  ;;  %14794 = vst [vmem:[#allocation88_spill] sm:$0xff] %v10927_v31  ;;  %v10949_v42 = vsel %vm1225_vm5, %v1371_v36, %v10927_v31  ;;  %v1375_v20 = vsel %vm1225_vm5, %v10927_v31, %v1374_v37  ;;  %v10986_v12 = vrot.slane %v1085_v2, 2  ;;  %v2340_v31 = vrot.slane %v10292_v29, 2 }
 0x155   :  { %14796 = vst [vmem:[#allocation90_spill] sm:$0xff] %v10937_v40  ;;  %v10943_v0 = vsel %vm2281_vm6, %v14797_v30, %v2330_v8  ;;  %8792 = vmatmul.mubr.msk.bf16.gmra.mxu0 %vm852_vm2, %v10924_v39  ;;  %14798 = vst [vmem:[#allocation91_spill] sm:$0xff] %v10949_v42  ;;  %v10960_v8 = vrot.slane %v10841_v11, 2  ;;  %v1479_v36 = vpack.c.bf16 %v1375_v20, %v10949_v42  ;;  %v14800_v30 = vrot.slane %v10221_v26, 2  ;;  %v10989_v11 = vld [vmem:[#allocation2 + $0x138] sm:$0xff] }
 0x156   :  { %8795 = vmatprep.mubr.msk.bf16.mxu0 %vm852_vm2, %v10933_v19  ;;  %v10977_v19 = vld [vmem:[#allocation2 + $0x140] sm:$0xff]  ;;  %v10979_v20 = vrot.slane %v1088_v3, 2  ;;  %v1480_v26 = vpack.c.bf16 %v1380_v1, %v10937_v40  ;;  %14802 = vst [vmem:[#allocation94_spill] sm:$0xff] %v10986_v12  ;;  %v14803_v27 = vrot.slane %v10276_v18, 2  ;;  %v14804_v3 = vrot.slane %v10272_v56, 2 }
 0x157   :  { %14799 = vst [vmem:[#allocation92_spill] sm:$0xff] %v10960_v8  ;;  %v10968_v37 = vsel %vm2281_vm6, %v14800_v30, %v2335_v21  ;;  %v10982_v21 = vld [vmem:[#allocation2 + $0x318] sm:$0xff]  ;;  %v2345_v40 = vrot.slane %v10278_v63, 2  ;;  %v14809_v42 = vrot.slane %v10276_v18, 2  ;;  %v11039_v18 = vld [vmem:[#allocation2 + $0x150] sm:$0xff] }
 0x158   :  { %14801 = vst [vmem:[#allocation93_spill] sm:$0xff] %v10979_v20  ;;  %8724 = vmatmul.mubr.msk.bf16.gmra.mxu1 %vm852_vm2, %v1479_v36  ;;  %v10997_v1 = vsel %vm2281_vm6, %v14804_v3, %v14803_v27  ;;  %v1381_v27 = vrot.slane %v10982_v21, 1  ;;  %v14808_v36 = vrot.slane %v10288_v53, 2  ;;  %v14821_v53 = vrot.slane %v10348_v25, 2 }
 0x159   :  { %14805 = vst [vmem:[#allocation95_spill] sm:$0xff] %v10997_v1  ;;  %8727 = vmatprep.mubr.msk.bf16.mxu1 %vm852_vm2, %v1480_v26  ;;  %v1091_v2 = vld [vmem:[#allocation2 + $0x320] sm:$0xff]  ;;  %v11002_v4 = vld [vmem:[#allocation2 + $0x328] sm:$0x3]  ;;  %v11025_v39 = vsel %vm2281_vm6, %v14809_v42, %v2345_v40  ;;  %v11041_v42 = vld [vmem:[#allocation2 + $0x158] sm:$0xff]  ;;  %v14812_v40 = vpack.c.bf16 %v10077_v41, %v10012_v38  ;;  %v14817_v26 = vrot.slane %v10330_v15, 2 }
 0x15a   :  { %v11009_v56 = vpack.c.bf16 %v1091_v2, %v10982_v21  ;;  %v11012_v63 = vrot.slane %v1091_v2, 1  ;;  %v1384_v3 = vrot.slane %v11002_v4, 1  ;;  %v11020_v29 = vsel %vm2281_vm6, %v14808_v36, %v2340_v31  ;;  %14810 = vst [vmem:[#allocation98_spill] sm:$0xff] %v11025_v39  ;;  %v9287_v31 = vld [vmem:[%s14390_s5 + $0x58] sm:$0xff]   ;;  %v11069_v1 = vld [vmem:[#allocation2 + $0x170] sm:$0xff] }
 0x15b   :  { %9003 = vmatprep.subr.bf16.mxu0 %v9287_v31  ;;  %v9288_v15 = vld [vmem:[%s14390_s5 + $0x50] sm:$0xff]  }
 0x15c   :  { %14806 = vst [vmem:[#allocation96_spill] sm:$0xff] %v11009_v56  ;;  %14807 = vst [vmem:[#allocation97_spill] sm:$0xff] %v11012_v63  ;;  %v11031_v32 = vsel %vm1225_vm5, %v1381_v27, %v11012_v63  ;;  %v1385_v30 = vsel %vm1225_vm5, %v11012_v63, %v1384_v3  ;;  %v2350_v27 = vrot.slane %v10351_v47, 2  ;;  %v14818_v63 = vrot.slane %v10321_v28, 2  ;;  %v14829_v3 = vld [vmem:[#allocation3_spill] sm:$0xff]  ;;  %v11133_v28 = vld [vmem:[#allocation2 + $0x1d0] sm:$0xff] }
 0x15d   :  { %8796 = vmatmul.mubr.msk.bf16.gmra.mxu0 %vm852_vm2, %v11009_v56  ;;  %14811 = vst [vmem:[#allocation99_spill] sm:$0xff] %v11031_v32  ;;  %v1481_v36 = vpack.c.bf16 %v1385_v30, %v11031_v32  ;;  %v14813_v56 = vrot.slane %v10348_v25, 2  ;;  %v11067_v32 = vld [vmem:[#allocation2 + $0x168] sm:$0xff]  ;;  %v11079_v47 = vrot.slane %v1091_v2, 2  ;;  %v11102_v25 = vld [vmem:[#allocation2 + $0x180] sm:$0xff]  ;;  %v14825_v2 = vrot.slane %v10407_v60, 2 }
 0x15e   :  { %8871 = vmatprep.mubr.msk.bf16.mxu0 %vm852_vm2, %v14812_v40  ;;  %v14814_v40 = vrot.slane %v10326_v7, 2  ;;  %14816 = vst [vmem:[#allocation101_spill] sm:$0xff] %v11067_v32  ;;  %v11076_v7 = vsel %vm2281_vm6, %v14818_v63, %v14817_v26  ;;  %v11087_v39 = vsel %vm2281_vm6, %v14821_v53, %v2350_v27  ;;  %v14823_v63 = vpack.c.bf16 %v10118_v48, %v10055_v23  ;;  %v11104_v53 = vld [vmem:[#allocation2 + $0x188] sm:$0xff] }
 0x15f   :  { %14819 = vst [vmem:[#allocation102_spill] sm:$0xff] %v11076_v7  ;;  %14820 = vst [vmem:[#allocation103_spill] sm:$0xff] %v11079_v47  ;;  %v2360_v23 = vrot.slane %v10410_v17, 2  ;;  %v14828_v48 = vld [vmem:[#allocation4_spill] sm:$0xff] }
 0x160   :  { %v11061_v30 = vsel %vm2281_vm6, %v14814_v40, %v14813_v56  ;;  %v2355_v56 = vrot.slane %v10332_v61, 2  ;;  %8728 = vmatmul.mubr.msk.bf16.gmra.mxu1 %vm852_vm2, %v1481_v36  ;;  %14822 = vst [vmem:[#allocation104_spill] sm:$0xff] %v11087_v39  ;;  %v14826_v40 = vrot.slane %v10392_v13, 2  ;;  %v14831_v13 = vrot.slane %v9947_v45, 2  ;;  %v14835_v7 = vld [vmem:[#allocation8_spill] sm:$0xff] }
 0x161   :  { %14815 = vst [vmem:[#allocation100_spill] sm:$0xff] %v11061_v30  ;;  %8803 = vmatprep.mubr.msk.bf16.mxu1 %vm852_vm2, %v14823_v63  ;;  %v14830_v63 = vpack.c.bf16 %v14828_v48, %v14829_v3  ;;  %v14837_v61 = vrot.slane %v10407_v60, 2  ;;  %v14839_v39 = vrot.slane %v10476_v49, 2  ;;  %v14847_v60 = vrot.slane %v9947_v45, 2 }
 0x162   :  { %v11100_v36 = vsel %vm2281_vm6, %v14817_v26, %v2355_v56  ;;  %v11122_v27 = vsel %vm2281_vm6, %v14826_v40, %v14825_v2  ;;  %v14832_v40 = vrot.slane %v9945_v43, 2  ;;  %v14834_v2 = vld [vmem:[#allocation9_spill] sm:$0xff]  ;;  %v9297_v26 = vld [vmem:[#allocation2 + $0x1c0] sm:$0x3]  ;;  %v14840_v43 = vrot.slane %v10456_v57, 2 }
 0x163   :  { %14824 = vst [vmem:[#allocation105_spill] sm:$0xff] %v11100_v36  ;;  %14827 = vst [vmem:[#allocation106_spill] sm:$0xff] %v11122_v27  ;;  %v14836_v36 = vpack.c.bf16 %v14834_v2, %v14835_v7  ;;  %v11151_v56 = vsel %vm2281_vm6, %v14837_v61, %v2360_v23  ;;  %v2365_v30 = vrot.slane %v9297_v26, 2  ;;  %v9286_v61 = vld [vmem:[%s14390_s5 + $0x40] sm:$0xff]   ;;  %v14842_v23 = vrot.slane %v10459_v44, 2  ;;  %v14843_v26 = vld [vmem:[#allocation22_spill] sm:$0xff] }
 0x164   :  { %v11140_v17 = vsel %vm2281_vm6, %v14832_v40, %v14831_v13  ;;  %14838 = vst [vmem:[#allocation3_spill] sm:$0xff] %v11151_v56  ;;  %v11158_v13 = vsel %vm2281_vm6, %v14840_v43, %v14839_v39  ;;  %v2370_v40 = vrot.slane %v10483_v24, 2  ;;  %v14844_v32 = vrot.slane %v14843_v26, 2  ;;  %v14846_v39 = vld [vmem:[#allocation24_spill] sm:$0xff]  ;;  %v11193_v24 = vld [vmem:[#allocation2 + $0x1e0] sm:$0xff] }
 0x165   :  { %8872 = vmatmul.mubr.msk.bf16.vlgmr.msra.gmra.mxu0 %vm852_vm2, %v14830_v63  ;;  %14833 = vst [vmem:[#allocation4_spill] sm:$0xff] %v11140_v17  ;;  %v11146_v63 = vld [vmem:[#allocation2 + $0x1c8] sm:$0xff]  ;;  %14841 = vst [vmem:[#allocation9_spill] sm:$0xff] %v11158_v13  ;;  %v2375_v43 = vrot.slane %v14846_v39, 2  ;;  %v14849_v27 = vrot.slane %v10476_v49, 2  ;;  %v14878_v17 = vld [vmem:[#allocation17_spill] sm:$0xff] }
 0x166   :  { %8875 = vmatprep.mubr.msk.bf16.mxu0 %vm852_vm2, %v14836_v36  ;;  %9004 = vmatpush3.bf16.msra.mxu0 %v9287_v31  ;;  %v11172_v57 = vsel %vm2281_vm6, %v14844_v32, %v14842_v23  ;;  %v11181_v36 = vsel %vm2281_vm6, %v14847_v60, %v2365_v30  ;;  %v14851_v32 = vld [vmem:[#allocation6_spill] sm:$0xff]  ;;  %v14852_v23 = vld [vmem:[#allocation5_spill] sm:$0xff]  ;;  %v11195_v31 = vld [vmem:[#allocation2 + $0x1e8] sm:$0xff]  ;;  %v14854_v30 = vrot.slane %v10459_v44, 2 }
 0x167   :  { %14845 = vst [vmem:[#allocation8_spill] sm:$0xff] %v11172_v57  ;;  %9005 = vmatprep.subr.bf16.mxu0 %v9288_v15  ;;  %14848 = vst [vmem:[#allocation22_spill] sm:$0xff] %v11181_v36  ;;  %v11186_v26 = vsel %vm2281_vm6, %v14849_v27, %v2370_v40  ;;  %v14853_v56 = vpack.c.bf16 %v14851_v32, %v14852_v23  ;;  %v14856_v40 = vld [vmem:[#allocation10_spill] sm:$0xff]  ;;  %v14857_v60 = vld [vmem:[#allocation7_spill] sm:$0xff] }
 0x168   :  { %14850 = vst [vmem:[#allocation24_spill] sm:$0xff] %v11186_v26  ;;  %v11204_v27 = vsel %vm2281_vm6, %v14854_v30, %v2375_v43  ;;  %v14858_v32 = vpack.c.bf16 %v14856_v40, %v14857_v60  ;;  %v14859_v44 = vld [vmem:[#allocation29_spill] sm:$0xff]  ;;  %v14863_v40 = vld [vmem:[#allocation31_spill] sm:$0xff]  ;;  %v14868_v49 = vld [vmem:[#allocation32_spill] sm:$0xff] }
 0x169   :  { %8804 = vmatmul.mubr.msk.bf16.vlgmr.msra.gmra.mxu1 %vm852_vm2, %v14853_v56  ;;  %14855 = vst [vmem:[#allocation6_spill] sm:$0xff] %v11204_v27  ;;  %v9298_v56 = vld [vmem:[%s14390_s5 + $0x48] sm:$0xff]   ;;  %v14860_v45 = vrot.slane %v14859_v44, 2  ;;  %v14862_v30 = vld [vmem:[#allocation33_spill] sm:$0xff]  ;;  %v14864_v60 = vrot.slane %v14863_v40, 2  ;;  %v2385_v57 = vrot.slane %v14868_v49, 2 }
 0x16a   :  { %8936 = vmatpush3.bf16.msra.mxu1 %v9298_v56  ;;  %8807 = vmatprep.mubr.msk.bf16.mxu1 %vm852_vm2, %v14858_v32  ;;  %v2380_v39 = vrot.slane %v14862_v30, 2  ;;  %v14865_v32 = vld [vmem:[#allocation30_spill] sm:$0xff]  ;;  %v14874_v49 = vrot.slane %v14863_v40, 2  ;;  %v14876_v30 = vrot.slane %v10596_v9, 2  ;;  %v14879_v36 = vld [vmem:[#allocation16_spill] sm:$0xff] }
 0x16b   :  { %v11220_v43 = vsel %vm2281_vm6, %v14860_v45, %v10656_v58  ;;  %8937 = vmatprep.subr.bf16.mxu1 %v9286_v61  ;;  %v14866_v23 = vrot.slane %v14865_v32, 2  ;;  %9006 = vmatpush3.bf16.msra.mxu0 %v9288_v15  ;;  %v11236_v45 = vld [vmem:[%s14390_s5 + $0x68] sm:$0xff]  }
 0x16c   :  { %14861 = vst [vmem:[#allocation5_spill] sm:$0xff] %v11220_v43  ;;  %14869 = vst [vmem:[#allocation7_spill] sm:$0xff] %v11236_v45  ;;  %v11243_v32 = vsel %vm2281_vm6, %v10656_v58, %v2380_v39  ;;  %v11254_v44 = vsel %vm2281_vm6, %v14874_v49, %v2385_v57  ;;  %v11260_v56 = vsel %vm2281_vm6, %v14876_v30, %v10740_v22  ;;  %v14877_v39 = vld [vmem:[#allocation45_spill] sm:$0xff]  ;;  %v14881_v57 = vrot.slane %v10603_v46, 2  ;;  %v14882_v40 = vld [vmem:[#allocation40_spill] sm:$0xff] }
 0x16d   :  { %v11230_v26 = vsel %vm2281_vm6, %v14866_v23, %v14864_v60  ;;  %14870 = vst [vmem:[#allocation29_spill] sm:$0xff] %v11243_v32  ;;  %v14871_v23 = vld [vmem:[#allocation11_spill] sm:$0xff]  ;;  %v14872_v60 = vld [vmem:[#allocation12_spill] sm:$0xff]  ;;  %14875 = vst [vmem:[#allocation33_spill] sm:$0xff] %v11254_v44  ;;  %v2390_v27 = vrot.slane %v14877_v39, 2  ;;  %v14880_v58 = vpack.c.bf16 %v14878_v17, %v14879_v36  ;;  %v14883_v49 = vrot.slane %v14882_v40, 2 }
 0x16e   :  { %14867 = vst [vmem:[#allocation10_spill] sm:$0xff] %v11230_v26  ;;  %v14873_v13 = vpack.c.bf16 %v14871_v23, %v14872_v60  ;;  %8938 = vmatpush3.bf16.msra.mxu1 %v9286_v61  ;;  %v14885_v30 = vld [vmem:[#allocation42_spill] sm:$0xff]  ;;  %v14886_v39 = vrot.slane %v10668_v62, 2  ;;  %v2400_v61 = vrot.slane %v10686_v6, 2  ;;  %v14894_v6 = vld [vmem:[#allocation63_spill] sm:$0xff]  ;;  %v14900_v43 = vld [vmem:[#allocation13_spill] sm:$0xff] }
 0x16f   :  { %v11274_v9 = vsel %vm2281_vm6, %v14883_v49, %v14881_v57  ;;  %v2395_v15 = vrot.slane %v14885_v30, 2  ;;  %v14890_v49 = vld [vmem:[#allocation51_spill] sm:$0xff]  ;;  %9071 = vmatprep.subr.bf16.mxu1 %v11236_v45  ;;  %v14893_v26 = vld [vmem:[#allocation78_spill] sm:$0xff]  ;;  %v14895_v44 = vrot.slane %v14894_v6, 2 }
 0x170   :  { %8876 = vmatmul.mubr.msk.bf16.gmra.mxu0 %vm852_vm2, %v14873_v13  ;;  %14884 = vst [vmem:[#allocation31_spill] sm:$0xff] %v11274_v9  ;;  %v11281_v32 = vsel %vm2281_vm6, %v14886_v39, %v10800_v51  ;;  %v14888_v13 = vld [vmem:[#allocation50_spill] sm:$0xff]  ;;  %v2405_v30 = vrot.slane %v14890_v49, 2  ;;  %v14891_v39 = vrot.slane %v10603_v46, 2  ;;  %v14899_v45 = vld [vmem:[#allocation15_spill] sm:$0xff] }
 0x171   :  { %8879 = vmatprep.mubr.msk.bf16.mxu0 %vm852_vm2, %v14880_v58  ;;  %v11285_v58 = vsel %vm2281_vm6, %v10740_v22, %v2390_v27  ;;  %v14889_v40 = vrot.slane %v14888_v13, 2  ;;  %v11307_v13 = vsel %vm2281_vm6, %v14895_v44, %v14893_v26  ;;  %v14901_v62 = vpack.c.bf16 %v14899_v45, %v14900_v43  ;;  %v14905_v6 = vld [vmem:[#allocation14_spill] sm:$0xff]  ;;  %v14917_v43 = vld [vmem:[#allocation73_spill] sm:$0xff] }
 0x172   :  { %14887 = vst [vmem:[#allocation30_spill] sm:$0xff] %v11285_v58  ;;  %v11301_v27 = vsel %vm2281_vm6, %v14891_v39, %v2395_v15  ;;  %v11323_v15 = vsel %vm2281_vm6, %v10800_v51, %v2400_v61  ;;  %v11327_v44 = vsel %vm2281_vm6, %v10759_v33, %v2405_v30  ;;  %v14904_v39 = vld [vmem:[#allocation18_spill] sm:$0xff]  ;;  %v14907_v61 = vld [vmem:[#allocation76_spill] sm:$0xff] }
 0x173   :  { %v11292_v57 = vsel %vm2281_vm6, %v14889_v40, %v10759_v33  ;;  %14892 = vst [vmem:[#allocation32_spill] sm:$0xff] %v11301_v27  ;;  %v14896_v40 = vld [vmem:[#allocation65_spill] sm:$0xff]  ;;  %8808 = vmatmul.mubr.msk.bf16.gmra.mxu1 %vm852_vm2, %v14901_v62  ;;  %14902 = vst [vmem:[#allocation12_spill] sm:$0xff] %v11323_v15  ;;  %v14911_v9 = vld [vmem:[#allocation62_spill] sm:$0xff] }
 0x174   :  { %v14897_v22 = vrot.slane %v14896_v40, 2  ;;  %14903 = vst [vmem:[#allocation45_spill] sm:$0xff] %v11327_v44  ;;  %v14906_v40 = vpack.c.bf16 %v14904_v39, %v14905_v6  ;;  %v14908_v62 = vld [vmem:[#allocation61_spill] sm:$0xff]  ;;  %v2415_v27 = vrot.slane %v14911_v9, 2  ;;  %v14912_v39 = vrot.slane %v10834_v59, 2  ;;  %v14920_v9 = vld [vmem:[#allocation74_spill] sm:$0xff] }
 0x175   :  { %v14909_v46 = vrot.slane %v14908_v62, 2  ;;  %v14916_v62 = vld [vmem:[#allocation85_spill] sm:$0xff]  ;;  %v2425_v44 = vrot.slane %v14920_v9, 2  ;;  %v11367_v15 = vld [vmem:[#allocation2 + $0x218] sm:$0xff]  ;;  %v14926_v9 = vld [vmem:[#allocation19_spill] sm:$0xff] }
 0x176   :  { %v11313_v49 = vsel %vm2281_vm6, %v14893_v26, %v14897_v22  ;;  %8811 = vmatprep.mubr.msk.bf16.mxu1 %vm852_vm2, %v14906_v40  ;;  %v11346_v22 = vld [vmem:[#allocation2 + $0x210] sm:$0xff]  ;;  %v11352_v6 = vsel %vm2281_vm6, %v14912_v39, %v10960_v8  ;;  %v14914_v40 = vrot.slane %v10843_v14, 2  ;;  %v11371_v59 = vsel %vm2281_vm6, %v14907_v61, %v2415_v27  ;;  %v14927_v58 = vld [vmem:[#allocation20_spill] sm:$0xff]  ;;  %v3009_v27 = vld [vmem:[#allocation2 + $0x40] sm:$0x3] }
 0x177   :  { %14898 = vst [vmem:[#allocation11_spill] sm:$0xff] %v11313_v49  ;;  %v11343_v30 = vsel %vm2281_vm6, %v14909_v46, %v14907_v61  ;;  %14913 = vst [vmem:[#allocation16_spill] sm:$0xff] %v11352_v6  ;;  %v14918_v46 = vrot.slane %v14917_v43, 2  ;;  %v14922_v39 = vrot.slane %v10895_v35, 2  ;;  %v14924_v43 = vrot.slane %v10911_v50, 2 }
 0x178   :  { %14910 = vst [vmem:[#allocation17_spill] sm:$0xff] %v11343_v30  ;;  %v11358_v45 = vsel %vm2281_vm6, %v10960_v8, %v14914_v40  ;;  %14921 = vst [vmem:[#allocation50_spill] sm:$0xff] %v11371_v59  ;;  %v14928_v8 = vpack.c.bf16 %v14926_v9, %v14927_v58  ;;  %v11395_v35 = vsel %vm2281_vm6, %v14916_v62, %v2425_v44  ;;  %v14930_v50 = vrot.slane %v10888_v16, 2  ;;  %v3006_v14 = vld [vmem:[#allocation2 + $0x28] sm:$0x3]  ;;  %v14951_v30 = vld [vmem:[#allocation23_spill] sm:$0xff] }
 0x179   :  { %14915 = vst [vmem:[#allocation40_spill] sm:$0xff] %v11358_v45  ;;  %v11364_v49 = vsel %vm2281_vm6, %v14918_v46, %v14916_v62  ;;  %v11379_v40 = vsel %vm2281_vm6, %v14922_v39, %v10986_v12  ;;  %v11385_v46 = vsel %vm2281_vm6, %v10986_v12, %v14924_v43  ;;  %14929 = vst [vmem:[#allocation63_spill] sm:$0xff] %v11395_v35  ;;  %v14932_v45 = vld [vmem:[#allocation28_spill] sm:$0xff]  ;;  %v14933_v12 = vld [vmem:[#allocation27_spill] sm:$0xff]  ;;  %v14936_v62 = vrot.slane %v10077_v41, 2 }
 0x17a   :  { %14919 = vst [vmem:[#allocation42_spill] sm:$0xff] %v11364_v49  ;;  %14923 = vst [vmem:[#allocation51_spill] sm:$0xff] %v11379_v40  ;;  %8880 = vmatmul.mubr.msk.bf16.gmra.mxu0 %vm852_vm2, %v14928_v8  ;;  %v11403_v43 = vsel %vm2281_vm6, %v14930_v50, %v10979_v20  ;;  %v14934_v8 = vpack.c.bf16 %v14932_v45, %v14933_v12  ;;  %v14935_v39 = vld [vmem:[#allocation84_spill] sm:$0xff]  ;;  %v14937_v6 = vrot.slane %v10012_v38, 2  ;;  %v4419_v59 = vrot.slane %v3006_v14, 2  ;;  %v14945_v35 = vld [vmem:[#allocation21_spill] sm:$0xff] }
 0x17b   :  { %14925 = vst [vmem:[#allocation78_spill] sm:$0xff] %v11385_v46  ;;  %14931 = vst [vmem:[#allocation65_spill] sm:$0xff] %v11403_v43  ;;  %v2435_v46 = vrot.slane %v14935_v39, 2  ;;  %v14940_v39 = vrot.slane %v10982_v21, 2  ;;  %v14942_v50 = vrot.slane %v11002_v4, 2  ;;  %v14948_v4 = vrot.slane %v10012_v38, 1 }
 0x17c   :  { %8883 = vmatprep.mubr.msk.bf16.mxu0 %vm852_vm2, %v14934_v8  ;;  %v11422_v8 = vsel %vm2281_vm6, %v14937_v6, %v14936_v62  ;;  %v3012_v6 = vld [vmem:[#allocation2 + $0x58] sm:$0x3]  ;;  %v14944_v62 = vld [vmem:[#allocation25_spill] sm:$0xff]  ;;  %v14956_v21 = vrot.slane %v14829_v3, 2 }
 0x17d   :  { %14938 = vst [vmem:[#allocation15_spill] sm:$0xff] %v11422_v8  ;;  %v11426_v44 = vsel %vm2281_vm6, %v10979_v20, %v2435_v46  ;;  %v11432_v16 = vsel %vm2281_vm6, %v14940_v39, %v11079_v47  ;;  %v11438_v40 = vsel %vm2281_vm6, %v11079_v47, %v14942_v50  ;;  %v14946_v49 = vpack.c.bf16 %v14944_v62, %v14945_v35  ;;  %v14950_v47 = vld [vmem:[#allocation26_spill] sm:$0xff] }
 0x17e   :  { %14939 = vst [vmem:[#allocation13_spill] sm:$0xff] %v11426_v44  ;;  %14941 = vst [vmem:[#allocation18_spill] sm:$0xff] %v11432_v16  ;;  %v14947_v39 = vrot.slane %v10077_v41, 1  ;;  %v3697_v50 = vrot.slane %v3006_v14, 1  ;;  %v14952_v61 = vpack.c.bf16 %v14950_v47, %v14951_v30  ;;  %v14955_v62 = vrot.slane %v14828_v48, 2 }
 0x17f   :  { %14943 = vst [vmem:[#allocation14_spill] sm:$0xff] %v11438_v40  ;;  %8812 = vmatmul.mubr.msk.bf16.gmra.mxu1 %vm852_vm2, %v14946_v49  ;;  %v14953_v49 = vrot.slane %v10077_v41, 2  ;;  %v14958_v14 = vrot.slane %v14834_v2, 2  ;;  %v14961_v30 = vrot.slane %v10077_v41, 1  ;;  %v3015_v40 = vld [vmem:[#allocation2 + $0x70] sm:$0x3] }
 0x180   :  { %v11453_v20 = vsel %vm1225_vm5, %v14948_v4, %v14947_v39  ;;  %8815 = vmatprep.mubr.msk.bf16.mxu1 %vm852_vm2, %v14952_v61  ;;  %v11469_v38 = vsel %vm2281_vm6, %v14956_v21, %v14955_v62  ;;  %v4424_v39 = vrot.slane %v3009_v27, 2  ;;  %v14959_v4 = vrot.slane %v14835_v7, 2 }
 0x181   :  { %14949 = vst [vmem:[#allocation61_spill] sm:$0xff] %v11453_v20  ;;  %v11462_v35 = vsel %vm2281_vm6, %v14953_v49, %v4419_v59  ;;  %14957 = vst [vmem:[#allocation73_spill] sm:$0xff] %v11469_v38  ;;  %v11483_v59 = vsel %vm1225_vm5, %v14961_v30, %v3697_v50  ;;  %v4429_v49 = vrot.slane %v3012_v6, 2  ;;  %v14963_v21 = vrot.slane %v14828_v48, 1  ;;  %v14978_v20 = vld [vmem:[#allocation41_spill] sm:$0xff] }
 0x182   :  { %14954 = vst [vmem:[#allocation62_spill] sm:$0xff] %v11462_v35  ;;  %v11476_v47 = vsel %vm2281_vm6, %v14959_v4, %v14958_v14  ;;  %14962 = vst [vmem:[#allocation19_spill] sm:$0xff] %v11483_v59  ;;  %v14964_v62 = vrot.slane %v14829_v3, 1  ;;  %v14966_v4 = vrot.slane %v14828_v48, 2  ;;  %v3702_v41 = vrot.slane %v3009_v27, 1  ;;  %v14979_v59 = vld [vmem:[#allocation44_spill] sm:$0xff] }
 0x183   :  { %14960 = vst [vmem:[#allocation74_spill] sm:$0xff] %v11476_v47  ;;  %v14967_v50 = vrot.slane %v14834_v2, 1  ;;  %v14968_v30 = vrot.slane %v14835_v7, 1  ;;  %v3018_v3 = vld [vmem:[#allocation2 + $0x88] sm:$0x3]  ;;  %v14975_v7 = vrot.slane %v14871_v23, 2  ;;  %v14980_v44 = vpack.c.bf16 %v14978_v20, %v14979_v59 }
 0x184   :  { %v11490_v46 = vsel %vm1225_vm5, %v14964_v62, %v14963_v21  ;;  %v11497_v61 = vsel %vm2281_vm6, %v14966_v4, %v4424_v39  ;;  %v14970_v21 = vld [vmem:[#allocation37_spill] sm:$0xff]  ;;  %v14971_v62 = vld [vmem:[#allocation39_spill] sm:$0xff]  ;;  %v14973_v39 = vmov %v14958_v14  ;;  %v3707_v4 = vrot.slane %v3012_v6, 1 }
 0x185   :  { %14965 = vst [vmem:[#allocation20_spill] sm:$0xff] %v11490_v46  ;;  %v11504_v8 = vsel %vm1225_vm5, %v14968_v30, %v14967_v50  ;;  %v14972_v35 = vpack.c.bf16 %v14970_v21, %v14971_v62  ;;  %v11515_v27 = vsel %vm2281_vm6, %v14973_v39, %v4429_v49  ;;  %v14976_v50 = vrot.slane %v14872_v60, 2 }
 0x186   :  { %14969 = vst [vmem:[#allocation28_spill] sm:$0xff] %v11504_v8  ;;  %14974 = vst [vmem:[#allocation27_spill] sm:$0xff] %v11515_v27  ;;  %v14981_v14 = vrot.slane %v14828_v48, 1  ;;  %v4434_v6 = vrot.slane %v3015_v40, 2  ;;  %v14983_v39 = vrot.slane %v14878_v17, 2  ;;  %v14984_v38 = vrot.slane %v14879_v36, 2 }
 0x187   :  { %8884 = vmatmul.mubr.msk.bf16.gmra.mxu0 %vm852_vm2, %v14972_v35  ;;  %v11522_v30 = vsel %vm2281_vm6, %v14976_v50, %v14975_v7  ;;  %v4439_v48 = vrot.slane %v3018_v3, 2  ;;  %v3021_v27 = vld [vmem:[#allocation2 + $0xa0] sm:$0x3]  ;;  %v15000_v8 = vld [vmem:[#allocation54_spill] sm:$0xff] }
 0x188   :  { %14977 = vst [vmem:[#allocation84_spill] sm:$0xff] %v11522_v30  ;;  %8887 = vmatprep.mubr.msk.bf16.mxu0 %vm852_vm2, %v14980_v44  ;;  %v11533_v49 = vsel %vm1225_vm5, %v14981_v14, %v3702_v41  ;;  %v11540_v7 = vsel %vm2281_vm6, %v14984_v38, %v14983_v39  ;;  %v14985_v44 = vrot.slane %v14834_v2, 1  ;;  %v14986_v14 = vrot.slane %v14871_v23, 1 }
 0x189   :  { %14982 = vst [vmem:[#allocation25_spill] sm:$0xff] %v11533_v49  ;;  %v14987_v41 = vrot.slane %v14872_v60, 1  ;;  %v14989_v39 = vrot.slane %v14871_v23, 2  ;;  %v3712_v2 = vrot.slane %v3015_v40, 1  ;;  %v3024_v60 = vld [vmem:[#allocation2 + $0xb8] sm:$0x3] }
 0x18a   :  { %v11547_v35 = vsel %vm1225_vm5, %v14985_v44, %v3707_v4  ;;  %v14990_v4 = vrot.slane %v14878_v17, 1  ;;  %v14991_v44 = vrot.slane %v14879_v36, 1  ;;  %v14997_v36 = vrot.slane %v14926_v9, 2 }
 0x18b   :  { %v11554_v47 = vsel %vm1225_vm5, %v14987_v41, %v14986_v14  ;;  %v11561_v50 = vsel %vm2281_vm6, %v14989_v39, %v4434_v6  ;;  %v14993_v14 = vld [vmem:[#allocation53_spill] sm:$0xff]  ;;  %v14994_v41 = vld [vmem:[#allocation34_spill] sm:$0xff]  ;;  %v14996_v6 = vrot.slane %v14878_v17, 2  ;;  %v3717_v39 = vrot.slane %v3018_v3, 1 }
 0x18c   :  { %14988 = vst [vmem:[#allocation21_spill] sm:$0xff] %v11554_v47  ;;  %v11568_v46 = vsel %vm1225_vm5, %v14991_v44, %v14990_v4  ;;  %v14995_v49 = vpack.c.bf16 %v14993_v14, %v14994_v41  ;;  %v14998_v4 = vrot.slane %v14927_v58, 2  ;;  %v15001_v14 = vld [vmem:[#allocation43_spill] sm:$0xff]  ;;  %v15003_v38 = vrot.slane %v14871_v23, 1 }
 0x18d   :  { %14992 = vst [vmem:[#allocation26_spill] sm:$0xff] %v11568_v46  ;;  %v11579_v40 = vsel %vm2281_vm6, %v14996_v6, %v4439_v48  ;;  %v15002_v41 = vpack.c.bf16 %v15000_v8, %v15001_v14  ;;  %v4444_v3 = vrot.slane %v3021_v27, 2  ;;  %v15005_v6 = vrot.slane %v14932_v45, 2 }
 0x18e   :  { %8816 = vmatmul.mubr.msk.bf16.gmra.mxu1 %vm852_vm2, %v14995_v49  ;;  %v11586_v44 = vsel %vm2281_vm6, %v14998_v4, %v14997_v36  ;;  %v11597_v48 = vsel %vm1225_vm5, %v15003_v38, %v3712_v2  ;;  %v15006_v30 = vrot.slane %v14933_v12, 2  ;;  %v15008_v4 = vrot.slane %v14878_v17, 1  ;;  %v3027_v49 = vld [vmem:[#allocation2 + $0xd0] sm:$0x3] }
 0x18f   :  { %14999 = vst [vmem:[#allocation23_spill] sm:$0xff] %v11586_v44  ;;  %8819 = vmatprep.mubr.msk.bf16.mxu1 %vm852_vm2, %v15002_v41  ;;  %15004 = vst [vmem:[#allocation37_spill] sm:$0xff] %v11597_v48  ;;  %v4449_v23 = vrot.slane %v3024_v60, 2  ;;  %v15009_v38 = vrot.slane %v14926_v9, 1  ;;  %v15010_v2 = vrot.slane %v14927_v58, 1  ;;  %v3722_v17 = vrot.slane %v3021_v27, 1 }
 0x190   :  { %v11604_v36 = vsel %vm2281_vm6, %v15006_v30, %v15005_v6  ;;  %v11611_v14 = vsel %vm1225_vm5, %v15008_v4, %v3717_v39  ;;  %v15012_v6 = vrot.slane %v14926_v9, 2  ;;  %v15013_v39 = vrot.slane %v14932_v45, 1  ;;  %v3030_v58 = vld [vmem:[#allocation2 + $0xe8] sm:$0x3] }
 0x191   :  { %15007 = vst [vmem:[#allocation39_spill] sm:$0xff] %v11604_v36  ;;  %v11618_v41 = vsel %vm1225_vm5, %v15010_v2, %v15009_v38  ;;  %v15014_v4 = vrot.slane %v14933_v12, 1  ;;  %v15015_v38 = vld [vmem:[#allocation71_spill] sm:$0xff]  ;;  %v15016_v2 = vld [vmem:[#allocation70_spill] sm:$0xff]  ;;  %v15020_v12 = vrot.slane %v14970_v21, 2  ;;  %v15022_v46 = vpack.c.bf16 %v10876_v10, %v10874_v34 }
 0x192   :  { %15011 = vst [vmem:[#allocation41_spill] sm:$0xff] %v11618_v41  ;;  %v11625_v8 = vsel %vm2281_vm6, %v15012_v6, %v4444_v3  ;;  %v15017_v48 = vpack.c.bf16 %v15015_v38, %v15016_v2  ;;  %v15018_v3 = vrot.slane %v14932_v45, 2  ;;  %v3727_v6 = vrot.slane %v3024_v60, 1 }
 0x193   :  { %v11632_v47 = vsel %vm1225_vm5, %v15014_v4, %v15013_v39  ;;  %v15021_v39 = vrot.slane %v14971_v62, 2  ;;  %v15023_v30 = vrot.slane %v14926_v9, 1  ;;  %v4454_v60 = vrot.slane %v3027_v49, 2 }
 0x194   :  { %8888 = vmatmul.mubr.msk.bf16.gmra.mxu0 %vm852_vm2, %v15017_v48  ;;  %v11643_v27 = vsel %vm2281_vm6, %v15018_v3, %v4449_v23  ;;  %v15024_v3 = vrot.slane %v14978_v20, 2  ;;  %v15025_v44 = vrot.slane %v14979_v59, 2  ;;  %v4459_v9 = vrot.slane %v3030_v58, 2 }
 0x195   :  { %15019 = vst [vmem:[#allocation44_spill] sm:$0xff] %v11643_v27  ;;  %v11650_v4 = vsel %vm2281_vm6, %v15021_v39, %v15020_v12  ;;  %8891 = vmatprep.mubr.msk.bf16.mxu0 %vm852_vm2, %v15022_v46  ;;  %v11661_v23 = vsel %vm1225_vm5, %v15023_v30, %v3722_v17  ;;  %v15026_v46 = vrot.slane %v14932_v45, 1  ;;  %v15027_v30 = vrot.slane %v14970_v21, 1  ;;  %v3033_v27 = vld [vmem:[#allocation2 + $0x100] sm:$0x3] }
 0x196   :  { %v11668_v12 = vsel %vm2281_vm6, %v15025_v44, %v15024_v3  ;;  %v15028_v17 = vrot.slane %v14971_v62, 1  ;;  %v15030_v3 = vrot.slane %v14970_v21, 2  ;;  %v3732_v45 = vrot.slane %v3027_v49, 1  ;;  %v3036_v62 = vld [vmem:[#allocation2 + $0x118] sm:$0x3] }
 0x197   :  { %v11675_v48 = vsel %vm1225_vm5, %v15026_v46, %v3727_v6  ;;  %v15031_v6 = vrot.slane %v14978_v20, 1  ;;  %v15032_v46 = vrot.slane %v14979_v59, 1  ;;  %v15035_v59 = vrot.slane %v15015_v38, 2 }
 0x198   :  { %v11682_v36 = vsel %vm1225_vm5, %v15028_v17, %v15027_v30  ;;  %v11689_v39 = vsel %vm2281_vm6, %v15030_v3, %v4454_v60  ;;  %v15033_v30 = vpack.c.bf16 %v10943_v0, %v10770_v52  ;;  %v15034_v60 = vrot.slane %v14978_v20, 2  ;;  %v15038_v52 = vld [vmem:[#allocation75_spill] sm:$0xff] }
 0x199   :  { %15029 = vst [vmem:[#allocation53_spill] sm:$0xff] %v11682_v36  ;;  %v11696_v41 = vsel %vm1225_vm5, %v15032_v46, %v15031_v6  ;;  %v3737_v3 = vrot.slane %v3030_v58, 1  ;;  %v15036_v6 = vrot.slane %v15016_v2, 2  ;;  %v15039_v0 = vpack.c.bf16 %v10968_v37, %v15038_v52 }
 0x19a   :  { %8820 = vmatmul.mubr.msk.bf16.gmra.mxu1 %vm852_vm2, %v15033_v30  ;;  %v11707_v49 = vsel %vm2281_vm6, %v15034_v60, %v4459_v9  ;;  %v15040_v17 = vrot.slane %v14970_v21, 1  ;;  %v4464_v58 = vrot.slane %v3033_v27, 2  ;;  %v15041_v60 = vrot.slane %v10876_v10, 2  ;;  %v3039_v30 = vld [vmem:[#allocation2 + $0x130] sm:$0x3] }
 0x19b   :  { %v11714_v46 = vsel %vm2281_vm6, %v15036_v6, %v15035_v59  ;;  %8823 = vmatprep.mubr.msk.bf16.mxu1 %vm852_vm2, %v15039_v0  ;;  %v15042_v44 = vrot.slane %v10874_v34, 2  ;;  %v15044_v6 = vrot.slane %v14978_v20, 1  ;;  %v4469_v21 = vrot.slane %v3036_v62, 2 }
 0x19c   :  { %15037 = vst [vmem:[#allocation34_spill] sm:$0xff] %v11714_v46  ;;  %v11725_v9 = vsel %vm1225_vm5, %v15040_v17, %v3732_v45  ;;  %v15045_v45 = vrot.slane %v15015_v38, 1  ;;  %v15046_v17 = vrot.slane %v15016_v2, 1  ;;  %v3742_v20 = vrot.slane %v3033_v27, 1  ;;  %v3042_v2 = vld [vmem:[#allocation2 + $0x148] sm:$0x3] }
 0x19d   :  { %v11732_v59 = vsel %vm2281_vm6, %v15042_v44, %v15041_v60  ;;  %v11739_v52 = vsel %vm1225_vm5, %v15044_v6, %v3737_v3  ;;  %v15048_v60 = vrot.slane %v15015_v38, 2  ;;  %v15049_v3 = vrot.slane %v10876_v10, 1 }
 0x19e   :  { %15043 = vst [vmem:[#allocation54_spill] sm:$0xff] %v11732_v59  ;;  %v11746_v0 = vsel %vm1225_vm5, %v15046_v17, %v15045_v45  ;;  %v15050_v6 = vrot.slane %v10874_v34, 1  ;;  %v15051_v45 = vpack.c.bf16 %v10930_v55, %v10957_v54  ;;  %v15054_v34 = vrot.slane %v10930_v55, 2 }
 0x19f   :  { %15047 = vst [vmem:[#allocation43_spill] sm:$0xff] %v11746_v0  ;;  %v11753_v37 = vsel %vm2281_vm6, %v15048_v60, %v4464_v58  ;;  %v15052_v58 = vrot.slane %v10876_v10, 2  ;;  %v3747_v60 = vrot.slane %v3036_v62, 1  ;;  %v15057_v44 = vpack.c.bf16 %v10977_v19, %v10989_v11 }
 0x1a0   :  { %v11760_v36 = vsel %vm1225_vm5, %v15050_v6, %v15049_v3  ;;  %8892 = vmatmul.mubr.msk.bf16.gmra.mxu0 %vm852_vm2, %v15051_v45  ;;  %v15055_v3 = vrot.slane %v10957_v54, 2  ;;  %v15058_v17 = vrot.slane %v15015_v38, 1  ;;  %v4474_v62 = vrot.slane %v3039_v30, 2 }
 0x1a1   :  { %v11771_v27 = vsel %vm2281_vm6, %v15052_v58, %v4469_v21  ;;  %8895 = vmatprep.mubr.msk.bf16.mxu0 %vm852_vm2, %v15057_v44  ;;  %v15059_v58 = vrot.slane %v10977_v19, 2  ;;  %v15060_v46 = vrot.slane %v10989_v11, 2  ;;  %v15061_v44 = vrot.slane %v10876_v10, 1 }
 0x1a2   :  { %15053 = vst [vmem:[#allocation71_spill] sm:$0xff] %v11771_v27  ;;  %v11778_v6 = vsel %vm2281_vm6, %v15055_v3, %v15054_v34  ;;  %v11789_v21 = vsel %vm1225_vm5, %v15058_v17, %v3742_v20  ;;  %v4479_v38 = vrot.slane %v3042_v2, 2  ;;  %v15062_v20 = vrot.slane %v10930_v55, 1  ;;  %v3045_v27 = vld [vmem:[#allocation2 + $0x160] sm:$0x3] }
 0x1a3   :  { %15056 = vst [vmem:[#allocation70_spill] sm:$0xff] %v11778_v6  ;;  %v11796_v34 = vsel %vm2281_vm6, %v15060_v46, %v15059_v58  ;;  %v11803_v45 = vsel %vm1225_vm5, %v15061_v44, %v3747_v60  ;;  %v15063_v17 = vrot.slane %v10957_v54, 1  ;;  %v15065_v58 = vrot.slane %v10930_v55, 2  ;;  %v3048_v54 = vld [vmem:[#allocation2 + $0x178] sm:$0x3]  ;;  %v15080_v6 = vld [vmem:[#allocation101_spill] sm:$0xff] }
 0x1a4   :  { %v3752_v10 = vrot.slane %v3039_v30, 1  ;;  %v15067_v60 = vrot.slane %v10977_v19, 1  ;;  %v15068_v44 = vrot.slane %v10989_v11, 1  ;;  %v15071_v11 = vrot.slane %v11041_v42, 2  ;;  %v15074_v46 = vld [vmem:[#allocation98_spill] sm:$0xff] }
 0x1a5   :  { %v11810_v59 = vsel %vm1225_vm5, %v15063_v17, %v15062_v20  ;;  %v11817_v3 = vsel %vm2281_vm6, %v15065_v58, %v4474_v62  ;;  %v15069_v20 = vpack.c.bf16 %v11020_v29, %v10920_v5  ;;  %v15070_v62 = vrot.slane %v10977_v19, 2  ;;  %v15075_v5 = vld [vmem:[#allocation95_spill] sm:$0xff] }
 0x1a6   :  { %15064 = vst [vmem:[#allocation75_spill] sm:$0xff] %v11810_v59  ;;  %15066 = vst [vmem:[#allocation107_spill] sm:$0xff] %v11817_v3  ;;  %v11824_v0 = vsel %vm1225_vm5, %v15068_v44, %v15067_v60  ;;  %v3757_v58 = vrot.slane %v3042_v2, 1  ;;  %v15072_v60 = vrot.slane %v11039_v18, 2  ;;  %v15076_v29 = vpack.c.bf16 %v15074_v46, %v15075_v5 }
 0x1a7   :  { %8824 = vmatmul.mubr.msk.bf16.gmra.mxu1 %vm852_vm2, %v15069_v20  ;;  %v11835_v30 = vsel %vm2281_vm6, %v15070_v62, %v4479_v38  ;;  %v15077_v17 = vrot.slane %v10930_v55, 1  ;;  %v4484_v2 = vrot.slane %v3045_v27, 2  ;;  %v15079_v62 = vrot.slane %v11069_v1, 2  ;;  %v3051_v20 = vld [vmem:[#allocation2 + $0x190] sm:$0x3] }
 0x1a8   :  { %v11842_v44 = vsel %vm2281_vm6, %v15072_v60, %v15071_v11  ;;  %8827 = vmatprep.mubr.msk.bf16.mxu1 %vm852_vm2, %v15076_v29  ;;  %v15081_v3 = vrot.slane %v15080_v6, 2  ;;  %v15083_v60 = vrot.slane %v10977_v19, 1  ;;  %v4489_v55 = vrot.slane %v3048_v54, 2 }
 0x1a9   :  { %15073 = vst [vmem:[#allocation108_spill] sm:$0xff] %v11842_v44  ;;  %v11853_v38 = vsel %vm1225_vm5, %v15077_v17, %v3752_v10  ;;  %v15084_v10 = vrot.slane %v11041_v42, 1  ;;  %v15085_v17 = vrot.slane %v11039_v18, 1  ;;  %v3762_v19 = vrot.slane %v3045_v27, 1 }
 0x1aa   :  { %15078 = vst [vmem:[#allocation98_spill] sm:$0xff] %v11853_v38  ;;  %v11860_v11 = vsel %vm2281_vm6, %v15081_v3, %v15079_v62  ;;  %v11867_v5 = vsel %vm1225_vm5, %v15083_v60, %v3757_v58  ;;  %v15087_v62 = vrot.slane %v11041_v42, 2  ;;  %v15088_v58 = vrot.slane %v11069_v1, 1  ;;  %v3054_v38 = vld [vmem:[#allocation2 + $0x1d8] sm:$0x3] }
 0x1ab   :  { %15082 = vst [vmem:[#allocation95_spill] sm:$0xff] %v11860_v11  ;;  %v11874_v29 = vsel %vm1225_vm5, %v15085_v17, %v15084_v10  ;;  %v15089_v60 = vrot.slane %v15080_v6, 1  ;;  %v15091_v10 = vpack.c.bf16 %v11041_v42, %v11039_v18  ;;  %v15094_v3 = vrot.slane %v11104_v53, 2  ;;  %v3057_v11 = vld [vmem:[#allocation2 + $0x1f0] sm:$0x3] }
 0x1ac   :  { %15086 = vst [vmem:[#allocation101_spill] sm:$0xff] %v11874_v29  ;;  %v11881_v46 = vsel %vm2281_vm6, %v15087_v62, %v4484_v2  ;;  %v15092_v2 = vrot.slane %v11069_v1, 2  ;;  %v3767_v62 = vrot.slane %v3048_v54, 1  ;;  %v15097_v18 = vpack.c.bf16 %v11069_v1, %v15080_v6 }
 0x1ad   :  { %v11888_v59 = vsel %vm1225_vm5, %v15089_v60, %v15088_v58  ;;  %8896 = vmatmul.mubr.msk.bf16.gmra.mxu0 %vm852_vm2, %v15091_v10  ;;  %v15095_v58 = vrot.slane %v11102_v25, 2  ;;  %v15098_v17 = vrot.slane %v11041_v42, 1  ;;  %v4494_v54 = vrot.slane %v3051_v20, 2 }
 0x1ae   :  { %15090 = vst [vmem:[#allocation109_spill] sm:$0xff] %v11888_v59  ;;  %v11899_v27 = vsel %vm2281_vm6, %v15092_v2, %v4489_v55  ;;  %8899 = vmatprep.mubr.msk.bf16.mxu0 %vm852_vm2, %v15097_v18  ;;  %v15100_v2 = vrot.slane %v11133_v28, 2  ;;  %v15101_v44 = vrot.slane %v11146_v63, 2  ;;  %v4499_v42 = vrot.slane %v3054_v38, 2 }
 0x1af   :  { %15093 = vst [vmem:[#allocation110_spill] sm:$0xff] %v11899_v27  ;;  %v11906_v60 = vsel %vm2281_vm6, %v15095_v58, %v15094_v3  ;;  %v11917_v55 = vsel %vm1225_vm5, %v15098_v17, %v3762_v19  ;;  %v15103_v58 = vrot.slane %v11069_v1, 1  ;;  %v15105_v19 = vrot.slane %v11104_v53, 1 }
 0x1b0   :  { %15096 = vst [vmem:[#allocation111_spill] sm:$0xff] %v11906_v60  ;;  %15099 = vst [vmem:[#allocation112_spill] sm:$0xff] %v11917_v55  ;;  %v11924_v3 = vsel %vm2281_vm6, %v15101_v44, %v15100_v2  ;;  %v15106_v17 = vrot.slane %v11102_v25, 1  ;;  %v15108_v2 = vrot.slane %v11104_v53, 2  ;;  %v3772_v1 = vrot.slane %v3051_v20, 1  ;;  %v11958_v44 = vld [vmem:[#allocation2 + $0x248] sm:$0xff] }
 0x1b1   :  { %15102 = vst [vmem:[#allocation113_spill] sm:$0xff] %v11924_v3  ;;  %v11931_v18 = vsel %vm1225_vm5, %v15103_v58, %v3767_v62  ;;  %v15110_v62 = vrot.slane %v11133_v28, 1  ;;  %v15111_v58 = vrot.slane %v11146_v63, 1  ;;  %v3060_v55 = vld [vmem:[#allocation2 + $0x208] sm:$0x3]  ;;  %v15116_v20 = vrot.slane %v11133_v28, 2 }
 0x1b2   :  { %15104 = vst [vmem:[#allocation114_spill] sm:$0xff] %v11931_v18  ;;  %v11938_v10 = vsel %vm1225_vm5, %v15106_v17, %v15105_v19  ;;  %v11945_v6 = vsel %vm2281_vm6, %v15108_v2, %v4494_v54  ;;  %v15113_v19 = vld [vmem:[#allocation104_spill] sm:$0xff]  ;;  %v3777_v59 = vrot.slane %v3054_v38, 1  ;;  %v15124_v60 = vrot.slane %v11104_v53, 1  ;;  %v3063_v3 = vld [vmem:[#allocation2 + $0x220] sm:$0x3] }
 0x1b3   :  { %15107 = vst [vmem:[#allocation115_spill] sm:$0xff] %v11938_v10  ;;  %15109 = vst [vmem:[#allocation116_spill] sm:$0xff] %v11945_v6  ;;  %v11952_v29 = vsel %vm1225_vm5, %v15111_v58, %v15110_v62  ;;  %v15114_v17 = vld [vmem:[#allocation100_spill] sm:$0xff]  ;;  %v11965_v2 = vsel %vm2281_vm6, %v15116_v20, %v4499_v42  ;;  %v15118_v62 = vrot.slane %v11195_v31, 2  ;;  %v15119_v58 = vrot.slane %v11193_v24, 2 }
 0x1b4   :  { %15112 = vst [vmem:[#allocation117_spill] sm:$0xff] %v11952_v29  ;;  %v15115_v27 = vpack.c.bf16 %v15113_v19, %v15114_v17  ;;  %15117 = vst [vmem:[#allocation104_spill] sm:$0xff] %v11965_v2  ;;  %v15121_v19 = vld [vmem:[#allocation105_spill] sm:$0xff]  ;;  %v11983_v42 = vsel %vm1225_vm5, %v15124_v60, %v3772_v1  ;;  %v4504_v38 = vrot.slane %v3057_v11, 2  ;;  %v11999_v60 = vld [vmem:[#allocation2 + $0x240] sm:$0xff]  ;;  %v3800_v1 = vrot.slane %v11958_v44, 1 }
 0x1b5   :  { %v11972_v18 = vsel %vm2281_vm6, %v15119_v58, %v15118_v62  ;;  %15125 = vst [vmem:[#allocation105_spill] sm:$0xff] %v11983_v42  ;;  %v15126_v62 = vrot.slane %v11133_v28, 1  ;;  %v15131_v10 = vrot.slane %v11195_v31, 2  ;;  %v15133_v42 = vpack.c.bf16 %v11104_v53, %v11102_v25  ;;  %v15134_v2 = vld [vmem:[#allocation49_spill] sm:$0xff] }
 0x1b6   :  { %8828 = vmatmul.mubr.msk.bf16.gmra.mxu1 %vm852_vm2, %v15115_v27  ;;  %15120 = vst [vmem:[#allocation100_spill] sm:$0xff] %v11972_v18  ;;  %v15122_v27 = vld [vmem:[#allocation102_spill] sm:$0xff]  ;;  %v15136_v29 = vrot.slane %v11367_v15, 2  ;;  %v15139_v25 = vpack.c.bf16 %v11133_v28, %v11146_v63  ;;  %v15140_v53 = vld [vmem:[#allocation5_spill] sm:$0xff]  ;;  %v15142_v18 = vrot.slane %v11367_v15, 1  ;;  %v15143_v28 = vrot.slane %v11346_v22, 1 }
 0x1b7   :  { %v15123_v17 = vpack.c.bf16 %v15121_v19, %v15122_v27  ;;  %v11990_v58 = vsel %vm1225_vm5, %v15126_v62, %v3777_v59  ;;  %v4509_v19 = vrot.slane %v3060_v55, 2  ;;  %v15128_v27 = vrot.slane %v11195_v31, 1  ;;  %v3066_v62 = vld [vmem:[#allocation2 + $0x238] sm:$0x3]  ;;  %8900 = vmatmul.mubr.msk.bf16.gmra.mxu0 %vm852_vm2, %v15133_v42 }
 0x1b8   :  { %15127 = vst [vmem:[#allocation102_spill] sm:$0xff] %v11990_v58  ;;  %v12007_v59 = vsel %vm2281_vm6, %v15131_v10, %v4504_v38  ;;  %v3782_v55 = vrot.slane %v3057_v11, 1  ;;  %v15137_v10 = vrot.slane %v11346_v22, 2  ;;  %8903 = vmatprep.mubr.msk.bf16.mxu0 %vm852_vm2, %v15139_v25  ;;  %v15141_v38 = vrot.slane %v11195_v31, 1  ;;  %v3069_v25 = vld [vmem:[#allocation2 + $0x250] sm:$0x3] }
 0x1b9   :  { %8831 = vmatprep.mubr.msk.bf16.mxu1 %vm852_vm2, %v15123_v17  ;;  %v15129_v17 = vrot.slane %v11193_v24, 1  ;;  %15132 = vst [vmem:[#allocation119_spill] sm:$0xff] %v12007_v59  ;;  %v12018_v20 = vsel %vm2281_vm6, %v15134_v2, %v4509_v19  ;;  %v4514_v19 = vrot.slane %v3063_v3, 2  ;;  %v12046_v63 = vsel %vm1225_vm5, %v15143_v28, %v15142_v18  ;;  %v15146_v59 = vld [vmem:[#allocation3_spill] sm:$0xff]  ;;  %v15147_v58 = vld [vmem:[#allocation106_spill] sm:$0xff]  ;;  %v15149_v18 = vld [vmem:[#allocation60_spill] sm:$0xff] }
 0x1ba   :  { %15135 = vst [vmem:[#allocation49_spill] sm:$0xff] %v12018_v20  ;;  %v12025_v11 = vsel %vm2281_vm6, %v15137_v10, %v15136_v29  ;;  %v12036_v2 = vsel %vm1225_vm5, %v15141_v38, %v3782_v55  ;;  %v4519_v10 = vrot.slane %v3066_v62, 2  ;;  %15144 = vst [vmem:[#allocation5_spill] sm:$0xff] %v12046_v63  ;;  %v15145_v42 = vmov %v15136_v29  ;;  %v3072_v20 = vld [vmem:[#allocation2 + $0x268] sm:$0x3]  ;;  %v15190_v63 = vld [vmem:[#allocation51_spill] sm:$0xff] }
 0x1bb   :  { %v11997_v54 = vsel %vm1225_vm5, %v15129_v17, %v15128_v27  ;;  %v4522_v27 = vrot.slane %v11958_v44, 2  ;;  %15138 = vst [vmem:[#allocation120_spill] sm:$0xff] %v12025_v11  ;;  %v4521_v17 = vrot.slane %v11999_v60, 2  ;;  %v12051_v55 = vsel %vm2281_vm6, %v15145_v42, %v4514_v19  ;;  %v15152_v42 = vld [vmem:[#allocation22_spill] sm:$0xff]  ;;  %v8737_v11 = vpop.f32.mrf.mxu0 }
 0x1bc   :  { %15130 = vst [vmem:[#allocation118_spill] sm:$0xff] %v11997_v54  ;;  %v3792_v38 = vrot.slane %v3063_v3, 1  ;;  %v15148_v6 = vpack.c.bf16 %v15146_v59, %v15147_v58  ;;  %v3799_v62 = vrot.slane %v11999_v60, 1  ;;  %v12062_v28 = vsel %vm2281_vm6, %v15149_v18, %v4519_v10  ;;  %v15153_v3 = vld [vmem:[#allocation4_spill] sm:$0xff] }
 0x1bd   :  { %15150 = vst [vmem:[#allocation3_spill] sm:$0xff] %v12062_v28  ;;  %v12065_v54 = vsel %vm2281_vm6, %v4521_v17, %v4522_v27  ;;  %v15154_v19 = vpack.c.bf16 %v15152_v42, %v15153_v3  ;;  %v15155_v58 = vrot.slane %v11367_v15, 1  ;;  %v4524_v29 = vrot.slane %v3069_v25, 2  ;;  %v3075_v3 = vld [vmem:[#allocation2 + $0x280] sm:$0x3]  ;;  %v15164_v17 = vld [vmem:[#allocation9_spill] sm:$0xff] }
 0x1be   :  { %8832 = vmatmul.mubr.msk.bf16.gmra.mxu1 %vm852_vm2, %v15148_v6  ;;  %15151 = vst [vmem:[#allocation106_spill] sm:$0xff] %v12065_v54  ;;  %v3117_v10 = vpack.c.bf16 %v11195_v31, %v11193_v24  ;;  %v4529_v18 = vrot.slane %v3072_v20, 2  ;;  %v12083_v42 = vsel %vm1225_vm5, %v3799_v62, %v3800_v1  ;;  %v3802_v6 = vrot.slane %v3069_v25, 1  ;;  %v3078_v28 = vld [vmem:[#allocation2 + $0x298] sm:$0x3]  ;;  %v15160_v31 = vld [vmem:[#allocation35_spill] sm:$0xff]  ;;  %v2026_v25 = vpop.f32.mrf.mxu0 }
 0x1bf   :  { %8835 = vmatprep.mubr.msk.bf16.mxu1 %vm852_vm2, %v15154_v19  ;;  %v12076_v59 = vsel %vm1225_vm5, %v15155_v58, %v3792_v38  ;;  %15157 = vst [vmem:[#allocation22_spill] sm:$0xff] %v12083_v42  ;;  %v12086_v19 = vsel %vm2281_vm6, %v4522_v27, %v4524_v29  ;;  %v4534_v29 = vrot.slane %v3075_v3, 2  ;;  %v4539_v58 = vrot.slane %v3078_v28, 2  ;;  %v8669_v38 = vpop.f32.mrf.mxu1  ;;  %v15167_v62 = vld [vmem:[#allocation6_spill] sm:$0xff] }
 0x1c0   :  { %15156 = vst [vmem:[#allocation60_spill] sm:$0xff] %v12076_v59  ;;  %15158 = vst [vmem:[#allocation4_spill] sm:$0xff] %v12086_v19  ;;  %8904 = vmatmul.mubr.msk.bf16.gmra.mxu0 %vm852_vm2, %v3117_v10  ;;  %v12093_v24 = vsel %vm2281_vm6, %v10800_v51, %v4529_v18  ;;  %v12100_v27 = vsel %vm1225_vm5, %v3800_v1, %v3802_v6  ;;  %v3081_v10 = vld [vmem:[#allocation2 + $0x2b0] sm:$0x3]  ;;  %v3084_v18 = vld [vmem:[#allocation2 + $0x2c8] sm:$0x3]  ;;  %v8738_v1 = vpop.f32.mrf.mxu0  ;;  %v12118_v28 = vadd.f32 %v8737_v11, %v8669_v38 }
 0x1c1   :  { %15159 = vst [vmem:[#allocation121_spill] sm:$0xff] %v12093_v24  ;;  %8907 = vmatprep.mubr.msk.bf16.mxu0 %vm852_vm2, %v15160_v31  ;;  %15161 = vst [vmem:[#allocation35_spill] sm:$0xff] %v12100_v27  ;;  %v12106_v51 = vsel %vm2281_vm6, %v10759_v33, %v4534_v29  ;;  %v15163_v31 = vld [vmem:[#allocation24_spill] sm:$0xff]  ;;  %v12116_v3 = vsel %vm2281_vm6, %v14893_v26, %v4539_v58  ;;  %v3119_v6 = vpack.c.bf16 %v11367_v15, %v11346_v22  ;;  %v3087_v38 = vld [vmem:[#allocation2 + $0x2e0] sm:$0x3] }
 0x1c2   :  { %15162 = vst [vmem:[#allocation122_spill] sm:$0xff] %v12106_v51  ;;  %v15165_v54 = vpack.c.bf16 %v15163_v31, %v15164_v17  ;;  %15166 = vst [vmem:[#allocation24_spill] sm:$0xff] %v12116_v3  ;;  %v15168_v33 = vld [vmem:[#allocation8_spill] sm:$0xff]  ;;  %v4544_v31 = vrot.slane %v3081_v10, 2  ;;  %v2029_v20 = vpop.f32.mrf.mxu0  ;;  %v4549_v51 = vrot.slane %v3084_v18, 2  ;;  %v15176_v22 = vld [vmem:[#allocation46_spill] sm:$0xff] }
 0x1c3   :  { %v15169_v29 = vpack.c.bf16 %v15167_v62, %v15168_v33  ;;  %v15170_v26 = vld [vmem:[#allocation76_spill] sm:$0xff]  ;;  %v3090_v62 = vld [vmem:[#allocation2 + $0x2f8] sm:$0x3]  ;;  %v3093_v24 = vld [vmem:[#allocation2 + $0x310] sm:$0x3] }
 0x1c4   :  { %v12132_v11 = vsel %vm2281_vm6, %v15170_v26, %v4544_v31  ;;  %v8741_v33 = vpop.f32.mrf.mxu0  ;;  %v15173_v17 = vld [vmem:[#allocation92_spill] sm:$0xff]  ;;  %v4554_v26 = vrot.slane %v3087_v38, 2  ;;  %v4559_v27 = vrot.slane %v3090_v62, 2  ;;  %v15183_v18 = vld [vmem:[#allocation94_spill] sm:$0xff]  ;;  %v15192_v59 = vld [vmem:[#allocation93_spill] sm:$0xff] }
 0x1c5   :  { %15171 = vst [vmem:[#allocation9_spill] sm:$0xff] %v12132_v11  ;;  %v12139_v3 = vsel %vm2281_vm6, %v15173_v17, %v4549_v51  ;;  %v15179_v11 = vld [vmem:[#allocation29_spill] sm:$0xff]  ;;  %v12153_v17 = vld [vmem:[#allocation2 + $0x338] sm:$0xff] }
 0x1c6   :  { %8836 = vmatmul.mubr.msk.bf16.gmra.mxu1 %vm852_vm2, %v15165_v54  ;;  %v1629_v54 = vpop.f32.mrf.mxu1  ;;  %15174 = vst [vmem:[#allocation6_spill] sm:$0xff] %v12139_v3  ;;  %v15180_v51 = vpack.c.bf16 %v15179_v11, %v15140_v53  ;;  %v12161_v38 = vsel %vm2281_vm6, %v15183_v18, %v4559_v27  ;;  %v15187_v3 = vld [vmem:[#allocation10_spill] sm:$0xff]  ;;  %v3121_v27 = vpack.c.bf16 %v11958_v44, %v11999_v60  ;;  %v12175_v18 = vld [vmem:[#allocation2 + $0x330] sm:$0xff]  ;;  %v15195_v60 = vld [vmem:[#allocation55_spill] sm:$0xff] }
 0x1c7   :  { %8839 = vmatprep.mubr.msk.bf16.mxu1 %vm852_vm2, %v15169_v29  ;;  %v12128_v42 = vadd.f32 %v2026_v25, %v1629_v54  ;;  %v15172_v29 = vld [vmem:[#allocation17_spill] sm:$0xff]  ;;  %v15177_v25 = vld [vmem:[#allocation16_spill] sm:$0xff]  ;;  %v2042_v54 = vpop.f32.mrf.mxu0  ;;  %15184 = vst [vmem:[#allocation92_spill] sm:$0xff] %v12161_v38  ;;  %v15189_v11 = vld [vmem:[#allocation42_spill] sm:$0xff] }
 0x1c8   :  { %v8670_v58 = vpop.f32.mrf.mxu1  ;;  %8908 = vmatmul.mubr.msk.bf16.gmra.mxu0 %vm852_vm2, %v3119_v6 }
 0x1c9   :  { %v12141_v15 = vadd.f32 %v8738_v1, %v8670_v58  ;;  %8911 = vmatprep.mubr.msk.bf16.mxu0 %vm852_vm2, %v15176_v22  ;;  %v8742_v1 = vpop.f32.mrf.mxu0  ;;  %v15181_v58 = vld [vmem:[#allocation85_spill] sm:$0xff] }
 0x1ca   :  { %v1632_v31 = vpop.f32.mrf.mxu1  ;;  %v12157_v22 = vsel %vm2281_vm6, %v15181_v58, %v4554_v26 }
 0x1cb   :  { %15175 = vst [vmem:[#allocation8_spill] sm:$0xff] %v12141_v15  ;;  %v12147_v6 = vadd.f32 %v2029_v20, %v1632_v31  ;;  %15182 = vst [vmem:[#allocation17_spill] sm:$0xff] %v12157_v22  ;;  %v3096_v20 = vld [vmem:[#allocation2 + $0x328] sm:$0x3]  ;;  %v15186_v31 = vld [vmem:[#allocation33_spill] sm:$0xff]  ;;  %v2045_v58 = vpop.f32.mrf.mxu0 }
 0x1cc   :  { %v8673_v10 = vpop.f32.mrf.mxu1  ;;  %v15188_v19 = vpack.c.bf16 %v15186_v31, %v15187_v3  ;;  %v4572_v3 = vrot.slane %v12153_v17, 2  ;;  %v4569_v31 = vrot.slane %v3096_v20, 2  ;;  %v3099_v22 = vld [vmem:[#allocation2 + $0x340] sm:$0x3] }
 0x1cd   :  { %15178 = vst [vmem:[#allocation76_spill] sm:$0xff] %v12147_v6  ;;  %v12163_v62 = vadd.f32 %v8741_v33, %v8673_v10  ;;  %v4564_v33 = vrot.slane %v3093_v24, 2  ;;  %v4571_v24 = vrot.slane %v12175_v18, 2  ;;  %v15196_v20 = vld [vmem:[#allocation103_spill] sm:$0xff]  ;;  %v15200_v6 = vld [vmem:[#allocation30_spill] sm:$0xff] }
 0x1ce   :  { %8840 = vmatmul.mubr.msk.bf16.gmra.mxu1 %vm852_vm2, %v15180_v51  ;;  %v1645_v26 = vpop.f32.mrf.mxu1  ;;  %v3850_v51 = vrot.slane %v12153_v17, 1  ;;  %v15204_v15 = vld [vmem:[#allocation31_spill] sm:$0xff] }
 0x1cf   :  { %15185 = vst [vmem:[#allocation46_spill] sm:$0xff] %v12163_v62  ;;  %8843 = vmatprep.mubr.msk.bf16.mxu1 %vm852_vm2, %v15188_v19  ;;  %v12177_v10 = vadd.f32 %v2042_v54, %v1645_v26  ;;  %v8745_v62 = vpop.f32.mrf.mxu0  ;;  %v12184_v38 = vsel %vm2281_vm6, %v15192_v59, %v4564_v33  ;;  %v12195_v26 = vsel %vm2281_vm6, %v15196_v20, %v4569_v31 }
 0x1d0   :  { %v8674_v19 = vpop.f32.mrf.mxu1  ;;  %8912 = vmatmul.mubr.msk.bf16.gmra.mxu0 %vm852_vm2, %v3121_v27  ;;  %15193 = vst [vmem:[#allocation29_spill] sm:$0xff] %v12184_v38  ;;  %15197 = vst [vmem:[#allocation94_spill] sm:$0xff] %v12195_v26  ;;  %v15201_v54 = vpack.c.bf16 %v15200_v6, %v11260_v56  ;;  %v15203_v38 = vld [vmem:[#allocation32_spill] sm:$0xff] }
 0x1d1   :  { %15191 = vst [vmem:[#allocation16_spill] sm:$0xff] %v12177_v10  ;;  %v12186_v44 = vadd.f32 %v8742_v1, %v8674_v19  ;;  %8915 = vmatprep.mubr.msk.bf16.mxu0 %vm852_vm2, %v15195_v60  ;;  %v2058_v10 = vpop.f32.mrf.mxu0  ;;  %v3849_v1 = vrot.slane %v12175_v18, 1  ;;  %v12203_v19 = vsel %vm2281_vm6, %v4571_v24, %v4572_v3  ;;  %v4574_v60 = vrot.slane %v3099_v22, 2 }
 0x1d2   :  { %v1648_v27 = vpop.f32.mrf.mxu1  ;;  %15199 = vst [vmem:[#allocation10_spill] sm:$0xff] %v12203_v19  ;;  %v15205_v59 = vpack.c.bf16 %v15203_v38, %v15204_v15 }
 0x1d3   :  { %15194 = vst [vmem:[#allocation85_spill] sm:$0xff] %v12186_v44  ;;  %v12199_v33 = vadd.f32 %v2045_v58, %v1648_v27  ;;  %v8746_v31 = vpop.f32.mrf.mxu0  ;;  %v12216_v58 = vsel %vm2281_vm6, %v4572_v3, %v4574_v60  ;;  %v12219_v24 = vsel %vm1225_vm5, %v3849_v1, %v3850_v51  ;;  %v15210_v3 = vld [vmem:[#allocation66_spill] sm:$0xff] }
 0x1d4   :  { %v8677_v44 = vpop.f32.mrf.mxu1  ;;  %15206 = vst [vmem:[#allocation93_spill] sm:$0xff] %v12216_v58  ;;  %15207 = vst [vmem:[#allocation55_spill] sm:$0xff] %v12219_v24  ;;  %v15215_v24 = vld [vmem:[#allocation67_spill] sm:$0xff]  ;;  %v15222_v58 = vld [vmem:[#allocation50_spill] sm:$0xff] }
 0x1d5   :  { %15198 = vst [vmem:[#allocation33_spill] sm:$0xff] %v12199_v33  ;;  %v12209_v20 = vadd.f32 %v8745_v62, %v8677_v44  ;;  %v2061_v26 = vpop.f32.mrf.mxu0 }
 0x1d6   :  { %8844 = vmatmul.mubr.msk.bf16.gmra.mxu1 %vm852_vm2, %v15201_v54  ;;  %v1661_v27 = vpop.f32.mrf.mxu1  ;;  %v3852_v54 = vrot.slane %v3099_v22, 1 }
 0x1d7   :  { %15202 = vst [vmem:[#allocation42_spill] sm:$0xff] %v12209_v20  ;;  %8847 = vmatprep.mubr.msk.bf16.mxu1 %vm852_vm2, %v15205_v59  ;;  %v12223_v33 = vadd.f32 %v2058_v10, %v1661_v27  ;;  %v8749_v44 = vpop.f32.mrf.mxu0  ;;  %v15208_v20 = vld [vmem:[#allocation57_spill] sm:$0xff]  ;;  %v15211_v27 = vld [vmem:[#allocation12_spill] sm:$0xff] }
 0x1d8   :  { %v8678_v62 = vpop.f32.mrf.mxu1  ;;  %8916 = vmatmul.mubr.msk.bf16.gmra.mxu0 %vm852_vm2, %v15208_v20  ;;  %v12228_v15 = vsel %vm1225_vm5, %v3850_v51, %v3852_v54  ;;  %v15212_v6 = vpack.c.bf16 %v15211_v27, %v11281_v32 }
 0x1d9   :  { %15209 = vst [vmem:[#allocation103_spill] sm:$0xff] %v12228_v15  ;;  %v12230_v38 = vadd.f32 %v8746_v31, %v8678_v62  ;;  %8919 = vmatprep.mubr.msk.bf16.mxu0 %vm852_vm2, %v15210_v3  ;;  %v2074_v22 = vpop.f32.mrf.mxu0  ;;  %v15213_v31 = vld [vmem:[#allocation45_spill] sm:$0xff] }
 0x1da   :  { %v1664_v1 = vpop.f32.mrf.mxu1  ;;  %v15214_v54 = vpack.c.bf16 %v15213_v31, %v11292_v57 }
 0x1db   :  { %v12236_v10 = vadd.f32 %v2061_v26, %v1664_v1  ;;  %v8750_v51 = vpop.f32.mrf.mxu0 }
 0x1dc   :  { %v8681_v60 = vpop.f32.mrf.mxu1 }
 0x1dd   :  { %v12242_v20 = vadd.f32 %v8749_v44, %v8681_v60  ;;  %v2077_v3 = vpop.f32.mrf.mxu0 }
 0x1de   :  { %8848 = vmatmul.mubr.msk.bf16.gmra.mxu1 %vm852_vm2, %v15212_v6  ;;  %v1677_v62 = vpop.f32.mrf.mxu1  ;;  %v15217_v6 = vld [vmem:[#allocation79_spill] sm:$0xff] }
 0x1df   :  { %8851 = vmatprep.mubr.msk.bf16.mxu1 %vm852_vm2, %v15214_v54  ;;  %v12248_v59 = vadd.f32 %v2074_v22, %v1677_v62  ;;  %v8753_v1 = vpop.f32.mrf.mxu0  ;;  %v15219_v54 = vld [vmem:[#allocation11_spill] sm:$0xff] }
 0x1e0   :  { %v8682_v26 = vpop.f32.mrf.mxu1  ;;  %8920 = vmatmul.mubr.msk.bf16.gmra.mxu0 %vm852_vm2, %v15215_v24  ;;  %v15220_v19 = vpack.c.bf16 %v15219_v54, %v11307_v13  ;;  %v15223_v24 = vpack.c.bf16 %v15222_v58, %v15172_v29 }
 0x1e1   :  { %v12252_v27 = vadd.f32 %v8750_v51, %v8682_v26  ;;  %8923 = vmatprep.mubr.msk.bf16.mxu0 %vm852_vm2, %v15217_v6  ;;  %v2090_v60 = vpop.f32.mrf.mxu0 }
 0x1e2   :  { %v1680_v44 = vpop.f32.mrf.mxu1 }
 0x1e3   :  { %15216 = vst [vmem:[#allocation30_spill] sm:$0xff] %v12252_v27  ;;  %v12256_v15 = vadd.f32 %v2077_v3, %v1680_v44  ;;  %v8754_v22 = vpop.f32.mrf.mxu0 }
 0x1e4   :  { %v8685_v31 = vpop.f32.mrf.mxu1 }
 0x1e5   :  { %15218 = vst [vmem:[#allocation32_spill] sm:$0xff] %v12256_v15  ;;  %v12262_v62 = vadd.f32 %v8753_v1, %v8685_v31  ;;  %v2093_v26 = vpop.f32.mrf.mxu0  ;;  %v15225_v15 = vld [vmem:[#allocation80_spill] sm:$0xff] }
 0x1e6   :  { %8852 = vmatmul.mubr.msk.bf16.gmra.mxu1 %vm852_vm2, %v15220_v19  ;;  %v1693_v51 = vpop.f32.mrf.mxu1  ;;  %v15227_v19 = vld [vmem:[#allocation87_spill] sm:$0xff] }
 0x1e7   :  { %15221 = vst [vmem:[#allocation31_spill] sm:$0xff] %v12262_v62  ;;  %8855 = vmatprep.mubr.msk.bf16.mxu1 %vm852_vm2, %v15223_v24  ;;  %v12268_v6 = vadd.f32 %v2090_v60, %v1693_v51  ;;  %v8757_v44 = vpop.f32.mrf.mxu0  ;;  %v15229_v24 = vld [vmem:[#allocation40_spill] sm:$0xff] }
 0x1e8   :  { %v8686_v3 = vpop.f32.mrf.mxu1  ;;  %8924 = vmatmul.mubr.msk.bf16.gmra.mxu0 %vm852_vm2, %v15225_v15  ;;  %v15230_v27 = vpack.c.bf16 %v15229_v24, %v15177_v25 }
 0x1e9   :  { %15224 = vst [vmem:[#allocation57_spill] sm:$0xff] %v12268_v6  ;;  %v12272_v54 = vadd.f32 %v8754_v22, %v8686_v3  ;;  %8927 = vmatprep.mubr.msk.bf16.mxu0 %vm852_vm2, %v15227_v19  ;;  %v2106_v31 = vpop.f32.mrf.mxu0  ;;  %v15232_v6 = vld [vmem:[#allocation63_spill] sm:$0xff] }
 0x1ea   :  { %v1696_v1 = vpop.f32.mrf.mxu1  ;;  %v15233_v15 = vpack.c.bf16 %v15232_v6, %v15189_v11 }
 0x1eb   :  { %15226 = vst [vmem:[#allocation66_spill] sm:$0xff] %v12272_v54  ;;  %v12276_v62 = vadd.f32 %v2093_v26, %v1696_v1  ;;  %v8758_v60 = vpop.f32.mrf.mxu0 }
 0x1ec   :  { %v8689_v58 = vpop.f32.mrf.mxu1 }
 0x1ed   :  { %15228 = vst [vmem:[#allocation12_spill] sm:$0xff] %v12276_v62  ;;  %v12282_v51 = vadd.f32 %v8757_v44, %v8689_v58  ;;  %v2109_v3 = vpop.f32.mrf.mxu0  ;;  %v15235_v62 = vld [vmem:[#allocation89_spill] sm:$0xff] }
 0x1ee   :  { %8856 = vmatmul.mubr.msk.bf16.gmra.mxu1 %vm852_vm2, %v15230_v27  ;;  %v1709_v22 = vpop.f32.mrf.mxu1  ;;  %v15237_v27 = vld [vmem:[#allocation96_spill] sm:$0xff] }
 0x1ef   :  { %15231 = vst [vmem:[#allocation45_spill] sm:$0xff] %v12282_v51  ;;  %8859 = vmatprep.mubr.msk.bf16.mxu1 %vm852_vm2, %v15233_v15  ;;  %v12288_v19 = vadd.f32 %v2106_v31, %v1709_v22  ;;  %v8761_v1 = vpop.f32.mrf.mxu0  ;;  %v15239_v15 = vld [vmem:[#allocation78_spill] sm:$0xff] }
 0x1f0   :  { %v8690_v26 = vpop.f32.mrf.mxu1  ;;  %8928 = vmatmul.mubr.msk.bf16.gmra.mxu0 %vm852_vm2, %v15235_v62  ;;  %v15240_v54 = vpack.c.bf16 %v15239_v15, %v15190_v63  ;;  %v5151_v63 = vld [vmem:[#allocation2 + $0x90] sm:$0xff] }
 0x1f1   :  { %15234 = vst [vmem:[#allocation67_spill] sm:$0xff] %v12288_v19  ;;  %v12292_v24 = vadd.f32 %v8758_v60, %v8690_v26  ;;  %8931 = vmatprep.mubr.msk.bf16.mxu0 %vm852_vm2, %v15237_v27  ;;  %v2122_v58 = vpop.f32.mrf.mxu0  ;;  %v15242_v19 = vld [vmem:[#allocation13_spill] sm:$0xff] }
 0x1f2   :  { %v1712_v44 = vpop.f32.mrf.mxu1  ;;  %v15243_v62 = vpack.c.bf16 %v15242_v19, %v11403_v43  ;;  %v9291_v19 = vld [vmem:[%s14390_s5 + $0x78] sm:$0xff]   ;;  %v5150_v43 = vld [vmem:[#allocation2 + $0x88] sm:$0x3] }
 0x1f3   :  { %15236 = vst [vmem:[#allocation79_spill] sm:$0xff] %v12292_v24  ;;  %v12296_v51 = vadd.f32 %v2109_v3, %v1712_v44  ;;  %v8762_v31 = vpop.f32.mrf.mxu0  ;;  %v3131_v3 = vpack.c.bf16 %v12153_v17, %v12175_v18  ;;  %9139 = vmatprep.subr.bf16.mxu0 %v9291_v19 }
 0x1f4   :  { %v8693_v6 = vpop.f32.mrf.mxu1 }
 0x1f5   :  { %15238 = vst [vmem:[#allocation11_spill] sm:$0xff] %v12296_v51  ;;  %v12302_v22 = vadd.f32 %v8761_v1, %v8693_v6  ;;  %v2125_v26 = vpop.f32.mrf.mxu0  ;;  %v15246_v1 = vld [vmem:[#allocation62_spill] sm:$0xff]  ;;  %v15247_v6 = vld [vmem:[#allocation15_spill] sm:$0xff] }
 0x1f6   :  { %8860 = vmatmul.mubr.msk.bf16.gmra.mxu1 %vm852_vm2, %v15240_v54  ;;  %v1725_v60 = vpop.f32.mrf.mxu1  ;;  %v15248_v15 = vpack.c.bf16 %v15246_v1, %v15247_v6  ;;  %v15254_v1 = vld [vmem:[#allocation61_spill] sm:$0xff] }
 0x1f7   :  { %15241 = vst [vmem:[#allocation50_spill] sm:$0xff] %v12302_v22  ;;  %8863 = vmatprep.mubr.msk.bf16.mxu1 %vm852_vm2, %v15243_v62  ;;  %v12310_v27 = vadd.f32 %v2122_v58, %v1725_v60  ;;  %v8765_v51 = vpop.f32.mrf.mxu0  ;;  %v15250_v58 = vld [vmem:[#allocation14_spill] sm:$0xff] }
 0x1f8   :  { %v8694_v44 = vpop.f32.mrf.mxu1  ;;  %8932 = vmatmul.mubr.msk.bf16.gmra.mxu0 %vm852_vm2, %v3131_v3  ;;  %v15251_v60 = vpack.c.bf16 %v15250_v58, %v11432_v16 }
 0x1f9   :  { %15244 = vst [vmem:[#allocation80_spill] sm:$0xff] %v12310_v27  ;;  %v12313_v54 = vadd.f32 %v8762_v31, %v8694_v44  ;;  %9007 = vmatprep.mubr.msk.bf16.mxu0 %vm852_vm2, %v15248_v15  ;;  %v2138_v22 = vpop.f32.mrf.mxu0  ;;  %v15253_v44 = vld [vmem:[#allocation19_spill] sm:$0xff] }
 0x1fa   :  { %v1728_v62 = vpop.f32.mrf.mxu1  ;;  %v15255_v6 = vpack.c.bf16 %v15253_v44, %v15254_v1  ;;  %v15261_v44 = vld [vmem:[#allocation74_spill] sm:$0xff] }
 0x1fb   :  { %15245 = vst [vmem:[#allocation87_spill] sm:$0xff] %v12313_v54  ;;  %v12322_v17 = vadd.f32 %v2125_v26, %v1728_v62  ;;  %v8766_v31 = vpop.f32.mrf.mxu0  ;;  %v9292_v26 = vld [vmem:[%s14390_s5 + $0x70] sm:$0xff]  }
 0x1fc   :  { %v8697_v18 = vpop.f32.mrf.mxu1 }
 0x1fd   :  { %15249 = vst [vmem:[#allocation40_spill] sm:$0xff] %v12322_v17  ;;  %v12328_v3 = vadd.f32 %v8765_v51, %v8697_v18  ;;  %v2141_v54 = vpop.f32.mrf.mxu0  ;;  %v15260_v18 = vld [vmem:[#allocation27_spill] sm:$0xff] }
 0x1fe   :  { %8864 = vmatmul.mubr.msk.bf16.gmra.mxu1 %vm852_vm2, %v15251_v60  ;;  %v1741_v15 = vpop.f32.mrf.mxu1  ;;  %v15257_v60 = vld [vmem:[#allocation73_spill] sm:$0xff]  ;;  %v15262_v1 = vpack.c.bf16 %v15260_v18, %v15261_v44  ;;  %v15268_v44 = vld [vmem:[#allocation7_spill] sm:$0xff] }
 0x1ff   :  { %15252 = vst [vmem:[#allocation63_spill] sm:$0xff] %v12328_v3  ;;  %8939 = vmatprep.mubr.msk.bf16.mxu1 %vm852_vm2, %v15255_v6  ;;  %v12337_v62 = vadd.f32 %v2138_v22, %v1741_v15  ;;  %v8769_v58 = vpop.f32.mrf.mxu0  ;;  %v15258_v27 = vpack.c.bf16 %v11497_v61, %v15257_v60  ;;  %v9290_v22 = vld [vmem:[%s14390_s5 + $0x60] sm:$0xff]   ;;  %v15264_v60 = vld [vmem:[#allocation25_spill] sm:$0xff] }
 0x200   :  { %v8698_v17 = vpop.f32.mrf.mxu1 }
 0x201   :  { %15256 = vst [vmem:[#allocation89_spill] sm:$0xff] %v12337_v62  ;;  %9008 = vmatmul.mubr.msk.bf16.vlgmr.msra.gmra.mxu0 %vm852_vm2, %v15258_v27  ;;  %v12343_v51 = vadd.f32 %v8766_v31, %v8698_v17  ;;  %v2154_v3 = vpop.f32.mrf.mxu0  ;;  %v15265_v27 = vld [vmem:[#allocation20_spill] sm:$0xff] }
 0x202   :  { %9011 = vmatprep.mubr.msk.bf16.mxu0 %vm852_vm2, %v15262_v1  ;;  %9140 = vmatpush3.bf16.msra.mxu0 %v9291_v19  ;;  %v1744_v6 = vpop.f32.mrf.mxu1  ;;  %v15266_v17 = vpack.c.bf16 %v15264_v60, %v15265_v27  ;;  %v15269_v19 = vld [vmem:[#allocation28_spill] sm:$0xff] }
 0x203   :  { %15259 = vst [vmem:[#allocation96_spill] sm:$0xff] %v12343_v51  ;;  %9141 = vmatprep.subr.bf16.mxu0 %v9292_v26  ;;  %v12352_v15 = vadd.f32 %v2141_v54, %v1744_v6  ;;  %v8770_v31 = vpop.f32.mrf.mxu0  ;;  %v15270_v1 = vpack.c.bf16 %v11547_v35, %v15269_v19  ;;  %v9293_v54 = vld [vmem:[%s14390_s5 + $0x88] sm:$0xff]   ;;  %v15277_v19 = vld [vmem:[#allocation37_spill] sm:$0xff] }
 0x204   :  { %v8701_v61 = vpop.f32.mrf.mxu1 }
 0x205   :  { %15263 = vst [vmem:[#allocation78_spill] sm:$0xff] %v12352_v15  ;;  %v12358_v18 = vadd.f32 %v8769_v58, %v8701_v61  ;;  %v2157_v62 = vpop.f32.mrf.mxu0  ;;  %v15272_v61 = vld [vmem:[#allocation84_spill] sm:$0xff] }
 0x206   :  { %8940 = vmatmul.mubr.msk.bf16.vlgmr.msra.gmra.mxu1 %vm852_vm2, %v15266_v17  ;;  %v1757_v51 = vpop.f32.mrf.mxu1  ;;  %9142 = vmatpush3.bf16.msra.mxu0 %v9292_v26  ;;  %v15273_v27 = vpack.c.bf16 %v11561_v50, %v15272_v61  ;;  %v15275_v17 = vpack.c.bf16 %v11579_v40, %v11540_v7 }
 0x207   :  { %15267 = vst [vmem:[#allocation13_spill] sm:$0xff] %v12358_v18  ;;  %9072 = vmatpush3.bf16.msra.mxu1 %v15268_v44  ;;  %8943 = vmatprep.mubr.msk.bf16.mxu1 %vm852_vm2, %v15270_v1  ;;  %v12368_v6 = vadd.f32 %v2154_v3, %v1757_v51  ;;  %v8773_v58 = vpop.f32.mrf.mxu0  ;;  %v15278_v1 = vld [vmem:[#allocation21_spill] sm:$0xff] }
 0x208   :  { %9073 = vmatprep.subr.bf16.mxu1 %v9290_v22  ;;  %v8702_v60 = vpop.f32.mrf.mxu1 }
 0x209   :  { %15271 = vst [vmem:[#allocation62_spill] sm:$0xff] %v12368_v6  ;;  %9012 = vmatmul.mubr.msk.bf16.gmra.mxu0 %vm852_vm2, %v15273_v27  ;;  %v12374_v35 = vadd.f32 %v8770_v31, %v8702_v60  ;;  %v2170_v44 = vpop.f32.mrf.mxu0  ;;  %v15279_v6 = vpack.c.bf16 %v15277_v19, %v15278_v1  ;;  %v15281_v60 = vld [vmem:[#allocation26_spill] sm:$0xff]  ;;  %v5141_v27 = vld [vmem:[#allocation2 + $0x40] sm:$0x3] }
 0x20a   :  { %9015 = vmatprep.mubr.msk.bf16.mxu0 %vm852_vm2, %v15275_v17  ;;  %v1760_v26 = vpop.f32.mrf.mxu1  ;;  %v15282_v7 = vpack.c.bf16 %v11611_v14, %v15281_v60  ;;  %v15284_v19 = vld [vmem:[#allocation23_spill] sm:$0xff]  ;;  %v5144_v1 = vld [vmem:[#allocation2 + $0x58] sm:$0x3]  ;;  %v15287_v60 = vld [vmem:[#allocation44_spill] sm:$0xff]  ;;  %v6554_v15 = vrot.slane %v5141_v27, 2 }
 0x20b   :  { %15274 = vst [vmem:[#allocation15_spill] sm:$0xff] %v12374_v35  ;;  %9074 = vmatpush3.bf16.msra.mxu1 %v9290_v22  ;;  %v12380_v3 = vadd.f32 %v2157_v62, %v1760_v26  ;;  %v8774_v50 = vpop.f32.mrf.mxu0  ;;  %v5139_v62 = vld [vmem:[#allocation2 + $0x30] sm:$0xff] }
 0x20c   :  { %9207 = vmatprep.subr.bf16.mxu1 %v9293_v54  ;;  %v8705_v51 = vpop.f32.mrf.mxu1  ;;  %v5140_v54 = vld [vmem:[#allocation2 + $0x38] sm:$0xff]  ;;  %v6551_v35 = vrot.slane %v5139_v62, 2 }
 0x20d   :  { %15276 = vst [vmem:[#allocation14_spill] sm:$0xff] %v12380_v3  ;;  %v12386_v31 = vadd.f32 %v8773_v58, %v8705_v51  ;;  %v2173_v22 = vpop.f32.mrf.mxu0  ;;  %v5142_v58 = vld [vmem:[#allocation2 + $0x48] sm:$0xff]  ;;  %v5143_v51 = vld [vmem:[#allocation2 + $0x50] sm:$0xff]  ;;  %v6552_v18 = vrot.slane %v5140_v54, 2 }
 0x20e   :  { %8944 = vmatmul.mubr.msk.bf16.gmra.mxu1 %vm852_vm2, %v15279_v6  ;;  %v1773_v40 = vpop.f32.mrf.mxu1  ;;  %v15285_v6 = vpack.c.bf16 %v11625_v8, %v15284_v19  ;;  %v5147_v19 = vld [vmem:[#allocation2 + $0x70] sm:$0x3]  ;;  %v6556_v16 = vrot.slane %v5142_v58, 2  ;;  %v6557_v24 = vrot.slane %v5143_v51, 2  ;;  %v15294_v58 = vpack.c.bf16 %v11675_v48, %v11632_v47  ;;  %v5153_v51 = vld [vmem:[#allocation2 + $0xa0] sm:$0x3] }
 0x20f   :  { %15280 = vst [vmem:[#allocation19_spill] sm:$0xff] %v12386_v31  ;;  %8947 = vmatprep.mubr.msk.bf16.mxu1 %vm852_vm2, %v15282_v7  ;;  %v12392_v61 = vadd.f32 %v2170_v44, %v1773_v40  ;;  %v8777_v26 = vpop.f32.mrf.mxu0  ;;  %v15288_v7 = vld [vmem:[#allocation39_spill] sm:$0xff]  ;;  %v5146_v40 = vld [vmem:[#allocation2 + $0x68] sm:$0xff]  ;;  %v12411_v62 = vsel %vm2281_vm6, %v6551_v35, %v6552_v18  ;;  %v6564_v48 = vrot.slane %v5147_v19, 2 }
 0x210   :  { %v8706_v17 = vpop.f32.mrf.mxu1  ;;  %v15289_v31 = vpack.c.bf16 %v15287_v60, %v15288_v7  ;;  %v5145_v44 = vld [vmem:[#allocation2 + $0x60] sm:$0xff]  ;;  %15292 = vst [vmem:[#allocation27_spill] sm:$0xff] %v12411_v62  ;;  %v6562_v54 = vrot.slane %v5146_v40, 2  ;;  %v12425_v35 = vsel %vm2281_vm6, %v6556_v16, %v6557_v24  ;;  %v6571_v16 = vrot.slane %v5151_v63, 2  ;;  %v5158_v63 = vld [vmem:[#allocation2 + $0xc8] sm:$0xff] }
 0x211   :  { %15283 = vst [vmem:[#allocation61_spill] sm:$0xff] %v12392_v61  ;;  %9016 = vmatmul.mubr.msk.bf16.gmra.mxu0 %vm852_vm2, %v15285_v6  ;;  %v12398_v14 = vadd.f32 %v8774_v50, %v8706_v17  ;;  %v2186_v3 = vpop.f32.mrf.mxu0  ;;  %v5148_v6 = vld [vmem:[#allocation2 + $0x78] sm:$0xff]  ;;  %v6559_v50 = vrot.slane %v5144_v1, 2  ;;  %v5149_v7 = vld [vmem:[#allocation2 + $0x80] sm:$0xff]  ;;  %v5154_v1 = vld [vmem:[#allocation2 + $0xa8] sm:$0xff] }
 0x212   :  { %9019 = vmatprep.mubr.msk.bf16.mxu0 %vm852_vm2, %v15289_v31  ;;  %v1776_v61 = vpop.f32.mrf.mxu1  ;;  %15295 = vst [vmem:[#allocation25_spill] sm:$0xff] %v12425_v35  ;;  %v6566_v40 = vrot.slane %v5148_v6, 2  ;;  %v6574_v6 = vrot.slane %v5153_v51, 2  ;;  %v5162_v51 = vld [vmem:[#allocation2 + $0xe8] sm:$0x3] }
 0x213   :  { %15286 = vst [vmem:[#allocation73_spill] sm:$0xff] %v12398_v14  ;;  %v12404_v8 = vadd.f32 %v2173_v22, %v1776_v61  ;;  %v15290_v14 = vld [vmem:[#allocation41_spill] sm:$0xff]  ;;  %v8778_v31 = vpop.f32.mrf.mxu0  ;;  %v12414_v22 = vsel %vm2281_vm6, %v6552_v18, %v6554_v15  ;;  %v6561_v61 = vrot.slane %v5145_v44, 2  ;;  %v12428_v15 = vsel %vm2281_vm6, %v6557_v24, %v6559_v50  ;;  %v5156_v50 = vld [vmem:[#allocation2 + $0xb8] sm:$0x3]  ;;  %v5157_v44 = vld [vmem:[#allocation2 + $0xc0] sm:$0xff] }
 0x214   :  { %v8709_v17 = vpop.f32.mrf.mxu1  ;;  %v15291_v60 = vpack.c.bf16 %v11661_v23, %v15290_v14  ;;  %15293 = vst [vmem:[#allocation74_spill] sm:$0xff] %v12414_v22  ;;  %v5152_v23 = vld [vmem:[#allocation2 + $0x98] sm:$0xff]  ;;  %15296 = vst [vmem:[#allocation20_spill] sm:$0xff] %v12428_v15  ;;  %v6569_v14 = vrot.slane %v5150_v43, 2  ;;  %v15298_v24 = vpack.c.bf16 %v11689_v39, %v11650_v4  ;;  %v15300_v43 = vpack.c.bf16 %v11707_v49, %v11668_v12  ;;  %v5175_v15 = vld [vmem:[#allocation2 + $0x150] sm:$0xff] }
 0x215   :  { %v12416_v27 = vadd.f32 %v8777_v26, %v8709_v17  ;;  %v2189_v26 = vpop.f32.mrf.mxu0  ;;  %v12433_v47 = vsel %vm2281_vm6, %v6561_v61, %v6562_v54  ;;  %v12442_v61 = vsel %vm2281_vm6, %v6562_v54, %v6564_v48  ;;  %v6572_v19 = vrot.slane %v5152_v23, 2  ;;  %v5160_v4 = vld [vmem:[#allocation2 + $0xd8] sm:$0xff] }
 0x216   :  { %8948 = vmatmul.mubr.msk.bf16.gmra.mxu1 %vm852_vm2, %v15291_v60  ;;  %v1789_v18 = vpop.f32.mrf.mxu1  ;;  %15297 = vst [vmem:[#allocation7_spill] sm:$0xff] %v12433_v47  ;;  %v5155_v60 = vld [vmem:[#allocation2 + $0xb0] sm:$0xff]  ;;  %15299 = vst [vmem:[#allocation28_spill] sm:$0xff] %v12442_v61  ;;  %v6581_v39 = vrot.slane %v5157_v44, 2  ;;  %v5164_v44 = vld [vmem:[#allocation2 + $0xf8] sm:$0xff] }
 0x217   :  { %8951 = vmatprep.mubr.msk.bf16.mxu1 %vm852_vm2, %v15294_v58  ;;  %v12435_v17 = vadd.f32 %v2186_v3, %v1789_v18  ;;  %v6567_v58 = vrot.slane %v5149_v7, 2  ;;  %v8781_v22 = vpop.f32.mrf.mxu0  ;;  %v6576_v3 = vrot.slane %v5154_v1, 2  ;;  %v5159_v7 = vld [vmem:[#allocation2 + $0xd0] sm:$0x3]  ;;  %v12461_v49 = vsel %vm2281_vm6, %v6571_v16, %v6572_v19 }
 0x218   :  { %v8710_v62 = vpop.f32.mrf.mxu1  ;;  %15303 = vst [vmem:[#allocation21_spill] sm:$0xff] %v12461_v49  ;;  %v12464_v1 = vsel %vm2281_vm6, %v6572_v19, %v6574_v6  ;;  %v6577_v48 = vrot.slane %v5155_v60, 2  ;;  %v15305_v61 = vld [vmem:[#allocation53_spill] sm:$0xff]  ;;  %v6582_v19 = vrot.slane %v5158_v63, 2  ;;  %v6584_v60 = vrot.slane %v5159_v7, 2 }
 0x219   :  { %9020 = vmatmul.mubr.msk.bf16.gmra.mxu0 %vm852_vm2, %v15298_v24  ;;  %v12444_v18 = vadd.f32 %v8778_v31, %v8710_v62  ;;  %v12453_v24 = vsel %vm2281_vm6, %v6566_v40, %v6567_v58  ;;  %v12456_v54 = vsel %vm2281_vm6, %v6567_v58, %v6569_v14  ;;  %v2202_v31 = vpop.f32.mrf.mxu0  ;;  %v5161_v62 = vld [vmem:[#allocation2 + $0xe0] sm:$0xff]  ;;  %15304 = vst [vmem:[#allocation26_spill] sm:$0xff] %v12464_v1  ;;  %v5163_v40 = vld [vmem:[#allocation2 + $0xf0] sm:$0xff]  ;;  %v6579_v58 = vrot.slane %v5156_v50, 2  ;;  %v5166_v14 = vld [vmem:[#allocation2 + $0x108] sm:$0xff] }
 0x21a   :  { %9023 = vmatprep.mubr.msk.bf16.mxu0 %vm852_vm2, %v15300_v43  ;;  %15301 = vst [vmem:[#allocation84_spill] sm:$0xff] %v12453_v24  ;;  %15302 = vst [vmem:[#allocation37_spill] sm:$0xff] %v12456_v54  ;;  %v1792_v23 = vpop.f32.mrf.mxu1  ;;  %v15306_v35 = vpack.c.bf16 %v11725_v9, %v15305_v61  ;;  %v12475_v12 = vsel %vm2281_vm6, %v6576_v3, %v6577_v48  ;;  %v5165_v50 = vld [vmem:[#allocation2 + $0x100] sm:$0x3]  ;;  %v6589_v61 = vrot.slane %v5162_v51, 2  ;;  %v5167_v63 = vld [vmem:[#allocation2 + $0x110] sm:$0xff] }
 0x21b   :  { %v12466_v43 = vadd.f32 %v2189_v26, %v1792_v23  ;;  %v8782_v16 = vpop.f32.mrf.mxu0  ;;  %15307 = vst [vmem:[#allocation23_spill] sm:$0xff] %v12475_v12  ;;  %v6586_v26 = vrot.slane %v5160_v4, 2  ;;  %v15308_v23 = vpack.c.bf16 %v11739_v52, %v11696_v41  ;;  %v12484_v9 = vsel %vm2281_vm6, %v6577_v48, %v6579_v58  ;;  %v5168_v7 = vld [vmem:[#allocation2 + $0x118] sm:$0x3]  ;;  %v5169_v4 = vld [vmem:[#allocation2 + $0x120] sm:$0xff]  ;;  %v5170_v48 = vld [vmem:[#allocation2 + $0x128] sm:$0xff] }
 0x21c   :  { %v8713_v47 = vpop.f32.mrf.mxu1  ;;  %15309 = vst [vmem:[#allocation44_spill] sm:$0xff] %v12484_v9  ;;  %v12489_v41 = vsel %vm2281_vm6, %v6581_v39, %v6582_v19  ;;  %v12492_v52 = vsel %vm2281_vm6, %v6582_v19, %v6584_v60  ;;  %v15314_v12 = vld [vmem:[#allocation34_spill] sm:$0xff]  ;;  %v6594_v60 = vrot.slane %v5165_v50, 2  ;;  %v6599_v9 = vrot.slane %v5168_v7, 2  ;;  %v5174_v54 = vld [vmem:[#allocation2 + $0x148] sm:$0x3] }
 0x21d   :  { %v12477_v6 = vadd.f32 %v8781_v22, %v8713_v47  ;;  %v2205_v49 = vpop.f32.mrf.mxu0  ;;  %15310 = vst [vmem:[#allocation39_spill] sm:$0xff] %v12489_v41  ;;  %15311 = vst [vmem:[#allocation41_spill] sm:$0xff] %v12492_v52  ;;  %v6591_v47 = vrot.slane %v5163_v40, 2  ;;  %v15315_v19 = vpack.c.bf16 %v11753_v37, %v15314_v12  ;;  %v6592_v40 = vrot.slane %v5164_v44, 2  ;;  %v15317_v41 = vld [vmem:[#allocation54_spill] sm:$0xff] }
 0x21e   :  { %8952 = vmatmul.mubr.msk.bf16.gmra.mxu1 %vm852_vm2, %v15306_v35  ;;  %v6587_v35 = vrot.slane %v5161_v62, 2  ;;  %v1805_v3 = vpop.f32.mrf.mxu1  ;;  %v5171_v62 = vld [vmem:[#allocation2 + $0x130] sm:$0x3]  ;;  %v6601_v24 = vrot.slane %v5169_v4, 2 }
 0x21f   :  { %8955 = vmatprep.mubr.msk.bf16.mxu1 %vm852_vm2, %v15308_v23  ;;  %v12494_v23 = vadd.f32 %v2202_v31, %v1805_v3  ;;  %v8785_v39 = vpop.f32.mrf.mxu0  ;;  %v6596_v3 = vrot.slane %v5166_v14, 2  ;;  %v12517_v44 = vsel %vm2281_vm6, %v6591_v47, %v6592_v40  ;;  %v12520_v14 = vsel %vm2281_vm6, %v6592_v40, %v6594_v60  ;;  %v15323_v40 = vld [vmem:[#allocation43_spill] sm:$0xff] }
 0x220   :  { %v12499_v58 = vsel %vm2281_vm6, %v6586_v26, %v6587_v35  ;;  %v12502_v1 = vsel %vm2281_vm6, %v6587_v35, %v6589_v61  ;;  %v8714_v22 = vpop.f32.mrf.mxu1  ;;  %v15316_v26 = vld [vmem:[#allocation71_spill] sm:$0xff]  ;;  %v5172_v35 = vld [vmem:[#allocation2 + $0x138] sm:$0xff]  ;;  %v6597_v61 = vrot.slane %v5167_v63, 2  ;;  %15319 = vst [vmem:[#allocation34_spill] sm:$0xff] %v12517_v44  ;;  %v6604_v50 = vrot.slane %v5171_v62, 2  ;;  %v5178_v63 = vld [vmem:[#allocation2 + $0x168] sm:$0xff] }
 0x221   :  { %15312 = vst [vmem:[#allocation53_spill] sm:$0xff] %v12499_v58  ;;  %15313 = vst [vmem:[#allocation123_spill] sm:$0xff] %v12502_v1  ;;  %9024 = vmatmul.mubr.msk.bf16.gmra.mxu0 %vm852_vm2, %v15315_v19  ;;  %v12510_v51 = vadd.f32 %v8782_v16, %v8714_v22  ;;  %v15318_v52 = vpack.c.bf16 %v15316_v26, %v15317_v41  ;;  %v2218_v12 = vpop.f32.mrf.mxu0  ;;  %v5173_v19 = vld [vmem:[#allocation2 + $0x140] sm:$0xff]  ;;  %v6602_v16 = vrot.slane %v5170_v48, 2  ;;  %v5176_v41 = vld [vmem:[#allocation2 + $0x158] sm:$0xff]  ;;  %v6606_v7 = vrot.slane %v5172_v35, 2 }
 0x222   :  { %v1808_v37 = vpop.f32.mrf.mxu1  ;;  %15320 = vst [vmem:[#allocation71_spill] sm:$0xff] %v12520_v14  ;;  %v12527_v4 = vsel %vm2281_vm6, %v6596_v3, %v6597_v61  ;;  %v12530_v26 = vsel %vm2281_vm6, %v6597_v61, %v6599_v9  ;;  %v15324_v60 = vpack.c.bf16 %v11789_v21, %v15323_v40  ;;  %v5179_v48 = vld [vmem:[#allocation2 + $0x170] sm:$0xff]  ;;  %v15327_v61 = vpack.c.bf16 %v11803_v45, %v11760_v36  ;;  %v5180_v21 = vld [vmem:[#allocation2 + $0x178] sm:$0x3]  ;;  %v5187_v36 = vld [vmem:[#allocation2 + $0x1e0] sm:$0xff] }
 0x223   :  { %9027 = vmatprep.mubr.msk.bf16.mxu0 %vm852_vm2, %v15318_v52  ;;  %v12522_v22 = vadd.f32 %v2205_v49, %v1808_v37  ;;  %v5177_v52 = vld [vmem:[#allocation2 + $0x160] sm:$0x3]  ;;  %15321 = vst [vmem:[#allocation54_spill] sm:$0xff] %v12527_v4  ;;  %15322 = vst [vmem:[#allocation124_spill] sm:$0xff] %v12530_v26  ;;  %v8786_v49 = vpop.f32.mrf.mxu0  ;;  %v12539_v37 = vsel %vm2281_vm6, %v6601_v24, %v6602_v16  ;;  %v12542_v3 = vsel %vm2281_vm6, %v6602_v16, %v6604_v50  ;;  %v5183_v44 = vld [vmem:[#allocation2 + $0x190] sm:$0x3] }
 0x224   :  { %v8717_v47 = vpop.f32.mrf.mxu1  ;;  %15325 = vst [vmem:[#allocation43_spill] sm:$0xff] %v12539_v37  ;;  %15326 = vst [vmem:[#allocation125_spill] sm:$0xff] %v12542_v3  ;;  %v6609_v62 = vrot.slane %v5174_v54, 2  ;;  %v5181_v4 = vld [vmem:[#allocation2 + $0x180] sm:$0xff]  ;;  %v6611_v26 = vrot.slane %v5175_v15, 2  ;;  %v6612_v16 = vrot.slane %v5176_v41, 2 }
 0x225   :  { %v12544_v9 = vadd.f32 %v8785_v39, %v8717_v47  ;;  %v2221_v24 = vpop.f32.mrf.mxu0  ;;  %v6614_v50 = vrot.slane %v5177_v52, 2  ;;  %v6616_v35 = vrot.slane %v5178_v63, 2  ;;  %v5182_v47 = vld [vmem:[#allocation2 + $0x188] sm:$0xff]  ;;  %v15330_v37 = vld [vmem:[#allocation107_spill] sm:$0xff]  ;;  %v15331_v3 = vld [vmem:[#allocation70_spill] sm:$0xff] }
 0x226   :  { %8956 = vmatmul.mubr.msk.bf16.gmra.mxu1 %vm852_vm2, %v15324_v60  ;;  %v6607_v60 = vrot.slane %v5173_v19, 2  ;;  %v1821_v31 = vpop.f32.mrf.mxu1  ;;  %v6617_v19 = vrot.slane %v5179_v48, 2  ;;  %v15332_v15 = vpack.c.bf16 %v15330_v37, %v15331_v3  ;;  %v5188_v41 = vld [vmem:[#allocation2 + $0x1e8] sm:$0xff]  ;;  %v12567_v52 = vsel %vm2281_vm6, %v6611_v26, %v6612_v16  ;;  %v5190_v37 = vld [vmem:[#allocation2 + $0x1f8] sm:$0xff]  ;;  %v5191_v3 = vld [vmem:[#allocation2 + $0x200] sm:$0xff] }
 0x227   :  { %8959 = vmatprep.mubr.msk.bf16.mxu1 %vm852_vm2, %v15327_v61  ;;  %v12552_v39 = vadd.f32 %v2218_v12, %v1821_v31  ;;  %v8789_v40 = vpop.f32.mrf.mxu0  ;;  %v5189_v31 = vld [vmem:[#allocation2 + $0x1f0] sm:$0x3]  ;;  %15333 = vst [vmem:[#allocation107_spill] sm:$0xff] %v12567_v52  ;;  %v12570_v63 = vsel %vm2281_vm6, %v6612_v16, %v6614_v50  ;;  %v6621_v26 = vrot.slane %v5181_v4, 2  ;;  %v6624_v50 = vrot.slane %v5183_v44, 2  ;;  %v15339_v4 = vld [vmem:[#allocation75_spill] sm:$0xff] }
 0x228   :  { %v12555_v45 = vsel %vm2281_vm6, %v6606_v7, %v6607_v60  ;;  %v12558_v61 = vsel %vm2281_vm6, %v6607_v60, %v6609_v62  ;;  %v8718_v54 = vpop.f32.mrf.mxu1  ;;  %15334 = vst [vmem:[#allocation70_spill] sm:$0xff] %v12570_v63  ;;  %v6619_v7 = vrot.slane %v5180_v21, 2  ;;  %v15335_v62 = vpack.c.bf16 %v11835_v30, %v11796_v34  ;;  %v5192_v30 = vld [vmem:[#allocation2 + $0x208] sm:$0x3]  ;;  %v15338_v63 = vld [vmem:[#allocation98_spill] sm:$0xff] }
 0x229   :  { %15328 = vst [vmem:[#allocation126_spill] sm:$0xff] %v12555_v45  ;;  %15329 = vst [vmem:[#allocation127_spill] sm:$0xff] %v12558_v61  ;;  %9028 = vmatmul.mubr.msk.bf16.gmra.mxu0 %vm852_vm2, %v15332_v15  ;;  %v12572_v48 = vadd.f32 %v8786_v49, %v8718_v54  ;;  %v12581_v15 = vsel %vm2281_vm6, %v6616_v35, %v6617_v19  ;;  %v2234_v16 = vpop.f32.mrf.mxu0  ;;  %v6622_v49 = vrot.slane %v5182_v47, 2  ;;  %v6631_v54 = vrot.slane %v5187_v36, 2  ;;  %v5195_v47 = vld [vmem:[#allocation2 + $0x220] sm:$0x3] }
 0x22a   :  { %9031 = vmatprep.mubr.msk.bf16.mxu0 %vm852_vm2, %v15335_v62  ;;  %15336 = vst [vmem:[#allocation128_spill] sm:$0xff] %v12581_v15  ;;  %v1824_v12 = vpop.f32.mrf.mxu1  ;;  %v12584_v21 = vsel %vm2281_vm6, %v6617_v19, %v6619_v7  ;;  %v5193_v62 = vld [vmem:[#allocation2 + $0x210] sm:$0xff]  ;;  %v6632_v60 = vrot.slane %v5188_v41, 2  ;;  %v6634_v52 = vrot.slane %v5189_v31, 2  ;;  %v15340_v61 = vpack.c.bf16 %v15338_v63, %v15339_v4  ;;  %v5194_v7 = vld [vmem:[#allocation2 + $0x218] sm:$0xff]  ;;  %v5196_v44 = vld [vmem:[#allocation2 + $0x228] sm:$0xff] }
 0x22b   :  { %15337 = vst [vmem:[#allocation129_spill] sm:$0xff] %v12584_v21  ;;  %v12586_v34 = vadd.f32 %v2221_v24, %v1824_v12  ;;  %v8790_v19 = vpop.f32.mrf.mxu0  ;;  %v12595_v24 = vsel %vm2281_vm6, %v6621_v26, %v6622_v49  ;;  %v12598_v36 = vsel %vm2281_vm6, %v6622_v49, %v6624_v50  ;;  %v6636_v12 = vrot.slane %v5190_v37, 2  ;;  %v5198_v63 = vld [vmem:[#allocation2 + $0x238] sm:$0x3]  ;;  %v5199_v4 = vld [vmem:[#allocation2 + $0x240] sm:$0xff] }
 0x22c   :  { %v8721_v35 = vpop.f32.mrf.mxu1  ;;  %15341 = vst [vmem:[#allocation98_spill] sm:$0xff] %v12595_v24  ;;  %15342 = vst [vmem:[#allocation75_spill] sm:$0xff] %v12598_v36  ;;  %v6637_v45 = vrot.slane %v5191_v3, 2  ;;  %v15343_v31 = vpack.c.bf16 %v11867_v5, %v11824_v0  ;;  %v12609_v26 = vsel %vm2281_vm6, %v6631_v54, %v6632_v60  ;;  %v12612_v49 = vsel %vm2281_vm6, %v6632_v60, %v6634_v52  ;;  %v15347_v52 = vld [vmem:[#allocation108_spill] sm:$0xff]  ;;  %v5201_v14 = vld [vmem:[#allocation2 + $0x250] sm:$0x3] }
 0x22d   :  { %v12600_v41 = vadd.f32 %v8789_v40, %v8721_v35  ;;  %15344 = vst [vmem:[#allocation130_spill] sm:$0xff] %v12609_v26  ;;  %15345 = vst [vmem:[#allocation131_spill] sm:$0xff] %v12612_v49  ;;  %v2237_v40 = vpop.f32.mrf.mxu0  ;;  %v6639_v5 = vrot.slane %v5192_v30, 2  ;;  %v6641_v50 = vrot.slane %v5193_v62, 2  ;;  %v6642_v15 = vrot.slane %v5194_v7, 2  ;;  %v5202_v3 = vld [vmem:[#allocation2 + $0x258] sm:$0xff] }
 0x22e   :  { %8960 = vmatmul.mubr.msk.bf16.gmra.mxu1 %vm852_vm2, %v15340_v61  ;;  %v5197_v61 = vld [vmem:[#allocation2 + $0x230] sm:$0xff]  ;;  %v1837_v37 = vpop.f32.mrf.mxu1  ;;  %v12617_v0 = vsel %vm2281_vm6, %v6636_v12, %v6637_v45  ;;  %v6644_v24 = vrot.slane %v5195_v47, 2  ;;  %v6646_v54 = vrot.slane %v5196_v44, 2  ;;  %v15348_v60 = vpack.c.bf16 %v11881_v46, %v15347_v52  ;;  %v15351_v7 = vld [vmem:[#allocation110_spill] sm:$0xff]  ;;  %v15352_v47 = vld [vmem:[#allocation95_spill] sm:$0xff] }
 0x22f   :  { %8963 = vmatprep.mubr.msk.bf16.mxu1 %vm852_vm2, %v15343_v31  ;;  %15346 = vst [vmem:[#allocation132_spill] sm:$0xff] %v12617_v0  ;;  %v12619_v35 = vadd.f32 %v2234_v16, %v1837_v37  ;;  %v5200_v31 = vld [vmem:[#allocation2 + $0x248] sm:$0xff]  ;;  %v8793_v21 = vpop.f32.mrf.mxu0  ;;  %v12626_v12 = vsel %vm2281_vm6, %v6637_v45, %v6639_v5  ;;  %v6647_v30 = vrot.slane %v5197_v61, 2  ;;  %v6649_v62 = vrot.slane %v5198_v63, 2  ;;  %v5203_v26 = vld [vmem:[#allocation2 + $0x260] sm:$0xff]  ;;  %v5205_v46 = vld [vmem:[#allocation2 + $0x270] sm:$0xff] }
 0x230   :  { %v8722_v36 = vpop.f32.mrf.mxu1  ;;  %15349 = vst [vmem:[#allocation108_spill] sm:$0xff] %v12626_v12  ;;  %v6651_v16 = vrot.slane %v5199_v4, 2  ;;  %v15353_v44 = vpack.c.bf16 %v15351_v7, %v15352_v47  ;;  %v5204_v49 = vld [vmem:[#allocation2 + $0x268] sm:$0x3]  ;;  %v12640_v45 = vsel %vm2281_vm6, %v6642_v15, %v6644_v24  ;;  %v5207_v63 = vld [vmem:[#allocation2 + $0x280] sm:$0x3] }
 0x231   :  { %9032 = vmatmul.mubr.msk.bf16.gmra.mxu0 %vm852_vm2, %v15348_v60  ;;  %v12628_v37 = vadd.f32 %v8790_v19, %v8722_v36  ;;  %v12637_v60 = vsel %vm2281_vm6, %v6641_v50, %v6642_v15  ;;  %15355 = vst [vmem:[#allocation95_spill] sm:$0xff] %v12640_v45  ;;  %v2250_v19 = vpop.f32.mrf.mxu0  ;;  %v5206_v36 = vld [vmem:[#allocation2 + $0x278] sm:$0xff]  ;;  %v12645_v5 = vsel %vm2281_vm6, %v6646_v54, %v6647_v30  ;;  %v6652_v47 = vrot.slane %v5200_v31, 2  ;;  %v15359_v0 = vld [vmem:[#allocation112_spill] sm:$0xff]  ;;  %v15360_v12 = vld [vmem:[#allocation101_spill] sm:$0xff] }
 0x232   :  { %9035 = vmatprep.mubr.msk.bf16.mxu0 %vm852_vm2, %v15353_v44  ;;  %15354 = vst [vmem:[#allocation110_spill] sm:$0xff] %v12637_v60  ;;  %v1840_v61 = vpop.f32.mrf.mxu1  ;;  %15356 = vst [vmem:[#allocation134_spill] sm:$0xff] %v12645_v5  ;;  %v12648_v7 = vsel %vm2281_vm6, %v6647_v30, %v6649_v62  ;;  %v6654_v24 = vrot.slane %v5201_v14, 2  ;;  %v6656_v50 = vrot.slane %v5202_v3, 2  ;;  %v15361_v58 = vpack.c.bf16 %v15359_v0, %v15360_v12  ;;  %v15365_v60 = vld [vmem:[#allocation109_spill] sm:$0xff]  ;;  %v5208_v14 = vld [vmem:[#allocation2 + $0x288] sm:$0xff] }
 0x233   :  { %15350 = vst [vmem:[#allocation133_spill] sm:$0xff] %v12628_v37  ;;  %15357 = vst [vmem:[#allocation135_spill] sm:$0xff] %v12648_v7  ;;  %v12650_v44 = vadd.f32 %v2237_v40, %v1840_v61  ;;  %v8794_v4 = vpop.f32.mrf.mxu0  ;;  %v12659_v54 = vsel %vm2281_vm6, %v6651_v16, %v6652_v47  ;;  %v6657_v30 = vrot.slane %v5203_v26, 2  ;;  %v6659_v62 = vrot.slane %v5204_v49, 2  ;;  %v15364_v61 = vld [vmem:[#allocation114_spill] sm:$0xff]  ;;  %v5209_v3 = vld [vmem:[#allocation2 + $0x290] sm:$0xff] }
 0x234   :  { %v8725_v52 = vpop.f32.mrf.mxu1  ;;  %15362 = vst [vmem:[#allocation112_spill] sm:$0xff] %v12659_v54  ;;  %v6661_v31 = vrot.slane %v5205_v46, 2  ;;  %v15366_v15 = vpack.c.bf16 %v15364_v61, %v15365_v60  ;;  %v5210_v5 = vld [vmem:[#allocation2 + $0x298] sm:$0x3]  ;;  %v12668_v0 = vsel %vm2281_vm6, %v6652_v47, %v6654_v24  ;;  %v6664_v12 = vrot.slane %v5207_v63, 2  ;;  %v5211_v46 = vld [vmem:[#allocation2 + $0x2a0] sm:$0xff] }
 0x235   :  { %15358 = vst [vmem:[#allocation136_spill] sm:$0xff] %v12650_v44  ;;  %v12661_v40 = vadd.f32 %v8793_v21, %v8725_v52  ;;  %15367 = vst [vmem:[#allocation114_spill] sm:$0xff] %v12668_v0  ;;  %v2253_v7 = vpop.f32.mrf.mxu0  ;;  %v9299_v26 = vld [vmem:[#allocation2 + $0x208] sm:$0x3]  ;;  %v5213_v52 = vld [vmem:[#allocation2 + $0x2b0] sm:$0x3]  ;;  %v12676_v61 = vsel %vm2281_vm6, %v6657_v30, %v6659_v62 }
 0x236   :  { %8964 = vmatmul.mubr.msk.bf16.gmra.mxu1 %vm852_vm2, %v15361_v58  ;;  %v6662_v58 = vrot.slane %v5206_v36, 2  ;;  %v1853_v16 = vpop.f32.mrf.mxu1  ;;  %v3787_v49 = vrot.slane %v9299_v26, 1  ;;  %v5212_v21 = vld [vmem:[#allocation2 + $0x2a8] sm:$0xff]  ;;  %15369 = vst [vmem:[#allocation137_spill] sm:$0xff] %v12676_v61  ;;  %v15374_v54 = vld [vmem:[#allocation111_spill] sm:$0xff]  ;;  %v6667_v62 = vrot.slane %v5209_v3, 2 }
 0x237   :  { %15363 = vst [vmem:[#allocation101_spill] sm:$0xff] %v12661_v40  ;;  %8967 = vmatprep.mubr.msk.bf16.mxu1 %vm852_vm2, %v15366_v15  ;;  %v12673_v15 = vsel %vm2281_vm6, %v6656_v50, %v6657_v30  ;;  %v12678_v47 = vadd.f32 %v2250_v19, %v1853_v16  ;;  %v8797_v45 = vpop.f32.mrf.mxu0  ;;  %v15373_v60 = vld [vmem:[#allocation116_spill] sm:$0xff]  ;;  %v6666_v30 = vrot.slane %v5208_v14, 2  ;;  %v6669_v16 = vrot.slane %v5210_v5, 2  ;;  %v5214_v19 = vld [vmem:[#allocation2 + $0x2b8] sm:$0xff]  ;;  %v5217_v14 = vld [vmem:[#allocation2 + $0x2d0] sm:$0xff] }
 0x238   :  { %15368 = vst [vmem:[#allocation109_spill] sm:$0xff] %v12673_v15  ;;  %v12683_v63 = vsel %vm2281_vm6, %v6661_v31, %v6662_v58  ;;  %v12686_v24 = vsel %vm2281_vm6, %v6662_v58, %v6664_v12  ;;  %v8726_v26 = vpop.f32.mrf.mxu1  ;;  %v15375_v50 = vpack.c.bf16 %v15373_v60, %v15374_v54  ;;  %v15377_v31 = vld [vmem:[#allocation104_spill] sm:$0xff]  ;;  %v15378_v15 = vld [vmem:[#allocation113_spill] sm:$0xff]  ;;  %v6671_v58 = vrot.slane %v5211_v46, 2  ;;  %v5215_v3 = vld [vmem:[#allocation2 + $0x2c0] sm:$0xff] }
 0x239   :  { %15370 = vst [vmem:[#allocation138_spill] sm:$0xff] %v12678_v47  ;;  %15371 = vst [vmem:[#allocation139_spill] sm:$0xff] %v12683_v63  ;;  %v12694_v36 = vadd.f32 %v8794_v4, %v8726_v26  ;;  %v15379_v61 = vpack.c.bf16 %v15377_v31, %v15378_v15  ;;  %v6672_v12 = vrot.slane %v5212_v21, 2  ;;  %v6674_v0 = vrot.slane %v5213_v52, 2  ;;  %v2266_v54 = vpop.f32.mrf.mxu0  ;;  %v15380_v60 = vld [vmem:[#allocation36_spill] sm:$0xff]  ;;  %v5218_v26 = vld [vmem:[#allocation2 + $0x2d8] sm:$0xff] }
 0x23a   :  { %15372 = vst [vmem:[#allocation140_spill] sm:$0xff] %v12686_v24  ;;  %9036 = vmatmul.mubr.msk.bf16.gmra.mxu0 %vm852_vm2, %v15375_v50  ;;  %v1856_v1 = vpop.f32.mrf.mxu1  ;;  %v12702_v50 = vsel %vm1225_vm5, %v15380_v60, %v3787_v49  ;;  %v12705_v5 = vsel %vm2281_vm6, %v6666_v30, %v6667_v62  ;;  %v5216_v15 = vld [vmem:[#allocation2 + $0x2c8] sm:$0x3]  ;;  %v12710_v46 = vsel %vm2281_vm6, %v6667_v62, %v6669_v16  ;;  %v15387_v31 = vld [vmem:[#allocation115_spill] sm:$0xff]  ;;  %v5221_v63 = vld [vmem:[#allocation2 + $0x2f0] sm:$0xff]  ;;  %v6676_v47 = vrot.slane %v5214_v19, 2 }
 0x23b   :  { %15376 = vst [vmem:[#allocation116_spill] sm:$0xff] %v12694_v36  ;;  %9039 = vmatprep.mubr.msk.bf16.mxu0 %vm852_vm2, %v15379_v61  ;;  %15381 = vst [vmem:[#allocation111_spill] sm:$0xff] %v12705_v5  ;;  %v12707_v4 = vadd.f32 %v2253_v7, %v1856_v1  ;;  %v12713_v21 = vsel %vm2281_vm6, %v6671_v58, %v6672_v12  ;;  %v12716_v52 = vsel %vm2281_vm6, %v6672_v12, %v6674_v0  ;;  %v15386_v61 = vld [vmem:[#allocation105_spill] sm:$0xff]  ;;  %v8798_v1 = vpop.f32.mrf.mxu0  ;;  %v5219_v7 = vld [vmem:[#allocation2 + $0x2e0] sm:$0x3] }
 0x23c   :  { %15383 = vst [vmem:[#allocation113_spill] sm:$0xff] %v12710_v46  ;;  %15384 = vst [vmem:[#allocation36_spill] sm:$0xff] %v12713_v21  ;;  %v8729_v49 = vpop.f32.mrf.mxu1  ;;  %v15388_v60 = vpack.c.bf16 %v15386_v61, %v15387_v31  ;;  %v5220_v30 = vld [vmem:[#allocation2 + $0x2e8] sm:$0xff]  ;;  %v15390_v0 = vld [vmem:[#allocation102_spill] sm:$0xff]  ;;  %v6677_v46 = vrot.slane %v5215_v3, 2  ;;  %v6679_v16 = vrot.slane %v5216_v15, 2 }
 0x23d   :  { %15382 = vst [vmem:[#allocation104_spill] sm:$0xff] %v12707_v4  ;;  %15385 = vst [vmem:[#allocation141_spill] sm:$0xff] %v12716_v52  ;;  %v12726_v58 = vadd.f32 %v8797_v45, %v8729_v49  ;;  %v15391_v12 = vld [vmem:[#allocation117_spill] sm:$0xff]  ;;  %v15393_v61 = vld [vmem:[#allocation38_spill] sm:$0xff]  ;;  %v2269_v5 = vpop.f32.mrf.mxu0  ;;  %v6681_v45 = vrot.slane %v5217_v14, 2  ;;  %v6682_v49 = vrot.slane %v5218_v26, 2 }
 0x23e   :  { %8968 = vmatmul.mubr.msk.bf16.gmra.mxu1 %vm852_vm2, %v15388_v60  ;;  %v15392_v24 = vpack.c.bf16 %v15390_v0, %v15391_v12  ;;  %v3936_v31 = vpack.c.bf16 %v12702_v50, %v15393_v61  ;;  %v12734_v60 = vld [vmem:[#allocation2 + $0x238] sm:$0x3]  ;;  %v1869_v62 = vpop.f32.mrf.mxu1  ;;  %v5223_v0 = vld [vmem:[#allocation2 + $0x300] sm:$0xff]  ;;  %v5224_v12 = vld [vmem:[#allocation2 + $0x308] sm:$0xff]  ;;  %v6686_v52 = vrot.slane %v5220_v30, 2  ;;  %v12744_v3 = vsel %vm2281_vm6, %v6676_v47, %v6677_v46 }
 0x23f   :  { %15389 = vst [vmem:[#allocation105_spill] sm:$0xff] %v12726_v58  ;;  %v5222_v36 = vld [vmem:[#allocation2 + $0x2f8] sm:$0x3]  ;;  %v12737_v21 = vadd.f32 %v2266_v54, %v1869_v62  ;;  %v6687_v58 = vrot.slane %v5221_v63, 2  ;;  %v8873_v61 = vpop.f32.mrf.mxu0  ;;  %v15394_v40 = vld [vmem:[#allocation119_spill] sm:$0xff]  ;;  %v15395_v44 = vld [vmem:[#allocation100_spill] sm:$0xff]  ;;  %v12747_v54 = vsel %vm2281_vm6, %v6677_v46, %v6679_v16  ;;  %v12750_v14 = vsel %vm2281_vm6, %v6681_v45, %v6682_v49 }
 0x240   :  { %8971 = vmatprep.mubr.msk.bf16.mxu1 %vm852_vm2, %v15392_v24  ;;  %v6684_v24 = vrot.slane %v5219_v7, 2  ;;  %v8730_v50 = vpop.f32.mrf.mxu1  ;;  %v15396_v4 = vpack.c.bf16 %v15394_v40, %v15395_v44  ;;  %v5225_v19 = vld [vmem:[#allocation2 + $0x310] sm:$0x3]  ;;  %v5226_v37 = vld [vmem:[#allocation2 + $0x318] sm:$0xff]  ;;  %15397 = vst [vmem:[#allocation115_spill] sm:$0xff] %v12744_v3  ;;  %15398 = vst [vmem:[#allocation102_spill] sm:$0xff] %v12747_v54 }
 0x241   :  { %15399 = vst [vmem:[#allocation117_spill] sm:$0xff] %v12750_v14  ;;  %v6689_v15 = vrot.slane %v5222_v36, 2  ;;  %v12752_v63 = vadd.f32 %v8798_v1, %v8730_v50  ;;  %v15401_v26 = vld [vmem:[#allocation49_spill] sm:$0xff]  ;;  %v5227_v44 = vld [vmem:[#allocation2 + $0x320] sm:$0xff]  ;;  %v5228_v40 = vld [vmem:[#allocation2 + $0x328] sm:$0x3]  ;;  %v12764_v30 = vsel %vm2281_vm6, %v6686_v52, %v6687_v58  ;;  %v3279_v1 = vpop.f32.mrf.mxu0 }
 0x242   :  { %9040 = vmatmul.mubr.msk.bf16.gmra.mxu0 %vm852_vm2, %v15396_v4  ;;  %v15402_v7 = vpack.c.bf16 %v15401_v26, %v15140_v53  ;;  %v5229_v4 = vld [vmem:[#allocation2 + $0x330] sm:$0xff]  ;;  %v12761_v46 = vsel %vm2281_vm6, %v6682_v49, %v6684_v24  ;;  %15404 = vst [vmem:[#allocation100_spill] sm:$0xff] %v12764_v30  ;;  %v1872_v36 = vpop.f32.mrf.mxu1  ;;  %v5230_v62 = vld [vmem:[#allocation2 + $0x338] sm:$0xff]  ;;  %v5231_v16 = vld [vmem:[#allocation2 + $0x340] sm:$0x3]  ;;  %v6691_v50 = vrot.slane %v5223_v0, 2 }
 0x243   :  { %15400 = vst [vmem:[#allocation38_spill] sm:$0xff] %v12752_v63  ;;  %15403 = vst [vmem:[#allocation119_spill] sm:$0xff] %v12761_v46  ;;  %v12769_v45 = vsel %vm2281_vm6, %v6687_v58, %v6689_v15  ;;  %v6692_v26 = vrot.slane %v5224_v12, 2  ;;  %v6694_v24 = vrot.slane %v5225_v19, 2  ;;  %v6696_v52 = vrot.slane %v5226_v37, 2  ;;  %v15406_v3 = vld [vmem:[#allocation118_spill] sm:$0xff]  ;;  %v8874_v63 = vpop.f32.mrf.mxu0 }
 0x244   :  { %9043 = vmatprep.mubr.msk.bf16.mxu0 %vm852_vm2, %v15402_v7  ;;  %15405 = vst [vmem:[#allocation49_spill] sm:$0xff] %v12769_v45  ;;  %v12771_v7 = vadd.f32 %v2269_v5, %v1872_v36  ;;  %v8805_v47 = vpop.f32.mrf.mxu1  ;;  %v15407_v54 = vpack.c.bf16 %v12036_v2, %v15406_v3  ;;  %v6697_v58 = vrot.slane %v5227_v44, 2  ;;  %v6699_v0 = vrot.slane %v5228_v40, 2 }
 0x245   :  { %v12780_v53 = vsel %vm2281_vm6, %v6691_v50, %v6692_v26  ;;  %v6701_v12 = vrot.slane %v5229_v4, 2  ;;  %v2942_v5 = vadd.f32 %v8805_v47, %v12118_v28  ;;  %v12785_v19 = vsel %vm2281_vm6, %v6692_v26, %v6694_v24  ;;  %v3282_v2 = vpop.f32.mrf.mxu0  ;;  %v15416_v24 = vld [vmem:[#allocation47_spill] sm:$0xff] }
 0x246   :  { %8972 = vmatmul.mubr.msk.bf16.gmra.mxu1 %vm852_vm2, %v15407_v54  ;;  %15408 = vst [vmem:[#allocation118_spill] sm:$0xff] %v12780_v53  ;;  %15409 = vst [vmem:[#allocation142_spill] sm:$0xff] %v12785_v19  ;;  %v6702_v37 = vrot.slane %v5230_v62, 2  ;;  %v6704_v15 = vrot.slane %v5231_v16, 2  ;;  %v2685_v36 = vpop.f32.mrf.mxu1  ;;  %v12790_v54 = vsel %vm2281_vm6, %v6696_v52, %v6697_v58  ;;  %v12793_v44 = vsel %vm2281_vm6, %v6697_v58, %v6699_v0  ;;  %v15413_v16 = vld [vmem:[#allocation120_spill] sm:$0xff]  ;;  %v15419_v0 = vld [vmem:[#allocation3_spill] sm:$0xff] }
 0x247   :  { %8975 = vmatprep.mubr.msk.bf16.mxu1 %vm852_vm2, %v3936_v31  ;;  %15410 = vst [vmem:[#allocation143_spill] sm:$0xff] %v12790_v54  ;;  %15411 = vst [vmem:[#allocation144_spill] sm:$0xff] %v12793_v44  ;;  %v2940_v28 = vadd.f32 %v2685_v36, %v12128_v42  ;;  %v12796_v40 = vadd.f32 %v8873_v61, %v2942_v5  ;;  %v8877_v62 = vpop.f32.mrf.mxu0  ;;  %v15414_v50 = vpack.c.bf16 %v12051_v55, %v15413_v16  ;;  %v15418_v52 = vld [vmem:[#allocation8_spill] sm:$0xff]  ;;  %v9308_v44 = vld [vmem:[#allocation2 + $0x310] sm:$0x3] }
 0x248   :  { %v12801_v4 = vsel %vm2281_vm6, %v6701_v12, %v6702_v37  ;;  %v8806_v47 = vpop.f32.mrf.mxu1  ;;  %v15415_v26 = vrot.slane %v12734_v60, 1  ;;  %v12812_v61 = vsel %vm2281_vm6, %v6702_v37, %v6704_v15  ;;  %v15420_v12 = vpack.c.bf16 %v15419_v0, %v11260_v56  ;;  %v15421_v16 = vld [vmem:[#allocation76_spill] sm:$0xff]  ;;  %v15426_v0 = vld [vmem:[#allocation46_spill] sm:$0xff] }
 0x249   :  { %15412 = vst [vmem:[#allocation145_spill] sm:$0xff] %v12801_v4  ;;  %15417 = vst [vmem:[#allocation120_spill] sm:$0xff] %v12812_v61  ;;  %v2943_v58 = vadd.f32 %v8806_v47, %v15418_v52  ;;  %v12819_v5 = vadd.f32 %v3279_v1, %v2940_v28  ;;  %v3295_v60 = vpop.f32.mrf.mxu0  ;;  %v15423_v47 = vld [vmem:[#allocation60_spill] sm:$0xff]  ;;  %v15424_v52 = vld [vmem:[#allocation5_spill] sm:$0xff] }
 0x24a   :  { %9044 = vmatmul.mubr.msk.bf16.gmra.mxu0 %vm852_vm2, %v15414_v50  ;;  %v3798_v42 = vsel %vm1225_vm5, %v15416_v24, %v15415_v26  ;;  %v2688_v36 = vpop.f32.mrf.mxu1  ;;  %v15422_v26 = vld [vmem:[#allocation48_spill] sm:$0xff]  ;;  %v15425_v31 = vpack.c.bf16 %v15423_v47, %v15424_v52  ;;  %v15429_v52 = vld [vmem:[#allocation106_spill] sm:$0xff]  ;;  %v15436_v4 = vld [vmem:[#allocation59_spill] sm:$0xff] }
 0x24b   :  { %9047 = vmatprep.mubr.msk.bf16.mxu0 %vm852_vm2, %v15420_v12  ;;  %v2941_v50 = vadd.f32 %v2688_v36, %v15421_v16  ;;  %v3938_v24 = vpack.c.bf16 %v3798_v42, %v15422_v26  ;;  %v12825_v37 = vadd.f32 %v8874_v63, %v2943_v58  ;;  %v8878_v56 = vpop.f32.mrf.mxu0  ;;  %v9301_v1 = vld [vmem:[#allocation2 + $0x268] sm:$0x3] }
 0x24c   :  { %v8809_v15 = vpop.f32.mrf.mxu1  ;;  %v3807_v28 = vrot.slane %v9301_v1, 1  ;;  %v15427_v42 = vld [vmem:[#allocation16_spill] sm:$0xff] }
 0x24d   :  { %v2946_v12 = vadd.f32 %v8809_v15, %v15426_v0  ;;  %v12833_v55 = vadd.f32 %v3282_v2, %v2941_v50  ;;  %v3298_v16 = vpop.f32.mrf.mxu0  ;;  %v15428_v47 = vld [vmem:[#allocation4_spill] sm:$0xff]  ;;  %v15432_v0 = vld [vmem:[#allocation85_spill] sm:$0xff] }
 0x24e   :  { %8976 = vmatmul.mubr.msk.bf16.gmra.mxu1 %vm852_vm2, %v15425_v31  ;;  %v2701_v36 = vpop.f32.mrf.mxu1  ;;  %v15430_v31 = vpack.c.bf16 %v15428_v47, %v15429_v52  ;;  %v15431_v1 = vld [vmem:[#allocation56_spill] sm:$0xff]  ;;  %v15433_v2 = vld [vmem:[#allocation121_spill] sm:$0xff]  ;;  %v9302_v52 = vld [vmem:[#allocation2 + $0x280] sm:$0x3] }
 0x24f   :  { %8979 = vmatprep.mubr.msk.bf16.mxu1 %vm852_vm2, %v3938_v24  ;;  %v2944_v63 = vadd.f32 %v2701_v36, %v15427_v42  ;;  %v12836_v58 = vadd.f32 %v8877_v62, %v2946_v12  ;;  %v8881_v3 = vpop.f32.mrf.mxu0  ;;  %v3808_v15 = vsel %vm1225_vm5, %v15431_v1, %v3807_v28  ;;  %v15434_v50 = vpack.c.bf16 %v15433_v2, %v11281_v32  ;;  %v15435_v42 = vld [vmem:[#allocation33_spill] sm:$0xff]  ;;  %v15437_v1 = vld [vmem:[#allocation35_spill] sm:$0xff]  ;;  %v9303_v2 = vld [vmem:[#allocation2 + $0x298] sm:$0x3] }
 0x250   :  { %v8810_v26 = vpop.f32.mrf.mxu1  ;;  %v3940_v47 = vpack.c.bf16 %v3808_v15, %v15436_v4  ;;  %v15473_v53 = vld [vmem:[#allocation12_spill] sm:$0xff] }
 0x251   :  { %v2947_v24 = vadd.f32 %v8810_v26, %v15432_v0  ;;  %v12849_v36 = vadd.f32 %v3295_v60, %v2944_v63  ;;  %v3311_v12 = vpop.f32.mrf.mxu0  ;;  %v15438_v26 = vld [vmem:[#allocation22_spill] sm:$0xff]  ;;  %v3817_v60 = vrot.slane %v9303_v2, 1 }
 0x252   :  { %9048 = vmatmul.mubr.msk.bf16.gmra.mxu0 %vm852_vm2, %v15430_v31  ;;  %v2704_v62 = vpop.f32.mrf.mxu1  ;;  %v3812_v31 = vrot.slane %v9302_v52, 1  ;;  %v15439_v0 = vpack.c.bf16 %v15437_v1, %v15438_v26  ;;  %v15440_v63 = vld [vmem:[#allocation42_spill] sm:$0xff] }
 0x253   :  { %9051 = vmatprep.mubr.msk.bf16.mxu0 %vm852_vm2, %v15434_v50  ;;  %v2945_v49 = vadd.f32 %v2704_v62, %v15435_v42  ;;  %v12853_v61 = vadd.f32 %v8878_v56, %v2947_v24  ;;  %v8882_v32 = vpop.f32.mrf.mxu0  ;;  %v15441_v24 = vld [vmem:[#allocation52_spill] sm:$0xff] }
 0x254   :  { %v8813_v28 = vpop.f32.mrf.mxu1  ;;  %v3813_v42 = vsel %vm1225_vm5, %v15441_v24, %v3812_v31  ;;  %v15448_v24 = vld [vmem:[#allocation72_spill] sm:$0xff] }
 0x255   :  { %v2950_v50 = vadd.f32 %v8813_v28, %v15440_v63  ;;  %v12861_v62 = vadd.f32 %v3298_v16, %v2945_v49  ;;  %v3314_v15 = vpop.f32.mrf.mxu0  ;;  %v15444_v28 = vld [vmem:[#allocation68_spill] sm:$0xff] }
 0x256   :  { %8980 = vmatmul.mubr.msk.bf16.gmra.mxu1 %vm852_vm2, %v15439_v0  ;;  %v2717_v4 = vpop.f32.mrf.mxu1  ;;  %v15442_v0 = vld [vmem:[#allocation122_spill] sm:$0xff]  ;;  %v3818_v49 = vsel %vm1225_vm5, %v15444_v28, %v3817_v60 }
 0x257   :  { %8983 = vmatprep.mubr.msk.bf16.mxu1 %vm852_vm2, %v3940_v47  ;;  %v2948_v56 = vadd.f32 %v2717_v4, %v12223_v33  ;;  %v12866_v52 = vadd.f32 %v8881_v3, %v2950_v50  ;;  %v8885_v26 = vpop.f32.mrf.mxu0  ;;  %v15443_v2 = vpack.c.bf16 %v15442_v0, %v11292_v57  ;;  %v15445_v47 = vld [vmem:[#allocation24_spill] sm:$0xff]  ;;  %v15447_v50 = vld [vmem:[#allocation58_spill] sm:$0xff]  ;;  %v3942_v0 = vpack.c.bf16 %v3818_v49, %v15448_v24 }
 0x258   :  { %v8814_v1 = vpop.f32.mrf.mxu1  ;;  %v15446_v33 = vpack.c.bf16 %v15445_v47, %v11307_v13  ;;  %v3941_v4 = vpack.c.bf16 %v3813_v42, %v15447_v50  ;;  %v15449_v47 = vld [vmem:[#allocation64_spill] sm:$0xff]  ;;  %v15450_v50 = vld [vmem:[#allocation9_spill] sm:$0xff] }
 0x259   :  { %v2951_v16 = vadd.f32 %v8814_v1, %v12230_v38  ;;  %v12879_v31 = vadd.f32 %v3311_v12, %v2948_v56  ;;  %v3327_v63 = vpop.f32.mrf.mxu0  ;;  %v9305_v1 = vld [vmem:[#allocation2 + $0x2c8] sm:$0x3] }
 0x25a   :  { %9052 = vmatmul.mubr.msk.bf16.gmra.mxu0 %vm852_vm2, %v15443_v2  ;;  %v2720_v3 = vpop.f32.mrf.mxu1  ;;  %v9304_v2 = vld [vmem:[#allocation2 + $0x2b0] sm:$0x3]  ;;  %v3827_v28 = vrot.slane %v9305_v1, 1 }
 0x25b   :  { %9055 = vmatprep.mubr.msk.bf16.mxu0 %vm852_vm2, %v15446_v33  ;;  %v2949_v57 = vadd.f32 %v2720_v3, %v12236_v10  ;;  %v3822_v54 = vrot.slane %v9304_v2, 1  ;;  %v12884_v60 = vadd.f32 %v8882_v32, %v2951_v16  ;;  %v8886_v13 = vpop.f32.mrf.mxu0 }
 0x25c   :  { %v8817_v38 = vpop.f32.mrf.mxu1 }
 0x25d   :  { %v2954_v12 = vadd.f32 %v8817_v38, %v12242_v20  ;;  %v12889_v56 = vadd.f32 %v3314_v15, %v2949_v57  ;;  %v3330_v10 = vpop.f32.mrf.mxu0  ;;  %v3823_v32 = vsel %vm1225_vm5, %v15449_v47, %v3822_v54  ;;  %v15452_v20 = vld [vmem:[#allocation81_spill] sm:$0xff]  ;;  %v15453_v57 = vld [vmem:[#allocation30_spill] sm:$0xff] }
 0x25e   :  { %8984 = vmatmul.mubr.msk.bf16.gmra.mxu1 %vm852_vm2, %v3941_v4  ;;  %v2733_v42 = vpop.f32.mrf.mxu1  ;;  %v15451_v4 = vpack.c.bf16 %v15450_v50, %v15172_v29  ;;  %v3828_v15 = vsel %vm1225_vm5, %v15452_v20, %v3827_v28  ;;  %v15456_v38 = vld [vmem:[#allocation69_spill] sm:$0xff]  ;;  %v9306_v50 = vld [vmem:[#allocation2 + $0x2e0] sm:$0x3]  ;;  %v9307_v20 = vld [vmem:[#allocation2 + $0x2f8] sm:$0x3] }
 0x25f   :  { %8987 = vmatprep.mubr.msk.bf16.mxu1 %vm852_vm2, %v3942_v0  ;;  %v2952_v49 = vadd.f32 %v2733_v42, %v12248_v59  ;;  %v12894_v16 = vadd.f32 %v8885_v26, %v2954_v12  ;;  %v8889_v3 = vpop.f32.mrf.mxu0  ;;  %v15454_v0 = vld [vmem:[#allocation6_spill] sm:$0xff]  ;;  %v3943_v1 = vpack.c.bf16 %v3823_v32, %v15456_v38  ;;  %v15457_v12 = vld [vmem:[#allocation32_spill] sm:$0xff]  ;;  %v15458_v42 = vld [vmem:[#allocation83_spill] sm:$0xff] }
 0x260   :  { %v8818_v33 = vpop.f32.mrf.mxu1  ;;  %v15455_v59 = vpack.c.bf16 %v15454_v0, %v15177_v25  ;;  %v3944_v47 = vpack.c.bf16 %v3828_v15, %v15458_v42  ;;  %v15462_v38 = vld [vmem:[#allocation77_spill] sm:$0xff] }
 0x261   :  { %v2955_v24 = vadd.f32 %v8818_v33, %v15453_v57  ;;  %v12907_v54 = vadd.f32 %v3327_v63, %v2952_v49  ;;  %v3343_v2 = vpop.f32.mrf.mxu0  ;;  %v3837_v57 = vrot.slane %v9307_v20, 1  ;;  %v15459_v63 = vld [vmem:[#allocation31_spill] sm:$0xff]  ;;  %v15464_v42 = vld [vmem:[#allocation17_spill] sm:$0xff]  ;;  %v15468_v20 = vld [vmem:[#allocation92_spill] sm:$0xff] }
 0x262   :  { %9056 = vmatmul.mubr.msk.bf16.gmra.mxu0 %vm852_vm2, %v15451_v4  ;;  %v2736_v26 = vpop.f32.mrf.mxu1  ;;  %v3832_v4 = vrot.slane %v9306_v50, 1  ;;  %v15465_v50 = vpack.c.bf16 %v15464_v42, %v15189_v11  ;;  %v3842_v11 = vrot.slane %v9308_v44, 1  ;;  %v9309_v42 = vld [vmem:[#allocation2 + $0x328] sm:$0x3] }
 0x263   :  { %9059 = vmatprep.mubr.msk.bf16.mxu0 %vm852_vm2, %v15455_v59  ;;  %v2953_v29 = vadd.f32 %v2736_v26, %v15457_v12  ;;  %v12912_v28 = vadd.f32 %v8886_v13, %v2955_v24  ;;  %v8890_v25 = vpop.f32.mrf.mxu0  ;;  %v15461_v26 = vld [vmem:[#allocation57_spill] sm:$0xff] }
 0x264   :  { %v8821_v33 = vpop.f32.mrf.mxu1  ;;  %v3833_v13 = vsel %vm1225_vm5, %v15462_v38, %v3832_v4 }
 0x265   :  { %v2958_v49 = vadd.f32 %v8821_v33, %v15459_v63  ;;  %v12917_v0 = vadd.f32 %v3330_v10, %v2953_v29  ;;  %v3346_v59 = vpop.f32.mrf.mxu0  ;;  %v15466_v33 = vld [vmem:[#allocation88_spill] sm:$0xff]  ;;  %v15467_v29 = vld [vmem:[#allocation66_spill] sm:$0xff]  ;;  %v15469_v63 = vld [vmem:[#allocation51_spill] sm:$0xff] }
 0x266   :  { %8988 = vmatmul.mubr.msk.bf16.gmra.mxu1 %vm852_vm2, %v3943_v1  ;;  %v2749_v32 = vpop.f32.mrf.mxu1  ;;  %v3838_v10 = vsel %vm1225_vm5, %v15466_v33, %v3837_v57  ;;  %v15474_v57 = vld [vmem:[#allocation91_spill] sm:$0xff] }
 0x267   :  { %8991 = vmatprep.mubr.msk.bf16.mxu1 %vm852_vm2, %v3944_v47  ;;  %15460 = vst [vmem:[#allocation47_spill] sm:$0xff] %v12917_v0  ;;  %v2956_v15 = vadd.f32 %v2749_v32, %v15461_v26  ;;  %v12922_v24 = vadd.f32 %v8889_v3, %v2958_v49  ;;  %v8893_v1 = vpop.f32.mrf.mxu0  ;;  %v15470_v32 = vpack.c.bf16 %v15468_v20, %v15469_v63  ;;  %v15472_v26 = vld [vmem:[#allocation82_spill] sm:$0xff] }
 0x268   :  { %v8822_v12 = vpop.f32.mrf.mxu1  ;;  %v3945_v38 = vpack.c.bf16 %v3833_v13, %v15472_v26  ;;  %v3946_v33 = vpack.c.bf16 %v3838_v10, %v15474_v57 }
 0x269   :  { %15463 = vst [vmem:[#allocation8_spill] sm:$0xff] %v12922_v24  ;;  %v2959_v47 = vadd.f32 %v8822_v12, %v15467_v29  ;;  %v12935_v4 = vadd.f32 %v3343_v2, %v2956_v15  ;;  %v3359_v49 = vpop.f32.mrf.mxu0  ;;  %v15476_v2 = vld [vmem:[#allocation45_spill] sm:$0xff]  ;;  %v15505_v24 = vld [vmem:[#allocation103_spill] sm:$0xff] }
 0x26a   :  { %9060 = vmatmul.mubr.msk.bf16.gmra.mxu0 %vm852_vm2, %v15465_v50  ;;  %v2752_v3 = vpop.f32.mrf.mxu1  ;;  %v3847_v50 = vrot.slane %v9309_v42, 1  ;;  %v9311_v42 = vld [vmem:[#allocation2 + $0x40] sm:$0x3] }
 0x26b   :  { %9063 = vmatprep.mubr.msk.bf16.mxu0 %vm852_vm2, %v15470_v32  ;;  %15471 = vst [vmem:[#allocation3_spill] sm:$0xff] %v12935_v4  ;;  %v2957_v19 = vadd.f32 %v2752_v3, %v15473_v53  ;;  %v12940_v12 = vadd.f32 %v8890_v25, %v2959_v47  ;;  %v8894_v20 = vpop.f32.mrf.mxu0  ;;  %v15478_v32 = vld [vmem:[#allocation86_spill] sm:$0xff]  ;;  %v15479_v53 = vld [vmem:[#allocation97_spill] sm:$0xff]  ;;  %v15480_v25 = vld [vmem:[#allocation67_spill] sm:$0xff]  ;;  %v5832_v57 = vrot.slane %v9311_v42, 1 }
 0x26c   :  { %v8825_v29 = vpop.f32.mrf.mxu1  ;;  %v3843_v26 = vsel %vm1225_vm5, %v15478_v32, %v3842_v11  ;;  %v3848_v10 = vsel %vm1225_vm5, %v15479_v53, %v3847_v50  ;;  %v12952_v3 = vld [vmem:[#allocation2 + $0x38] sm:$0xff]  ;;  %v15485_v11 = vld [vmem:[#allocation79_spill] sm:$0xff] }
 0x26d   :  { %15475 = vst [vmem:[#allocation76_spill] sm:$0xff] %v12940_v12  ;;  %v2962_v15 = vadd.f32 %v8825_v29, %v15476_v2  ;;  %v12945_v63 = vadd.f32 %v3346_v59, %v2957_v19  ;;  %v3362_v44 = vpop.f32.mrf.mxu0  ;;  %v15483_v2 = vld [vmem:[#allocation65_spill] sm:$0xff]  ;;  %v15486_v50 = vld [vmem:[#allocation94_spill] sm:$0xff] }
 0x26e   :  { %8992 = vmatmul.mubr.msk.bf16.gmra.mxu1 %vm852_vm2, %v3945_v38  ;;  %v2765_v13 = vpop.f32.mrf.mxu1  ;;  %v5830_v38 = vrot.slane %v12952_v3, 1  ;;  %v15487_v53 = vld [vmem:[#allocation18_spill] sm:$0xff] }
 0x26f   :  { %8995 = vmatprep.mubr.msk.bf16.mxu1 %vm852_vm2, %v3946_v33  ;;  %15477 = vst [vmem:[#allocation48_spill] sm:$0xff] %v12945_v63  ;;  %v2960_v47 = vadd.f32 %v2765_v13, %v15480_v25  ;;  %v12955_v29 = vadd.f32 %v8893_v1, %v2962_v15  ;;  %v8897_v59 = vpop.f32.mrf.mxu0  ;;  %v15482_v33 = vld [vmem:[#allocation29_spill] sm:$0xff]  ;;  %v15488_v13 = vpack.c.bf16 %v15486_v50, %v15487_v53  ;;  %v15490_v42 = vld [vmem:[#allocation90_spill] sm:$0xff] }
 0x270   :  { %v8826_v19 = vpop.f32.mrf.mxu1  ;;  %v15484_v30 = vpack.c.bf16 %v15482_v33, %v15483_v2  ;;  %v9312_v25 = vld [vmem:[#allocation2 + $0x30] sm:$0xff]  ;;  %v3947_v46 = vpack.c.bf16 %v3843_v26, %v15490_v42  ;;  %v15492_v33 = vld [vmem:[#allocation11_spill] sm:$0xff]  ;;  %v12984_v42 = vld [vmem:[#allocation2 + $0x68] sm:$0xff] }
 0x271   :  { %15481 = vst [vmem:[#allocation60_spill] sm:$0xff] %v12955_v29  ;;  %v2963_v32 = vadd.f32 %v8826_v19, %v15485_v11  ;;  %v5829_v45 = vrot.slane %v9312_v25, 1  ;;  %v12966_v14 = vadd.f32 %v3359_v49, %v2960_v47  ;;  %v3375_v15 = vpop.f32.mrf.mxu0  ;;  %v15491_v29 = vld [vmem:[#allocation99_spill] sm:$0xff]  ;;  %v5833_v19 = vsel %vm1225_vm5, %v5830_v38, %v5832_v57  ;;  %v15494_v49 = vld [vmem:[#allocation50_spill] sm:$0xff]  ;;  %v15496_v57 = vld [vmem:[#allocation80_spill] sm:$0xff] }
 0x272   :  { %9064 = vmatmul.mubr.msk.bf16.gmra.mxu0 %vm852_vm2, %v15484_v30  ;;  %v2768_v1 = vpop.f32.mrf.mxu1  ;;  %v3948_v63 = vpack.c.bf16 %v3848_v10, %v15491_v29 }
 0x273   :  { %9067 = vmatprep.mubr.msk.bf16.mxu0 %vm852_vm2, %v15488_v13  ;;  %15489 = vst [vmem:[#allocation5_spill] sm:$0xff] %v12966_v14  ;;  %v2961_v2 = vadd.f32 %v2768_v1, %v15492_v33  ;;  %v5831_v30 = vsel %vm1225_vm5, %v5829_v45, %v5830_v38  ;;  %v12973_v11 = vadd.f32 %v8894_v20, %v2963_v32  ;;  %v8898_v53 = vpop.f32.mrf.mxu0  ;;  %v12980_v1 = vld [vmem:[#allocation2 + $0x50] sm:$0xff]  ;;  %v9314_v38 = vld [vmem:[#allocation2 + $0x58] sm:$0x3] }
 0x274   :  { %v6053_v29 = vpack.c.bf16 %v5833_v19, %v5831_v30  ;;  %v5835_v45 = vrot.slane %v12980_v1, 1  ;;  %v5837_v20 = vrot.slane %v9314_v38, 1  ;;  %v9316_v33 = vld [vmem:[#allocation2 + $0x70] sm:$0x3]  ;;  %v15499_v30 = vld [vmem:[#allocation10_spill] sm:$0xff]  ;;  %v15501_v38 = vld [vmem:[#allocation87_spill] sm:$0xff] }
 0x275   :  { %15493 = vst [vmem:[#allocation46_spill] sm:$0xff] %v12973_v11  ;;  %v12978_v13 = vadd.f32 %v3362_v44, %v2961_v2  ;;  %v3378_v10 = vpop.f32.mrf.mxu0 }
 0x276   :  { %v8829_v50 = vpop.f32.mrf.mxu1  ;;  %8996 = vmatmul.mubr.msk.bf16.gmra.mxu1 %vm852_vm2, %v3947_v46  ;;  %v5840_v46 = vrot.slane %v12984_v42, 1 }
 0x277   :  { %v2966_v47 = vadd.f32 %v8829_v50, %v15494_v49  ;;  %8999 = vmatprep.mubr.msk.bf16.mxu1 %vm852_vm2, %v3948_v63  ;;  %15495 = vst [vmem:[#allocation16_spill] sm:$0xff] %v12978_v13  ;;  %v5842_v50 = vrot.slane %v9316_v33, 1  ;;  %v8901_v2 = vpop.f32.mrf.mxu0  ;;  %v15498_v49 = vld [vmem:[#allocation93_spill] sm:$0xff]  ;;  %v9317_v13 = vld [vmem:[#allocation2 + $0x48] sm:$0xff] }
 0x278   :  { %v2781_v26 = vpop.f32.mrf.mxu1  ;;  %v15500_v19 = vpack.c.bf16 %v15498_v49, %v15499_v30  ;;  %v5834_v11 = vrot.slane %v9317_v13, 1  ;;  %v5838_v49 = vsel %vm1225_vm5, %v5835_v45, %v5837_v20  ;;  %v15503_v30 = vld [vmem:[#allocation40_spill] sm:$0xff] }
 0x279   :  { %v2964_v32 = vadd.f32 %v2781_v26, %v15496_v57  ;;  %v12987_v63 = vadd.f32 %v8897_v59, %v2966_v47  ;;  %v9318_v26 = vld [vmem:[#allocation2 + $0x60] sm:$0xff]  ;;  %v3391_v59 = vpop.f32.mrf.mxu0  ;;  %v5235_v47 = vpack.c.bf16 %v12952_v3, %v9312_v25 }
 0x27a   :  { %v8830_v44 = vpop.f32.mrf.mxu1  ;;  %9068 = vmatmul.mubr.msk.bf16.gmra.mxu0 %vm852_vm2, %v15500_v19  ;;  %v5839_v57 = vrot.slane %v9318_v26, 1  ;;  %v15508_v3 = vld [vmem:[#allocation63_spill] sm:$0xff] }
 0x27b   :  { %15497 = vst [vmem:[#allocation4_spill] sm:$0xff] %v12987_v63  ;;  %v2967_v14 = vadd.f32 %v8830_v44, %v15501_v38  ;;  %9143 = vmatprep.mubr.msk.bf16.mxu0 %vm852_vm2, %v6053_v29  ;;  %v12995_v12 = vadd.f32 %v3375_v15, %v2964_v32  ;;  %v5836_v63 = vsel %vm1225_vm5, %v5834_v11, %v5835_v45  ;;  %v15506_v15 = vld [vmem:[#allocation55_spill] sm:$0xff] }
 0x27c   :  { %v2784_v33 = vpop.f32.mrf.mxu1  ;;  %v5841_v4 = vsel %vm1225_vm5, %v5839_v57, %v5840_v46  ;;  %v5843_v44 = vsel %vm1225_vm5, %v5840_v46, %v5842_v50  ;;  %v15507_v32 = vpack.c.bf16 %v15505_v24, %v15506_v15  ;;  %v6054_v57 = vpack.c.bf16 %v5838_v49, %v5836_v63  ;;  %v13013_v46 = vld [vmem:[#allocation2 + $0x80] sm:$0xff]  ;;  %v15510_v24 = vld [vmem:[#allocation89_spill] sm:$0xff]  ;;  %v13017_v15 = vld [vmem:[#allocation2 + $0x98] sm:$0xff] }
 0x27d   :  { %15502 = vst [vmem:[#allocation106_spill] sm:$0xff] %v12995_v12  ;;  %v2965_v19 = vadd.f32 %v2784_v33, %v15503_v30  ;;  %v13003_v38 = vadd.f32 %v8898_v53, %v2967_v14  ;;  %v8902_v12 = vpop.f32.mrf.mxu0  ;;  %v6055_v33 = vpack.c.bf16 %v5843_v44, %v5841_v4  ;;  %v5845_v14 = vrot.slane %v13013_v46, 1  ;;  %v9320_v53 = vld [vmem:[#allocation2 + $0x88] sm:$0x3]  ;;  %v13023_v4 = vld [vmem:[#allocation2 + $0x78] sm:$0xff] }
 0x27e   :  { %v8833_v29 = vpop.f32.mrf.mxu1  ;;  %9000 = vmatmul.mubr.msk.bf16.gmra.mxu1 %vm852_vm2, %v15507_v32  ;;  %v5847_v50 = vrot.slane %v9320_v53, 1  ;;  %v9322_v32 = vld [vmem:[#allocation2 + $0xa0] sm:$0x3]  ;;  %v5844_v63 = vrot.slane %v13023_v4, 1  ;;  %v15512_v49 = vld [vmem:[#allocation96_spill] sm:$0xff] }
 0x27f   :  { %15504 = vst [vmem:[#allocation56_spill] sm:$0xff] %v13003_v38  ;;  %v2970_v25 = vadd.f32 %v8833_v29, %v15508_v3  ;;  %9075 = vmatprep.mubr.msk.bf16.mxu1 %vm852_vm2, %v5235_v47  ;;  %v13011_v11 = vadd.f32 %v3378_v10, %v2965_v19  ;;  %v3394_v20 = vpop.f32.mrf.mxu0  ;;  %v5850_v29 = vrot.slane %v13017_v15, 1  ;;  %v5852_v47 = vrot.slane %v9322_v32, 1 }
 0x280   :  { %v2797_v45 = vpop.f32.mrf.mxu1  ;;  %v5236_v32 = vpack.c.bf16 %v12980_v1, %v9317_v13  ;;  %v15516_v1 = vld [vmem:[#allocation13_spill] sm:$0xff] }
 0x281   :  { %15509 = vst [vmem:[#allocation85_spill] sm:$0xff] %v13011_v11  ;;  %v2968_v30 = vadd.f32 %v2797_v45, %v15510_v24  ;;  %v13020_v10 = vadd.f32 %v8901_v2, %v2970_v25  ;;  %v8905_v3 = vpop.f32.mrf.mxu0  ;;  %v13028_v45 = vld [vmem:[#allocation2 + $0x90] sm:$0xff]  ;;  %v5848_v11 = vsel %vm1225_vm5, %v5845_v14, %v5847_v50 }
 0x282   :  { %v8834_v19 = vpop.f32.mrf.mxu1  ;;  %9144 = vmatmul.mubr.msk.bf16.vlgmr.msra.gmra.mxu0 %vm852_vm2, %v6054_v57  ;;  %v5849_v53 = vrot.slane %v13028_v45, 1  ;;  %v5237_v57 = vpack.c.bf16 %v12984_v42, %v9318_v26  ;;  %v9325_v26 = vld [vmem:[%s14390_s5 + $0x88] sm:$0xff]  }
 0x283   :  { %15511 = vst [vmem:[#allocation121_spill] sm:$0xff] %v13020_v10  ;;  %v2971_v44 = vadd.f32 %v8834_v19, %v15512_v49  ;;  %9147 = vmatprep.mubr.msk.bf16.mxu0 %vm852_vm2, %v6055_v33  ;;  %v13031_v24 = vadd.f32 %v3391_v59, %v2968_v30  ;;  %v3407_v25 = vpop.f32.mrf.mxu0  ;;  %v5846_v10 = vsel %vm1225_vm5, %v5844_v63, %v5845_v14  ;;  %v9294_v33 = vld [vmem:[%s14390_s5 + $0x80] sm:$0xff]   ;;  %v15514_v19 = vld [vmem:[#allocation78_spill] sm:$0xff] }
 0x284   :  { %v2800_v2 = vpop.f32.mrf.mxu1  ;;  %v5851_v38 = vsel %vm1225_vm5, %v5849_v53, %v5850_v29  ;;  %v5853_v59 = vsel %vm1225_vm5, %v5850_v29, %v5852_v47  ;;  %v6056_v29 = vpack.c.bf16 %v5848_v11, %v5846_v10  ;;  %v13053_v47 = vld [vmem:[#allocation2 + $0xb0] sm:$0xff]  ;;  %v9327_v53 = vld [vmem:[#allocation2 + $0xb8] sm:$0x3] }
 0x285   :  { %15513 = vst [vmem:[#allocation33_spill] sm:$0xff] %v13031_v24  ;;  %v2969_v49 = vadd.f32 %v2800_v2, %v15514_v19  ;;  %v13043_v30 = vadd.f32 %v8902_v12, %v2971_v44  ;;  %v8906_v13 = vpop.f32.mrf.mxu0  ;;  %v6057_v12 = vpack.c.bf16 %v5853_v59, %v5851_v38  ;;  %v5855_v44 = vrot.slane %v13053_v47, 1  ;;  %v13057_v19 = vld [vmem:[#allocation2 + $0xc8] sm:$0xff]  ;;  %v15519_v59 = vld [vmem:[#allocation15_spill] sm:$0xff] }
 0x286   :  { %v8837_v24 = vpop.f32.mrf.mxu1  ;;  %9076 = vmatmul.mubr.msk.bf16.vlgmr.msra.gmra.mxu1 %vm852_vm2, %v5236_v32  ;;  %v5857_v2 = vrot.slane %v9327_v53, 1  ;;  %v9330_v38 = vld [vmem:[#allocation2 + $0xa8] sm:$0xff]  ;;  %v9331_v53 = vld [vmem:[#allocation2 + $0xc0] sm:$0xff] }
 0x287   :  { %15515 = vst [vmem:[#allocation59_spill] sm:$0xff] %v13043_v30  ;;  %v2974_v42 = vadd.f32 %v8837_v24, %v15516_v1  ;;  %9208 = vmatpush3.bf16.msra.mxu1 %v9325_v26  ;;  %9079 = vmatprep.mubr.msk.bf16.mxu1 %vm852_vm2, %v5237_v57  ;;  %v13051_v14 = vadd.f32 %v3394_v20, %v2969_v49  ;;  %v3410_v63 = vpop.f32.mrf.mxu0  ;;  %v15518_v24 = vld [vmem:[#allocation62_spill] sm:$0xff]  ;;  %v5860_v1 = vrot.slane %v13057_v19, 1  ;;  %v9329_v57 = vld [vmem:[#allocation2 + $0xd0] sm:$0x3]  ;;  %v5854_v10 = vrot.slane %v9330_v38, 1 }
 0x288   :  { %v2813_v50 = vpop.f32.mrf.mxu1  ;;  %9209 = vmatprep.subr.bf16.mxu1 %v9294_v33  ;;  %v5862_v20 = vrot.slane %v9329_v57, 1  ;;  %v5858_v57 = vsel %vm1225_vm5, %v5855_v44, %v5857_v2 }
 0x289   :  { %15517 = vst [vmem:[#allocation35_spill] sm:$0xff] %v13051_v14  ;;  %v2972_v32 = vadd.f32 %v2813_v50, %v15518_v24  ;;  %v13060_v49 = vadd.f32 %v8905_v3, %v2974_v42  ;;  %v8909_v11 = vpop.f32.mrf.mxu0  ;;  %v5859_v50 = vrot.slane %v9331_v53, 1  ;;  %v5238_v3 = vpack.c.bf16 %v13013_v46, %v13023_v4  ;;  %v15523_v46 = vld [vmem:[#allocation19_spill] sm:$0xff] }
 0x28a   :  { %v8838_v26 = vpop.f32.mrf.mxu1  ;;  %9148 = vmatmul.mubr.msk.bf16.gmra.mxu0 %vm852_vm2, %v6056_v29  ;;  %v5239_v42 = vpack.c.bf16 %v13017_v15, %v13028_v45  ;;  %v5856_v29 = vsel %vm1225_vm5, %v5854_v10, %v5855_v44  ;;  %v13083_v10 = vld [vmem:[#allocation2 + $0xe0] sm:$0xff] }
 0x28b   :  { %v2975_v14 = vadd.f32 %v8838_v26, %v15519_v59  ;;  %9151 = vmatprep.mubr.msk.bf16.mxu0 %vm852_vm2, %v6057_v12  ;;  %9210 = vmatpush3.bf16.msra.mxu1 %v9294_v33  ;;  %v13065_v24 = vadd.f32 %v3407_v25, %v2972_v32  ;;  %v3423_v0 = vpop.f32.mrf.mxu0  ;;  %v15521_v26 = vld [vmem:[#allocation14_spill] sm:$0xff]  ;;  %v5861_v12 = vsel %vm1225_vm5, %v5859_v50, %v5860_v1 }
 0x28c   :  { %v2816_v30 = vpop.f32.mrf.mxu1  ;;  %v5863_v33 = vsel %vm1225_vm5, %v5860_v1, %v5862_v20  ;;  %v6058_v2 = vpack.c.bf16 %v5858_v57, %v5856_v29  ;;  %v5865_v1 = vrot.slane %v13083_v10, 1  ;;  %v15525_v20 = vld [vmem:[#allocation61_spill] sm:$0xff]  ;;  %v9336_v29 = vld [vmem:[#allocation2 + $0xd8] sm:$0xff] }
 0x28d   :  { %15520 = vst [vmem:[#allocation22_spill] sm:$0xff] %v13065_v24  ;;  %v2973_v59 = vadd.f32 %v2816_v30, %v15521_v26  ;;  %v13076_v25 = vadd.f32 %v8906_v13, %v2975_v14  ;;  %v8910_v24 = vpop.f32.mrf.mxu0  ;;  %v6059_v30 = vpack.c.bf16 %v5863_v33, %v5861_v12  ;;  %v9333_v13 = vld [vmem:[#allocation2 + $0xe8] sm:$0x3]  ;;  %v5864_v57 = vrot.slane %v9336_v29, 1  ;;  %v15527_v12 = vld [vmem:[#allocation73_spill] sm:$0xff] }
 0x28e   :  { %v8841_v32 = vpop.f32.mrf.mxu1  ;;  %9080 = vmatmul.mubr.msk.bf16.gmra.mxu1 %vm852_vm2, %v5238_v3  ;;  %v5867_v14 = vrot.slane %v9333_v13, 1  ;;  %v13087_v3 = vld [vmem:[#allocation2 + $0xf8] sm:$0xff]  ;;  %v9337_v13 = vld [vmem:[#allocation2 + $0xf0] sm:$0xff] }
 0x28f   :  { %15522 = vst [vmem:[#allocation42_spill] sm:$0xff] %v13076_v25  ;;  %v2978_v4 = vadd.f32 %v8841_v32, %v15523_v46  ;;  %9083 = vmatprep.mubr.msk.bf16.mxu1 %vm852_vm2, %v5239_v42  ;;  %v13081_v15 = vadd.f32 %v3410_v63, %v2973_v59  ;;  %v3426_v44 = vpop.f32.mrf.mxu0  ;;  %v5870_v26 = vrot.slane %v13087_v3, 1  ;;  %v9335_v32 = vld [vmem:[#allocation2 + $0x100] sm:$0x3] }
 0x290   :  { %v2829_v45 = vpop.f32.mrf.mxu1  ;;  %v5872_v42 = vrot.slane %v9335_v32, 1  ;;  %v5240_v32 = vpack.c.bf16 %v13053_v47, %v9330_v38 }
 0x291   :  { %15524 = vst [vmem:[#allocation52_spill] sm:$0xff] %v13081_v15  ;;  %v2976_v50 = vadd.f32 %v2829_v45, %v15525_v20  ;;  %v13090_v63 = vadd.f32 %v8909_v11, %v2978_v4  ;;  %v8913_v46 = vpop.f32.mrf.mxu0  ;;  %v5869_v45 = vrot.slane %v9337_v13, 1  ;;  %v5241_v11 = vpack.c.bf16 %v13057_v19, %v9331_v53 }
 0x292   :  { %v8842_v59 = vpop.f32.mrf.mxu1  ;;  %9152 = vmatmul.mubr.msk.bf16.gmra.mxu0 %vm852_vm2, %v6058_v2  ;;  %v5866_v4 = vsel %vm1225_vm5, %v5864_v57, %v5865_v1  ;;  %v5868_v2 = vsel %vm1225_vm5, %v5865_v1, %v5867_v14  ;;  %v13115_v57 = vld [vmem:[#allocation2 + $0x128] sm:$0xff] }
 0x293   :  { %15526 = vst [vmem:[#allocation122_spill] sm:$0xff] %v13090_v63  ;;  %v2979_v33 = vadd.f32 %v8842_v59, %v15527_v12  ;;  %9155 = vmatprep.mubr.msk.bf16.mxu0 %vm852_vm2, %v6059_v30  ;;  %v13095_v20 = vadd.f32 %v3423_v0, %v2976_v50  ;;  %v3439_v25 = vpop.f32.mrf.mxu0  ;;  %v5871_v59 = vsel %vm1225_vm5, %v5869_v45, %v5870_v26 }
 0x294   :  { %v2832_v15 = vpop.f32.mrf.mxu1  ;;  %v5873_v30 = vsel %vm1225_vm5, %v5870_v26, %v5872_v42  ;;  %v6060_v1 = vpack.c.bf16 %v5868_v2, %v5866_v4 }
 0x295   :  { %v2977_v63 = vadd.f32 %v2832_v15, %v12404_v8  ;;  %v13104_v12 = vadd.f32 %v8910_v24, %v2979_v33  ;;  %v8914_v50 = vpop.f32.mrf.mxu0  ;;  %v6061_v8 = vpack.c.bf16 %v5873_v30, %v5871_v59  ;;  %v13111_v15 = vld [vmem:[#allocation2 + $0x110] sm:$0xff]  ;;  %v9339_v24 = vld [vmem:[#allocation2 + $0x118] sm:$0x3]  ;;  %v9343_v59 = vld [vmem:[#allocation2 + $0x120] sm:$0xff] }
 0x296   :  { %v8845_v0 = vpop.f32.mrf.mxu1  ;;  %9084 = vmatmul.mubr.msk.bf16.gmra.mxu1 %vm852_vm2, %v5240_v32  ;;  %v5875_v14 = vrot.slane %v13111_v15, 1  ;;  %v5877_v26 = vrot.slane %v9339_v24, 1  ;;  %v9341_v33 = vld [vmem:[#allocation2 + $0x130] sm:$0x3]  ;;  %v5242_v24 = vpack.c.bf16 %v13083_v10, %v9336_v29 }
 0x297   :  { %v2982_v47 = vadd.f32 %v8845_v0, %v12416_v27  ;;  %9087 = vmatprep.mubr.msk.bf16.mxu1 %vm852_vm2, %v5241_v11  ;;  %v13109_v19 = vadd.f32 %v3426_v44, %v2977_v63  ;;  %v3442_v53 = vpop.f32.mrf.mxu0  ;;  %v5880_v27 = vrot.slane %v13115_v57, 1  ;;  %v5882_v45 = vrot.slane %v9341_v33, 1  ;;  %v9342_v11 = vld [vmem:[#allocation2 + $0x108] sm:$0xff] }
 0x298   :  { %v2845_v38 = vpop.f32.mrf.mxu1  ;;  %v5874_v4 = vrot.slane %v9342_v11, 1 }
 0x299   :  { %v2980_v42 = vadd.f32 %v2845_v38, %v12435_v17  ;;  %v13118_v44 = vadd.f32 %v8913_v46, %v2982_v47  ;;  %v8917_v32 = vpop.f32.mrf.mxu0  ;;  %v5879_v17 = vrot.slane %v9343_v59, 1  ;;  %v5243_v46 = vpack.c.bf16 %v13087_v3, %v9337_v13 }
 0x29a   :  { %v8846_v63 = vpop.f32.mrf.mxu1  ;;  %9156 = vmatmul.mubr.msk.bf16.gmra.mxu0 %vm852_vm2, %v6060_v1  ;;  %v5876_v47 = vsel %vm1225_vm5, %v5874_v4, %v5875_v14  ;;  %v5878_v1 = vsel %vm1225_vm5, %v5875_v14, %v5877_v26  ;;  %v13139_v26 = vld [vmem:[#allocation2 + $0x140] sm:$0xff] }
 0x29b   :  { %v2983_v2 = vadd.f32 %v8846_v63, %v12444_v18  ;;  %9159 = vmatprep.mubr.msk.bf16.mxu0 %vm852_vm2, %v6061_v8  ;;  %v13123_v30 = vadd.f32 %v3439_v25, %v2980_v42  ;;  %v3455_v38 = vpop.f32.mrf.mxu0  ;;  %v5881_v18 = vsel %vm1225_vm5, %v5879_v17, %v5880_v27  ;;  %v5883_v8 = vsel %vm1225_vm5, %v5880_v27, %v5882_v45  ;;  %v9347_v17 = vld [vmem:[#allocation2 + $0x160] sm:$0x3] }
 0x29c   :  { %v2848_v0 = vpop.f32.mrf.mxu1  ;;  %v6062_v14 = vpack.c.bf16 %v5878_v1, %v5876_v47  ;;  %v5885_v27 = vrot.slane %v13139_v26, 1  ;;  %v9348_v47 = vld [vmem:[#allocation2 + $0x138] sm:$0xff] }
 0x29d   :  { %v2981_v33 = vadd.f32 %v2848_v0, %v12466_v43  ;;  %v13132_v63 = vadd.f32 %v8914_v50, %v2983_v2  ;;  %v8918_v42 = vpop.f32.mrf.mxu0  ;;  %v6063_v43 = vpack.c.bf16 %v5883_v8, %v5881_v18  ;;  %v9345_v50 = vld [vmem:[#allocation2 + $0x148] sm:$0x3]  ;;  %v13143_v2 = vld [vmem:[#allocation2 + $0x158] sm:$0xff]  ;;  %v5892_v0 = vrot.slane %v9347_v17, 1  ;;  %v9349_v18 = vld [vmem:[#allocation2 + $0x150] sm:$0xff] }
 0x29e   :  { %v8849_v25 = vpop.f32.mrf.mxu1  ;;  %9088 = vmatmul.mubr.msk.bf16.gmra.mxu1 %vm852_vm2, %v5242_v24  ;;  %v5887_v45 = vrot.slane %v9345_v50, 1  ;;  %v5884_v1 = vrot.slane %v9348_v47, 1  ;;  %v5244_v50 = vpack.c.bf16 %v13111_v15, %v9342_v11 }
 0x29f   :  { %v2986_v10 = vadd.f32 %v8849_v25, %v12477_v6  ;;  %9091 = vmatprep.mubr.msk.bf16.mxu1 %vm852_vm2, %v5243_v46  ;;  %v13137_v3 = vadd.f32 %v3442_v53, %v2981_v33  ;;  %v3458_v13 = vpop.f32.mrf.mxu0  ;;  %v5890_v6 = vrot.slane %v13143_v2, 1 }
 0x2a0   :  { %v2861_v29 = vpop.f32.mrf.mxu1 }
 0x2a1   :  { %v2984_v4 = vadd.f32 %v2861_v29, %v12494_v23  ;;  %v13146_v53 = vadd.f32 %v8917_v32, %v2986_v10  ;;  %v8921_v46 = vpop.f32.mrf.mxu0  ;;  %v5889_v23 = vrot.slane %v9349_v18, 1  ;;  %v5245_v32 = vpack.c.bf16 %v13115_v57, %v9343_v59 }
 0x2a2   :  { %v8850_v24 = vpop.f32.mrf.mxu1  ;;  %9160 = vmatmul.mubr.msk.bf16.gmra.mxu0 %vm852_vm2, %v6062_v14  ;;  %v5886_v10 = vsel %vm1225_vm5, %v5884_v1, %v5885_v27  ;;  %v5888_v14 = vsel %vm1225_vm5, %v5885_v27, %v5887_v45  ;;  %v13167_v45 = vld [vmem:[#allocation2 + $0x170] sm:$0xff] }
 0x2a3   :  { %v2987_v33 = vadd.f32 %v8850_v24, %v12510_v51  ;;  %9163 = vmatprep.mubr.msk.bf16.mxu0 %vm852_vm2, %v6063_v43  ;;  %v13151_v8 = vadd.f32 %v3455_v38, %v2984_v4  ;;  %v3471_v29 = vpop.f32.mrf.mxu0  ;;  %v5891_v51 = vsel %vm1225_vm5, %v5889_v23, %v5890_v6  ;;  %v5893_v43 = vsel %vm1225_vm5, %v5890_v6, %v5892_v0  ;;  %v9353_v23 = vld [vmem:[#allocation2 + $0x190] sm:$0x3] }
 0x2a4   :  { %v2864_v25 = vpop.f32.mrf.mxu1  ;;  %v6064_v27 = vpack.c.bf16 %v5888_v14, %v5886_v10  ;;  %v5895_v6 = vrot.slane %v13167_v45, 1  ;;  %v9354_v10 = vld [vmem:[#allocation2 + $0x168] sm:$0xff] }
 0x2a5   :  { %v2985_v17 = vadd.f32 %v2864_v25, %v12522_v22  ;;  %v13160_v24 = vadd.f32 %v8918_v42, %v2987_v33  ;;  %v8922_v4 = vpop.f32.mrf.mxu0  ;;  %v6065_v22 = vpack.c.bf16 %v5893_v43, %v5891_v51  ;;  %v9351_v42 = vld [vmem:[#allocation2 + $0x178] sm:$0x3]  ;;  %v13171_v33 = vld [vmem:[#allocation2 + $0x188] sm:$0xff]  ;;  %v5902_v25 = vrot.slane %v9353_v23, 1  ;;  %v9355_v51 = vld [vmem:[#allocation2 + $0x180] sm:$0xff] }
 0x2a6   :  { %v8853_v38 = vpop.f32.mrf.mxu1  ;;  %9092 = vmatmul.mubr.msk.bf16.gmra.mxu1 %vm852_vm2, %v5244_v50  ;;  %v5897_v0 = vrot.slane %v9351_v42, 1  ;;  %v5894_v14 = vrot.slane %v9354_v10, 1  ;;  %v13179_v43 = vld [vmem:[#allocation2 + $0x198] sm:$0xff] }
 0x2a7   :  { %v2990_v15 = vadd.f32 %v8853_v38, %v12544_v9  ;;  %9095 = vmatprep.mubr.msk.bf16.mxu1 %vm852_vm2, %v5245_v32  ;;  %v13165_v57 = vadd.f32 %v3458_v13, %v2985_v17  ;;  %v3474_v59 = vpop.f32.mrf.mxu0  ;;  %v5900_v9 = vrot.slane %v13171_v33, 1 }
 0x2a8   :  { %v2877_v11 = vpop.f32.mrf.mxu1  ;;  %v5898_v23 = vsel %vm1225_vm5, %v5895_v6, %v5897_v0 }
 0x2a9   :  { %v2988_v1 = vadd.f32 %v2877_v11, %v12552_v39  ;;  %v13174_v13 = vadd.f32 %v8921_v46, %v2990_v15  ;;  %v8925_v32 = vpop.f32.mrf.mxu0  ;;  %v5899_v39 = vrot.slane %v9355_v51, 1  ;;  %v5246_v46 = vpack.c.bf16 %v13139_v26, %v9348_v47 }
 0x2aa   :  { %v8854_v50 = vpop.f32.mrf.mxu1  ;;  %9164 = vmatmul.mubr.msk.bf16.gmra.mxu0 %vm852_vm2, %v6064_v27  ;;  %v5247_v15 = vpack.c.bf16 %v13143_v2, %v9349_v18  ;;  %v5896_v27 = vsel %vm1225_vm5, %v5894_v14, %v5895_v6  ;;  %v5904_v2 = vrot.slane %v13179_v43, 1 }
 0x2ab   :  { %15528 = vst [vmem:[#allocation68_spill] sm:$0xff] %v13174_v13  ;;  %v2991_v17 = vadd.f32 %v8854_v50, %v12572_v48  ;;  %9167 = vmatprep.mubr.msk.bf16.mxu0 %vm852_vm2, %v6065_v22  ;;  %v13181_v38 = vadd.f32 %v3471_v29, %v2988_v1  ;;  %v3487_v42 = vpop.f32.mrf.mxu0  ;;  %v13187_v13 = vld [vmem:[#allocation2 + $0x1a0] sm:$0xff]  ;;  %v13189_v48 = vld [vmem:[#allocation2 + $0x1a8] sm:$0x3]  ;;  %v5901_v50 = vsel %vm1225_vm5, %v5899_v39, %v5900_v9 }
 0x2ac   :  { %v2880_v11 = vpop.f32.mrf.mxu1  ;;  %15530 = vst [vmem:[#allocation58_spill] sm:$0xff] %v13187_v13  ;;  %15531 = vst [vmem:[#allocation72_spill] sm:$0xff] %v13189_v48  ;;  %v5903_v29 = vsel %vm1225_vm5, %v5900_v9, %v5902_v25  ;;  %v5905_v18 = vrot.slane %v13187_v13, 1 }
 0x2ad   :  { %15529 = vst [vmem:[#allocation24_spill] sm:$0xff] %v13181_v38  ;;  %v2989_v22 = vadd.f32 %v2880_v11, %v12586_v34  ;;  %v13194_v1 = vadd.f32 %v8922_v4, %v2991_v17  ;;  %v8926_v26 = vpop.f32.mrf.mxu0  ;;  %v5907_v34 = vrot.slane %v13189_v48, 1  ;;  %v6066_v4 = vpack.c.bf16 %v5898_v23, %v5896_v27  ;;  %v13205_v17 = vld [vmem:[#allocation2 + $0x1e8] sm:$0xff]  ;;  %v9357_v11 = vld [vmem:[#allocation2 + $0x1f0] sm:$0x3] }
 0x2ae   :  { %v8857_v38 = vpop.f32.mrf.mxu1  ;;  %9096 = vmatmul.mubr.msk.bf16.gmra.mxu1 %vm852_vm2, %v5246_v46  ;;  %v6067_v25 = vpack.c.bf16 %v5903_v29, %v5901_v50  ;;  %v5910_v39 = vrot.slane %v13205_v17, 1  ;;  %v15533_v48 = vld [vmem:[#allocation133_spill] sm:$0xff] }
 0x2af   :  { %v2994_v47 = vadd.f32 %v8857_v38, %v12600_v41  ;;  %9099 = vmatprep.mubr.msk.bf16.mxu1 %vm852_vm2, %v5247_v15  ;;  %v13202_v6 = vadd.f32 %v3474_v59, %v2989_v22  ;;  %v3490_v9 = vpop.f32.mrf.mxu0  ;;  %v5912_v41 = vrot.slane %v9357_v11, 1  ;;  %v9358_v59 = vld [vmem:[#allocation2 + $0x1e0] sm:$0xff]  ;;  %v5908_v27 = vsel %vm1225_vm5, %v5905_v18, %v5907_v34 }
 0x2b0   :  { %v2893_v0 = vpop.f32.mrf.mxu1  ;;  %v5909_v22 = vrot.slane %v9358_v59, 1 }
 0x2b1   :  { %15532 = vst [vmem:[#allocation64_spill] sm:$0xff] %v13202_v6  ;;  %v2992_v14 = vadd.f32 %v2893_v0, %v12619_v35  ;;  %v13208_v38 = vadd.f32 %v8925_v32, %v2994_v47  ;;  %v8929_v15 = vpop.f32.mrf.mxu0  ;;  %v5906_v35 = vsel %vm1225_vm5, %v5904_v2, %v5905_v18  ;;  %v5248_v32 = vpack.c.bf16 %v13167_v45, %v9354_v10  ;;  %v15534_v0 = vld [vmem:[#allocation136_spill] sm:$0xff]  ;;  %v15536_v18 = vld [vmem:[#allocation101_spill] sm:$0xff] }
 0x2b2   :  { %v8858_v46 = vpop.f32.mrf.mxu1  ;;  %9168 = vmatmul.mubr.msk.bf16.gmra.mxu0 %vm852_vm2, %v6066_v4  ;;  %v5249_v47 = vpack.c.bf16 %v13171_v33, %v9355_v51  ;;  %v5911_v11 = vsel %vm1225_vm5, %v5909_v22, %v5910_v39 }
 0x2b3   :  { %v2995_v6 = vadd.f32 %v8858_v46, %v15533_v48  ;;  %9171 = vmatprep.mubr.msk.bf16.mxu0 %vm852_vm2, %v6067_v25  ;;  %v13215_v23 = vadd.f32 %v3487_v42, %v2992_v14  ;;  %v3503_v29 = vpop.f32.mrf.mxu0  ;;  %v5913_v48 = vsel %vm1225_vm5, %v5910_v39, %v5912_v41  ;;  %v6068_v42 = vpack.c.bf16 %v5908_v27, %v5906_v35  ;;  %v13229_v14 = vld [vmem:[#allocation2 + $0x200] sm:$0xff]  ;;  %v15538_v41 = vld [vmem:[#allocation138_spill] sm:$0xff] }
 0x2b4   :  { %v2896_v50 = vpop.f32.mrf.mxu1  ;;  %v6069_v51 = vpack.c.bf16 %v5913_v48, %v5911_v11  ;;  %v5915_v39 = vrot.slane %v13229_v14, 1  ;;  %v9362_v27 = vld [vmem:[#allocation2 + $0x220] sm:$0x3]  ;;  %v9363_v11 = vld [vmem:[#allocation2 + $0x1f8] sm:$0xff] }
 0x2b5   :  { %v2993_v4 = vadd.f32 %v2896_v50, %v15534_v0  ;;  %v13222_v46 = vadd.f32 %v8926_v26, %v2995_v6  ;;  %v8930_v2 = vpop.f32.mrf.mxu0  ;;  %v9360_v26 = vld [vmem:[#allocation2 + $0x208] sm:$0x3]  ;;  %v13233_v50 = vld [vmem:[#allocation2 + $0x218] sm:$0xff]  ;;  %v5914_v48 = vrot.slane %v9363_v11, 1 }
 0x2b6   :  { %v8861_v25 = vpop.f32.mrf.mxu1  ;;  %9100 = vmatmul.mubr.msk.bf16.gmra.mxu1 %vm852_vm2, %v5248_v32  ;;  %v5917_v6 = vrot.slane %v9360_v26, 1  ;;  %v5920_v35 = vrot.slane %v13233_v50, 1  ;;  %v5922_v32 = vrot.slane %v9362_v27, 1 }
 0x2b7   :  { %15535 = vst [vmem:[#allocation9_spill] sm:$0xff] %v13222_v46  ;;  %v2998_v34 = vadd.f32 %v8861_v25, %v15536_v18  ;;  %9103 = vmatprep.mubr.msk.bf16.mxu1 %vm852_vm2, %v5249_v47  ;;  %v13227_v45 = vadd.f32 %v3490_v9, %v2993_v4  ;;  %v3506_v10 = vpop.f32.mrf.mxu0  ;;  %v5250_v4 = vpack.c.bf16 %v13187_v13, %v13179_v43  ;;  %v15540_v25 = vld [vmem:[#allocation116_spill] sm:$0xff] }
 0x2b8   :  { %v2909_v33 = vpop.f32.mrf.mxu1 }
 0x2b9   :  { %15537 = vst [vmem:[#allocation81_spill] sm:$0xff] %v13227_v45  ;;  %v2996_v22 = vadd.f32 %v2909_v33, %v15538_v41  ;;  %v13236_v47 = vadd.f32 %v8929_v15, %v2998_v34  ;;  %v8933_v0 = vpop.f32.mrf.mxu0  ;;  %v9364_v33 = vld [vmem:[#allocation2 + $0x210] sm:$0xff]  ;;  %v5251_v34 = vpack.c.bf16 %v13205_v17, %v9358_v59  ;;  %v15542_v45 = vld [vmem:[#allocation104_spill] sm:$0xff] }
 0x2ba   :  { %v8862_v9 = vpop.f32.mrf.mxu1  ;;  %9172 = vmatmul.mubr.msk.bf16.gmra.mxu0 %vm852_vm2, %v6068_v42  ;;  %v5919_v26 = vrot.slane %v9364_v33, 1  ;;  %v5918_v42 = vsel %vm1225_vm5, %v5915_v39, %v5917_v6 }
 0x2bb   :  { %15539 = vst [vmem:[#allocation30_spill] sm:$0xff] %v13236_v47  ;;  %v2999_v18 = vadd.f32 %v8862_v9, %v15540_v25  ;;  %9175 = vmatprep.mubr.msk.bf16.mxu0 %vm852_vm2, %v6069_v51  ;;  %v13243_v41 = vadd.f32 %v3503_v29, %v2996_v22  ;;  %v3519_v15 = vpop.f32.mrf.mxu0  ;;  %v5916_v47 = vsel %vm1225_vm5, %v5914_v48, %v5915_v39  ;;  %v15543_v22 = vld [vmem:[#allocation105_spill] sm:$0xff] }
 0x2bc   :  { %v2912_v27 = vpop.f32.mrf.mxu1  ;;  %v5921_v46 = vsel %vm1225_vm5, %v5919_v26, %v5920_v35  ;;  %v5923_v9 = vsel %vm1225_vm5, %v5920_v35, %v5922_v32  ;;  %v6070_v6 = vpack.c.bf16 %v5918_v42, %v5916_v47  ;;  %v13258_v48 = vld [vmem:[#allocation2 + $0x230] sm:$0xff]  ;;  %v15546_v42 = vld [vmem:[#allocation38_spill] sm:$0xff] }
 0x2bd   :  { %15541 = vst [vmem:[#allocation6_spill] sm:$0xff] %v13243_v41  ;;  %v2997_v13 = vadd.f32 %v2912_v27, %v15542_v45  ;;  %v13251_v25 = vadd.f32 %v8930_v2, %v2999_v18  ;;  %v8934_v29 = vpop.f32.mrf.mxu0  ;;  %v6071_v45 = vpack.c.bf16 %v5923_v9, %v5921_v46  ;;  %v5925_v35 = vrot.slane %v13258_v48, 1  ;;  %v9366_v2 = vld [vmem:[#allocation2 + $0x238] sm:$0x3]  ;;  %v9368_v27 = vld [vmem:[#allocation2 + $0x250] sm:$0x3] }
 0x2be   :  { %v8865_v51 = vpop.f32.mrf.mxu1  ;;  %9104 = vmatmul.mubr.msk.bf16.gmra.mxu1 %vm852_vm2, %v5250_v4  ;;  %v5927_v32 = vrot.slane %v9366_v2, 1  ;;  %v13262_v4 = vld [vmem:[#allocation2 + $0x248] sm:$0xff] }
 0x2bf   :  { %v3002_v41 = vadd.f32 %v8865_v51, %v15543_v22  ;;  %9107 = vmatprep.mubr.msk.bf16.mxu1 %vm852_vm2, %v5251_v34  ;;  %v13256_v17 = vadd.f32 %v3506_v10, %v2997_v13  ;;  %v3522_v39 = vpop.f32.mrf.mxu0  ;;  %v5930_v26 = vrot.slane %v13262_v4, 1  ;;  %v5932_v34 = vrot.slane %v9368_v27, 1  ;;  %v9369_v46 = vld [vmem:[#allocation2 + $0x228] sm:$0xff]  ;;  %v9370_v22 = vld [vmem:[#allocation2 + $0x240] sm:$0xff] }
 0x2c0   :  { %v2925_v59 = vpop.f32.mrf.mxu1  ;;  %v5924_v47 = vrot.slane %v9369_v46, 1  ;;  %v5252_v27 = vpack.c.bf16 %v13229_v14, %v9363_v11 }
 0x2c1   :  { %15544 = vst [vmem:[#allocation69_spill] sm:$0xff] %v13256_v17  ;;  %v3000_v18 = vadd.f32 %v2925_v59, %v12737_v21  ;;  %v13265_v13 = vadd.f32 %v8933_v0, %v3002_v41  ;;  %v9009_v51 = vpop.f32.mrf.mxu0  ;;  %v5929_v21 = vrot.slane %v9370_v22, 1  ;;  %v5253_v0 = vpack.c.bf16 %v13233_v50, %v9364_v33 }
 0x2c2   :  { %v8866_v10 = vpop.f32.mrf.mxu1  ;;  %9176 = vmatmul.mubr.msk.bf16.gmra.mxu0 %vm852_vm2, %v6070_v6  ;;  %v5926_v41 = vsel %vm1225_vm5, %v5924_v47, %v5925_v35  ;;  %v5928_v6 = vsel %vm1225_vm5, %v5925_v35, %v5927_v32  ;;  %v13286_v32 = vld [vmem:[#allocation2 + $0x260] sm:$0xff] }
 0x2c3   :  { %15545 = vst [vmem:[#allocation32_spill] sm:$0xff] %v13265_v13  ;;  %v3003_v9 = vadd.f32 %v8866_v10, %v15546_v42  ;;  %9179 = vmatprep.mubr.msk.bf16.mxu0 %vm852_vm2, %v6071_v45  ;;  %v13270_v59 = vadd.f32 %v3519_v15, %v3000_v18  ;;  %v4819_v17 = vpop.f32.mrf.mxu0  ;;  %v5931_v10 = vsel %vm1225_vm5, %v5929_v21, %v5930_v26  ;;  %v9374_v21 = vld [vmem:[#allocation2 + $0x280] sm:$0x3] }
 0x2c4   :  { %v2928_v2 = vpop.f32.mrf.mxu1  ;;  %v5933_v45 = vsel %vm1225_vm5, %v5930_v26, %v5932_v34  ;;  %v6072_v35 = vpack.c.bf16 %v5928_v6, %v5926_v41  ;;  %v5935_v26 = vrot.slane %v13286_v32, 1 }
 0x2c5   :  { %v3001_v13 = vadd.f32 %v2928_v2, %v12771_v7  ;;  %v13279_v42 = vadd.f32 %v8934_v29, %v3003_v9  ;;  %v9010_v18 = vpop.f32.mrf.mxu0  ;;  %v6073_v7 = vpack.c.bf16 %v5933_v45, %v5931_v10  ;;  %v9372_v29 = vld [vmem:[#allocation2 + $0x268] sm:$0x3]  ;;  %v13290_v9 = vld [vmem:[#allocation2 + $0x278] sm:$0xff]  ;;  %v5942_v2 = vrot.slane %v9374_v21, 1  ;;  %v9376_v10 = vld [vmem:[#allocation2 + $0x270] sm:$0xff] }
 0x2c6   :  { %v8941_v15 = vpop.f32.mrf.mxu1  ;;  %9108 = vmatmul.mubr.msk.bf16.gmra.mxu1 %vm852_vm2, %v5252_v27  ;;  %v5937_v34 = vrot.slane %v9372_v29, 1  ;;  %v5254_v29 = vpack.c.bf16 %v13258_v48, %v9369_v46 }
 0x2c7   :  { %v4354_v14 = vadd.f32 %v8941_v15, %v12796_v40  ;;  %9111 = vmatprep.mubr.msk.bf16.mxu1 %vm852_vm2, %v5253_v0  ;;  %v13284_v50 = vadd.f32 %v3522_v39, %v3001_v13  ;;  %v4822_v33 = vpop.f32.mrf.mxu0  ;;  %v5940_v40 = vrot.slane %v13290_v9, 1  ;;  %v9375_v0 = vld [vmem:[#allocation2 + $0x258] sm:$0xff] }
 0x2c8   :  { %v4097_v11 = vpop.f32.mrf.mxu1  ;;  %v5934_v41 = vrot.slane %v9375_v0, 1 }
 0x2c9   :  { %v4352_v47 = vadd.f32 %v4097_v11, %v12819_v5  ;;  %v13293_v39 = vadd.f32 %v9009_v51, %v4354_v14  ;;  %v9013_v27 = vpop.f32.mrf.mxu0  ;;  %v5939_v5 = vrot.slane %v9376_v10, 1  ;;  %v5255_v51 = vpack.c.bf16 %v13262_v4, %v9370_v22 }
 0x2ca   :  { %v8942_v13 = vpop.f32.mrf.mxu1  ;;  %9180 = vmatmul.mubr.msk.bf16.gmra.mxu0 %vm852_vm2, %v6072_v35  ;;  %v5936_v14 = vsel %vm1225_vm5, %v5934_v41, %v5935_v26  ;;  %v5938_v35 = vsel %vm1225_vm5, %v5935_v26, %v5937_v34  ;;  %v13314_v34 = vld [vmem:[#allocation2 + $0x290] sm:$0xff] }
 0x2cb   :  { %v4355_v6 = vadd.f32 %v8942_v13, %v12825_v37  ;;  %9183 = vmatprep.mubr.msk.bf16.mxu0 %vm852_vm2, %v6073_v7  ;;  %v13298_v45 = vadd.f32 %v4819_v17, %v4352_v47  ;;  %v4835_v11 = vpop.f32.mrf.mxu0  ;;  %v5941_v37 = vsel %vm1225_vm5, %v5939_v5, %v5940_v40  ;;  %v5943_v7 = vsel %vm1225_vm5, %v5940_v40, %v5942_v2  ;;  %v9380_v5 = vld [vmem:[#allocation2 + $0x2b0] sm:$0x3] }
 0x2cc   :  { %v4100_v15 = vpop.f32.mrf.mxu1  ;;  %v6074_v26 = vpack.c.bf16 %v5938_v35, %v5936_v14  ;;  %v5945_v40 = vrot.slane %v13314_v34, 1  ;;  %v9381_v14 = vld [vmem:[#allocation2 + $0x288] sm:$0xff] }
 0x2cd   :  { %v4353_v21 = vadd.f32 %v4100_v15, %v12833_v55  ;;  %v13307_v13 = vadd.f32 %v9010_v18, %v4355_v6  ;;  %v9014_v47 = vpop.f32.mrf.mxu0  ;;  %v6075_v55 = vpack.c.bf16 %v5943_v7, %v5941_v37  ;;  %v9378_v18 = vld [vmem:[#allocation2 + $0x298] sm:$0x3]  ;;  %v13318_v6 = vld [vmem:[#allocation2 + $0x2a8] sm:$0xff]  ;;  %v5952_v15 = vrot.slane %v9380_v5, 1  ;;  %v9382_v37 = vld [vmem:[#allocation2 + $0x2a0] sm:$0xff] }
 0x2ce   :  { %v8945_v17 = vpop.f32.mrf.mxu1  ;;  %9112 = vmatmul.mubr.msk.bf16.gmra.mxu1 %vm852_vm2, %v5254_v29  ;;  %v5947_v2 = vrot.slane %v9378_v18, 1  ;;  %v5944_v35 = vrot.slane %v9381_v14, 1  ;;  %v5256_v18 = vpack.c.bf16 %v13286_v32, %v9375_v0 }
 0x2cf   :  { %v4358_v48 = vadd.f32 %v8945_v17, %v12836_v58  ;;  %9115 = vmatprep.mubr.msk.bf16.mxu1 %vm852_vm2, %v5255_v51  ;;  %v13312_v4 = vadd.f32 %v4822_v33, %v4353_v21  ;;  %v4838_v22 = vpop.f32.mrf.mxu0  ;;  %v5950_v58 = vrot.slane %v13318_v6, 1 }
 0x2d0   :  { %v4113_v46 = vpop.f32.mrf.mxu1 }
 0x2d1   :  { %v4356_v41 = vadd.f32 %v4113_v46, %v12849_v36  ;;  %v13321_v33 = vadd.f32 %v9013_v27, %v4358_v48  ;;  %v9017_v51 = vpop.f32.mrf.mxu0  ;;  %v5949_v36 = vrot.slane %v9382_v37, 1  ;;  %v5257_v27 = vpack.c.bf16 %v13290_v9, %v9376_v10 }
 0x2d2   :  { %v8946_v29 = vpop.f32.mrf.mxu1  ;;  %9184 = vmatmul.mubr.msk.bf16.gmra.mxu0 %vm852_vm2, %v6074_v26  ;;  %v5946_v48 = vsel %vm1225_vm5, %v5944_v35, %v5945_v40  ;;  %v5948_v26 = vsel %vm1225_vm5, %v5945_v40, %v5947_v2  ;;  %v13342_v2 = vld [vmem:[#allocation2 + $0x2c0] sm:$0xff] }
 0x2d3   :  { %v4359_v21 = vadd.f32 %v8946_v29, %v12853_v61  ;;  %9187 = vmatprep.mubr.msk.bf16.mxu0 %vm852_vm2, %v6075_v55  ;;  %v13326_v7 = vadd.f32 %v4835_v11, %v4356_v41  ;;  %v4851_v46 = vpop.f32.mrf.mxu0  ;;  %v5951_v61 = vsel %vm1225_vm5, %v5949_v36, %v5950_v58  ;;  %v5953_v55 = vsel %vm1225_vm5, %v5950_v58, %v5952_v15  ;;  %v9386_v36 = vld [vmem:[#allocation2 + $0x2e0] sm:$0x3] }
 0x2d4   :  { %v4116_v17 = vpop.f32.mrf.mxu1  ;;  %v6076_v40 = vpack.c.bf16 %v5948_v26, %v5946_v48  ;;  %v5955_v58 = vrot.slane %v13342_v2, 1  ;;  %v9387_v48 = vld [vmem:[#allocation2 + $0x2b8] sm:$0xff] }
 0x2d5   :  { %v4357_v5 = vadd.f32 %v4116_v17, %v12861_v62  ;;  %v13335_v29 = vadd.f32 %v9014_v47, %v4359_v21  ;;  %v9018_v41 = vpop.f32.mrf.mxu0  ;;  %v6077_v62 = vpack.c.bf16 %v5953_v55, %v5951_v61  ;;  %v9384_v47 = vld [vmem:[#allocation2 + $0x2c8] sm:$0x3]  ;;  %v13346_v21 = vld [vmem:[#allocation2 + $0x2d8] sm:$0xff]  ;;  %v5962_v17 = vrot.slane %v9386_v36, 1  ;;  %v9388_v61 = vld [vmem:[#allocation2 + $0x2d0] sm:$0xff] }
 0x2d6   :  { %v8949_v11 = vpop.f32.mrf.mxu1  ;;  %9116 = vmatmul.mubr.msk.bf16.gmra.mxu1 %vm852_vm2, %v5256_v18  ;;  %v5957_v15 = vrot.slane %v9384_v47, 1  ;;  %v5954_v26 = vrot.slane %v9387_v48, 1  ;;  %v5258_v47 = vpack.c.bf16 %v13314_v34, %v9381_v14 }
 0x2d7   :  { %v4362_v32 = vadd.f32 %v8949_v11, %v12866_v52  ;;  %9119 = vmatprep.mubr.msk.bf16.mxu1 %vm852_vm2, %v5257_v27  ;;  %v13340_v9 = vadd.f32 %v4838_v22, %v4357_v5  ;;  %v4854_v10 = vpop.f32.mrf.mxu0  ;;  %v5960_v52 = vrot.slane %v13346_v21, 1 }
 0x2d8   :  { %v4129_v0 = vpop.f32.mrf.mxu1 }
 0x2d9   :  { %v4360_v35 = vadd.f32 %v4129_v0, %v12879_v31  ;;  %v13349_v22 = vadd.f32 %v9017_v51, %v4362_v32  ;;  %v9021_v27 = vpop.f32.mrf.mxu0  ;;  %v5959_v31 = vrot.slane %v9388_v61, 1  ;;  %v5259_v51 = vpack.c.bf16 %v13318_v6, %v9382_v37 }
 0x2da   :  { %v8950_v18 = vpop.f32.mrf.mxu1  ;;  %9188 = vmatmul.mubr.msk.bf16.gmra.mxu0 %vm852_vm2, %v6076_v40  ;;  %v5956_v32 = vsel %vm1225_vm5, %v5954_v26, %v5955_v58  ;;  %v5958_v40 = vsel %vm1225_vm5, %v5955_v58, %v5957_v15  ;;  %v13370_v15 = vld [vmem:[#allocation2 + $0x2f0] sm:$0xff] }
 0x2db   :  { %v4363_v5 = vadd.f32 %v8950_v18, %v12884_v60  ;;  %9191 = vmatprep.mubr.msk.bf16.mxu0 %vm852_vm2, %v6077_v62  ;;  %v13354_v55 = vadd.f32 %v4851_v46, %v4360_v35  ;;  %v4867_v0 = vpop.f32.mrf.mxu0  ;;  %v5961_v60 = vsel %vm1225_vm5, %v5959_v31, %v5960_v52  ;;  %v5963_v62 = vsel %vm1225_vm5, %v5960_v52, %v5962_v17  ;;  %v9392_v31 = vld [vmem:[#allocation2 + $0x310] sm:$0x3] }
 0x2dc   :  { %v4132_v11 = vpop.f32.mrf.mxu1  ;;  %v6078_v58 = vpack.c.bf16 %v5958_v40, %v5956_v32  ;;  %v5965_v52 = vrot.slane %v13370_v15, 1  ;;  %v9393_v32 = vld [vmem:[#allocation2 + $0x2e8] sm:$0xff] }
 0x2dd   :  { %v4361_v36 = vadd.f32 %v4132_v11, %v12889_v56  ;;  %v13363_v18 = vadd.f32 %v9018_v41, %v4363_v5  ;;  %v9022_v35 = vpop.f32.mrf.mxu0  ;;  %v6079_v56 = vpack.c.bf16 %v5963_v62, %v5961_v60  ;;  %v9390_v41 = vld [vmem:[#allocation2 + $0x2f8] sm:$0x3]  ;;  %v13374_v5 = vld [vmem:[#allocation2 + $0x308] sm:$0xff]  ;;  %v5972_v11 = vrot.slane %v9392_v31, 1  ;;  %v9394_v60 = vld [vmem:[#allocation2 + $0x300] sm:$0xff] }
 0x2de   :  { %v8953_v46 = vpop.f32.mrf.mxu1  ;;  %9120 = vmatmul.mubr.msk.bf16.gmra.mxu1 %vm852_vm2, %v5258_v47  ;;  %v5967_v17 = vrot.slane %v9390_v41, 1  ;;  %v5964_v40 = vrot.slane %v9393_v32, 1  ;;  %v5260_v41 = vpack.c.bf16 %v13342_v2, %v9387_v48  ;;  %v15550_v31 = vld [vmem:[#allocation47_spill] sm:$0xff] }
 0x2df   :  { %v4366_v34 = vadd.f32 %v8953_v46, %v12894_v16  ;;  %9123 = vmatprep.mubr.msk.bf16.mxu1 %vm852_vm2, %v5259_v51  ;;  %v13368_v6 = vadd.f32 %v4854_v10, %v4361_v36  ;;  %v4870_v37 = vpop.f32.mrf.mxu0  ;;  %v5970_v16 = vrot.slane %v13374_v5, 1 }
 0x2e0   :  { %v4145_v14 = vpop.f32.mrf.mxu1 }
 0x2e1   :  { %15547 = vst [vmem:[#allocation83_spill] sm:$0xff] %v13368_v6  ;;  %v4364_v26 = vadd.f32 %v4145_v14, %v12907_v54  ;;  %v13377_v10 = vadd.f32 %v9021_v27, %v4366_v34  ;;  %v9025_v51 = vpop.f32.mrf.mxu0  ;;  %v5969_v54 = vrot.slane %v9394_v60, 1  ;;  %v5261_v27 = vpack.c.bf16 %v13346_v21, %v9388_v61 }
 0x2e2   :  { %v8954_v47 = vpop.f32.mrf.mxu1  ;;  %9192 = vmatmul.mubr.msk.bf16.gmra.mxu0 %vm852_vm2, %v6078_v58  ;;  %v5966_v34 = vsel %vm1225_vm5, %v5964_v40, %v5965_v52  ;;  %v5968_v58 = vsel %vm1225_vm5, %v5965_v52, %v5967_v17  ;;  %v15554_v40 = vld [vmem:[#allocation3_spill] sm:$0xff] }
 0x2e3   :  { %15548 = vst [vmem:[#allocation31_spill] sm:$0xff] %v13377_v10  ;;  %v4367_v36 = vadd.f32 %v8954_v47, %v12912_v28  ;;  %9195 = vmatprep.mubr.msk.bf16.mxu0 %vm852_vm2, %v6079_v56  ;;  %v13382_v62 = vadd.f32 %v4867_v0, %v4364_v26  ;;  %v4883_v14 = vpop.f32.mrf.mxu0  ;;  %v5971_v28 = vsel %vm1225_vm5, %v5969_v54, %v5970_v16 }
 0x2e4   :  { %v4148_v46 = vpop.f32.mrf.mxu1  ;;  %v5973_v56 = vsel %vm1225_vm5, %v5970_v16, %v5972_v11  ;;  %v6080_v52 = vpack.c.bf16 %v5968_v58, %v5966_v34  ;;  %v9396_v16 = vld [vmem:[#allocation2 + $0x328] sm:$0x3] }
 0x2e5   :  { %15549 = vst [vmem:[#allocation57_spill] sm:$0xff] %v13382_v62  ;;  %v4365_v10 = vadd.f32 %v4148_v46, %v15550_v31  ;;  %v13391_v47 = vadd.f32 %v9022_v35, %v4367_v36  ;;  %v9026_v26 = vpop.f32.mrf.mxu0  ;;  %v15552_v62 = vld [vmem:[#allocation8_spill] sm:$0xff]  ;;  %v6081_v17 = vpack.c.bf16 %v5973_v56, %v5971_v28  ;;  %v13399_v46 = vld [vmem:[#allocation2 + $0x320] sm:$0xff]  ;;  %v5977_v11 = vrot.slane %v9396_v16, 1  ;;  %v9399_v28 = vld [vmem:[#allocation2 + $0x318] sm:$0xff] }
 0x2e6   :  { %v8957_v0 = vpop.f32.mrf.mxu1  ;;  %9124 = vmatmul.mubr.msk.bf16.gmra.mxu1 %vm852_vm2, %v5260_v41  ;;  %v5975_v35 = vrot.slane %v13399_v46, 1  ;;  %v15556_v34 = vld [vmem:[#allocation76_spill] sm:$0xff]  ;;  %v5974_v56 = vrot.slane %v9399_v28, 1  ;;  %v9400_v16 = vld [vmem:[#allocation2 + $0x330] sm:$0xff] }
 0x2e7   :  { %15551 = vst [vmem:[#allocation77_spill] sm:$0xff] %v13391_v47  ;;  %v4370_v2 = vadd.f32 %v8957_v0, %v15552_v62  ;;  %9127 = vmatprep.mubr.msk.bf16.mxu1 %vm852_vm2, %v5261_v27  ;;  %v13396_v21 = vadd.f32 %v4870_v37, %v4365_v10  ;;  %v4886_v61 = vpop.f32.mrf.mxu0  ;;  %v9397_v37 = vld [vmem:[#allocation2 + $0x338] sm:$0xff]  ;;  %v9398_v27 = vld [vmem:[#allocation2 + $0x340] sm:$0x3]  ;;  %v13407_v0 = vld [vmem:[#allocation2 + $0x348] sm:$0xff] }
 0x2e8   :  { %v4161_v48 = vpop.f32.mrf.mxu1  ;;  %v5980_v10 = vrot.slane %v9397_v37, 1  ;;  %v5982_v31 = vrot.slane %v9398_v27, 1  ;;  %v13415_v27 = vld [vmem:[#allocation2 + $0x358] sm:$0x3]  ;;  %v5978_v47 = vsel %vm1225_vm5, %v5975_v35, %v5977_v11 }
 0x2e9   :  { %15553 = vst [vmem:[#allocation17_spill] sm:$0xff] %v13396_v21  ;;  %v4368_v54 = vadd.f32 %v4161_v48, %v15554_v40  ;;  %v13402_v36 = vadd.f32 %v9025_v51, %v4370_v2  ;;  %v9029_v62 = vpop.f32.mrf.mxu0  ;;  %v5262_v40 = vpack.c.bf16 %v13370_v15, %v9393_v32  ;;  %v13413_v21 = vld [vmem:[#allocation2 + $0x350] sm:$0xff] }
 0x2ea   :  { %v8958_v41 = vpop.f32.mrf.mxu1  ;;  %9196 = vmatmul.mubr.msk.bf16.gmra.mxu0 %vm852_vm2, %v6080_v52  ;;  %v5263_v52 = vpack.c.bf16 %v13374_v5, %v9394_v60  ;;  %v5983_v32 = vsel %vm1225_vm5, %v5980_v10, %v5982_v31  ;;  %v5984_v60 = vrot.slane %v13407_v0, 1 }
 0x2eb   :  { %15555 = vst [vmem:[#allocation88_spill] sm:$0xff] %v13402_v36  ;;  %v4371_v58 = vadd.f32 %v8958_v41, %v15556_v34  ;;  %9199 = vmatprep.mubr.msk.bf16.mxu0 %vm852_vm2, %v6081_v17  ;;  %v13409_v48 = vadd.f32 %v4883_v14, %v4368_v54  ;;  %v4899_v2 = vpop.f32.mrf.mxu0  ;;  %v5979_v36 = vrot.slane %v9400_v16, 1  ;;  %v15558_v41 = vld [vmem:[#allocation48_spill] sm:$0xff]  ;;  %v5976_v34 = vsel %vm1225_vm5, %v5974_v56, %v5975_v35 }
 0x2ec   :  { %v4164_v51 = vpop.f32.mrf.mxu1  ;;  %v5985_v56 = vrot.slane %v13413_v21, 1  ;;  %v5987_v35 = vrot.slane %v13415_v27, 1 }
 0x2ed   :  { %15557 = vst [vmem:[#allocation66_spill] sm:$0xff] %v13409_v48  ;;  %v4369_v17 = vadd.f32 %v4164_v51, %v15558_v41  ;;  %v13420_v14 = vadd.f32 %v9026_v26, %v4371_v58  ;;  %v9030_v15 = vpop.f32.mrf.mxu0  ;;  %v5981_v5 = vsel %vm1225_vm5, %v5979_v36, %v5980_v10  ;;  %v15560_v48 = vld [vmem:[#allocation60_spill] sm:$0xff]  ;;  %v6082_v51 = vpack.c.bf16 %v5978_v47, %v5976_v34 }
 0x2ee   :  { %v8961_v54 = vpop.f32.mrf.mxu1  ;;  %9128 = vmatmul.mubr.msk.bf16.gmra.mxu1 %vm852_vm2, %v5262_v40  ;;  %v15561_v40 = vld [vmem:[#allocation5_spill] sm:$0xff]  ;;  %v6083_v36 = vpack.c.bf16 %v5983_v32, %v5981_v5  ;;  %v5264_v5 = vpack.c.bf16 %v13399_v46, %v9399_v28  ;;  %v5265_v32 = vpack.c.bf16 %v9397_v37, %v9400_v16 }
 0x2ef   :  { %15559 = vst [vmem:[#allocation92_spill] sm:$0xff] %v13420_v14  ;;  %v4374_v6 = vadd.f32 %v8961_v54, %v15560_v48  ;;  %9131 = vmatprep.mubr.msk.bf16.mxu1 %vm852_vm2, %v5263_v52  ;;  %v13430_v26 = vadd.f32 %v4886_v61, %v4369_v17  ;;  %v4902_v58 = vpop.f32.mrf.mxu0  ;;  %v15562_v48 = vld [vmem:[#allocation46_spill] sm:$0xff]  ;;  %v5986_v54 = vsel %vm1225_vm5, %v5984_v60, %v5985_v56 }
 0x2f0   :  { %v4177_v11 = vpop.f32.mrf.mxu1  ;;  %v5988_v61 = vsel %vm1225_vm5, %v5985_v56, %v5987_v35 }
 0x2f1   :  { %v4372_v41 = vadd.f32 %v4177_v11, %v15561_v40  ;;  %v13433_v14 = vadd.f32 %v9029_v62, %v4374_v6  ;;  %v9033_v31 = vpop.f32.mrf.mxu0  ;;  %v15563_v6 = vld [vmem:[#allocation16_spill] sm:$0xff] }
 0x2f2   :  { %v8962_v10 = vpop.f32.mrf.mxu1  ;;  %9200 = vmatmul.mubr.msk.bf16.gmra.mxu0 %vm852_vm2, %v6082_v51 }
 0x2f3   :  { %v4375_v52 = vadd.f32 %v8962_v10, %v15562_v48  ;;  %9203 = vmatprep.mubr.msk.bf16.mxu0 %vm852_vm2, %v6083_v36  ;;  %v13440_v17 = vadd.f32 %v4899_v2, %v4372_v41  ;;  %v4915_v34 = vpop.f32.mrf.mxu0  ;;  %v6084_v36 = vpack.c.bf16 %v5988_v61, %v5986_v54  ;;  %v15564_v10 = vld [vmem:[#allocation4_spill] sm:$0xff]  ;;  %v15565_v41 = vld [vmem:[#allocation106_spill] sm:$0xff]  ;;  %v6706_v54 = vrot.slane %v13407_v0, 2 }
 0x2f4   :  { %v4180_v47 = vpop.f32.mrf.mxu1  ;;  %v15566_v48 = vld [vmem:[#allocation56_spill] sm:$0xff] }
 0x2f5   :  { %v4373_v62 = vadd.f32 %v4180_v47, %v15563_v6  ;;  %v13444_v11 = vadd.f32 %v9030_v15, %v4375_v52  ;;  %v9034_v40 = vpop.f32.mrf.mxu0  ;;  %v5266_v15 = vpack.c.bf16 %v13413_v21, %v13407_v0  ;;  %v15567_v6 = vld [vmem:[#allocation85_spill] sm:$0xff] }
 0x2f6   :  { %v8965_v51 = vpop.f32.mrf.mxu1  ;;  %9132 = vmatmul.mubr.msk.bf16.gmra.mxu1 %vm852_vm2, %v5264_v5 }
 0x2f7   :  { %v4378_v60 = vadd.f32 %v8965_v51, %v15564_v10  ;;  %9135 = vmatprep.mubr.msk.bf16.mxu1 %vm852_vm2, %v5265_v32  ;;  %v13449_v2 = vadd.f32 %v4902_v58, %v4373_v62  ;;  %v4918_v35 = vpop.f32.mrf.mxu0  ;;  %v6707_v58 = vrot.slane %v13413_v21, 2  ;;  %v15568_v10 = vld [vmem:[#allocation121_spill] sm:$0xff] }
 0x2f8   :  { %v4193_v56 = vpop.f32.mrf.mxu1 }
 0x2f9   :  { %v4376_v46 = vadd.f32 %v4193_v56, %v15565_v41  ;;  %v13452_v28 = vadd.f32 %v9033_v31, %v4378_v60  ;;  %v15569_v60 = vld [vmem:[#allocation74_spill] sm:$0xff]  ;;  %v15570_v56 = vld [vmem:[#allocation27_spill] sm:$0xff]  ;;  %v13474_v0 = vsel %vm2281_vm6, %v6706_v54, %v6707_v58 }
 0x2fa   :  { %v8966_v37 = vpop.f32.mrf.mxu1  ;;  %v9037_v16 = vpop.f32.mrf.mxu0  ;;  %9204 = vmatmul.mubr.msk.bf16.gmra.mxu0 %vm852_vm2, %v6084_v36  ;;  %v15571_v41 = vpack.c.bf16 %v15569_v60, %v15570_v56  ;;  %v15576_v60 = vld [vmem:[#allocation35_spill] sm:$0xff] }
 0x2fb   :  { %v4379_v52 = vadd.f32 %v8966_v37, %v15566_v48  ;;  %v13460_v61 = vadd.f32 %v4915_v34, %v4376_v46  ;;  %v6709_v34 = vrot.slane %v13415_v27, 2  ;;  %v15572_v37 = vld [vmem:[#allocation33_spill] sm:$0xff] }
 0x2fc   :  { %v4196_v47 = vpop.f32.mrf.mxu1  ;;  %v4931_v5 = vpop.f32.mrf.mxu0 }
 0x2fd   :  { %v4377_v31 = vadd.f32 %v4196_v47, %v15567_v6  ;;  %v13463_v62 = vadd.f32 %v9034_v40, %v4379_v52  ;;  %v13481_v52 = vsel %vm2281_vm6, %v6707_v58, %v6709_v34 }
 0x2fe   :  { %v8969_v32 = vpop.f32.mrf.mxu1  ;;  %9136 = vmatmul.mubr.msk.bf16.gmra.mxu1 %vm852_vm2, %v5266_v15  ;;  %v9038_v51 = vpop.f32.mrf.mxu0 }
 0x2ff   :  { %v4382_v36 = vadd.f32 %v8969_v32, %v15568_v10  ;;  %9211 = vmatprep.mubr.msk.bf16.mxu1 %vm852_vm2, %v15571_v41  ;;  %v13471_v21 = vadd.f32 %v4918_v35, %v4377_v31  ;;  %v15574_v31 = vld [vmem:[#allocation59_spill] sm:$0xff]  ;;  %v15581_v35 = vld [vmem:[#allocation28_spill] sm:$0xff] }
 0x300   :  { %v4209_v40 = vpop.f32.mrf.mxu1  ;;  %v4934_v46 = vpop.f32.mrf.mxu0 }
 0x301   :  { %v4380_v48 = vadd.f32 %v4209_v40, %v15572_v37  ;;  %v13478_v15 = vadd.f32 %v9037_v16, %v4382_v36  ;;  %v15578_v36 = vld [vmem:[#allocation20_spill] sm:$0xff]  ;;  %v15579_v40 = vld [vmem:[#allocation25_spill] sm:$0xff] }
 0x302   :  { %v8970_v47 = vpop.f32.mrf.mxu1  ;;  %v9041_v6 = vpop.f32.mrf.mxu0  ;;  %v15580_v58 = vpack.c.bf16 %v15578_v36, %v15579_v40  ;;  %v15587_v40 = vld [vmem:[#allocation42_spill] sm:$0xff] }
 0x303   :  { %15573 = vst [vmem:[#allocation51_spill] sm:$0xff] %v13478_v15  ;;  %v4383_v32 = vadd.f32 %v8970_v47, %v15574_v31  ;;  %v13486_v54 = vadd.f32 %v4931_v5, %v4380_v48  ;;  %v15582_v15 = vld [vmem:[#allocation7_spill] sm:$0xff] }
 0x304   :  { %v4212_v10 = vpop.f32.mrf.mxu1  ;;  %v4947_v27 = vpop.f32.mrf.mxu0  ;;  %v15583_v47 = vpack.c.bf16 %v15581_v35, %v15582_v15 }
 0x305   :  { %15575 = vst [vmem:[#allocation82_spill] sm:$0xff] %v13486_v54  ;;  %v4381_v56 = vadd.f32 %v4212_v10, %v15576_v60  ;;  %v13489_v41 = vadd.f32 %v9038_v51, %v4383_v32  ;;  %v15585_v51 = vld [vmem:[#allocation22_spill] sm:$0xff]  ;;  %v15588_v54 = vld [vmem:[#allocation52_spill] sm:$0xff] }
 0x306   :  { %v8973_v16 = vpop.f32.mrf.mxu1  ;;  %9212 = vmatmul.mubr.msk.bf16.vlgmr.msra.gmra.mxu1 %vm852_vm2, %v15580_v58  ;;  %v9042_v34 = vpop.f32.mrf.mxu0 }
 0x307   :  { %15577 = vst [vmem:[#allocation12_spill] sm:$0xff] %v13489_v41  ;;  %v4386_v37 = vadd.f32 %v8973_v16, %v13060_v49  ;;  %9215 = vmatprep.mubr.msk.bf16.mxu1 %vm852_vm2, %v15583_v47  ;;  %v13500_v5 = vadd.f32 %v4934_v46, %v4381_v56  ;;  %v15589_v56 = vld [vmem:[#allocation37_spill] sm:$0xff]  ;;  %v15590_v47 = vld [vmem:[#allocation84_spill] sm:$0xff] }
 0x308   :  { %v4225_v48 = vpop.f32.mrf.mxu1  ;;  %v4950_v31 = vpop.f32.mrf.mxu0 }
 0x309   :  { %15584 = vst [vmem:[#allocation91_spill] sm:$0xff] %v13500_v5  ;;  %v4384_v32 = vadd.f32 %v4225_v48, %v15585_v51  ;;  %v13503_v10 = vadd.f32 %v9041_v6, %v4386_v37  ;;  %v15591_v5 = vpack.c.bf16 %v15589_v56, %v15590_v47  ;;  %v15592_v37 = vld [vmem:[#allocation122_spill] sm:$0xff] }
 0x30a   :  { %v8974_v60 = vpop.f32.mrf.mxu1  ;;  %v9045_v36 = vpop.f32.mrf.mxu0  ;;  %v15593_v51 = vld [vmem:[#allocation26_spill] sm:$0xff] }
 0x30b   :  { %15586 = vst [vmem:[#allocation45_spill] sm:$0xff] %v13503_v10  ;;  %v4387_v58 = vadd.f32 %v8974_v60, %v15587_v40  ;;  %v13506_v41 = vadd.f32 %v4947_v27, %v4384_v32  ;;  %v15594_v10 = vld [vmem:[#allocation21_spill] sm:$0xff] }
 0x30c   :  { %v4228_v49 = vpop.f32.mrf.mxu1  ;;  %v4963_v16 = vpop.f32.mrf.mxu0  ;;  %v15595_v60 = vpack.c.bf16 %v15593_v51, %v15594_v10  ;;  %v15597_v51 = vld [vmem:[#allocation23_spill] sm:$0xff] }
 0x30d   :  { %v4385_v15 = vadd.f32 %v4228_v49, %v15588_v54  ;;  %v13509_v35 = vadd.f32 %v9042_v34, %v4387_v58 }
 0x30e   :  { %v8977_v46 = vpop.f32.mrf.mxu1  ;;  %9216 = vmatmul.mubr.msk.bf16.gmra.mxu1 %vm852_vm2, %v15591_v5  ;;  %v9046_v6 = vpop.f32.mrf.mxu0 }
 0x30f   :  { %v4390_v48 = vadd.f32 %v8977_v46, %v15592_v37  ;;  %9219 = vmatprep.mubr.msk.bf16.mxu1 %vm852_vm2, %v15595_v60  ;;  %v13520_v27 = vadd.f32 %v4950_v31, %v4385_v15  ;;  %v15596_v15 = vld [vmem:[#allocation44_spill] sm:$0xff] }
 0x310   :  { %v4241_v32 = vpop.f32.mrf.mxu1  ;;  %v4966_v54 = vpop.f32.mrf.mxu0  ;;  %v15598_v60 = vpack.c.bf16 %v15596_v15, %v15597_v51 }
 0x311   :  { %v4388_v34 = vadd.f32 %v4241_v32, %v13095_v20  ;;  %v13523_v40 = vadd.f32 %v9045_v36, %v4390_v48  ;;  %v15599_v48 = vld [vmem:[#allocation41_spill] sm:$0xff]  ;;  %v15600_v32 = vld [vmem:[#allocation39_spill] sm:$0xff] }
 0x312   :  { %v8978_v58 = vpop.f32.mrf.mxu1  ;;  %v9049_v49 = vpop.f32.mrf.mxu0 }
 0x313   :  { %v4391_v5 = vadd.f32 %v8978_v58, %v13104_v12  ;;  %v13526_v56 = vadd.f32 %v4963_v16, %v4388_v34  ;;  %v15601_v12 = vpack.c.bf16 %v15599_v48, %v15600_v32  ;;  %v15603_v32 = vld [vmem:[#allocation53_spill] sm:$0xff] }
 0x314   :  { %v4244_v46 = vpop.f32.mrf.mxu1  ;;  %v4979_v47 = vpop.f32.mrf.mxu0 }
 0x315   :  { %v4389_v10 = vadd.f32 %v4244_v46, %v13109_v19  ;;  %v13529_v37 = vadd.f32 %v9046_v6, %v4391_v5 }
 0x316   :  { %v8981_v31 = vpop.f32.mrf.mxu1  ;;  %9220 = vmatmul.mubr.msk.bf16.gmra.mxu1 %vm852_vm2, %v15598_v60  ;;  %v9050_v20 = vpop.f32.mrf.mxu0 }
 0x317   :  { %v4394_v36 = vadd.f32 %v8981_v31, %v13118_v44  ;;  %9223 = vmatprep.mubr.msk.bf16.mxu1 %vm852_vm2, %v15601_v12  ;;  %v13540_v16 = vadd.f32 %v4966_v54, %v4389_v10  ;;  %v15602_v10 = vld [vmem:[#allocation123_spill] sm:$0xff] }
 0x318   :  { %v4257_v34 = vpop.f32.mrf.mxu1  ;;  %v4982_v19 = vpop.f32.mrf.mxu0  ;;  %v15604_v12 = vpack.c.bf16 %v15602_v10, %v15603_v32 }
 0x319   :  { %v4392_v6 = vadd.f32 %v4257_v34, %v13123_v30  ;;  %v13543_v58 = vadd.f32 %v9049_v49, %v4394_v36  ;;  %v15605_v36 = vld [vmem:[#allocation71_spill] sm:$0xff]  ;;  %v15606_v34 = vld [vmem:[#allocation34_spill] sm:$0xff] }
 0x31a   :  { %v8982_v5 = vpop.f32.mrf.mxu1  ;;  %v9053_v46 = vpop.f32.mrf.mxu0 }
 0x31b   :  { %v4395_v15 = vadd.f32 %v8982_v5, %v13132_v63  ;;  %v13546_v51 = vadd.f32 %v4979_v47, %v4392_v6  ;;  %v15607_v63 = vpack.c.bf16 %v15605_v36, %v15606_v34  ;;  %v15611_v34 = vld [vmem:[#allocation54_spill] sm:$0xff] }
 0x31c   :  { %v4260_v44 = vpop.f32.mrf.mxu1  ;;  %v4995_v31 = vpop.f32.mrf.mxu0 }
 0x31d   :  { %v4393_v60 = vadd.f32 %v4260_v44, %v13137_v3  ;;  %v13549_v48 = vadd.f32 %v9050_v20, %v4395_v15 }
 0x31e   :  { %v8985_v54 = vpop.f32.mrf.mxu1  ;;  %9224 = vmatmul.mubr.msk.bf16.gmra.mxu1 %vm852_vm2, %v15604_v12  ;;  %v9054_v30 = vpop.f32.mrf.mxu0 }
 0x31f   :  { %v4398_v49 = vadd.f32 %v8985_v54, %v13146_v53  ;;  %9227 = vmatprep.mubr.msk.bf16.mxu1 %vm852_vm2, %v15607_v63  ;;  %v13560_v47 = vadd.f32 %v4982_v19, %v4393_v60  ;;  %v15610_v60 = vld [vmem:[#allocation124_spill] sm:$0xff] }
 0x320   :  { %v4273_v6 = vpop.f32.mrf.mxu1  ;;  %v4998_v3 = vpop.f32.mrf.mxu0  ;;  %v15612_v63 = vpack.c.bf16 %v15610_v60, %v15611_v34 }
 0x321   :  { %v4396_v20 = vadd.f32 %v4273_v6, %v13151_v8  ;;  %v13563_v5 = vadd.f32 %v9053_v46, %v4398_v49  ;;  %v15613_v46 = vld [vmem:[#allocation68_spill] sm:$0xff]  ;;  %v15614_v6 = vld [vmem:[#allocation125_spill] sm:$0xff] }
 0x322   :  { %v8986_v15 = vpop.f32.mrf.mxu1  ;;  %v9057_v44 = vpop.f32.mrf.mxu0 }
 0x323   :  { %15608 = vst [vmem:[#allocation86_spill] sm:$0xff] %v13563_v5  ;;  %v4399_v10 = vadd.f32 %v8986_v15, %v13160_v24  ;;  %v13566_v32 = vadd.f32 %v4995_v31, %v4396_v20  ;;  %v15615_v5 = vld [vmem:[#allocation43_spill] sm:$0xff] }
 0x324   :  { %v4276_v53 = vpop.f32.mrf.mxu1  ;;  %v5011_v54 = vpop.f32.mrf.mxu0  ;;  %v15616_v24 = vpack.c.bf16 %v15614_v6, %v15615_v5 }
 0x325   :  { %v4397_v12 = vadd.f32 %v4276_v53, %v13165_v57  ;;  %v13569_v36 = vadd.f32 %v9054_v30, %v4399_v10  ;;  %v15618_v30 = vld [vmem:[#allocation24_spill] sm:$0xff] }
 0x326   :  { %v8989_v19 = vpop.f32.mrf.mxu1  ;;  %9228 = vmatmul.mubr.msk.bf16.gmra.mxu1 %vm852_vm2, %v15612_v63  ;;  %v9058_v8 = vpop.f32.mrf.mxu0 }
 0x327   :  { %15609 = vst [vmem:[#allocation97_spill] sm:$0xff] %v13569_v36  ;;  %v4402_v49 = vadd.f32 %v8989_v19, %v15613_v46  ;;  %9231 = vmatprep.mubr.msk.bf16.mxu1 %vm852_vm2, %v15616_v24  ;;  %v13580_v31 = vadd.f32 %v4998_v3, %v4397_v12  ;;  %v15620_v36 = vld [vmem:[#allocation64_spill] sm:$0xff]  ;;  %v15622_v12 = vld [vmem:[#allocation127_spill] sm:$0xff]  ;;  %v15623_v24 = vld [vmem:[#allocation126_spill] sm:$0xff] }
 0x328   :  { %v4289_v20 = vpop.f32.mrf.mxu1  ;;  %v5014_v57 = vpop.f32.mrf.mxu0 }
 0x329   :  { %15617 = vst [vmem:[#allocation67_spill] sm:$0xff] %v13580_v31  ;;  %v4400_v15 = vadd.f32 %v4289_v20, %v15618_v30  ;;  %v13583_v10 = vadd.f32 %v9057_v44, %v4402_v49  ;;  %v15624_v31 = vpack.c.bf16 %v15622_v12, %v15623_v24  ;;  %v15625_v20 = vld [vmem:[#allocation70_spill] sm:$0xff]  ;;  %v15626_v30 = vld [vmem:[#allocation107_spill] sm:$0xff]  ;;  %v15630_v12 = vld [vmem:[#allocation9_spill] sm:$0xff] }
 0x32a   :  { %v8990_v53 = vpop.f32.mrf.mxu1  ;;  %v9061_v60 = vpop.f32.mrf.mxu0 }
 0x32b   :  { %v4403_v34 = vadd.f32 %v8990_v53, %v13194_v1  ;;  %v13586_v63 = vadd.f32 %v5011_v54, %v4400_v15  ;;  %v15627_v1 = vpack.c.bf16 %v15625_v20, %v15626_v30 }
 0x32c   :  { %v4292_v19 = vpop.f32.mrf.mxu1  ;;  %v5027_v46 = vpop.f32.mrf.mxu0 }
 0x32d   :  { %15619 = vst [vmem:[#allocation29_spill] sm:$0xff] %v13586_v63  ;;  %v4401_v5 = vadd.f32 %v4292_v19, %v15620_v36  ;;  %v13589_v6 = vadd.f32 %v9058_v8, %v4403_v34 }
 0x32e   :  { %v8993_v3 = vpop.f32.mrf.mxu1  ;;  %9232 = vmatmul.mubr.msk.bf16.gmra.mxu1 %vm852_vm2, %v15624_v31  ;;  %v9062_v44 = vpop.f32.mrf.mxu0  ;;  %v6626_v31 = vrot.slane %v13179_v43, 2 }
 0x32f   :  { %15621 = vst [vmem:[#allocation65_spill] sm:$0xff] %v13589_v6  ;;  %v4406_v49 = vadd.f32 %v8993_v3, %v13208_v38  ;;  %9235 = vmatprep.mubr.msk.bf16.mxu1 %vm852_vm2, %v15627_v1  ;;  %v13600_v54 = vadd.f32 %v5014_v57, %v4401_v5  ;;  %v15631_v38 = vld [vmem:[#allocation58_spill] sm:$0xff]  ;;  %v15632_v6 = vld [vmem:[#allocation72_spill] sm:$0xff]  ;;  %v15634_v1 = vld [vmem:[#allocation81_spill] sm:$0xff] }
 0x330   :  { %v4305_v15 = vpop.f32.mrf.mxu1  ;;  %v5030_v36 = vpop.f32.mrf.mxu0  ;;  %v6627_v3 = vrot.slane %v15631_v38, 2  ;;  %v6629_v20 = vrot.slane %v15632_v6, 2  ;;  %v15640_v38 = vld [vmem:[#allocation75_spill] sm:$0xff] }
 0x331   :  { %15628 = vst [vmem:[#allocation79_spill] sm:$0xff] %v13600_v54  ;;  %v4404_v8 = vadd.f32 %v4305_v15, %v13215_v23  ;;  %v13603_v53 = vadd.f32 %v9061_v60, %v4406_v49  ;;  %v15636_v60 = vld [vmem:[#allocation129_spill] sm:$0xff]  ;;  %v15637_v49 = vld [vmem:[#allocation128_spill] sm:$0xff] }
 0x332   :  { %v8994_v34 = vpop.f32.mrf.mxu1  ;;  %v9065_v19 = vpop.f32.mrf.mxu0  ;;  %v15638_v15 = vpack.c.bf16 %v15636_v60, %v15637_v49 }
 0x333   :  { %15629 = vst [vmem:[#allocation94_spill] sm:$0xff] %v13603_v53  ;;  %v4407_v24 = vadd.f32 %v8994_v34, %v15630_v12  ;;  %v13609_v30 = vadd.f32 %v5027_v46, %v4404_v8  ;;  %v15639_v34 = vld [vmem:[#allocation30_spill] sm:$0xff]  ;;  %v6628_v46 = vsel %vm2281_vm6, %v6626_v31, %v6627_v3  ;;  %v6630_v8 = vsel %vm2281_vm6, %v6627_v3, %v6629_v20  ;;  %v15644_v31 = vld [vmem:[#allocation69_spill] sm:$0xff]  ;;  %v15645_v20 = vld [vmem:[#allocation32_spill] sm:$0xff] }
 0x334   :  { %v4308_v57 = vpop.f32.mrf.mxu1  ;;  %v5043_v5 = vpop.f32.mrf.mxu0  ;;  %v15641_v53 = vld [vmem:[#allocation98_spill] sm:$0xff] }
 0x335   :  { %15633 = vst [vmem:[#allocation18_spill] sm:$0xff] %v13609_v30  ;;  %v4405_v54 = vadd.f32 %v4308_v57, %v15634_v1  ;;  %v13612_v63 = vadd.f32 %v9062_v44, %v4407_v24  ;;  %v15642_v6 = vpack.c.bf16 %v15640_v38, %v15641_v53  ;;  %v15643_v1 = vld [vmem:[#allocation6_spill] sm:$0xff] }
 0x336   :  { %v8997_v23 = vpop.f32.mrf.mxu1  ;;  %9236 = vmatmul.mubr.msk.bf16.gmra.mxu1 %vm852_vm2, %v15638_v15  ;;  %v9066_v43 = vpop.f32.mrf.mxu0 }
 0x337   :  { %15635 = vst [vmem:[#allocation90_spill] sm:$0xff] %v13612_v63  ;;  %v4410_v12 = vadd.f32 %v8997_v23, %v15639_v34  ;;  %9239 = vmatprep.mubr.msk.bf16.mxu1 %vm852_vm2, %v15642_v6  ;;  %v13625_v44 = vadd.f32 %v5030_v36, %v4405_v54  ;;  %v6790_v23 = vpack.c.bf16 %v6630_v8, %v6628_v46 }
 0x338   :  { %v4321_v24 = vpop.f32.mrf.mxu1  ;;  %v5046_v57 = vpop.f32.mrf.mxu0 }
 0x339   :  { %v4408_v60 = vadd.f32 %v4321_v24, %v15643_v1  ;;  %v13628_v49 = vadd.f32 %v9065_v19, %v4410_v12  ;;  %v15646_v12 = vld [vmem:[#allocation131_spill] sm:$0xff]  ;;  %v15647_v24 = vld [vmem:[#allocation130_spill] sm:$0xff] }
 0x33a   :  { %v8998_v15 = vpop.f32.mrf.mxu1  ;;  %v9069_v63 = vpop.f32.mrf.mxu0  ;;  %v15648_v1 = vpack.c.bf16 %v15646_v12, %v15647_v24 }
 0x33b   :  { %v4411_v34 = vadd.f32 %v8998_v15, %v13251_v25  ;;  %v13631_v53 = vadd.f32 %v5043_v5, %v4408_v60 }
 0x33c   :  { %v4324_v38 = vpop.f32.mrf.mxu1  ;;  %v5059_v6 = vpop.f32.mrf.mxu0 }
 0x33d   :  { %v4409_v30 = vadd.f32 %v4324_v38, %v15644_v31  ;;  %v13634_v3 = vadd.f32 %v9066_v43, %v4411_v34 }
 0x33e   :  { %v9001_v54 = vpop.f32.mrf.mxu1  ;;  %9240 = vmatmul.mubr.msk.bf16.gmra.mxu1 %vm852_vm2, %v6790_v23  ;;  %v9070_v36 = vpop.f32.mrf.mxu0 }
 0x33f   :  { %v4414_v19 = vadd.f32 %v9001_v54, %v15645_v20  ;;  %9243 = vmatprep.mubr.msk.bf16.mxu1 %vm852_vm2, %v15648_v1  ;;  %v13642_v25 = vadd.f32 %v5046_v57, %v4409_v30  ;;  %v15649_v57 = vld [vmem:[#allocation108_spill] sm:$0xff] }
 0x340   :  { %v4337_v5 = vpop.f32.mrf.mxu1  ;;  %v5062_v43 = vpop.f32.mrf.mxu0  ;;  %v15650_v20 = vld [vmem:[#allocation132_spill] sm:$0xff] }
 0x341   :  { %v4412_v46 = vadd.f32 %v4337_v5, %v13270_v59  ;;  %v13645_v8 = vadd.f32 %v9069_v63, %v4414_v19  ;;  %v15651_v12 = vpack.c.bf16 %v15649_v57, %v15650_v20  ;;  %v15652_v63 = vld [vmem:[#allocation95_spill] sm:$0xff]  ;;  %v15659_v57 = vld [vmem:[#allocation112_spill] sm:$0xff] }
 0x342   :  { %v9002_v60 = vpop.f32.mrf.mxu1  ;;  %v13653_v54 = vpop.f32.mrf.mxu0 }
 0x343   :  { %v4415_v15 = vadd.f32 %v9002_v60, %v13279_v42  ;;  %v13648_v23 = vadd.f32 %v5059_v6, %v4412_v46  ;;  %v15653_v42 = vld [vmem:[#allocation110_spill] sm:$0xff] }
 0x344   :  { %v4340_v34 = vpop.f32.mrf.mxu1  ;;  %v15654_v6 = vpack.c.bf16 %v15652_v63, %v15653_v42  ;;  %v13671_v24 = vpop.f32.mrf.mxu0 }
 0x345   :  { %v4413_v38 = vadd.f32 %v4340_v34, %v13284_v50  ;;  %v13651_v31 = vadd.f32 %v9070_v36, %v4415_v15  ;;  %v15655_v34 = vld [vmem:[#allocation135_spill] sm:$0xff] }
 0x346   :  { %v9077_v30 = vpop.f32.mrf.mxu1  ;;  %9244 = vmatmul.mubr.msk.bf16.gmra.mxu1 %vm852_vm2, %v15651_v12  ;;  %v13679_v60 = vpop.f32.mrf.mxu0 }
 0x347   :  { %v13660_v59 = vadd.f32 %v9077_v30, %v13293_v39  ;;  %9247 = vmatprep.mubr.msk.bf16.mxu1 %vm852_vm2, %v15654_v6  ;;  %v13666_v19 = vadd.f32 %v5062_v43, %v4413_v38  ;;  %v15656_v43 = vld [vmem:[#allocation134_spill] sm:$0xff] }
 0x348   :  { %v5414_v50 = vpop.f32.mrf.mxu1  ;;  %v15657_v38 = vpack.c.bf16 %v15655_v34, %v15656_v43  ;;  %v15658_v30 = vld [vmem:[#allocation114_spill] sm:$0xff]  ;;  %v13695_v12 = vpop.f32.mrf.mxu0  ;;  %v15665_v43 = vld [vmem:[#allocation140_spill] sm:$0xff] }
 0x349   :  { %v13669_v36 = vadd.f32 %v5414_v50, %v13298_v45  ;;  %v15660_v20 = vpack.c.bf16 %v15658_v30, %v15659_v57 }
 0x34a   :  { %v9078_v1 = vpop.f32.mrf.mxu1 }
 0x34b   :  { %v13674_v5 = vadd.f32 %v9078_v1, %v13307_v13 }
 0x34c   :  { %v5417_v46 = vpop.f32.mrf.mxu1 }
 0x34d   :  { %v13677_v39 = vadd.f32 %v5417_v46, %v13312_v4  ;;  %v15661_v46 = vld [vmem:[#allocation137_spill] sm:$0xff] }
 0x34e   :  { %v9081_v15 = vpop.f32.mrf.mxu1  ;;  %9248 = vmatmul.mubr.msk.bf16.gmra.mxu1 %vm852_vm2, %v15657_v38  ;;  %v15666_v38 = vld [vmem:[#allocation139_spill] sm:$0xff] }
 0x34f   :  { %v13686_v45 = vadd.f32 %v9081_v15, %v13321_v33  ;;  %9251 = vmatprep.mubr.msk.bf16.mxu1 %vm852_vm2, %v15660_v20  ;;  %v13703_v33 = vpop.f32.mrf.mxu0  ;;  %v15662_v15 = vld [vmem:[#allocation109_spill] sm:$0xff]  ;;  %v15667_v30 = vpack.c.bf16 %v15665_v43, %v15666_v38 }
 0x350   :  { %v5430_v13 = vpop.f32.mrf.mxu1  ;;  %v15663_v34 = vpack.c.bf16 %v15661_v46, %v15662_v15  ;;  %v15672_v15 = vld [vmem:[#allocation113_spill] sm:$0xff] }
 0x351   :  { %v13693_v4 = vadd.f32 %v5430_v13, %v13326_v7  ;;  %v13719_v57 = vpop.f32.mrf.mxu0 }
 0x352   :  { %v9082_v63 = vpop.f32.mrf.mxu1 }
 0x353   :  { %v13698_v42 = vadd.f32 %v9082_v63, %v13335_v29 }
 0x354   :  { %v5433_v6 = vpop.f32.mrf.mxu1 }
 0x355   :  { %v13701_v50 = vadd.f32 %v5433_v6, %v13340_v9  ;;  %v15670_v6 = vld [vmem:[#allocation83_spill] sm:$0xff] }
 0x356   :  { %v9085_v1 = vpop.f32.mrf.mxu1  ;;  %9252 = vmatmul.mubr.msk.bf16.gmra.mxu1 %vm852_vm2, %v15663_v34  ;;  %v15673_v34 = vld [vmem:[#allocation111_spill] sm:$0xff] }
 0x357   :  { %v13710_v7 = vadd.f32 %v9085_v1, %v13349_v22  ;;  %9255 = vmatprep.mubr.msk.bf16.mxu1 %vm852_vm2, %v15667_v30  ;;  %v13727_v22 = vpop.f32.mrf.mxu0  ;;  %v15674_v43 = vpack.c.bf16 %v15672_v15, %v15673_v34  ;;  %v15677_v30 = vld [vmem:[#allocation141_spill] sm:$0xff] }
 0x358   :  { %v5446_v29 = vpop.f32.mrf.mxu1  ;;  %v15685_v34 = vld [vmem:[#allocation17_spill] sm:$0xff] }
 0x359   :  { %15664 = vst [vmem:[#allocation99_spill] sm:$0xff] %v13710_v7  ;;  %v13717_v9 = vadd.f32 %v5446_v29, %v13354_v55  ;;  %v15675_v55 = vld [vmem:[#allocation31_spill] sm:$0xff]  ;;  %v15678_v29 = vld [vmem:[#allocation36_spill] sm:$0xff] }
 0x35a   :  { %v9086_v20 = vpop.f32.mrf.mxu1 }
 0x35b   :  { %15668 = vst [vmem:[#allocation11_spill] sm:$0xff] %v13717_v9  ;;  %v13722_v13 = vadd.f32 %v9086_v20, %v13363_v18  ;;  %v15679_v9 = vpack.c.bf16 %v15677_v30, %v15678_v29  ;;  %v15680_v20 = vld [vmem:[#allocation57_spill] sm:$0xff]  ;;  %v15688_v30 = vld [vmem:[#allocation102_spill] sm:$0xff]  ;;  %v15689_v29 = vld [vmem:[#allocation115_spill] sm:$0xff] }
 0x35c   :  { %v5449_v63 = vpop.f32.mrf.mxu1 }
 0x35d   :  { %15669 = vst [vmem:[#allocation50_spill] sm:$0xff] %v13722_v13  ;;  %v13725_v46 = vadd.f32 %v5449_v63, %v15670_v6  ;;  %v13743_v6 = vpop.f32.mrf.mxu0  ;;  %v15683_v13 = vld [vmem:[#allocation77_spill] sm:$0xff] }
 0x35e   :  { %v9089_v1 = vpop.f32.mrf.mxu1  ;;  %9256 = vmatmul.mubr.msk.bf16.gmra.mxu1 %vm852_vm2, %v15674_v43  ;;  %15682 = vst [vmem:[#allocation87_spill] sm:$0xff] %v13743_v6 }
 0x35f   :  { %15671 = vst [vmem:[#allocation80_spill] sm:$0xff] %v13725_v46  ;;  %v13734_v38 = vadd.f32 %v9089_v1, %v15675_v55  ;;  %9259 = vmatprep.mubr.msk.bf16.mxu1 %vm852_vm2, %v15679_v9  ;;  %v13751_v1 = vpop.f32.mrf.mxu0  ;;  %v15690_v9 = vpack.c.bf16 %v15688_v30, %v15689_v29 }
 0x360   :  { %v5462_v18 = vpop.f32.mrf.mxu1  ;;  %15687 = vst [vmem:[#allocation55_spill] sm:$0xff] %v13751_v1 }
 0x361   :  { %15676 = vst [vmem:[#allocation93_spill] sm:$0xff] %v13734_v38  ;;  %v13741_v63 = vadd.f32 %v5462_v18, %v15680_v20  ;;  %v15691_v18 = vld [vmem:[#allocation88_spill] sm:$0xff]  ;;  %v15693_v38 = vld [vmem:[#allocation117_spill] sm:$0xff] }
 0x362   :  { %v9090_v46 = vpop.f32.mrf.mxu1 }
 0x363   :  { %15681 = vst [vmem:[#allocation10_spill] sm:$0xff] %v13741_v63  ;;  %v13746_v7 = vadd.f32 %v9090_v46, %v15683_v13  ;;  %v15692_v63 = vld [vmem:[#allocation119_spill] sm:$0xff]  ;;  %v15695_v46 = vld [vmem:[#allocation66_spill] sm:$0xff] }
 0x364   :  { %v5465_v15 = vpop.f32.mrf.mxu1  ;;  %v15694_v6 = vpack.c.bf16 %v15692_v63, %v15693_v38  ;;  %v15699_v38 = vld [vmem:[#allocation49_spill] sm:$0xff]  ;;  %v15700_v63 = vld [vmem:[#allocation100_spill] sm:$0xff] }
 0x365   :  { %15684 = vst [vmem:[#allocation40_spill] sm:$0xff] %v13746_v7  ;;  %v13749_v43 = vadd.f32 %v5465_v15, %v15685_v34  ;;  %v13767_v34 = vpop.f32.mrf.mxu0  ;;  %v15697_v7 = vld [vmem:[#allocation92_spill] sm:$0xff] }
 0x366   :  { %v9093_v55 = vpop.f32.mrf.mxu1  ;;  %9260 = vmatmul.mubr.msk.bf16.gmra.mxu1 %vm852_vm2, %v15690_v9 }
 0x367   :  { %15686 = vst [vmem:[#allocation103_spill] sm:$0xff] %v13749_v43  ;;  %v13758_v20 = vadd.f32 %v9093_v55, %v15691_v18  ;;  %9263 = vmatprep.mubr.msk.bf16.mxu1 %vm852_vm2, %v15694_v6  ;;  %v13775_v55 = vpop.f32.mrf.mxu0  ;;  %v15701_v6 = vpack.c.bf16 %v15699_v38, %v15700_v63 }
 0x368   :  { %v5478_v13 = vpop.f32.mrf.mxu1 }
 0x369   :  { %v13765_v15 = vadd.f32 %v5478_v13, %v15695_v46  ;;  %v15702_v13 = vld [vmem:[#allocation142_spill] sm:$0xff] }
 0x36a   :  { %v9094_v43 = vpop.f32.mrf.mxu1  ;;  %v15703_v46 = vld [vmem:[#allocation118_spill] sm:$0xff] }
 0x36b   :  { %15696 = vst [vmem:[#allocation63_spill] sm:$0xff] %v13765_v15  ;;  %v13770_v1 = vadd.f32 %v9094_v43, %v15697_v7  ;;  %v15704_v15 = vpack.c.bf16 %v15702_v13, %v15703_v46  ;;  %v13791_v43 = vpop.f32.mrf.mxu0  ;;  %v15708_v13 = vld [vmem:[#allocation143_spill] sm:$0xff]  ;;  %v15710_v46 = vld [vmem:[#allocation120_spill] sm:$0xff] }
 0x36c   :  { %v5481_v30 = vpop.f32.mrf.mxu1 }
 0x36d   :  { %v13773_v29 = vadd.f32 %v5481_v30, %v13430_v26 }
 0x36e   :  { %v9097_v9 = vpop.f32.mrf.mxu1  ;;  %9264 = vmatmul.mubr.msk.bf16.gmra.mxu1 %vm852_vm2, %v15701_v6  ;;  %v15707_v6 = vld [vmem:[#allocation144_spill] sm:$0xff] }
 0x36f   :  { %15698 = vst [vmem:[#allocation89_spill] sm:$0xff] %v13773_v29  ;;  %v13782_v18 = vadd.f32 %v9097_v9, %v13433_v14  ;;  %9267 = vmatprep.mubr.msk.bf16.mxu1 %vm852_vm2, %v15704_v15  ;;  %v13799_v14 = vpop.f32.mrf.mxu0  ;;  %v15709_v15 = vpack.c.bf16 %v15707_v6, %v15708_v13 }
 0x370   :  { %v5494_v7 = vpop.f32.mrf.mxu1 }
 0x371   :  { %v13789_v26 = vadd.f32 %v5494_v7, %v13440_v17  ;;  %v15711_v7 = vld [vmem:[#allocation145_spill] sm:$0xff] }
 0x372   :  { %v9098_v30 = vpop.f32.mrf.mxu1 }
 0x373   :  { %15705 = vst [vmem:[#allocation96_spill] sm:$0xff] %v13789_v26  ;;  %v13794_v29 = vadd.f32 %v9098_v30, %v13444_v11  ;;  %v15712_v26 = vpack.c.bf16 %v15710_v46, %v15711_v7  ;;  %v13815_v30 = vpop.f32.mrf.mxu0  ;;  %v15718_v7 = vld [vmem:[#allocation82_spill] sm:$0xff] }
 0x374   :  { %v5497_v38 = vpop.f32.mrf.mxu1 }
 0x375   :  { %v13797_v63 = vadd.f32 %v5497_v38, %v13449_v2 }
 0x376   :  { %v9101_v9 = vpop.f32.mrf.mxu1  ;;  %9268 = vmatmul.mubr.msk.bf16.gmra.mxu1 %vm852_vm2, %v15709_v15 }
 0x377   :  { %15706 = vst [vmem:[#allocation78_spill] sm:$0xff] %v13797_v63  ;;  %v13806_v17 = vadd.f32 %v9101_v9, %v13452_v28  ;;  %9271 = vmatprep.mubr.msk.bf16.mxu1 %vm852_vm2, %v15712_v26  ;;  %v13823_v28 = vpop.f32.mrf.mxu0  ;;  %v15716_v26 = vpack.c.bf16 %v13481_v52, %v13474_v0 }
 0x378   :  { %v5510_v11 = vpop.f32.mrf.mxu1 }
 0x379   :  { %v13813_v2 = vadd.f32 %v5510_v11, %v13460_v61  ;;  %v15717_v61 = vld [vmem:[#allocation51_spill] sm:$0xff] }
 0x37a   :  { %v9102_v38 = vpop.f32.mrf.mxu1 }
 0x37b   :  { %15713 = vst [vmem:[#allocation13_spill] sm:$0xff] %v13813_v2  ;;  %v13818_v63 = vadd.f32 %v9102_v38, %v13463_v62  ;;  %v13835_v62 = vpop.f32.mrf.mxu0 }
 0x37c   :  { %v5513_v6 = vpop.f32.mrf.mxu1 }
 0x37d   :  { %15714 = vst [vmem:[#allocation62_spill] sm:$0xff] %v13818_v63  ;;  %v13821_v13 = vadd.f32 %v5513_v6, %v13471_v21  ;;  %v15720_v21 = vld [vmem:[#allocation12_spill] sm:$0xff]  ;;  %v15721_v63 = vld [vmem:[#allocation91_spill] sm:$0xff]  ;;  %v13843_v0 = vpop.f32.mrf.mxu0 }
 0x37e   :  { %v9105_v9 = vpop.f32.mrf.mxu1  ;;  %9272 = vmatmul.mubr.msk.bf16.gmra.mxu1 %vm852_vm2, %v15716_v26  ;;  %v15723_v26 = vld [vmem:[#allocation45_spill] sm:$0xff] }
 0x37f   :  { %15715 = vst [vmem:[#allocation15_spill] sm:$0xff] %v13821_v13  ;;  %v13830_v15 = vadd.f32 %v9105_v9, %v15717_v61 }
 0x380   :  { %v5526_v46 = vpop.f32.mrf.mxu1 }
 0x381   :  { %v13833_v11 = vadd.f32 %v5526_v46, %v15718_v7  ;;  %v13851_v7 = vpop.f32.mrf.mxu0 }
 0x382   :  { %v9106_v38 = vpop.f32.mrf.mxu1 }
 0x383   :  { %15719 = vst [vmem:[#allocation14_spill] sm:$0xff] %v13833_v11  ;;  %v13838_v6 = vadd.f32 %v9106_v38, %v15720_v21 }
 0x384   :  { %v5529_v13 = vpop.f32.mrf.mxu1 }
 0x385   :  { %v13841_v2 = vadd.f32 %v5529_v13, %v15721_v63  ;;  %v13859_v13 = vpop.f32.mrf.mxu0 }
 0x386   :  { %v9109_v52 = vpop.f32.mrf.mxu1 }
 0x387   :  { %15722 = vst [vmem:[#allocation19_spill] sm:$0xff] %v13841_v2  ;;  %v13846_v9 = vadd.f32 %v9109_v52, %v15723_v26 }
 0x388   :  { %v5542_v61 = vpop.f32.mrf.mxu1 }
 0x389   :  { %15724 = vst [vmem:[#allocation61_spill] sm:$0xff] %v13846_v9  ;;  %v13849_v46 = vadd.f32 %v5542_v61, %v13506_v41  ;;  %v13867_v61 = vpop.f32.mrf.mxu0  ;;  %v15752_v9 = vld [vmem:[#allocation90_spill] sm:$0xff] }
 0x38a   :  { %v9110_v11 = vpop.f32.mrf.mxu1 }
 0x38b   :  { %15725 = vst [vmem:[#allocation73_spill] sm:$0xff] %v13849_v46  ;;  %v13854_v38 = vadd.f32 %v9110_v11, %v13509_v35 }
 0x38c   :  { %v5545_v21 = vpop.f32.mrf.mxu1 }
 0x38d   :  { %15726 = vst [vmem:[#allocation133_spill] sm:$0xff] %v13854_v38  ;;  %v13857_v63 = vadd.f32 %v5545_v21, %v13520_v27  ;;  %v13875_v21 = vpop.f32.mrf.mxu0  ;;  %v15749_v38 = vld [vmem:[#allocation94_spill] sm:$0xff] }
 0x38e   :  { %v9113_v2 = vpop.f32.mrf.mxu1 }
 0x38f   :  { %15727 = vst [vmem:[#allocation136_spill] sm:$0xff] %v13857_v63  ;;  %v13862_v52 = vadd.f32 %v9113_v2, %v13523_v40 }
 0x390   :  { %v5558_v26 = vpop.f32.mrf.mxu1 }
 0x391   :  { %15728 = vst [vmem:[#allocation101_spill] sm:$0xff] %v13862_v52  ;;  %v13865_v41 = vadd.f32 %v5558_v26, %v13526_v56  ;;  %v13883_v26 = vpop.f32.mrf.mxu0  ;;  %v15746_v52 = vld [vmem:[#allocation65_spill] sm:$0xff] }
 0x392   :  { %v9114_v46 = vpop.f32.mrf.mxu1 }
 0x393   :  { %15729 = vst [vmem:[#allocation138_spill] sm:$0xff] %v13865_v41  ;;  %v13870_v35 = vadd.f32 %v9114_v46, %v13529_v37 }
 0x394   :  { %v5561_v11 = vpop.f32.mrf.mxu1 }
 0x395   :  { %15730 = vst [vmem:[#allocation116_spill] sm:$0xff] %v13870_v35  ;;  %v13873_v27 = vadd.f32 %v5561_v11, %v13540_v16  ;;  %v13891_v11 = vpop.f32.mrf.mxu0  ;;  %v15736_v35 = vld [vmem:[#allocation86_spill] sm:$0xff] }
 0x396   :  { %v9117_v63 = vpop.f32.mrf.mxu1 }
 0x397   :  { %15731 = vst [vmem:[#allocation104_spill] sm:$0xff] %v13873_v27  ;;  %v13878_v40 = vadd.f32 %v9117_v63, %v13543_v58 }
 0x398   :  { %v5574_v2 = vpop.f32.mrf.mxu1 }
 0x399   :  { %15732 = vst [vmem:[#allocation105_spill] sm:$0xff] %v13878_v40  ;;  %v13881_v56 = vadd.f32 %v5574_v2, %v13546_v51  ;;  %v13899_v2 = vpop.f32.mrf.mxu0  ;;  %v15739_v40 = vld [vmem:[#allocation97_spill] sm:$0xff] }
 0x39a   :  { %v9118_v41 = vpop.f32.mrf.mxu1 }
 0x39b   :  { %15733 = vst [vmem:[#allocation38_spill] sm:$0xff] %v13881_v56  ;;  %v13886_v37 = vadd.f32 %v9118_v41, %v13549_v48 }
 0x39c   :  { %v5577_v46 = vpop.f32.mrf.mxu1 }
 0x39d   :  { %15734 = vst [vmem:[#allocation47_spill] sm:$0xff] %v13886_v37  ;;  %v13889_v16 = vadd.f32 %v5577_v46, %v13560_v47  ;;  %v15741_v37 = vld [vmem:[#allocation67_spill] sm:$0xff]  ;;  %v13907_v46 = vpop.f32.mrf.mxu0 }
 0x39e   :  { %v9121_v27 = vpop.f32.mrf.mxu1 }
 0x39f   :  { %15735 = vst [vmem:[#allocation8_spill] sm:$0xff] %v13889_v16  ;;  %v13894_v58 = vadd.f32 %v9121_v27, %v15736_v35 }
 0x3a0   :  { %v5590_v63 = vpop.f32.mrf.mxu1 }
 0x3a1   :  { %15737 = vst [vmem:[#allocation3_spill] sm:$0xff] %v13894_v58  ;;  %v13897_v51 = vadd.f32 %v5590_v63, %v13566_v32  ;;  %v15744_v58 = vld [vmem:[#allocation29_spill] sm:$0xff]  ;;  %v13915_v63 = vpop.f32.mrf.mxu0 }
 0x3a2   :  { %v9122_v56 = vpop.f32.mrf.mxu1 }
 0x3a3   :  { %15738 = vst [vmem:[#allocation76_spill] sm:$0xff] %v13897_v51  ;;  %v13902_v48 = vadd.f32 %v9122_v56, %v15739_v40 }
 0x3a4   :  { %v5593_v41 = vpop.f32.mrf.mxu1 }
 0x3a5   :  { %15740 = vst [vmem:[#allocation48_spill] sm:$0xff] %v13902_v48  ;;  %v13905_v47 = vadd.f32 %v5593_v41, %v15741_v37  ;;  %v15747_v48 = vld [vmem:[#allocation79_spill] sm:$0xff]  ;;  %v13923_v41 = vpop.f32.mrf.mxu0 }
 0x3a6   :  { %v9125_v16 = vpop.f32.mrf.mxu1 }
 0x3a7   :  { %15742 = vst [vmem:[#allocation60_spill] sm:$0xff] %v13905_v47  ;;  %v13910_v35 = vadd.f32 %v9125_v16, %v13583_v10 }
 0x3a8   :  { %v5606_v27 = vpop.f32.mrf.mxu1 }
 0x3a9   :  { %15743 = vst [vmem:[#allocation5_spill] sm:$0xff] %v13910_v35  ;;  %v13913_v32 = vadd.f32 %v5606_v27, %v15744_v58  ;;  %v15750_v35 = vld [vmem:[#allocation18_spill] sm:$0xff]  ;;  %v13931_v27 = vpop.f32.mrf.mxu0 }
 0x3aa   :  { %v9126_v51 = vpop.f32.mrf.mxu1 }
 0x3ab   :  { %15745 = vst [vmem:[#allocation46_spill] sm:$0xff] %v13913_v32  ;;  %v13918_v40 = vadd.f32 %v9126_v51, %v15746_v52 }
 0x3ac   :  { %v5609_v56 = vpop.f32.mrf.mxu1 }
 0x3ad   :  { %v13921_v37 = vadd.f32 %v5609_v56, %v15747_v48  ;;  %v13939_v56 = vpop.f32.mrf.mxu0 }
 0x3ae   :  { %v9129_v47 = vpop.f32.mrf.mxu1 }
 0x3af   :  { %15748 = vst [vmem:[#allocation16_spill] sm:$0xff] %v13921_v37  ;;  %v13926_v10 = vadd.f32 %v9129_v47, %v15749_v38 }
 0x3b0   :  { %v5622_v16 = vpop.f32.mrf.mxu1 }
 0x3b1   :  { %v13929_v58 = vadd.f32 %v5622_v16, %v15750_v35  ;;  %v13947_v16 = vpop.f32.mrf.mxu0 }
 0x3b2   :  { %v9130_v32 = vpop.f32.mrf.mxu1 }
 0x3b3   :  { %15751 = vst [vmem:[#allocation4_spill] sm:$0xff] %v13929_v58  ;;  %v13934_v52 = vadd.f32 %v9130_v32, %v15752_v9 }
 0x3b4   :  { %v5625_v51 = vpop.f32.mrf.mxu1 }
 0x3b5   :  { %v13937_v48 = vadd.f32 %v5625_v51, %v13625_v44  ;;  %v13955_v51 = vpop.f32.mrf.mxu0 }
 0x3b6   :  { %v9133_v37 = vpop.f32.mrf.mxu1 }
 0x3b7   :  { %15753 = vst [vmem:[#allocation106_spill] sm:$0xff] %v13937_v48  ;;  %v13942_v38 = vadd.f32 %v9133_v37, %v13628_v49 }
 0x3b8   :  { %v5638_v47 = vpop.f32.mrf.mxu1 }
 0x3b9   :  { %v13945_v35 = vadd.f32 %v5638_v47, %v13631_v53  ;;  %v13963_v47 = vpop.f32.mrf.mxu0 }
 0x3ba   :  { %v9134_v58 = vpop.f32.mrf.mxu1 }
 0x3bb   :  { %15754 = vst [vmem:[#allocation56_spill] sm:$0xff] %v13945_v35  ;;  %v13950_v9 = vadd.f32 %v9134_v58, %v13634_v3 }
 0x3bc   :  { %v5641_v32 = vpop.f32.mrf.mxu1 }
 0x3bd   :  { %v13953_v44 = vadd.f32 %v5641_v32, %v13642_v25  ;;  %v6489_v32 = vadd.f32 %v13653_v54, %v13660_v59 }
 0x3be   :  { %v9137_v48 = vpop.f32.mrf.mxu1 }
 0x3bf   :  { %15755 = vst [vmem:[#allocation85_spill] sm:$0xff] %v13953_v44  ;;  %v13958_v49 = vadd.f32 %v9137_v48, %v13645_v8  ;;  %v13973_v44 = vpop.f32.mrf.mxu0 }
 0x3c0   :  { %v5654_v37 = vpop.f32.mrf.mxu1 }
 0x3c1   :  { %15756 = vst [vmem:[#allocation121_spill] sm:$0xff] %v13958_v49  ;;  %v13961_v53 = vadd.f32 %v5654_v37, %v13648_v23  ;;  %v6487_v23 = vadd.f32 %v13671_v24, %v13669_v36  ;;  %v6488_v36 = vadd.f32 %v13695_v12, %v13677_v39 }
 0x3c2   :  { %v9138_v35 = vpop.f32.mrf.mxu1 }
 0x3c3   :  { %15757 = vst [vmem:[#allocation74_spill] sm:$0xff] %v13961_v53  ;;  %v13966_v3 = vadd.f32 %v9138_v35, %v13651_v31  ;;  %v6490_v31 = vadd.f32 %v13679_v60, %v13674_v5  ;;  %v13979_v35 = vpop.f32.mrf.mxu0 }
 0x3c4   :  { %v5657_v58 = vpop.f32.mrf.mxu1 }
 0x3c5   :  { %v13969_v25 = vadd.f32 %v5657_v58, %v13666_v19  ;;  %v6493_v58 = vadd.f32 %v13703_v33, %v13686_v45 }
 0x3c6   :  { %v9213_v8 = vpop.f32.mrf.mxu1 }
 0x3c7   :  { %v7211_v48 = vadd.f32 %v9213_v8, %v6489_v32  ;;  %v13993_v32 = vpop.f32.mrf.mxu0 }
 0x3c8   :  { %v6954_v37 = vpop.f32.mrf.mxu1 }
 0x3c9   :  { %v8037_v53 = vpack.c.bf16 %v7211_v48, %v7211_v48  ;;  %v7209_v49 = vadd.f32 %v6954_v37, %v6487_v23  ;;  %v6494_v48 = vadd.f32 %v13727_v22, %v13698_v42  ;;  %v14007_v23 = vpop.f32.mrf.mxu0 }
 0x3ca   :  { %v9214_v19 = vpop.f32.mrf.mxu1 }
 0x3cb   :  { %7532 = vst.msk [vmem:[%s14392_s6 + $0x8] sm:$0xf] %vm7529_vm7, %v8037_v53  ;;  %v8035_v54 = vpack.c.bf16 %v7209_v49, %v7209_v49  ;;  %v7212_v59 = vadd.f32 %v9214_v19, %v6490_v31  ;;  %v6491_v49 = vadd.f32 %v13719_v57, %v13693_v4  ;;  %v15758_v31 = vld [vmem:[#allocation87_spill] sm:$0xff] }
 0x3cc   :  { %v6957_v24 = vpop.f32.mrf.mxu1  ;;  %v6492_v19 = vadd.f32 %v15758_v31, %v13701_v50 }
 0x3cd   :  { %7530 = vst.msk [vmem:[%s14392_s6] sm:$0xf] %vm7529_vm7, %v8035_v54  ;;  %v8038_v5 = vpack.c.bf16 %v7212_v59, %v7212_v59  ;;  %v7210_v60 = vadd.f32 %v6957_v24, %v6488_v36  ;;  %v15759_v59 = vld [vmem:[#allocation99_spill] sm:$0xff] }
 0x3ce   :  { %v9217_v8 = vpop.f32.mrf.mxu1  ;;  %v15760_v36 = vld [vmem:[#allocation55_spill] sm:$0xff] }
 0x3cf   :  { %7533 = vst.msk [vmem:[%s14392_s6 + $0xc] sm:$0xf] %vm7529_vm7, %v8038_v5  ;;  %v8036_v39 = vpack.c.bf16 %v7210_v60, %v7210_v60  ;;  %v7215_v12 = vadd.f32 %v9217_v8, %v6493_v58  ;;  %v6497_v24 = vadd.f32 %v15760_v36, %v15759_v59  ;;  %v14021_v5 = vpop.f32.mrf.mxu0  ;;  %v15761_v8 = vld [vmem:[#allocation11_spill] sm:$0xff] }
 0x3d0   :  { %v6970_v53 = vpop.f32.mrf.mxu1 }
 0x3d1   :  { %7531 = vst.msk [vmem:[%s14392_s6 + $0x4] sm:$0xf] %vm7529_vm7, %v8036_v39  ;;  %v8041_v45 = vpack.c.bf16 %v7215_v12, %v7215_v12  ;;  %v7213_v33 = vadd.f32 %v6970_v53, %v6491_v49  ;;  %v6495_v39 = vadd.f32 %v13767_v34, %v15761_v8 }
 0x3d2   :  { %v9218_v37 = vpop.f32.mrf.mxu1 }
 0x3d3   :  { %7536 = vst.msk [vmem:[%s14392_s6 + $0x18] sm:$0xf] %vm7529_vm7, %v8041_v45  ;;  %v8039_v4 = vpack.c.bf16 %v7213_v33, %v7213_v33  ;;  %v7216_v57 = vadd.f32 %v9218_v37, %v6494_v48  ;;  %v15762_v45 = vld [vmem:[#allocation50_spill] sm:$0xff]  ;;  %v14035_v48 = vpop.f32.mrf.mxu0 }
 0x3d4   :  { %v6973_v54 = vpop.f32.mrf.mxu1  ;;  %v6498_v33 = vadd.f32 %v13775_v55, %v15762_v45 }
 0x3d5   :  { %7534 = vst.msk [vmem:[%s14392_s6 + $0x10] sm:$0xf] %vm7529_vm7, %v8039_v4  ;;  %v8042_v42 = vpack.c.bf16 %v7216_v57, %v7216_v57  ;;  %v7214_v22 = vadd.f32 %v6973_v54, %v6492_v19  ;;  %v15763_v57 = vld [vmem:[#allocation80_spill] sm:$0xff]  ;;  %v14049_v59 = vpop.f32.mrf.mxu0 }
 0x3d6   :  { %v9221_v60 = vpop.f32.mrf.mxu1  ;;  %v6496_v31 = vadd.f32 %v13791_v43, %v15763_v57  ;;  %v6505_v57 = vadd.f32 %v13843_v0, %v13758_v20 }
 0x3d7   :  { %7537 = vst.msk [vmem:[%s14392_s6 + $0x1c] sm:$0xf] %vm7529_vm7, %v8042_v42  ;;  %v8040_v50 = vpack.c.bf16 %v7214_v22, %v7214_v22  ;;  %v7219_v58 = vadd.f32 %v9221_v60, %v6497_v24  ;;  %v15764_v42 = vld [vmem:[#allocation93_spill] sm:$0xff]  ;;  %v15765_v60 = vld [vmem:[#allocation10_spill] sm:$0xff] }
 0x3d8   :  { %v6986_v12 = vpop.f32.mrf.mxu1  ;;  %v6501_v22 = vadd.f32 %v13799_v14, %v15764_v42 }
 0x3d9   :  { %7535 = vst.msk [vmem:[%s14392_s6 + $0x14] sm:$0xf] %vm7529_vm7, %v8040_v50  ;;  %v8045_v49 = vpack.c.bf16 %v7219_v58, %v7219_v58  ;;  %v7217_v53 = vadd.f32 %v6986_v12, %v6495_v39  ;;  %v6499_v50 = vadd.f32 %v13815_v30, %v15765_v60  ;;  %v15766_v39 = vld [vmem:[#allocation40_spill] sm:$0xff] }
 0x3da   :  { %v9222_v37 = vpop.f32.mrf.mxu1  ;;  %v6502_v12 = vadd.f32 %v13823_v28, %v15766_v39 }
 0x3db   :  { %7540 = vst.msk [vmem:[%s14392_s6 + $0x28] sm:$0xf] %vm7529_vm7, %v8045_v49  ;;  %v8043_v34 = vpack.c.bf16 %v7217_v53, %v7217_v53  ;;  %v7220_v4 = vadd.f32 %v9222_v37, %v6498_v33  ;;  %v14063_v49 = vpop.f32.mrf.mxu0  ;;  %v15767_v33 = vld [vmem:[#allocation103_spill] sm:$0xff] }
 0x3dc   :  { %v6989_v19 = vpop.f32.mrf.mxu1  ;;  %v6500_v37 = vadd.f32 %v13835_v62, %v15767_v33 }
 0x3dd   :  { %7538 = vst.msk [vmem:[%s14392_s6 + $0x20] sm:$0xf] %vm7529_vm7, %v8043_v34  ;;  %v8046_v55 = vpack.c.bf16 %v7220_v4, %v7220_v4  ;;  %v7218_v54 = vadd.f32 %v6989_v19, %v6496_v31  ;;  %v14077_v31 = vpop.f32.mrf.mxu0 }
 0x3de   :  { %v9225_v36 = vpop.f32.mrf.mxu1 }
 0x3df   :  { %7541 = vst.msk [vmem:[%s14392_s6 + $0x2c] sm:$0xf] %vm7529_vm7, %v8046_v55  ;;  %v8044_v43 = vpack.c.bf16 %v7218_v54, %v7218_v54  ;;  %v7223_v24 = vadd.f32 %v9225_v36, %v6501_v22  ;;  %v15768_v54 = vld [vmem:[#allocation63_spill] sm:$0xff]  ;;  %v6506_v36 = vadd.f32 %v13859_v13, %v13770_v1 }
 0x3e0   :  { %v7002_v58 = vpop.f32.mrf.mxu1  ;;  %v6503_v42 = vadd.f32 %v13851_v7, %v15768_v54 }
 0x3e1   :  { %7539 = vst.msk [vmem:[%s14392_s6 + $0x24] sm:$0xf] %vm7529_vm7, %v8044_v43  ;;  %v8049_v14 = vpack.c.bf16 %v7223_v24, %v7223_v24  ;;  %v7221_v8 = vadd.f32 %v7002_v58, %v6499_v50  ;;  %v14091_v43 = vpop.f32.mrf.mxu0  ;;  %v15769_v50 = vld [vmem:[#allocation89_spill] sm:$0xff] }
 0x3e2   :  { %v9226_v53 = vpop.f32.mrf.mxu1  ;;  %v6504_v58 = vadd.f32 %v13867_v61, %v15769_v50 }
 0x3e3   :  { %7544 = vst.msk [vmem:[%s14392_s6 + $0x38] sm:$0xf] %vm7529_vm7, %v8049_v14  ;;  %v8047_v30 = vpack.c.bf16 %v7221_v8, %v7221_v8  ;;  %v7224_v45 = vadd.f32 %v9226_v53, %v6502_v12  ;;  %v6509_v8 = vadd.f32 %v13875_v21, %v13782_v18  ;;  %v14105_v39 = vpop.f32.mrf.mxu0 }
 0x3e4   :  { %v7005_v34 = vpop.f32.mrf.mxu1 }
 0x3e5   :  { %7542 = vst.msk [vmem:[%s14392_s6 + $0x30] sm:$0xf] %vm7529_vm7, %v8047_v30  ;;  %v8050_v28 = vpack.c.bf16 %v7224_v45, %v7224_v45  ;;  %v7222_v4 = vadd.f32 %v7005_v34, %v6500_v37  ;;  %v15770_v30 = vld [vmem:[#allocation96_spill] sm:$0xff]  ;;  %v6510_v37 = vadd.f32 %v13891_v11, %v13794_v29  ;;  %v14119_v34 = vpop.f32.mrf.mxu0 }
 0x3e6   :  { %v9229_v19 = vpop.f32.mrf.mxu1  ;;  %v6507_v45 = vadd.f32 %v13883_v26, %v15770_v30 }
 0x3e7   :  { %7545 = vst.msk [vmem:[%s14392_s6 + $0x3c] sm:$0xf] %vm7529_vm7, %v8050_v28  ;;  %v8048_v62 = vpack.c.bf16 %v7222_v4, %v7222_v4  ;;  %v7227_v55 = vadd.f32 %v9229_v19, %v6505_v57  ;;  %v15771_v57 = vld [vmem:[#allocation78_spill] sm:$0xff]  ;;  %v14133_v54 = vpop.f32.mrf.mxu0 }
 0x3e8   :  { %v7018_v22 = vpop.f32.mrf.mxu1  ;;  %v6508_v19 = vadd.f32 %v13899_v2, %v15771_v57 }
 0x3e9   :  { %7543 = vst.msk [vmem:[%s14392_s6 + $0x34] sm:$0xf] %vm7529_vm7, %v8048_v62  ;;  %v8053_v20 = vpack.c.bf16 %v7227_v55, %v7227_v55  ;;  %v7225_v0 = vadd.f32 %v7018_v22, %v6503_v42  ;;  %v6513_v55 = vadd.f32 %v13907_v46, %v13806_v17 }
 0x3ea   :  { %v9230_v24 = vpop.f32.mrf.mxu1 }
 0x3eb   :  { %7548 = vst.msk [vmem:[%s14392_s6 + $0x48] sm:$0xf] %vm7529_vm7, %v8053_v20  ;;  %v8051_v7 = vpack.c.bf16 %v7225_v0, %v7225_v0  ;;  %v7228_v60 = vadd.f32 %v9230_v24, %v6506_v36  ;;  %v15772_v20 = vld [vmem:[#allocation13_spill] sm:$0xff]  ;;  %v15773_v24 = vld [vmem:[#allocation62_spill] sm:$0xff] }
 0x3ec   :  { %v7021_v14 = vpop.f32.mrf.mxu1  ;;  %v6511_v0 = vadd.f32 %v13915_v63, %v15772_v20 }
 0x3ed   :  { %7546 = vst.msk [vmem:[%s14392_s6 + $0x40] sm:$0xf] %vm7529_vm7, %v8051_v7  ;;  %v8054_v1 = vpack.c.bf16 %v7228_v60, %v7228_v60  ;;  %v7226_v13 = vadd.f32 %v7021_v14, %v6504_v58  ;;  %v6514_v7 = vadd.f32 %v13923_v41, %v15773_v24  ;;  %v14147_v60 = vpop.f32.mrf.mxu0  ;;  %v15774_v14 = vld [vmem:[#allocation15_spill] sm:$0xff] }
 0x3ee   :  { %v9233_v12 = vpop.f32.mrf.mxu1 }
 0x3ef   :  { %7549 = vst.msk [vmem:[%s14392_s6 + $0x4c] sm:$0xf] %vm7529_vm7, %v8054_v1  ;;  %v8052_v61 = vpack.c.bf16 %v7226_v13, %v7226_v13  ;;  %v7231_v53 = vadd.f32 %v9233_v12, %v6509_v8  ;;  %v6512_v1 = vadd.f32 %v13931_v27, %v15774_v14  ;;  %v6517_v12 = vadd.f32 %v13939_v56, %v13830_v15 }
 0x3f0   :  { %v7034_v33 = vpop.f32.mrf.mxu1 }
 0x3f1   :  { %7547 = vst.msk [vmem:[%s14392_s6 + $0x44] sm:$0xf] %vm7529_vm7, %v8052_v61  ;;  %v8057_v18 = vpack.c.bf16 %v7231_v53, %v7231_v53  ;;  %v7229_v21 = vadd.f32 %v7034_v33, %v6507_v45  ;;  %v14161_v61 = vpop.f32.mrf.mxu0  ;;  %v15775_v45 = vld [vmem:[#allocation14_spill] sm:$0xff] }
 0x3f2   :  { %v9234_v28 = vpop.f32.mrf.mxu1  ;;  %v6515_v33 = vadd.f32 %v13947_v16, %v15775_v45 }
 0x3f3   :  { %7552 = vst.msk [vmem:[%s14392_s6 + $0x58] sm:$0xf] %vm7529_vm7, %v8057_v18  ;;  %v8055_v26 = vpack.c.bf16 %v7229_v21, %v7229_v21  ;;  %v7232_v4 = vadd.f32 %v9234_v28, %v6510_v37  ;;  %v6518_v21 = vadd.f32 %v13955_v51, %v13838_v6  ;;  %v14175_v37 = vpop.f32.mrf.mxu0 }
 0x3f4   :  { %v7037_v62 = vpop.f32.mrf.mxu1 }
 0x3f5   :  { %7550 = vst.msk [vmem:[%s14392_s6 + $0x50] sm:$0xf] %vm7529_vm7, %v8055_v26  ;;  %v8058_v29 = vpack.c.bf16 %v7232_v4, %v7232_v4  ;;  %v7230_v11 = vadd.f32 %v7037_v62, %v6508_v19  ;;  %v15776_v4 = vld [vmem:[#allocation19_spill] sm:$0xff]  ;;  %v15777_v62 = vld [vmem:[#allocation61_spill] sm:$0xff] }
 0x3f6   :  { %v9237_v42 = vpop.f32.mrf.mxu1  ;;  %v6516_v57 = vadd.f32 %v13963_v47, %v15776_v4 }
 0x3f7   :  { %7553 = vst.msk [vmem:[%s14392_s6 + $0x5c] sm:$0xf] %vm7529_vm7, %v8058_v29  ;;  %v8056_v2 = vpack.c.bf16 %v7230_v11, %v7230_v11  ;;  %v7235_v22 = vadd.f32 %v9237_v42, %v6513_v55  ;;  %v6521_v29 = vadd.f32 %v13973_v44, %v15777_v62  ;;  %v14189_v11 = vpop.f32.mrf.mxu0 }
 0x3f8   :  { %v7050_v36 = vpop.f32.mrf.mxu1 }
 0x3f9   :  { %7551 = vst.msk [vmem:[%s14392_s6 + $0x54] sm:$0xf] %vm7529_vm7, %v8056_v2  ;;  %v8061_v17 = vpack.c.bf16 %v7235_v22, %v7235_v22  ;;  %v7233_v46 = vadd.f32 %v7050_v36, %v6511_v0  ;;  %v15778_v2 = vld [vmem:[#allocation73_spill] sm:$0xff] }
 0x3fa   :  { %v9238_v50 = vpop.f32.mrf.mxu1  ;;  %v6519_v22 = vadd.f32 %v13979_v35, %v15778_v2  ;;  %v15779_v36 = vld [vmem:[#allocation133_spill] sm:$0xff]  ;;  %v15787_v2 = vld [vmem:[#allocation47_spill] sm:$0xff] }
 0x3fb   :  { %7556 = vst.msk [vmem:[%s14392_s6 + $0x68] sm:$0xf] %vm7529_vm7, %v8061_v17  ;;  %v8059_v63 = vpack.c.bf16 %v7233_v46, %v7233_v46  ;;  %v7236_v58 = vadd.f32 %v9238_v50, %v6514_v7  ;;  %v6522_v17 = vadd.f32 %v13993_v32, %v15779_v36  ;;  %v14203_v46 = vpop.f32.mrf.mxu0  ;;  %v15780_v50 = vld [vmem:[#allocation136_spill] sm:$0xff] }
 0x3fc   :  { %v7053_v13 = vpop.f32.mrf.mxu1  ;;  %v15788_v36 = vld [vmem:[#allocation8_spill] sm:$0xff] }
 0x3fd   :  { %7554 = vst.msk [vmem:[%s14392_s6 + $0x60] sm:$0xf] %vm7529_vm7, %v8059_v63  ;;  %v8062_v41 = vpack.c.bf16 %v7236_v58, %v7236_v58  ;;  %v7234_v8 = vadd.f32 %v7053_v13, %v6512_v1  ;;  %v6520_v63 = vadd.f32 %v14007_v23, %v15780_v50  ;;  %v15781_v1 = vld [vmem:[#allocation101_spill] sm:$0xff] }
 0x3fe   :  { %v9241_v53 = vpop.f32.mrf.mxu1  ;;  %v6525_v13 = vadd.f32 %v14021_v5, %v15781_v1 }
 0x3ff   :  { %7557 = vst.msk [vmem:[%s14392_s6 + $0x6c] sm:$0xf] %vm7529_vm7, %v8062_v41  ;;  %v8060_v27 = vpack.c.bf16 %v7234_v8, %v7234_v8  ;;  %v7239_v30 = vadd.f32 %v9241_v53, %v6517_v12  ;;  %v14217_v41 = vpop.f32.mrf.mxu0  ;;  %v15782_v53 = vld [vmem:[#allocation138_spill] sm:$0xff] }
 0x400   :  { %v7066_v18 = vpop.f32.mrf.mxu1 }
 0x401   :  { %7555 = vst.msk [vmem:[%s14392_s6 + $0x64] sm:$0xf] %vm7529_vm7, %v8060_v27  ;;  %v8065_v15 = vpack.c.bf16 %v7239_v30, %v7239_v30  ;;  %v7237_v56 = vadd.f32 %v7066_v18, %v6515_v33  ;;  %v6523_v27 = vadd.f32 %v14035_v48, %v15782_v53  ;;  %v15783_v33 = vld [vmem:[#allocation116_spill] sm:$0xff] }
 0x402   :  { %v9242_v28 = vpop.f32.mrf.mxu1  ;;  %v6526_v18 = vadd.f32 %v14049_v59, %v15783_v33 }
 0x403   :  { %7560 = vst.msk [vmem:[%s14392_s6 + $0x78] sm:$0xf] %vm7529_vm7, %v8065_v15  ;;  %v8063_v16 = vpack.c.bf16 %v7237_v56, %v7237_v56  ;;  %v7240_v26 = vadd.f32 %v9242_v28, %v6518_v21  ;;  %v14231_v15 = vpop.f32.mrf.mxu0  ;;  %v15784_v28 = vld [vmem:[#allocation104_spill] sm:$0xff] }
 0x404   :  { %v7069_v19 = vpop.f32.mrf.mxu1 }
 0x405   :  { %7558 = vst.msk [vmem:[%s14392_s6 + $0x70] sm:$0xf] %vm7529_vm7, %v8063_v16  ;;  %v8066_v6 = vpack.c.bf16 %v7240_v26, %v7240_v26  ;;  %v7238_v51 = vadd.f32 %v7069_v19, %v6516_v57  ;;  %v6524_v16 = vadd.f32 %v14063_v49, %v15784_v28  ;;  %v15785_v57 = vld [vmem:[#allocation105_spill] sm:$0xff] }
 0x406   :  { %v9245_v55 = vpop.f32.mrf.mxu1  ;;  %v6529_v19 = vadd.f32 %v14077_v31, %v15785_v57 }
 0x407   :  { %7561 = vst.msk [vmem:[%s14392_s6 + $0x7c] sm:$0xf] %vm7529_vm7, %v8066_v6  ;;  %v8064_v47 = vpack.c.bf16 %v7238_v51, %v7238_v51  ;;  %v7243_v42 = vadd.f32 %v9245_v55, %v6521_v29  ;;  %v14245_v6 = vpop.f32.mrf.mxu0  ;;  %v15786_v29 = vld [vmem:[#allocation38_spill] sm:$0xff] }
 0x408   :  { %v7082_v20 = vpop.f32.mrf.mxu1  ;;  %v6527_v55 = vadd.f32 %v14091_v43, %v15786_v29  ;;  %v15795_v29 = vld [vmem:[#allocation16_spill] sm:$0xff] }
 0x409   :  { %7559 = vst.msk [vmem:[%s14392_s6 + $0x74] sm:$0xf] %vm7529_vm7, %v8064_v47  ;;  %v8069_v44 = vpack.c.bf16 %v7243_v42, %v7243_v42  ;;  %v7241_v0 = vadd.f32 %v7082_v20, %v6519_v22  ;;  %v6530_v22 = vadd.f32 %v14105_v39, %v15787_v2  ;;  %v6440_v20 = vpop.f32.mrf.mxu0 }
 0x40a   :  { %v9246_v24 = vpop.f32.mrf.mxu1 }
 0x40b   :  { %7564 = vst.msk [vmem:[%s14392_s6 + $0x88] sm:$0xf] %vm7529_vm7, %v8069_v44  ;;  %v8067_v35 = vpack.c.bf16 %v7241_v0, %v7241_v0  ;;  %v7244_v7 = vadd.f32 %v9246_v24, %v6522_v17  ;;  %v6528_v17 = vadd.f32 %v14119_v34, %v15788_v36 }
 0x40c   :  { %v7085_v58 = vpop.f32.mrf.mxu1 }
 0x40d   :  { %7562 = vst.msk [vmem:[%s14392_s6 + $0x80] sm:$0xf] %vm7529_vm7, %v8067_v35  ;;  %v8070_v32 = vpack.c.bf16 %v7244_v7, %v7244_v7  ;;  %v7242_v14 = vadd.f32 %v7085_v58, %v6520_v63  ;;  %v15789_v7 = vld [vmem:[#allocation3_spill] sm:$0xff]  ;;  %v9198_v63 = vpop.f32.mrf.mxu0 }
 0x40e   :  { %v9249_v8 = vpop.f32.mrf.mxu1  ;;  %v6533_v50 = vadd.f32 %v14133_v54, %v15789_v7 }
 0x40f   :  { %7565 = vst.msk [vmem:[%s14392_s6 + $0x8c] sm:$0xf] %vm7529_vm7, %v8070_v32  ;;  %v8068_v23 = vpack.c.bf16 %v7242_v14, %v7242_v14  ;;  %v7247_v12 = vadd.f32 %v9249_v8, %v6525_v13  ;;  %v15790_v14 = vld [vmem:[#allocation76_spill] sm:$0xff]  ;;  %v6443_v53 = vpop.f32.mrf.mxu0 }
 0x410   :  { %v7098_v30 = vpop.f32.mrf.mxu1  ;;  %v6531_v1 = vadd.f32 %v14147_v60, %v15790_v14 }
 0x411   :  { %7563 = vst.msk [vmem:[%s14392_s6 + $0x84] sm:$0xf] %vm7529_vm7, %v8068_v23  ;;  %v8073_v5 = vpack.c.bf16 %v7247_v12, %v7247_v12  ;;  %v7245_v45 = vadd.f32 %v7098_v30, %v6523_v27  ;;  %v15791_v23 = vld [vmem:[#allocation48_spill] sm:$0xff] }
 0x412   :  { %v9250_v56 = vpop.f32.mrf.mxu1  ;;  %v6534_v12 = vadd.f32 %v14161_v61, %v15791_v23 }
 0x413   :  { %7568 = vst.msk [vmem:[%s14392_s6 + $0x98] sm:$0xf] %vm7529_vm7, %v8073_v5  ;;  %v8071_v48 = vpack.c.bf16 %v7245_v45, %v7245_v45  ;;  %v7248_v21 = vadd.f32 %v9250_v56, %v6526_v18  ;;  %v15792_v5 = vld [vmem:[#allocation60_spill] sm:$0xff]  ;;  %v15793_v56 = vld [vmem:[#allocation5_spill] sm:$0xff] }
 0x414   :  { %v7101_v26 = vpop.f32.mrf.mxu1  ;;  %v6532_v45 = vadd.f32 %v14175_v37, %v15792_v5  ;;  %v15799_v5 = vld [vmem:[#allocation85_spill] sm:$0xff] }
 0x415   :  { %7566 = vst.msk [vmem:[%s14392_s6 + $0x90] sm:$0xf] %vm7529_vm7, %v8071_v48  ;;  %v8074_v59 = vpack.c.bf16 %v7248_v21, %v7248_v21  ;;  %v7246_v4 = vadd.f32 %v7101_v26, %v6524_v16  ;;  %v6537_v48 = vadd.f32 %v14189_v11, %v15793_v56  ;;  %v9201_v21 = vpop.f32.mrf.mxu0  ;;  %v15794_v26 = vld [vmem:[#allocation46_spill] sm:$0xff] }
 0x416   :  { %v9253_v51 = vpop.f32.mrf.mxu1 }
 0x417   :  { %7569 = vst.msk [vmem:[%s14392_s6 + $0x9c] sm:$0xf] %vm7529_vm7, %v8074_v59  ;;  %v8072_v49 = vpack.c.bf16 %v7246_v4, %v7246_v4  ;;  %v7251_v62 = vadd.f32 %v9253_v51, %v6529_v19  ;;  %v6535_v59 = vadd.f32 %v14203_v46, %v15794_v26  ;;  %v6538_v19 = vadd.f32 %v14217_v41, %v13918_v40  ;;  %v6456_v51 = vpop.f32.mrf.mxu0 }
 0x418   :  { %v7114_v47 = vpop.f32.mrf.mxu1  ;;  %v6541_v41 = vadd.f32 %v14245_v6, %v13926_v10  ;;  %v6542_v10 = vadd.f32 %v9198_v63, %v13934_v52  ;;  %v6545_v63 = vadd.f32 %v9201_v21, %v13942_v38 }
 0x419   :  { %7567 = vst.msk [vmem:[%s14392_s6 + $0x94] sm:$0xf] %vm7529_vm7, %v8072_v49  ;;  %v8077_v31 = vpack.c.bf16 %v7251_v62, %v7251_v62  ;;  %v7249_v42 = vadd.f32 %v7114_v47, %v6527_v55  ;;  %v6536_v55 = vadd.f32 %v14231_v15, %v15795_v29 }
 0x41a   :  { %v9254_v44 = vpop.f32.mrf.mxu1 }
 0x41b   :  { %7572 = vst.msk [vmem:[%s14392_s6 + $0xa8] sm:$0xf] %vm7529_vm7, %v8077_v31  ;;  %v8075_v0 = vpack.c.bf16 %v7249_v42, %v7249_v42  ;;  %v7252_v43 = vadd.f32 %v9254_v44, %v6530_v22  ;;  %v9202_v42 = vpop.f32.mrf.mxu0  ;;  %v15796_v44 = vld [vmem:[#allocation4_spill] sm:$0xff] }
 0x41c   :  { %v7117_v24 = vpop.f32.mrf.mxu1  ;;  %v6546_v38 = vadd.f32 %v9202_v42, %v13950_v9 }
 0x41d   :  { %7570 = vst.msk [vmem:[%s14392_s6 + $0xa0] sm:$0xf] %vm7529_vm7, %v8075_v0  ;;  %v8078_v35 = vpack.c.bf16 %v7252_v43, %v7252_v43  ;;  %v7250_v39 = vadd.f32 %v7117_v24, %v6528_v17  ;;  %v6539_v0 = vadd.f32 %v6440_v20, %v15796_v44  ;;  %v6459_v6 = vpop.f32.mrf.mxu0  ;;  %v15797_v20 = vld [vmem:[#allocation106_spill] sm:$0xff] }
 0x41e   :  { %v9257_v58 = vpop.f32.mrf.mxu1  ;;  %v6540_v7 = vadd.f32 %v6443_v53, %v15797_v20 }
 0x41f   :  { %7573 = vst.msk [vmem:[%s14392_s6 + $0xac] sm:$0xf] %vm7529_vm7, %v8078_v35  ;;  %v8076_v32 = vpack.c.bf16 %v7250_v39, %v7250_v39  ;;  %v7255_v34 = vadd.f32 %v9257_v58, %v6533_v50  ;;  %v9205_v50 = vpop.f32.mrf.mxu0 }
 0x420   :  { %v7130_v13 = vpop.f32.mrf.mxu1 }
 0x421   :  { %7571 = vst.msk [vmem:[%s14392_s6 + $0xa4] sm:$0xf] %vm7529_vm7, %v8076_v32  ;;  %v8081_v8 = vpack.c.bf16 %v7255_v34, %v7255_v34  ;;  %v7253_v54 = vadd.f32 %v7130_v13, %v6531_v1  ;;  %v15798_v13 = vld [vmem:[#allocation56_spill] sm:$0xff] }
 0x422   :  { %v9258_v27 = vpop.f32.mrf.mxu1 }
 0x423   :  { %7576 = vst.msk [vmem:[%s14392_s6 + $0xb8] sm:$0xf] %vm7529_vm7, %v8081_v8  ;;  %v8079_v30 = vpack.c.bf16 %v7253_v54, %v7253_v54  ;;  %v7256_v60 = vadd.f32 %v9258_v27, %v6534_v12  ;;  %v6543_v8 = vadd.f32 %v6456_v51, %v15798_v13  ;;  %v6472_v54 = vpop.f32.mrf.mxu0 }
 0x424   :  { %v7133_v33 = vpop.f32.mrf.mxu1 }
 0x425   :  { %7574 = vst.msk [vmem:[%s14392_s6 + $0xb0] sm:$0xf] %vm7529_vm7, %v8079_v30  ;;  %v8082_v18 = vpack.c.bf16 %v7256_v60, %v7256_v60  ;;  %v7254_v61 = vadd.f32 %v7133_v33, %v6532_v45  ;;  %v6544_v45 = vadd.f32 %v6459_v6, %v15799_v5  ;;  %v9206_v33 = vpop.f32.mrf.mxu0 }
 0x426   :  { %v9261_v28 = vpop.f32.mrf.mxu1 }
 0x427   :  { %7577 = vst.msk [vmem:[%s14392_s6 + $0xbc] sm:$0xf] %vm7529_vm7, %v8082_v18  ;;  %v8080_v16 = vpack.c.bf16 %v7254_v61, %v7254_v61  ;;  %v7259_v37 = vadd.f32 %v9261_v28, %v6537_v48  ;;  %v15800_v61 = vld [vmem:[#allocation121_spill] sm:$0xff]  ;;  %v15801_v28 = vld [vmem:[#allocation74_spill] sm:$0xff] }
 0x428   :  { %v7146_v4 = vpop.f32.mrf.mxu1  ;;  %v6549_v56 = vadd.f32 %v9205_v50, %v15800_v61 }
 0x429   :  { %7575 = vst.msk [vmem:[%s14392_s6 + $0xb4] sm:$0xf] %vm7529_vm7, %v8080_v16  ;;  %v8085_v57 = vpack.c.bf16 %v7259_v37, %v7259_v37  ;;  %v7257_v11 = vadd.f32 %v7146_v4, %v6535_v59  ;;  %v6547_v16 = vadd.f32 %v6472_v54, %v15801_v28  ;;  %v6475_v59 = vpop.f32.mrf.mxu0 }
 0x42a   :  { %v9262_v49 = vpop.f32.mrf.mxu1 }
 0x42b   :  { %7580 = vst.msk [vmem:[%s14392_s6 + $0xc8] sm:$0xf] %vm7529_vm7, %v8085_v57  ;;  %v8083_v62 = vpack.c.bf16 %v7257_v11, %v7257_v11  ;;  %v7260_v46 = vadd.f32 %v9262_v49, %v6538_v19  ;;  %v6550_v57 = vadd.f32 %v9206_v33, %v13966_v3  ;;  %v6548_v49 = vadd.f32 %v6475_v59, %v13969_v25 }
 0x42c   :  { %v7149_v47 = vpop.f32.mrf.mxu1 }
 0x42d   :  { %7578 = vst.msk [vmem:[%s14392_s6 + $0xc0] sm:$0xf] %vm7529_vm7, %v8083_v62  ;;  %v8086_v31 = vpack.c.bf16 %v7260_v46, %v7260_v46  ;;  %v7258_v40 = vadd.f32 %v7149_v47, %v6536_v55 }
 0x42e   :  { %v9265_v2 = vpop.f32.mrf.mxu1 }
 0x42f   :  { %7581 = vst.msk [vmem:[%s14392_s6 + $0xcc] sm:$0xf] %vm7529_vm7, %v8086_v31  ;;  %v8084_v22 = vpack.c.bf16 %v7258_v40, %v7258_v40  ;;  %v7263_v15 = vadd.f32 %v9265_v2, %v6541_v41 }
 0x430   :  { %v7162_v43 = vpop.f32.mrf.mxu1 }
 0x431   :  { %7579 = vst.msk [vmem:[%s14392_s6 + $0xc4] sm:$0xf] %vm7529_vm7, %v8084_v22  ;;  %v8089_v36 = vpack.c.bf16 %v7263_v15, %v7263_v15  ;;  %v7261_v17 = vadd.f32 %v7162_v43, %v6539_v0 }
 0x432   :  { %v9266_v24 = vpop.f32.mrf.mxu1 }
 0x433   :  { %7584 = vst.msk [vmem:[%s14392_s6 + $0xd8] sm:$0xf] %vm7529_vm7, %v8089_v36  ;;  %v8087_v35 = vpack.c.bf16 %v7261_v17, %v7261_v17  ;;  %v7264_v39 = vadd.f32 %v9266_v24, %v6542_v10 }
 0x434   :  { %v7165_v58 = vpop.f32.mrf.mxu1 }
 0x435   :  { %7582 = vst.msk [vmem:[%s14392_s6 + $0xd0] sm:$0xf] %vm7529_vm7, %v8087_v35  ;;  %v8090_v32 = vpack.c.bf16 %v7264_v39, %v7264_v39  ;;  %v7262_v52 = vadd.f32 %v7165_v58, %v6540_v7 }
 0x436   :  { %v9269_v34 = vpop.f32.mrf.mxu1 }
 0x437   :  { %7585 = vst.msk [vmem:[%s14392_s6 + $0xdc] sm:$0xf] %vm7529_vm7, %v8090_v32  ;;  %v8088_v14 = vpack.c.bf16 %v7262_v52, %v7262_v52  ;;  %v7267_v1 = vadd.f32 %v9269_v34, %v6545_v63 }
 0x438   :  { %v7178_v23 = vpop.f32.mrf.mxu1 }
 0x439   :  { %7583 = vst.msk [vmem:[%s14392_s6 + $0xd4] sm:$0xf] %vm7529_vm7, %v8088_v14  ;;  %v8093_v12 = vpack.c.bf16 %v7267_v1, %v7267_v1  ;;  %v7265_v53 = vadd.f32 %v7178_v23, %v6543_v8 }
 0x43a   :  { %v9270_v27 = vpop.f32.mrf.mxu1 }
 0x43b   :  { %7588 = vst.msk [vmem:[%s14392_s6 + $0xe8] sm:$0xf] %vm7529_vm7, %v8093_v12  ;;  %v8091_v30 = vpack.c.bf16 %v7265_v53, %v7265_v53  ;;  %v7268_v60 = vadd.f32 %v9270_v27, %v6546_v38 }
 0x43c   :  { %v7181_v18 = vpop.f32.mrf.mxu1 }
 0x43d   :  { %7586 = vst.msk [vmem:[%s14392_s6 + $0xe0] sm:$0xf] %vm7529_vm7, %v8091_v30  ;;  %v8094_v9 = vpack.c.bf16 %v7268_v60, %v7268_v60  ;;  %v7266_v48 = vadd.f32 %v7181_v18, %v6544_v45 }
 0x43e   :  { %v9273_v21 = vpop.f32.mrf.mxu1 }
 0x43f   :  { %7589 = vst.msk [vmem:[%s14392_s6 + $0xec] sm:$0xf] %vm7529_vm7, %v8094_v9  ;;  %v8092_v37 = vpack.c.bf16 %v7266_v48, %v7266_v48  ;;  %v7271_v26 = vadd.f32 %v9273_v21, %v6549_v56 }
 0x440   :  { %v7194_v4 = vpop.f32.mrf.mxu1 }
 0x441   :  { %7587 = vst.msk [vmem:[%s14392_s6 + $0xe4] sm:$0xf] %vm7529_vm7, %v8092_v37  ;;  %v8097_v11 = vpack.c.bf16 %v7271_v26, %v7271_v26  ;;  %v7269_v19 = vadd.f32 %v7194_v4, %v6547_v16 }
 0x442   :  { %v9274_v51 = vpop.f32.mrf.mxu1 }
 0x443   :  { %7592 = vst.msk [vmem:[%s14392_s6 + $0xf8] sm:$0xf] %vm7529_vm7, %v8097_v11  ;;  %v8095_v62 = vpack.c.bf16 %v7269_v19, %v7269_v19  ;;  %v7272_v46 = vadd.f32 %v9274_v51, %v6550_v57 }
 0x444   :  { %v7197_v29 = vpop.f32.mrf.mxu1 }
 0x445   :  { %7590 = vst.msk [vmem:[%s14392_s6 + $0xf0] sm:$0xf] %vm7529_vm7, %v8095_v62  ;;  %v8098_v3 = vpack.c.bf16 %v7272_v46, %v7272_v46  ;;  %v7270_v55 = vadd.f32 %v7197_v29, %v6548_v49 }
 0x447   :  { %7593 = vst.msk [vmem:[%s14392_s6 + $0xfc] sm:$0xf] %vm7529_vm7, %v8098_v3  ;;  %v8096_v25 = vpack.c.bf16 %v7270_v55, %v7270_v55 }
 0x449   :  { %7591 = vst.msk [vmem:[%s14392_s6 + $0xf4] sm:$0xf] %vm7529_vm7, %v8096_v25 }

</bundles_post_ra>
